<compile_context>
chip_gen: v5e
topology: v5e:2x2
jax: 0.10.0
libtpu: 0.0.40
codegen_flags: <defaults>
</compile_context>

<pallas_src>
import numpy as np
import jax
import jax.numpy as jnp
from jax.experimental import pallas as pl
from jax.experimental.pallas import tpu as pltpu

_SMEM = pl.BlockSpec(memory_space=pltpu.MemorySpace.SMEM)


# ---------------------------------------------------------------------------
# Helpers
# ---------------------------------------------------------------------------
def _row_tile(R, max_tr=4096):
    """Lane-axis tile for the head GEMM: VMEM-capped (v7x-safe) and split in
    two when possible so both v7x TensorCores get a 'parallel' grid step."""
    if R <= max_tr:
        if R % 128 == 0 and R >= 256:
            return max(128, ((R // 2) // 128) * 128)
        return R                       # single full-width block
    return max_tr                      # ragged tail handled by block padding


def _bn_scale_shift(bn, eps=1e-5):
    scale = bn["gamma"] / jnp.sqrt(bn["var"] + eps)
    shift = bn["beta"] - bn["mean"] * scale
    return scale, shift


def make_conv_mask(mask_type, channels, cout, cin, kh, kw):
    """Autoregressive mask exactly as in MaskedConv2d.__init__ (numpy, static)."""
    assert mask_type in ("A", "B")
    mask = np.ones((cout, cin, kh, kw), dtype=np.float32)
    mask[:, :, kh // 2, kw // 2 + (mask_type == "B"):] = 0
    mask[:, :, kh // 2 + 1:] = 0
    if channels > 1:
        def channel_mask(i_out, i_in):
            cout_idx = np.expand_dims(np.arange(cout) % 2 == i_out, 1)
            cin_idx = np.expand_dims(np.arange(cin) % 2 == i_in, 0)
            a1, a2 = np.broadcast_arrays(cout_idx, cin_idx)
            return (a1 * a2).astype(bool)
        for c in range(2):
            mask[channel_mask(c, c), kh // 2, kw // 2] = 0.0 if mask_type == "A" else 1.0
        mask[channel_mask(0, 1), kh // 2, kw // 2] = 0.0
    return mask


# ---------------------------------------------------------------------------
# Kernel 1: initial masked 'A' conv (+BN fold) + ReLU, valid conv, grid over N
# ---------------------------------------------------------------------------
def _masked_conv_relu(x, w_flat, b, mask_np, k):
    """relu(valid masked conv(x)).  x: (Cin, N, Hin, Win) f32.
    Weights/bias are flat f32 arrays read as scalars from SMEM; masked taps
    are skipped statically."""
    Cin, N, Hin, Win = x.shape
    Cout = int(b.shape[0])
    Ho, Wo = Hin - k + 1, Win - k + 1

    def kernel(x_ref, w_ref, b_ref, o_ref):
        xs = [x_ref[c, 0] for c in range(Cin)]
        # shifted input windows, hoisted out of the output-channel loop
        win = {}
        for ci in range(Cin):
            for ki in range(k):
                for kj in range(k):
                    if mask_np[:, ci, ki, kj].any():
                        win[(ci, ki, kj)] = xs[ci][ki:ki + Ho, kj:kj + Wo]
        for co in range(Cout):
            acc = None
            for ci in range(Cin):
                for ki in range(k):
                    for kj in range(k):
                        if mask_np[co, ci, ki, kj] == 0.0:
                            continue        # autoregressive mask (static skip)
                        widx = ((co * Cin + ci) * k + ki) * k + kj
                        term = w_ref[widx] * win[(ci, ki, kj)]
                        acc = term if acc is None else acc + term
            if acc is None:
                acc = jnp.zeros((Ho, Wo), jnp.float32)
            o_ref[co, 0, :, :] = jnp.maximum(acc + b_ref[co], 0.0)

    return pl.pallas_call(
        kernel,
        grid=(N,),
        in_specs=[pl.BlockSpec((Cin, 1, Hin, Win), lambda n: (0, n, 0, 0)),
                  _SMEM, _SMEM],
        out_specs=pl.BlockSpec((Cout, 1, Ho, Wo), lambda n: (0, n, 0, 0)),
        out_shape=jax.ShapeDtypeStruct((Cout, N, Ho, Wo), jnp.float32),
        compiler_params=pltpu.CompilerParams(dimension_semantics=("parallel",)),
    )(x, w_flat, b)


# ---------------------------------------------------------------------------
# Kernel 2: one full residual block, grid over N, intermediates in VMEM
# ---------------------------------------------------------------------------
def _res_block(x, ws_f, bs_f, wh_f, bh_f, wg_f, bg_f, s1, t1, hmask_np, F, padding):
    """x (2F, N, Hc, Wc) ->
       relu(bn1) -> shrink 1x1 (bn2 folded) -> relu -> masked 3x3 'B' conv
       (bn3 folded) -> relu -> grow 1x1 + residual (cropped when padding==0)."""
    C2, N, Hc, Wc = x.shape
    Ho = Hc if padding else Hc - 2
    Wo = Wc if padding else Wc - 2

    def kernel(x_ref, ws_ref, bs_ref, wh_ref, bh_ref, wg_ref, bg_ref,
               s1_ref, t1_ref, o_ref):
        xc = [x_ref[c, 0] for c in range(C2)]
        # bn1 + relu prologue
        a1 = [jnp.maximum(xc[c] * s1_ref[c] + t1_ref[c], 0.0) for c in range(C2)]
        # shrink 1x1 (bn2 folded) + relu
        z1 = []
        for f in range(F):
            acc = ws_ref[f * C2] * a1[0]
            for c in range(1, C2):
                acc = acc + ws_ref[f * C2 + c] * a1[c]
            z1.append(jnp.maximum(acc + bs_ref[f], 0.0))
        if padding:
            # TODO(synk): padded=1 path uses in-kernel zero-pad; not exercised
            # by the padded=0 demo config.
            z1 = [jnp.pad(z, ((1, 1), (1, 1))) for z in z1]
        # hidden masked 'B' 3x3 conv (bn3 folded) + relu: tap accumulation
        win = {}
        for c in range(F):
            for ki in range(3):
                for kj in range(3):
                    if hmask_np[:, c, ki, kj].any():
                        win[(c, ki, kj)] = z1[c][ki:ki + Ho, kj:kj + Wo]
        z2 = []
        for f in range(F):
            acc = None
            for c in range(F):
                for ki in range(3):
                    for kj in range(3):
                        if hmask_np[f, c, ki, kj] == 0.0:
                            continue        # autoregressive mask (static skip)
                        widx = ((f * F + c) * 3 + ki) * 3 + kj
                        term = wh_ref[widx] * win[(c, ki, kj)]
                        acc = term if acc is None else acc + term
            if acc is None:
                acc = jnp.zeros((Ho, Wo), jnp.float32)
            z2.append(jnp.maximum(acc + bh_ref[f], 0.0))
        # grow 1x1 + fused residual (crop when valid-padded) + write out
        for c in range(C2):
            acc = wg_ref[c * F] * z2[0]
            for f in range(1, F):
                acc = acc + wg_ref[c * F + f] * z2[f]
            res = xc[c] if padding else xc[c][1:Hc - 1, 1:Wc - 1]
            o_ref[c, 0, :, :] = acc + bg_ref[c] + res

    return pl.pallas_call(
        kernel,
        grid=(N,),
        in_specs=[pl.BlockSpec((C2, 1, Hc, Wc), lambda n: (0, n, 0, 0))]
                 + [_SMEM] * 8,
        out_specs=pl.BlockSpec((C2, 1, Ho, Wo), lambda n: (0, n, 0, 0)),
        out_shape=jax.ShapeDtypeStruct((C2, N, Ho, Wo), jnp.float32),
        compiler_params=pltpu.CompilerParams(dimension_semantics=("parallel",)),
    )(x, ws_f, bs_f, wh_f, bh_f, wg_f, bg_f, s1, t1)


# ---------------------------------------------------------------------------
# Kernel 3: fused head fc2(relu(fc1(x))) in lane-dense (C, R) layout
# ---------------------------------------------------------------------------
def _fused_head(x, w1, b1, w2, b2):
    K, R = x.shape
    H1 = w1.shape[0]
    C2 = w2.shape[0]
    TR = _row_tile(R)
    grid = (pl.cdiv(R, TR),)

    def kernel(x_ref, w1_ref, b1_ref, w2_ref, b2_ref, o_ref):
        h = jnp.dot(w1_ref[...], x_ref[...], preferred_element_type=jnp.float32)
        h = jnp.maximum(h + b1_ref[...], 0.0)
        o_ref[...] = jnp.dot(w2_ref[...], h,
                             preferred_element_type=jnp.float32) + b2_ref[...]

    return pl.pallas_call(
        kernel,
        grid=grid,
        in_specs=[
            pl.BlockSpec((K, TR), lambda i: (0, i)),
            pl.BlockSpec((H1, K), lambda i: (0, 0)),
            pl.BlockSpec((H1, 1), lambda i: (0, 0)),
            pl.BlockSpec((C2, H1), lambda i: (0, 0)),
            pl.BlockSpec((C2, 1), lambda i: (0, 0)),
        ],
        out_specs=pl.BlockSpec((C2, TR), lambda i: (0, i)),
        out_shape=jax.ShapeDtypeStruct((C2, R), jnp.float32),
        compiler_params=pltpu.CompilerParams(dimension_semantics=("parallel",)),
    )(x, w1, b1.reshape(H1, 1), w2, b2.reshape(C2, 1))


# ---------------------------------------------------------------------------
# PixelCNN_RES forward
# ---------------------------------------------------------------------------
def pixelcnn_res_forward(params, x_nchw, *, filters, filter_size, layers,
                         out_maps, channels, padded):
    padding = 1 if padded == 1 else 0
    F = filters
    k = filter_size
    N, _, H, W = x_nchw.shape
    x = jnp.transpose(x_nchw, (1, 0, 2, 3))            # (C, N, H, W) entry transpose

    # static autoregressive masks (depend only on config)
    mask0 = make_conv_mask("A", channels, 2 * F, channels, k, k)
    hmask = make_conv_mask("B", channels, F, F, 3, 3)

    # ---- initial stage: relu(masked_conv_A(bn0(x))) ----
    w0 = params["init_conv_w"]
    b0 = params["init_conv_b"]
    s0, t0 = _bn_scale_shift(params["init_bn"])
    p0 = padding * ((k - 1) // 2)
    if p0 == 0:
        w0m = w0 * mask0
        w_flat = (w0m * s0[None, :, None, None]).reshape(-1)      # BN scale folded
        b_fold = b0 + jnp.sum(w0m * t0[None, :, None, None], axis=(1, 2, 3))
        xin = x
    else:
        # TODO(synk): padded path keeps the pre-conv BN affine + zero pad as
        # plain-JAX glue (weight fold would be invalid at the zero border).
        w_flat = w0.reshape(-1)
        b_fold = b0
        xin = x * s0[:, None, None, None] + t0[:, None, None, None]
        xin = jnp.pad(xin, ((0, 0), (0, 0), (p0, p0), (p0, p0)))
    y = _masked_conv_relu(xin, w_flat, b_fold, mask0, k)          # (2F, N, Hc, Wc)

    # ---- residual blocks (one pallas_call each) ----
    for i in range(layers):
        s1, t1 = _bn_scale_shift(params["bn1"][i])
        s2, t2 = _bn_scale_shift(params["bn2"][i])
        s3, t3 = _bn_scale_shift(params["bn3"][i])
        ws = params["shrink_w"][i].reshape(F, 2 * F)
        wh = params["hidden_w"][i]
        wg = params["grow_w"][i].reshape(2 * F, F)
        ws_f = (s2[:, None] * ws).reshape(-1)                     # bn2 fold
        bs_f = s2 * params["shrink_b"][i] + t2
        wh_f = (s3[:, None, None, None] * wh).reshape(-1)         # bn3 fold
        bh_f = s3 * params["hidden_b"][i] + t3
        y = _res_block(y, ws_f, bs_f, wh_f, bh_f,
                       wg.reshape(-1), params["grow_b"][i],
                       s1, t1, hmask, F, padding)

    # ---- head: fc2(relu(fc1(x))) in one fused GEMM kernel ----
    C2, N2, Hf, Wf = y.shape
    x2d = y.reshape(C2, N2 * Hf * Wf)                             # contiguous, free
    out2d = _fused_head(x2d,
                        params["fc1_w"].reshape(256, 2 * F), params["fc1_b"],
                        params["fc2_w"].reshape(out_maps * channels, 256),
                        params["fc2_b"])
    out = out2d.reshape(out_maps * channels, N2, Hf, Wf)
    return jnp.transpose(out, (1, 0, 2, 3))                       # exit -> NCHW


# ---------------------------------------------------------------------------
# Deterministic synthetic parameters
# ---------------------------------------------------------------------------
def init_params(key, *, filters, filter_size, layers, out_maps, channels):
    F = filters

    def bn_params(kk, c):
        k1, k2, k3, k4 = jax.random.split(kk, 4)
        return {"gamma": 1.0 + 0.1 * jax.random.normal(k1, (c,), jnp.float32),
                "beta": 0.1 * jax.random.normal(k2, (c,), jnp.float32),
                "mean": 0.1 * jax.random.normal(k3, (c,), jnp.float32),
                "var": 1.0 + 0.1 * jax.random.uniform(k4, (c,), jnp.float32)}

    n = lambda kk, shape, s=0.1: s * jax.random.normal(kk, shape, jnp.float32)
    keys = jax.random.split(key, 8 + 10 * layers)
    ki = iter(keys)
    params = {
        "init_bn": bn_params(next(ki), channels),
        "init_conv_w": n(next(ki), (2 * F, channels, filter_size, filter_size)),
        "init_conv_b": n(next(ki), (2 * F,)),
        "fc1_w": n(next(ki), (256, 2 * F, 1, 1)),
        "fc1_b": n(next(ki), (256,)),
        "fc2_w": n(next(ki), (out_maps * channels, 256, 1, 1)),
        "fc2_b": n(next(ki), (out_maps * channels,)),
        "bn1": [], "bn2": [], "bn3": [],
        "shrink_w": [], "shrink_b": [],
        "hidden_w": [], "hidden_b": [],
        "grow_w": [], "grow_b": [],
    }
    for _ in range(layers):
        params["bn1"].append(bn_params(next(ki), 2 * F))
        params["bn2"].append(bn_params(next(ki), F))
        params["bn3"].append(bn_params(next(ki), F))
        params["shrink_w"].append(n(next(ki), (F, 2 * F, 1, 1)))
        params["shrink_b"].append(n(next(ki), (F,)))
        params["hidden_w"].append(n(next(ki), (F, F, 3, 3)))
        params["hidden_b"].append(n(next(ki), (F,)))
        params["grow_w"].append(n(next(ki), (2 * F, F, 1, 1)))
        params["grow_b"].append(n(next(ki), (2 * F,)))
    return params


if __name__ == "__main__":
    cfg = dict(filters=4, filter_size=3, layers=2, out_maps=2, channels=2, padded=0)
    key = jax.random.PRNGKey(0)
    kp, kx = jax.random.split(key)

    params = init_params(kp, filters=cfg["filters"], filter_size=cfg["filter_size"],
                         layers=cfg["layers"], out_maps=cfg["out_maps"],
                         channels=cfg["channels"])
    N, H, W = 2, 16, 16
    x = jax.random.normal(kx, (N, cfg["channels"], H, W), jnp.float32)

    fwd = jax.jit(lambda p, xx: pixelcnn_res_forward(p, xx, **cfg))
    out = fwd(params, x)
    jax.block_until_ready(out)

    # padded=0: initial 3x3 valid conv -> 14x14, two hidden 3x3 valid convs -> 10x10
    assert out.shape == (N, cfg["out_maps"] * cfg["channels"], 10, 10), out.shape
    assert out.dtype == jnp.float32
    assert bool(jnp.all(jnp.isfinite(out)))
    print("KERNEL_OK")
</pallas_src>

<mosaic_0001>
module attributes {stable_mosaic.version = 11 : i64} {
  func.func @kernel(%arg0: i32, %arg1: memref<2x1x16x16xf32, #tpu.memory_space<vmem>>, %arg2: memref<144xf32, #tpu.memory_space<smem>>, %arg3: memref<8xf32, #tpu.memory_space<smem>>, %arg4: memref<8x1x14x14xf32, #tpu.memory_space<vmem>>) attributes {dimension_semantics = [#tpu.dimension_semantics<parallel>], iteration_bounds = array<i64: 2>, scalar_prefetch = 0 : i64, scratch_operands = 0 : i64, tpu.core_type = #tpu.core_type<tc>, window_params = [{transform_indices = @transform_0, window_bounds = array<i64: 2, 1, 16, 16>}, {transform_indices = @transform_1, window_bounds = array<i64: 144>}, {transform_indices = @transform_2, window_bounds = array<i64: 8>}, {transform_indices = @transform_3, window_bounds = array<i64: 8, 1, 14, 14>}]} {
    %c0 = arith.constant 0 : index
    %c0_0 = arith.constant 0 : index
    %c0_1 = arith.constant 0 : index
    %c0_2 = arith.constant 0 : index
    %0 = vector.load %arg1[%c0, %c0_0, %c0_1, %c0_2] : memref<2x1x16x16xf32, #tpu.memory_space<vmem>>, vector<1x1x16x16xf32>
    %1 = vector.shape_cast %0 : vector<1x1x16x16xf32> to vector<16x16xf32>
    %c1 = arith.constant 1 : index
    %c0_3 = arith.constant 0 : index
    %c0_4 = arith.constant 0 : index
    %c0_5 = arith.constant 0 : index
    %2 = vector.load %arg1[%c1, %c0_3, %c0_4, %c0_5] : memref<2x1x16x16xf32, #tpu.memory_space<vmem>>, vector<1x1x16x16xf32>
    %3 = vector.shape_cast %2 : vector<1x1x16x16xf32> to vector<16x16xf32>
    %4 = vector.extract_strided_slice %1 {offsets = [0, 0], sizes = [14, 14], strides = [1, 1]} : vector<16x16xf32> to vector<14x14xf32>
    %5 = vector.extract_strided_slice %1 {offsets = [0, 1], sizes = [14, 14], strides = [1, 1]} : vector<16x16xf32> to vector<14x14xf32>
    %6 = vector.extract_strided_slice %1 {offsets = [0, 2], sizes = [14, 14], strides = [1, 1]} : vector<16x16xf32> to vector<14x14xf32>
    %7 = vector.extract_strided_slice %1 {offsets = [1, 0], sizes = [14, 14], strides = [1, 1]} : vector<16x16xf32> to vector<14x14xf32>
    %8 = vector.extract_strided_slice %3 {offsets = [0, 0], sizes = [14, 14], strides = [1, 1]} : vector<16x16xf32> to vector<14x14xf32>
    %9 = vector.extract_strided_slice %3 {offsets = [0, 1], sizes = [14, 14], strides = [1, 1]} : vector<16x16xf32> to vector<14x14xf32>
    %10 = vector.extract_strided_slice %3 {offsets = [0, 2], sizes = [14, 14], strides = [1, 1]} : vector<16x16xf32> to vector<14x14xf32>
    %11 = vector.extract_strided_slice %3 {offsets = [1, 0], sizes = [14, 14], strides = [1, 1]} : vector<16x16xf32> to vector<14x14xf32>
    %c0_6 = arith.constant 0 : index
    %12 = memref.load %arg2[%c0_6] : memref<144xf32, #tpu.memory_space<smem>>
    %13 = vector.broadcast %12 : f32 to vector<14x14xf32>
    %14 = arith.mulf %13, %4 : vector<14x14xf32>
    %c1_7 = arith.constant 1 : index
    %15 = memref.load %arg2[%c1_7] : memref<144xf32, #tpu.memory_space<smem>>
    %16 = vector.broadcast %15 : f32 to vector<14x14xf32>
    %17 = arith.mulf %16, %5 : vector<14x14xf32>
    %18 = arith.addf %14, %17 : vector<14x14xf32>
    %c2 = arith.constant 2 : index
    %19 = memref.load %arg2[%c2] : memref<144xf32, #tpu.memory_space<smem>>
    %20 = vector.broadcast %19 : f32 to vector<14x14xf32>
    %21 = arith.mulf %20, %6 : vector<14x14xf32>
    %22 = arith.addf %18, %21 : vector<14x14xf32>
    %c3 = arith.constant 3 : index
    %23 = memref.load %arg2[%c3] : memref<144xf32, #tpu.memory_space<smem>>
    %24 = vector.broadcast %23 : f32 to vector<14x14xf32>
    %25 = arith.mulf %24, %7 : vector<14x14xf32>
    %26 = arith.addf %22, %25 : vector<14x14xf32>
    %c9 = arith.constant 9 : index
    %27 = memref.load %arg2[%c9] : memref<144xf32, #tpu.memory_space<smem>>
    %28 = vector.broadcast %27 : f32 to vector<14x14xf32>
    %29 = arith.mulf %28, %8 : vector<14x14xf32>
    %30 = arith.addf %26, %29 : vector<14x14xf32>
    %c10 = arith.constant 10 : index
    %31 = memref.load %arg2[%c10] : memref<144xf32, #tpu.memory_space<smem>>
    %32 = vector.broadcast %31 : f32 to vector<14x14xf32>
    %33 = arith.mulf %32, %9 : vector<14x14xf32>
    %34 = arith.addf %30, %33 : vector<14x14xf32>
    %c11 = arith.constant 11 : index
    %35 = memref.load %arg2[%c11] : memref<144xf32, #tpu.memory_space<smem>>
    %36 = vector.broadcast %35 : f32 to vector<14x14xf32>
    %37 = arith.mulf %36, %10 : vector<14x14xf32>
    %38 = arith.addf %34, %37 : vector<14x14xf32>
    %c12 = arith.constant 12 : index
    %39 = memref.load %arg2[%c12] : memref<144xf32, #tpu.memory_space<smem>>
    %40 = vector.broadcast %39 : f32 to vector<14x14xf32>
    %41 = arith.mulf %40, %11 : vector<14x14xf32>
    %42 = arith.addf %38, %41 : vector<14x14xf32>
    %c0_8 = arith.constant 0 : index
    %43 = memref.load %arg3[%c0_8] : memref<8xf32, #tpu.memory_space<smem>>
    %44 = vector.broadcast %43 : f32 to vector<14x14xf32>
    %45 = arith.addf %42, %44 : vector<14x14xf32>
    %cst = arith.constant 0.000000e+00 : f32
    %46 = vector.broadcast %cst : f32 to vector<14x14xf32>
    %47 = arith.maximumf %45, %46 : vector<14x14xf32>
    %c0_9 = arith.constant 0 : index
    %c0_10 = arith.constant 0 : index
    %c0_11 = arith.constant 0 : index
    %c0_12 = arith.constant 0 : index
    %48 = vector.load %arg4[%c0_9, %c0_10, %c0_11, %c0_12] : memref<8x1x14x14xf32, #tpu.memory_space<vmem>>, vector<1x1x14x14xf32>
    %49 = vector.shape_cast %48 : vector<1x1x14x14xf32> to vector<14x14xf32>
    %50 = vector.shape_cast %47 : vector<14x14xf32> to vector<1x1x14x14xf32>
    tpu.vector_store %arg4[%c0_9, %c0_10, %c0_11, %c0_12], %50 {strides = array<i32>} : memref<8x1x14x14xf32, #tpu.memory_space<vmem>>, vector<1x1x14x14xf32>,
    %c18 = arith.constant 18 : index
    %51 = memref.load %arg2[%c18] : memref<144xf32, #tpu.memory_space<smem>>
    %52 = vector.broadcast %51 : f32 to vector<14x14xf32>
    %53 = arith.mulf %52, %4 : vector<14x14xf32>
    %c19 = arith.constant 19 : index
    %54 = memref.load %arg2[%c19] : memref<144xf32, #tpu.memory_space<smem>>
    %55 = vector.broadcast %54 : f32 to vector<14x14xf32>
    %56 = arith.mulf %55, %5 : vector<14x14xf32>
    %57 = arith.addf %53, %56 : vector<14x14xf32>
    %c20 = arith.constant 20 : index
    %58 = memref.load %arg2[%c20] : memref<144xf32, #tpu.memory_space<smem>>
    %59 = vector.broadcast %58 : f32 to vector<14x14xf32>
    %60 = arith.mulf %59, %6 : vector<14x14xf32>
    %61 = arith.addf %57, %60 : vector<14x14xf32>
    %c21 = arith.constant 21 : index
    %62 = memref.load %arg2[%c21] : memref<144xf32, #tpu.memory_space<smem>>
    %63 = vector.broadcast %62 : f32 to vector<14x14xf32>
    %64 = arith.mulf %63, %7 : vector<14x14xf32>
    %65 = arith.addf %61, %64 : vector<14x14xf32>
    %c27 = arith.constant 27 : index
    %66 = memref.load %arg2[%c27] : memref<144xf32, #tpu.memory_space<smem>>
    %67 = vector.broadcast %66 : f32 to vector<14x14xf32>
    %68 = arith.mulf %67, %8 : vector<14x14xf32>
    %69 = arith.addf %65, %68 : vector<14x14xf32>
    %c28 = arith.constant 28 : index
    %70 = memref.load %arg2[%c28] : memref<144xf32, #tpu.memory_space<smem>>
    %71 = vector.broadcast %70 : f32 to vector<14x14xf32>
    %72 = arith.mulf %71, %9 : vector<14x14xf32>
    %73 = arith.addf %69, %72 : vector<14x14xf32>
    %c29 = arith.constant 29 : index
    %74 = memref.load %arg2[%c29] : memref<144xf32, #tpu.memory_space<smem>>
    %75 = vector.broadcast %74 : f32 to vector<14x14xf32>
    %76 = arith.mulf %75, %10 : vector<14x14xf32>
    %77 = arith.addf %73, %76 : vector<14x14xf32>
    %c30 = arith.constant 30 : index
    %78 = memref.load %arg2[%c30] : memref<144xf32, #tpu.memory_space<smem>>
    %79 = vector.broadcast %78 : f32 to vector<14x14xf32>
    %80 = arith.mulf %79, %11 : vector<14x14xf32>
    %81 = arith.addf %77, %80 : vector<14x14xf32>
    %c1_13 = arith.constant 1 : index
    %82 = memref.load %arg3[%c1_13] : memref<8xf32, #tpu.memory_space<smem>>
    %83 = vector.broadcast %82 : f32 to vector<14x14xf32>
    %84 = arith.addf %81, %83 : vector<14x14xf32>
    %cst_14 = arith.constant 0.000000e+00 : f32
    %85 = vector.broadcast %cst_14 : f32 to vector<14x14xf32>
    %86 = arith.maximumf %84, %85 : vector<14x14xf32>
    %c1_15 = arith.constant 1 : index
    %c0_16 = arith.constant 0 : index
    %c0_17 = arith.constant 0 : index
    %c0_18 = arith.constant 0 : index
    %87 = vector.load %arg4[%c1_15, %c0_16, %c0_17, %c0_18] : memref<8x1x14x14xf32, #tpu.memory_space<vmem>>, vector<1x1x14x14xf32>
    %88 = vector.shape_cast %87 : vector<1x1x14x14xf32> to vector<14x14xf32>
    %89 = vector.shape_cast %86 : vector<14x14xf32> to vector<1x1x14x14xf32>
    tpu.vector_store %arg4[%c1_15, %c0_16, %c0_17, %c0_18], %89 {strides = array<i32>} : memref<8x1x14x14xf32, #tpu.memory_space<vmem>>, vector<1x1x14x14xf32>,
    %c36 = arith.constant 36 : index
    %90 = memref.load %arg2[%c36] : memref<144xf32, #tpu.memory_space<smem>>
    %91 = vector.broadcast %90 : f32 to vector<14x14xf32>
    %92 = arith.mulf %91, %4 : vector<14x14xf32>
    %c37 = arith.constant 37 : index
    %93 = memref.load %arg2[%c37] : memref<144xf32, #tpu.memory_space<smem>>
    %94 = vector.broadcast %93 : f32 to vector<14x14xf32>
    %95 = arith.mulf %94, %5 : vector<14x14xf32>
    %96 = arith.addf %92, %95 : vector<14x14xf32>
    %c38 = arith.constant 38 : index
    %97 = memref.load %arg2[%c38] : memref<144xf32, #tpu.memory_space<smem>>
    %98 = vector.broadcast %97 : f32 to vector<14x14xf32>
    %99 = arith.mulf %98, %6 : vector<14x14xf32>
    %100 = arith.addf %96, %99 : vector<14x14xf32>
    %c39 = arith.constant 39 : index
    %101 = memref.load %arg2[%c39] : memref<144xf32, #tpu.memory_space<smem>>
    %102 = vector.broadcast %101 : f32 to vector<14x14xf32>
    %103 = arith.mulf %102, %7 : vector<14x14xf32>
    %104 = arith.addf %100, %103 : vector<14x14xf32>
    %c45 = arith.constant 45 : index
    %105 = memref.load %arg2[%c45] : memref<144xf32, #tpu.memory_space<smem>>
    %106 = vector.broadcast %105 : f32 to vector<14x14xf32>
    %107 = arith.mulf %106, %8 : vector<14x14xf32>
    %108 = arith.addf %104, %107 : vector<14x14xf32>
    %c46 = arith.constant 46 : index
    %109 = memref.load %arg2[%c46] : memref<144xf32, #tpu.memory_space<smem>>
    %110 = vector.broadcast %109 : f32 to vector<14x14xf32>
    %111 = arith.mulf %110, %9 : vector<14x14xf32>
    %112 = arith.addf %108, %111 : vector<14x14xf32>
    %c47 = arith.constant 47 : index
    %113 = memref.load %arg2[%c47] : memref<144xf32, #tpu.memory_space<smem>>
    %114 = vector.broadcast %113 : f32 to vector<14x14xf32>
    %115 = arith.mulf %114, %10 : vector<14x14xf32>
    %116 = arith.addf %112, %115 : vector<14x14xf32>
    %c48 = arith.constant 48 : index
    %117 = memref.load %arg2[%c48] : memref<144xf32, #tpu.memory_space<smem>>
    %118 = vector.broadcast %117 : f32 to vector<14x14xf32>
    %119 = arith.mulf %118, %11 : vector<14x14xf32>
    %120 = arith.addf %116, %119 : vector<14x14xf32>
    %c2_19 = arith.constant 2 : index
    %121 = memref.load %arg3[%c2_19] : memref<8xf32, #tpu.memory_space<smem>>
    %122 = vector.broadcast %121 : f32 to vector<14x14xf32>
    %123 = arith.addf %120, %122 : vector<14x14xf32>
    %cst_20 = arith.constant 0.000000e+00 : f32
    %124 = vector.broadcast %cst_20 : f32 to vector<14x14xf32>
    %125 = arith.maximumf %123, %124 : vector<14x14xf32>
    %c2_21 = arith.constant 2 : index
    %c0_22 = arith.constant 0 : index
    %c0_23 = arith.constant 0 : index
    %c0_24 = arith.constant 0 : index
    %126 = vector.load %arg4[%c2_21, %c0_22, %c0_23, %c0_24] : memref<8x1x14x14xf32, #tpu.memory_space<vmem>>, vector<1x1x14x14xf32>
    %127 = vector.shape_cast %126 : vector<1x1x14x14xf32> to vector<14x14xf32>
    %128 = vector.shape_cast %125 : vector<14x14xf32> to vector<1x1x14x14xf32>
    tpu.vector_store %arg4[%c2_21, %c0_22, %c0_23, %c0_24], %128 {strides = array<i32>} : memref<8x1x14x14xf32, #tpu.memory_space<vmem>>, vector<1x1x14x14xf32>,
    %c54 = arith.constant 54 : index
    %129 = memref.load %arg2[%c54] : memref<144xf32, #tpu.memory_space<smem>>
    %130 = vector.broadcast %129 : f32 to vector<14x14xf32>
    %131 = arith.mulf %130, %4 : vector<14x14xf32>
    %c55 = arith.constant 55 : index
    %132 = memref.load %arg2[%c55] : memref<144xf32, #tpu.memory_space<smem>>
    %133 = vector.broadcast %132 : f32 to vector<14x14xf32>
    %134 = arith.mulf %133, %5 : vector<14x14xf32>
    %135 = arith.addf %131, %134 : vector<14x14xf32>
    %c56 = arith.constant 56 : index
    %136 = memref.load %arg2[%c56] : memref<144xf32, #tpu.memory_space<smem>>
    %137 = vector.broadcast %136 : f32 to vector<14x14xf32>
    %138 = arith.mulf %137, %6 : vector<14x14xf32>
    %139 = arith.addf %135, %138 : vector<14x14xf32>
    %c57 = arith.constant 57 : index
    %140 = memref.load %arg2[%c57] : memref<144xf32, #tpu.memory_space<smem>>
    %141 = vector.broadcast %140 : f32 to vector<14x14xf32>
    %142 = arith.mulf %141, %7 : vector<14x14xf32>
    %143 = arith.addf %139, %142 : vector<14x14xf32>
    %c63 = arith.constant 63 : index
    %144 = memref.load %arg2[%c63] : memref<144xf32, #tpu.memory_space<smem>>
    %145 = vector.broadcast %144 : f32 to vector<14x14xf32>
    %146 = arith.mulf %145, %8 : vector<14x14xf32>
    %147 = arith.addf %143, %146 : vector<14x14xf32>
    %c64 = arith.constant 64 : index
    %148 = memref.load %arg2[%c64] : memref<144xf32, #tpu.memory_space<smem>>
    %149 = vector.broadcast %148 : f32 to vector<14x14xf32>
    %150 = arith.mulf %149, %9 : vector<14x14xf32>
    %151 = arith.addf %147, %150 : vector<14x14xf32>
    %c65 = arith.constant 65 : index
    %152 = memref.load %arg2[%c65] : memref<144xf32, #tpu.memory_space<smem>>
    %153 = vector.broadcast %152 : f32 to vector<14x14xf32>
    %154 = arith.mulf %153, %10 : vector<14x14xf32>
    %155 = arith.addf %151, %154 : vector<14x14xf32>
    %c66 = arith.constant 66 : index
    %156 = memref.load %arg2[%c66] : memref<144xf32, #tpu.memory_space<smem>>
    %157 = vector.broadcast %156 : f32 to vector<14x14xf32>
    %158 = arith.mulf %157, %11 : vector<14x14xf32>
    %159 = arith.addf %155, %158 : vector<14x14xf32>
    %c3_25 = arith.constant 3 : index
    %160 = memref.load %arg3[%c3_25] : memref<8xf32, #tpu.memory_space<smem>>
    %161 = vector.broadcast %160 : f32 to vector<14x14xf32>
    %162 = arith.addf %159, %161 : vector<14x14xf32>
    %cst_26 = arith.constant 0.000000e+00 : f32
    %163 = vector.broadcast %cst_26 : f32 to vector<14x14xf32>
    %164 = arith.maximumf %162, %163 : vector<14x14xf32>
    %c3_27 = arith.constant 3 : index
    %c0_28 = arith.constant 0 : index
    %c0_29 = arith.constant 0 : index
    %c0_30 = arith.constant 0 : index
    %165 = vector.load %arg4[%c3_27, %c0_28, %c0_29, %c0_30] : memref<8x1x14x14xf32, #tpu.memory_space<vmem>>, vector<1x1x14x14xf32>
    %166 = vector.shape_cast %165 : vector<1x1x14x14xf32> to vector<14x14xf32>
    %167 = vector.shape_cast %164 : vector<14x14xf32> to vector<1x1x14x14xf32>
    tpu.vector_store %arg4[%c3_27, %c0_28, %c0_29, %c0_30], %167 {strides = array<i32>} : memref<8x1x14x14xf32, #tpu.memory_space<vmem>>, vector<1x1x14x14xf32>,
    %c72 = arith.constant 72 : index
    %168 = memref.load %arg2[%c72] : memref<144xf32, #tpu.memory_space<smem>>
    %169 = vector.broadcast %168 : f32 to vector<14x14xf32>
    %170 = arith.mulf %169, %4 : vector<14x14xf32>
    %c73 = arith.constant 73 : index
    %171 = memref.load %arg2[%c73] : memref<144xf32, #tpu.memory_space<smem>>
    %172 = vector.broadcast %171 : f32 to vector<14x14xf32>
    %173 = arith.mulf %172, %5 : vector<14x14xf32>
    %174 = arith.addf %170, %173 : vector<14x14xf32>
    %c74 = arith.constant 74 : index
    %175 = memref.load %arg2[%c74] : memref<144xf32, #tpu.memory_space<smem>>
    %176 = vector.broadcast %175 : f32 to vector<14x14xf32>
    %177 = arith.mulf %176, %6 : vector<14x14xf32>
    %178 = arith.addf %174, %177 : vector<14x14xf32>
    %c75 = arith.constant 75 : index
    %179 = memref.load %arg2[%c75] : memref<144xf32, #tpu.memory_space<smem>>
    %180 = vector.broadcast %179 : f32 to vector<14x14xf32>
    %181 = arith.mulf %180, %7 : vector<14x14xf32>
    %182 = arith.addf %178, %181 : vector<14x14xf32>
    %c81 = arith.constant 81 : index
    %183 = memref.load %arg2[%c81] : memref<144xf32, #tpu.memory_space<smem>>
    %184 = vector.broadcast %183 : f32 to vector<14x14xf32>
    %185 = arith.mulf %184, %8 : vector<14x14xf32>
    %186 = arith.addf %182, %185 : vector<14x14xf32>
    %c82 = arith.constant 82 : index
    %187 = memref.load %arg2[%c82] : memref<144xf32, #tpu.memory_space<smem>>
    %188 = vector.broadcast %187 : f32 to vector<14x14xf32>
    %189 = arith.mulf %188, %9 : vector<14x14xf32>
    %190 = arith.addf %186, %189 : vector<14x14xf32>
    %c83 = arith.constant 83 : index
    %191 = memref.load %arg2[%c83] : memref<144xf32, #tpu.memory_space<smem>>
    %192 = vector.broadcast %191 : f32 to vector<14x14xf32>
    %193 = arith.mulf %192, %10 : vector<14x14xf32>
    %194 = arith.addf %190, %193 : vector<14x14xf32>
    %c84 = arith.constant 84 : index
    %195 = memref.load %arg2[%c84] : memref<144xf32, #tpu.memory_space<smem>>
    %196 = vector.broadcast %195 : f32 to vector<14x14xf32>
    %197 = arith.mulf %196, %11 : vector<14x14xf32>
    %198 = arith.addf %194, %197 : vector<14x14xf32>
    %c4 = arith.constant 4 : index
    %199 = memref.load %arg3[%c4] : memref<8xf32, #tpu.memory_space<smem>>
    %200 = vector.broadcast %199 : f32 to vector<14x14xf32>
    %201 = arith.addf %198, %200 : vector<14x14xf32>
    %cst_31 = arith.constant 0.000000e+00 : f32
    %202 = vector.broadcast %cst_31 : f32 to vector<14x14xf32>
    %203 = arith.maximumf %201, %202 : vector<14x14xf32>
    %c4_32 = arith.constant 4 : index
    %c0_33 = arith.constant 0 : index
    %c0_34 = arith.constant 0 : index
    %c0_35 = arith.constant 0 : index
    %204 = vector.load %arg4[%c4_32, %c0_33, %c0_34, %c0_35] : memref<8x1x14x14xf32, #tpu.memory_space<vmem>>, vector<1x1x14x14xf32>
    %205 = vector.shape_cast %204 : vector<1x1x14x14xf32> to vector<14x14xf32>
    %206 = vector.shape_cast %203 : vector<14x14xf32> to vector<1x1x14x14xf32>
    tpu.vector_store %arg4[%c4_32, %c0_33, %c0_34, %c0_35], %206 {strides = array<i32>} : memref<8x1x14x14xf32, #tpu.memory_space<vmem>>, vector<1x1x14x14xf32>,
    %c90 = arith.constant 90 : index
    %207 = memref.load %arg2[%c90] : memref<144xf32, #tpu.memory_space<smem>>
    %208 = vector.broadcast %207 : f32 to vector<14x14xf32>
    %209 = arith.mulf %208, %4 : vector<14x14xf32>
    %c91 = arith.constant 91 : index
    %210 = memref.load %arg2[%c91] : memref<144xf32, #tpu.memory_space<smem>>
    %211 = vector.broadcast %210 : f32 to vector<14x14xf32>
    %212 = arith.mulf %211, %5 : vector<14x14xf32>
    %213 = arith.addf %209, %212 : vector<14x14xf32>
    %c92 = arith.constant 92 : index
    %214 = memref.load %arg2[%c92] : memref<144xf32, #tpu.memory_space<smem>>
    %215 = vector.broadcast %214 : f32 to vector<14x14xf32>
    %216 = arith.mulf %215, %6 : vector<14x14xf32>
    %217 = arith.addf %213, %216 : vector<14x14xf32>
    %c93 = arith.constant 93 : index
    %218 = memref.load %arg2[%c93] : memref<144xf32, #tpu.memory_space<smem>>
    %219 = vector.broadcast %218 : f32 to vector<14x14xf32>
    %220 = arith.mulf %219, %7 : vector<14x14xf32>
    %221 = arith.addf %217, %220 : vector<14x14xf32>
    %c99 = arith.constant 99 : index
    %222 = memref.load %arg2[%c99] : memref<144xf32, #tpu.memory_space<smem>>
    %223 = vector.broadcast %222 : f32 to vector<14x14xf32>
    %224 = arith.mulf %223, %8 : vector<14x14xf32>
    %225 = arith.addf %221, %224 : vector<14x14xf32>
    %c100 = arith.constant 100 : index
    %226 = memref.load %arg2[%c100] : memref<144xf32, #tpu.memory_space<smem>>
    %227 = vector.broadcast %226 : f32 to vector<14x14xf32>
    %228 = arith.mulf %227, %9 : vector<14x14xf32>
    %229 = arith.addf %225, %228 : vector<14x14xf32>
    %c101 = arith.constant 101 : index
    %230 = memref.load %arg2[%c101] : memref<144xf32, #tpu.memory_space<smem>>
    %231 = vector.broadcast %230 : f32 to vector<14x14xf32>
    %232 = arith.mulf %231, %10 : vector<14x14xf32>
    %233 = arith.addf %229, %232 : vector<14x14xf32>
    %c102 = arith.constant 102 : index
    %234 = memref.load %arg2[%c102] : memref<144xf32, #tpu.memory_space<smem>>
    %235 = vector.broadcast %234 : f32 to vector<14x14xf32>
    %236 = arith.mulf %235, %11 : vector<14x14xf32>
    %237 = arith.addf %233, %236 : vector<14x14xf32>
    %c5 = arith.constant 5 : index
    %238 = memref.load %arg3[%c5] : memref<8xf32, #tpu.memory_space<smem>>
    %239 = vector.broadcast %238 : f32 to vector<14x14xf32>
    %240 = arith.addf %237, %239 : vector<14x14xf32>
    %cst_36 = arith.constant 0.000000e+00 : f32
    %241 = vector.broadcast %cst_36 : f32 to vector<14x14xf32>
    %242 = arith.maximumf %240, %241 : vector<14x14xf32>
    %c5_37 = arith.constant 5 : index
    %c0_38 = arith.constant 0 : index
    %c0_39 = arith.constant 0 : index
    %c0_40 = arith.constant 0 : index
    %243 = vector.load %arg4[%c5_37, %c0_38, %c0_39, %c0_40] : memref<8x1x14x14xf32, #tpu.memory_space<vmem>>, vector<1x1x14x14xf32>
    %244 = vector.shape_cast %243 : vector<1x1x14x14xf32> to vector<14x14xf32>
    %245 = vector.shape_cast %242 : vector<14x14xf32> to vector<1x1x14x14xf32>
    tpu.vector_store %arg4[%c5_37, %c0_38, %c0_39, %c0_40], %245 {strides = array<i32>} : memref<8x1x14x14xf32, #tpu.memory_space<vmem>>, vector<1x1x14x14xf32>,
    %c108 = arith.constant 108 : index
    %246 = memref.load %arg2[%c108] : memref<144xf32, #tpu.memory_space<smem>>
    %247 = vector.broadcast %246 : f32 to vector<14x14xf32>
    %248 = arith.mulf %247, %4 : vector<14x14xf32>
    %c109 = arith.constant 109 : index
    %249 = memref.load %arg2[%c109] : memref<144xf32, #tpu.memory_space<smem>>
    %250 = vector.broadcast %249 : f32 to vector<14x14xf32>
    %251 = arith.mulf %250, %5 : vector<14x14xf32>
    %252 = arith.addf %248, %251 : vector<14x14xf32>
    %c110 = arith.constant 110 : index
    %253 = memref.load %arg2[%c110] : memref<144xf32, #tpu.memory_space<smem>>
    %254 = vector.broadcast %253 : f32 to vector<14x14xf32>
    %255 = arith.mulf %254, %6 : vector<14x14xf32>
    %256 = arith.addf %252, %255 : vector<14x14xf32>
    %c111 = arith.constant 111 : index
    %257 = memref.load %arg2[%c111] : memref<144xf32, #tpu.memory_space<smem>>
    %258 = vector.broadcast %257 : f32 to vector<14x14xf32>
    %259 = arith.mulf %258, %7 : vector<14x14xf32>
    %260 = arith.addf %256, %259 : vector<14x14xf32>
    %c117 = arith.constant 117 : index
    %261 = memref.load %arg2[%c117] : memref<144xf32, #tpu.memory_space<smem>>
    %262 = vector.broadcast %261 : f32 to vector<14x14xf32>
    %263 = arith.mulf %262, %8 : vector<14x14xf32>
    %264 = arith.addf %260, %263 : vector<14x14xf32>
    %c118 = arith.constant 118 : index
    %265 = memref.load %arg2[%c118] : memref<144xf32, #tpu.memory_space<smem>>
    %266 = vector.broadcast %265 : f32 to vector<14x14xf32>
    %267 = arith.mulf %266, %9 : vector<14x14xf32>
    %268 = arith.addf %264, %267 : vector<14x14xf32>
    %c119 = arith.constant 119 : index
    %269 = memref.load %arg2[%c119] : memref<144xf32, #tpu.memory_space<smem>>
    %270 = vector.broadcast %269 : f32 to vector<14x14xf32>
    %271 = arith.mulf %270, %10 : vector<14x14xf32>
    %272 = arith.addf %268, %271 : vector<14x14xf32>
    %c120 = arith.constant 120 : index
    %273 = memref.load %arg2[%c120] : memref<144xf32, #tpu.memory_space<smem>>
    %274 = vector.broadcast %273 : f32 to vector<14x14xf32>
    %275 = arith.mulf %274, %11 : vector<14x14xf32>
    %276 = arith.addf %272, %275 : vector<14x14xf32>
    %c6 = arith.constant 6 : index
    %277 = memref.load %arg3[%c6] : memref<8xf32, #tpu.memory_space<smem>>
    %278 = vector.broadcast %277 : f32 to vector<14x14xf32>
    %279 = arith.addf %276, %278 : vector<14x14xf32>
    %cst_41 = arith.constant 0.000000e+00 : f32
    %280 = vector.broadcast %cst_41 : f32 to vector<14x14xf32>
    %281 = arith.maximumf %279, %280 : vector<14x14xf32>
    %c6_42 = arith.constant 6 : index
    %c0_43 = arith.constant 0 : index
    %c0_44 = arith.constant 0 : index
    %c0_45 = arith.constant 0 : index
    %282 = vector.load %arg4[%c6_42, %c0_43, %c0_44, %c0_45] : memref<8x1x14x14xf32, #tpu.memory_space<vmem>>, vector<1x1x14x14xf32>
    %283 = vector.shape_cast %282 : vector<1x1x14x14xf32> to vector<14x14xf32>
    %284 = vector.shape_cast %281 : vector<14x14xf32> to vector<1x1x14x14xf32>
    tpu.vector_store %arg4[%c6_42, %c0_43, %c0_44, %c0_45], %284 {strides = array<i32>} : memref<8x1x14x14xf32, #tpu.memory_space<vmem>>, vector<1x1x14x14xf32>,
    %c126 = arith.constant 126 : index
    %285 = memref.load %arg2[%c126] : memref<144xf32, #tpu.memory_space<smem>>
    %286 = vector.broadcast %285 : f32 to vector<14x14xf32>
    %287 = arith.mulf %286, %4 : vector<14x14xf32>
    %c127 = arith.constant 127 : index
    %288 = memref.load %arg2[%c127] : memref<144xf32, #tpu.memory_space<smem>>
    %289 = vector.broadcast %288 : f32 to vector<14x14xf32>
    %290 = arith.mulf %289, %5 : vector<14x14xf32>
    %291 = arith.addf %287, %290 : vector<14x14xf32>
    %c128 = arith.constant 128 : index
    %292 = memref.load %arg2[%c128] : memref<144xf32, #tpu.memory_space<smem>>
    %293 = vector.broadcast %292 : f32 to vector<14x14xf32>
    %294 = arith.mulf %293, %6 : vector<14x14xf32>
    %295 = arith.addf %291, %294 : vector<14x14xf32>
    %c129 = arith.constant 129 : index
    %296 = memref.load %arg2[%c129] : memref<144xf32, #tpu.memory_space<smem>>
    %297 = vector.broadcast %296 : f32 to vector<14x14xf32>
    %298 = arith.mulf %297, %7 : vector<14x14xf32>
    %299 = arith.addf %295, %298 : vector<14x14xf32>
    %c135 = arith.constant 135 : index
    %300 = memref.load %arg2[%c135] : memref<144xf32, #tpu.memory_space<smem>>
    %301 = vector.broadcast %300 : f32 to vector<14x14xf32>
    %302 = arith.mulf %301, %8 : vector<14x14xf32>
    %303 = arith.addf %299, %302 : vector<14x14xf32>
    %c136 = arith.constant 136 : index
    %304 = memref.load %arg2[%c136] : memref<144xf32, #tpu.memory_space<smem>>
    %305 = vector.broadcast %304 : f32 to vector<14x14xf32>
    %306 = arith.mulf %305, %9 : vector<14x14xf32>
    %307 = arith.addf %303, %306 : vector<14x14xf32>
    %c137 = arith.constant 137 : index
    %308 = memref.load %arg2[%c137] : memref<144xf32, #tpu.memory_space<smem>>
    %309 = vector.broadcast %308 : f32 to vector<14x14xf32>
    %310 = arith.mulf %309, %10 : vector<14x14xf32>
    %311 = arith.addf %307, %310 : vector<14x14xf32>
    %c138 = arith.constant 138 : index
    %312 = memref.load %arg2[%c138] : memref<144xf32, #tpu.memory_space<smem>>
    %313 = vector.broadcast %312 : f32 to vector<14x14xf32>
    %314 = arith.mulf %313, %11 : vector<14x14xf32>
    %315 = arith.addf %311, %314 : vector<14x14xf32>
    %c7 = arith.constant 7 : index
    %316 = memref.load %arg3[%c7] : memref<8xf32, #tpu.memory_space<smem>>
    %317 = vector.broadcast %316 : f32 to vector<14x14xf32>
    %318 = arith.addf %315, %317 : vector<14x14xf32>
    %cst_46 = arith.constant 0.000000e+00 : f32
    %319 = vector.broadcast %cst_46 : f32 to vector<14x14xf32>
    %320 = arith.maximumf %318, %319 : vector<14x14xf32>
    %c7_47 = arith.constant 7 : index
    %c0_48 = arith.constant 0 : index
    %c0_49 = arith.constant 0 : index
    %c0_50 = arith.constant 0 : index
    %321 = vector.load %arg4[%c7_47, %c0_48, %c0_49, %c0_50] : memref<8x1x14x14xf32, #tpu.memory_space<vmem>>, vector<1x1x14x14xf32>
    %322 = vector.shape_cast %321 : vector<1x1x14x14xf32> to vector<14x14xf32>
    %323 = vector.shape_cast %320 : vector<14x14xf32> to vector<1x1x14x14xf32>
    tpu.vector_store %arg4[%c7_47, %c0_48, %c0_49, %c0_50], %323 {strides = array<i32>} : memref<8x1x14x14xf32, #tpu.memory_space<vmem>>, vector<1x1x14x14xf32>,
    return
  }
  func.func @transform_0(%arg0: i32) -> (i32, i32, i32, i32) {
    %c0_i32 = arith.constant 0 : i32
    %c0_i32_0 = arith.constant 0 : i32
    %c0_i32_1 = arith.constant 0 : i32
    %c0_i32_2 = arith.constant 0 : i32
    return %c0_i32, %arg0, %c0_i32_0, %c0_i32_1 : i32, i32, i32, i32
  }
  func.func @transform_1(%arg0: i32) -> i32 {
    %c0_i32 = arith.constant 0 : i32
    %c0_i32_0 = arith.constant 0 : i32
    return %c0_i32 : i32
  }
  func.func @transform_2(%arg0: i32) -> i32 {
    %c0_i32 = arith.constant 0 : i32
    %c0_i32_0 = arith.constant 0 : i32
    return %c0_i32 : i32
  }
  func.func @transform_3(%arg0: i32) -> (i32, i32, i32, i32) {
    %c0_i32 = arith.constant 0 : i32
    %c0_i32_0 = arith.constant 0 : i32
    %c0_i32_1 = arith.constant 0 : i32
    %c0_i32_2 = arith.constant 0 : i32
    return %c0_i32, %arg0, %c0_i32_0, %c0_i32_1 : i32, i32, i32, i32
  }
}

module attributes {stable_mosaic.version = 11 : i64} {
  func.func @kernel(%arg0: i32, %arg1: memref<8x1x12x12xf32, #tpu.memory_space<vmem>>, %arg2: memref<32xf32, #tpu.memory_space<smem>>, %arg3: memref<4xf32, #tpu.memory_space<smem>>, %arg4: memref<144xf32, #tpu.memory_space<smem>>, %arg5: memref<4xf32, #tpu.memory_space<smem>>, %arg6: memref<32xf32, #tpu.memory_space<smem>>, %arg7: memref<8xf32, #tpu.memory_space<smem>>, %arg8: memref<8xf32, #tpu.memory_space<smem>>, %arg9: memref<8xf32, #tpu.memory_space<smem>>, %arg10: memref<8x1x10x10xf32, #tpu.memory_space<vmem>>) attributes {dimension_semantics = [#tpu.dimension_semantics<parallel>], iteration_bounds = array<i64: 2>, scalar_prefetch = 0 : i64, scratch_operands = 0 : i64, tpu.core_type = #tpu.core_type<tc>, window_params = [{transform_indices = @transform_0, window_bounds = array<i64: 8, 1, 12, 12>}, {transform_indices = @transform_1, window_bounds = array<i64: 32>}, {transform_indices = @transform_2, window_bounds = array<i64: 4>}, {transform_indices = @transform_3, window_bounds = array<i64: 144>}, {transform_indices = @transform_4, window_bounds = array<i64: 4>}, {transform_indices = @transform_5, window_bounds = array<i64: 32>}, {transform_indices = @transform_6, window_bounds = array<i64: 8>}, {transform_indices = @transform_7, window_bounds = array<i64: 8>}, {transform_indices = @transform_8, window_bounds = array<i64: 8>}, {transform_indices = @transform_9, window_bounds = array<i64: 8, 1, 10, 10>}]} {
    %c0 = arith.constant 0 : index
    %c0_0 = arith.constant 0 : index
    %c0_1 = arith.constant 0 : index
    %c0_2 = arith.constant 0 : index
    %0 = vector.load %arg1[%c0, %c0_0, %c0_1, %c0_2] : memref<8x1x12x12xf32, #tpu.memory_space<vmem>>, vector<1x1x12x12xf32>
    %1 = vector.shape_cast %0 : vector<1x1x12x12xf32> to vector<12x12xf32>
    %c1 = arith.constant 1 : index
    %c0_3 = arith.constant 0 : index
    %c0_4 = arith.constant 0 : index
    %c0_5 = arith.constant 0 : index
    %2 = vector.load %arg1[%c1, %c0_3, %c0_4, %c0_5] : memref<8x1x12x12xf32, #tpu.memory_space<vmem>>, vector<1x1x12x12xf32>
    %3 = vector.shape_cast %2 : vector<1x1x12x12xf32> to vector<12x12xf32>
    %c2 = arith.constant 2 : index
    %c0_6 = arith.constant 0 : index
    %c0_7 = arith.constant 0 : index
    %c0_8 = arith.constant 0 : index
    %4 = vector.load %arg1[%c2, %c0_6, %c0_7, %c0_8] : memref<8x1x12x12xf32, #tpu.memory_space<vmem>>, vector<1x1x12x12xf32>
    %5 = vector.shape_cast %4 : vector<1x1x12x12xf32> to vector<12x12xf32>
    %c3 = arith.constant 3 : index
    %c0_9 = arith.constant 0 : index
    %c0_10 = arith.constant 0 : index
    %c0_11 = arith.constant 0 : index
    %6 = vector.load %arg1[%c3, %c0_9, %c0_10, %c0_11] : memref<8x1x12x12xf32, #tpu.memory_space<vmem>>, vector<1x1x12x12xf32>
    %7 = vector.shape_cast %6 : vector<1x1x12x12xf32> to vector<12x12xf32>
    %c4 = arith.constant 4 : index
    %c0_12 = arith.constant 0 : index
    %c0_13 = arith.constant 0 : index
    %c0_14 = arith.constant 0 : index
    %8 = vector.load %arg1[%c4, %c0_12, %c0_13, %c0_14] : memref<8x1x12x12xf32, #tpu.memory_space<vmem>>, vector<1x1x12x12xf32>
    %9 = vector.shape_cast %8 : vector<1x1x12x12xf32> to vector<12x12xf32>
    %c5 = arith.constant 5 : index
    %c0_15 = arith.constant 0 : index
    %c0_16 = arith.constant 0 : index
    %c0_17 = arith.constant 0 : index
    %10 = vector.load %arg1[%c5, %c0_15, %c0_16, %c0_17] : memref<8x1x12x12xf32, #tpu.memory_space<vmem>>, vector<1x1x12x12xf32>
    %11 = vector.shape_cast %10 : vector<1x1x12x12xf32> to vector<12x12xf32>
    %c6 = arith.constant 6 : index
    %c0_18 = arith.constant 0 : index
    %c0_19 = arith.constant 0 : index
    %c0_20 = arith.constant 0 : index
    %12 = vector.load %arg1[%c6, %c0_18, %c0_19, %c0_20] : memref<8x1x12x12xf32, #tpu.memory_space<vmem>>, vector<1x1x12x12xf32>
    %13 = vector.shape_cast %12 : vector<1x1x12x12xf32> to vector<12x12xf32>
    %c7 = arith.constant 7 : index
    %c0_21 = arith.constant 0 : index
    %c0_22 = arith.constant 0 : index
    %c0_23 = arith.constant 0 : index
    %14 = vector.load %arg1[%c7, %c0_21, %c0_22, %c0_23] : memref<8x1x12x12xf32, #tpu.memory_space<vmem>>, vector<1x1x12x12xf32>
    %15 = vector.shape_cast %14 : vector<1x1x12x12xf32> to vector<12x12xf32>
    %c0_24 = arith.constant 0 : index
    %16 = memref.load %arg8[%c0_24] : memref<8xf32, #tpu.memory_space<smem>>
    %17 = vector.broadcast %16 : f32 to vector<12x12xf32>
    %18 = arith.mulf %1, %17 : vector<12x12xf32>
    %c0_25 = arith.constant 0 : index
    %19 = memref.load %arg9[%c0_25] : memref<8xf32, #tpu.memory_space<smem>>
    %20 = vector.broadcast %19 : f32 to vector<12x12xf32>
    %21 = arith.addf %18, %20 : vector<12x12xf32>
    %cst = arith.constant 0.000000e+00 : f32
    %22 = vector.broadcast %cst : f32 to vector<12x12xf32>
    %23 = arith.maximumf %21, %22 : vector<12x12xf32>
    %c1_26 = arith.constant 1 : index
    %24 = memref.load %arg8[%c1_26] : memref<8xf32, #tpu.memory_space<smem>>
    %25 = vector.broadcast %24 : f32 to vector<12x12xf32>
    %26 = arith.mulf %3, %25 : vector<12x12xf32>
    %c1_27 = arith.constant 1 : index
    %27 = memref.load %arg9[%c1_27] : memref<8xf32, #tpu.memory_space<smem>>
    %28 = vector.broadcast %27 : f32 to vector<12x12xf32>
    %29 = arith.addf %26, %28 : vector<12x12xf32>
    %cst_28 = arith.constant 0.000000e+00 : f32
    %30 = vector.broadcast %cst_28 : f32 to vector<12x12xf32>
    %31 = arith.maximumf %29, %30 : vector<12x12xf32>
    %c2_29 = arith.constant 2 : index
    %32 = memref.load %arg8[%c2_29] : memref<8xf32, #tpu.memory_space<smem>>
    %33 = vector.broadcast %32 : f32 to vector<12x12xf32>
    %34 = arith.mulf %5, %33 : vector<12x12xf32>
    %c2_30 = arith.constant 2 : index
    %35 = memref.load %arg9[%c2_30] : memref<8xf32, #tpu.memory_space<smem>>
    %36 = vector.broadcast %35 : f32 to vector<12x12xf32>
    %37 = arith.addf %34, %36 : vector<12x12xf32>
    %cst_31 = arith.constant 0.000000e+00 : f32
    %38 = vector.broadcast %cst_31 : f32 to vector<12x12xf32>
    %39 = arith.maximumf %37, %38 : vector<12x12xf32>
    %c3_32 = arith.constant 3 : index
    %40 = memref.load %arg8[%c3_32] : memref<8xf32, #tpu.memory_space<smem>>
    %41 = vector.broadcast %40 : f32 to vector<12x12xf32>
    %42 = arith.mulf %7, %41 : vector<12x12xf32>
    %c3_33 = arith.constant 3 : index
    %43 = memref.load %arg9[%c3_33] : memref<8xf32, #tpu.memory_space<smem>>
    %44 = vector.broadcast %43 : f32 to vector<12x12xf32>
    %45 = arith.addf %42, %44 : vector<12x12xf32>
    %cst_34 = arith.constant 0.000000e+00 : f32
    %46 = vector.broadcast %cst_34 : f32 to vector<12x12xf32>
    %47 = arith.maximumf %45, %46 : vector<12x12xf32>
    %c4_35 = arith.constant 4 : index
    %48 = memref.load %arg8[%c4_35] : memref<8xf32, #tpu.memory_space<smem>>
    %49 = vector.broadcast %48 : f32 to vector<12x12xf32>
    %50 = arith.mulf %9, %49 : vector<12x12xf32>
    %c4_36 = arith.constant 4 : index
    %51 = memref.load %arg9[%c4_36] : memref<8xf32, #tpu.memory_space<smem>>
    %52 = vector.broadcast %51 : f32 to vector<12x12xf32>
    %53 = arith.addf %50, %52 : vector<12x12xf32>
    %cst_37 = arith.constant 0.000000e+00 : f32
    %54 = vector.broadcast %cst_37 : f32 to vector<12x12xf32>
    %55 = arith.maximumf %53, %54 : vector<12x12xf32>
    %c5_38 = arith.constant 5 : index
    %56 = memref.load %arg8[%c5_38] : memref<8xf32, #tpu.memory_space<smem>>
    %57 = vector.broadcast %56 : f32 to vector<12x12xf32>
    %58 = arith.mulf %11, %57 : vector<12x12xf32>
    %c5_39 = arith.constant 5 : index
    %59 = memref.load %arg9[%c5_39] : memref<8xf32, #tpu.memory_space<smem>>
    %60 = vector.broadcast %59 : f32 to vector<12x12xf32>
    %61 = arith.addf %58, %60 : vector<12x12xf32>
    %cst_40 = arith.constant 0.000000e+00 : f32
    %62 = vector.broadcast %cst_40 : f32 to vector<12x12xf32>
    %63 = arith.maximumf %61, %62 : vector<12x12xf32>
    %c6_41 = arith.constant 6 : index
    %64 = memref.load %arg8[%c6_41] : memref<8xf32, #tpu.memory_space<smem>>
    %65 = vector.broadcast %64 : f32 to vector<12x12xf32>
    %66 = arith.mulf %13, %65 : vector<12x12xf32>
    %c6_42 = arith.constant 6 : index
    %67 = memref.load %arg9[%c6_42] : memref<8xf32, #tpu.memory_space<smem>>
    %68 = vector.broadcast %67 : f32 to vector<12x12xf32>
    %69 = arith.addf %66, %68 : vector<12x12xf32>
    %cst_43 = arith.constant 0.000000e+00 : f32
    %70 = vector.broadcast %cst_43 : f32 to vector<12x12xf32>
    %71 = arith.maximumf %69, %70 : vector<12x12xf32>
    %c7_44 = arith.constant 7 : index
    %72 = memref.load %arg8[%c7_44] : memref<8xf32, #tpu.memory_space<smem>>
    %73 = vector.broadcast %72 : f32 to vector<12x12xf32>
    %74 = arith.mulf %15, %73 : vector<12x12xf32>
    %c7_45 = arith.constant 7 : index
    %75 = memref.load %arg9[%c7_45] : memref<8xf32, #tpu.memory_space<smem>>
    %76 = vector.broadcast %75 : f32 to vector<12x12xf32>
    %77 = arith.addf %74, %76 : vector<12x12xf32>
    %cst_46 = arith.constant 0.000000e+00 : f32
    %78 = vector.broadcast %cst_46 : f32 to vector<12x12xf32>
    %79 = arith.maximumf %77, %78 : vector<12x12xf32>
    %c0_47 = arith.constant 0 : index
    %80 = memref.load %arg2[%c0_47] : memref<32xf32, #tpu.memory_space<smem>>
    %81 = vector.broadcast %80 : f32 to vector<12x12xf32>
    %82 = arith.mulf %81, %23 : vector<12x12xf32>
    %c1_48 = arith.constant 1 : index
    %83 = memref.load %arg2[%c1_48] : memref<32xf32, #tpu.memory_space<smem>>
    %84 = vector.broadcast %83 : f32 to vector<12x12xf32>
    %85 = arith.mulf %84, %31 : vector<12x12xf32>
    %86 = arith.addf %82, %85 : vector<12x12xf32>
    %c2_49 = arith.constant 2 : index
    %87 = memref.load %arg2[%c2_49] : memref<32xf32, #tpu.memory_space<smem>>
    %88 = vector.broadcast %87 : f32 to vector<12x12xf32>
    %89 = arith.mulf %88, %39 : vector<12x12xf32>
    %90 = arith.addf %86, %89 : vector<12x12xf32>
    %c3_50 = arith.constant 3 : index
    %91 = memref.load %arg2[%c3_50] : memref<32xf32, #tpu.memory_space<smem>>
    %92 = vector.broadcast %91 : f32 to vector<12x12xf32>
    %93 = arith.mulf %92, %47 : vector<12x12xf32>
    %94 = arith.addf %90, %93 : vector<12x12xf32>
    %c4_51 = arith.constant 4 : index
    %95 = memref.load %arg2[%c4_51] : memref<32xf32, #tpu.memory_space<smem>>
    %96 = vector.broadcast %95 : f32 to vector<12x12xf32>
    %97 = arith.mulf %96, %55 : vector<12x12xf32>
    %98 = arith.addf %94, %97 : vector<12x12xf32>
    %c5_52 = arith.constant 5 : index
    %99 = memref.load %arg2[%c5_52] : memref<32xf32, #tpu.memory_space<smem>>
    %100 = vector.broadcast %99 : f32 to vector<12x12xf32>
    %101 = arith.mulf %100, %63 : vector<12x12xf32>
    %102 = arith.addf %98, %101 : vector<12x12xf32>
    %c6_53 = arith.constant 6 : index
    %103 = memref.load %arg2[%c6_53] : memref<32xf32, #tpu.memory_space<smem>>
    %104 = vector.broadcast %103 : f32 to vector<12x12xf32>
    %105 = arith.mulf %104, %71 : vector<12x12xf32>
    %106 = arith.addf %102, %105 : vector<12x12xf32>
    %c7_54 = arith.constant 7 : index
    %107 = memref.load %arg2[%c7_54] : memref<32xf32, #tpu.memory_space<smem>>
    %108 = vector.broadcast %107 : f32 to vector<12x12xf32>
    %109 = arith.mulf %108, %79 : vector<12x12xf32>
    %110 = arith.addf %106, %109 : vector<12x12xf32>
    %c0_55 = arith.constant 0 : index
    %111 = memref.load %arg3[%c0_55] : memref<4xf32, #tpu.memory_space<smem>>
    %112 = vector.broadcast %111 : f32 to vector<12x12xf32>
    %113 = arith.addf %110, %112 : vector<12x12xf32>
    %cst_56 = arith.constant 0.000000e+00 : f32
    %114 = vector.broadcast %cst_56 : f32 to vector<12x12xf32>
    %115 = arith.maximumf %113, %114 : vector<12x12xf32>
    %c8 = arith.constant 8 : index
    %116 = memref.load %arg2[%c8] : memref<32xf32, #tpu.memory_space<smem>>
    %117 = vector.broadcast %116 : f32 to vector<12x12xf32>
    %118 = arith.mulf %117, %23 : vector<12x12xf32>
    %c9 = arith.constant 9 : index
    %119 = memref.load %arg2[%c9] : memref<32xf32, #tpu.memory_space<smem>>
    %120 = vector.broadcast %119 : f32 to vector<12x12xf32>
    %121 = arith.mulf %120, %31 : vector<12x12xf32>
    %122 = arith.addf %118, %121 : vector<12x12xf32>
    %c10 = arith.constant 10 : index
    %123 = memref.load %arg2[%c10] : memref<32xf32, #tpu.memory_space<smem>>
    %124 = vector.broadcast %123 : f32 to vector<12x12xf32>
    %125 = arith.mulf %124, %39 : vector<12x12xf32>
    %126 = arith.addf %122, %125 : vector<12x12xf32>
    %c11 = arith.constant 11 : index
    %127 = memref.load %arg2[%c11] : memref<32xf32, #tpu.memory_space<smem>>
    %128 = vector.broadcast %127 : f32 to vector<12x12xf32>
    %129 = arith.mulf %128, %47 : vector<12x12xf32>
    %130 = arith.addf %126, %129 : vector<12x12xf32>
    %c12 = arith.constant 12 : index
    %131 = memref.load %arg2[%c12] : memref<32xf32, #tpu.memory_space<smem>>
    %132 = vector.broadcast %131 : f32 to vector<12x12xf32>
    %133 = arith.mulf %132, %55 : vector<12x12xf32>
    %134 = arith.addf %130, %133 : vector<12x12xf32>
    %c13 = arith.constant 13 : index
    %135 = memref.load %arg2[%c13] : memref<32xf32, #tpu.memory_space<smem>>
    %136 = vector.broadcast %135 : f32 to vector<12x12xf32>
    %137 = arith.mulf %136, %63 : vector<12x12xf32>
    %138 = arith.addf %134, %137 : vector<12x12xf32>
    %c14 = arith.constant 14 : index
    %139 = memref.load %arg2[%c14] : memref<32xf32, #tpu.memory_space<smem>>
    %140 = vector.broadcast %139 : f32 to vector<12x12xf32>
    %141 = arith.mulf %140, %71 : vector<12x12xf32>
    %142 = arith.addf %138, %141 : vector<12x12xf32>
    %c15 = arith.constant 15 : index
    %143 = memref.load %arg2[%c15] : memref<32xf32, #tpu.memory_space<smem>>
    %144 = vector.broadcast %143 : f32 to vector<12x12xf32>
    %145 = arith.mulf %144, %79 : vector<12x12xf32>
    %146 = arith.addf %142, %145 : vector<12x12xf32>
    %c1_57 = arith.constant 1 : index
    %147 = memref.load %arg3[%c1_57] : memref<4xf32, #tpu.memory_space<smem>>
    %148 = vector.broadcast %147 : f32 to vector<12x12xf32>
    %149 = arith.addf %146, %148 : vector<12x12xf32>
    %cst_58 = arith.constant 0.000000e+00 : f32
    %150 = vector.broadcast %cst_58 : f32 to vector<12x12xf32>
    %151 = arith.maximumf %149, %150 : vector<12x12xf32>
    %c16 = arith.constant 16 : index
    %152 = memref.load %arg2[%c16] : memref<32xf32, #tpu.memory_space<smem>>
    %153 = vector.broadcast %152 : f32 to vector<12x12xf32>
    %154 = arith.mulf %153, %23 : vector<12x12xf32>
    %c17 = arith.constant 17 : index
    %155 = memref.load %arg2[%c17] : memref<32xf32, #tpu.memory_space<smem>>
    %156 = vector.broadcast %155 : f32 to vector<12x12xf32>
    %157 = arith.mulf %156, %31 : vector<12x12xf32>
    %158 = arith.addf %154, %157 : vector<12x12xf32>
    %c18 = arith.constant 18 : index
    %159 = memref.load %arg2[%c18] : memref<32xf32, #tpu.memory_space<smem>>
    %160 = vector.broadcast %159 : f32 to vector<12x12xf32>
    %161 = arith.mulf %160, %39 : vector<12x12xf32>
    %162 = arith.addf %158, %161 : vector<12x12xf32>
    %c19 = arith.constant 19 : index
    %163 = memref.load %arg2[%c19] : memref<32xf32, #tpu.memory_space<smem>>
    %164 = vector.broadcast %163 : f32 to vector<12x12xf32>
    %165 = arith.mulf %164, %47 : vector<12x12xf32>
    %166 = arith.addf %162, %165 : vector<12x12xf32>
    %c20 = arith.constant 20 : index
    %167 = memref.load %arg2[%c20] : memref<32xf32, #tpu.memory_space<smem>>
    %168 = vector.broadcast %167 : f32 to vector<12x12xf32>
    %169 = arith.mulf %168, %55 : vector<12x12xf32>
    %170 = arith.addf %166, %169 : vector<12x12xf32>
    %c21 = arith.constant 21 : index
    %171 = memref.load %arg2[%c21] : memref<32xf32, #tpu.memory_space<smem>>
    %172 = vector.broadcast %171 : f32 to vector<12x12xf32>
    %173 = arith.mulf %172, %63 : vector<12x12xf32>
    %174 = arith.addf %170, %173 : vector<12x12xf32>
    %c22 = arith.constant 22 : index
    %175 = memref.load %arg2[%c22] : memref<32xf32, #tpu.memory_space<smem>>
    %176 = vector.broadcast %175 : f32 to vector<12x12xf32>
    %177 = arith.mulf %176, %71 : vector<12x12xf32>
    %178 = arith.addf %174, %177 : vector<12x12xf32>
    %c23 = arith.constant 23 : index
    %179 = memref.load %arg2[%c23] : memref<32xf32, #tpu.memory_space<smem>>
    %180 = vector.broadcast %179 : f32 to vector<12x12xf32>
    %181 = arith.mulf %180, %79 : vector<12x12xf32>
    %182 = arith.addf %178, %181 : vector<12x12xf32>
    %c2_59 = arith.constant 2 : index
    %183 = memref.load %arg3[%c2_59] : memref<4xf32, #tpu.memory_space<smem>>
    %184 = vector.broadcast %183 : f32 to vector<12x12xf32>
    %185 = arith.addf %182, %184 : vector<12x12xf32>
    %cst_60 = arith.constant 0.000000e+00 : f32
    %186 = vector.broadcast %cst_60 : f32 to vector<12x12xf32>
    %187 = arith.maximumf %185, %186 : vector<12x12xf32>
    %c24 = arith.constant 24 : index
    %188 = memref.load %arg2[%c24] : memref<32xf32, #tpu.memory_space<smem>>
    %189 = vector.broadcast %188 : f32 to vector<12x12xf32>
    %190 = arith.mulf %189, %23 : vector<12x12xf32>
    %c25 = arith.constant 25 : index
    %191 = memref.load %arg2[%c25] : memref<32xf32, #tpu.memory_space<smem>>
    %192 = vector.broadcast %191 : f32 to vector<12x12xf32>
    %193 = arith.mulf %192, %31 : vector<12x12xf32>
    %194 = arith.addf %190, %193 : vector<12x12xf32>
    %c26 = arith.constant 26 : index
    %195 = memref.load %arg2[%c26] : memref<32xf32, #tpu.memory_space<smem>>
    %196 = vector.broadcast %195 : f32 to vector<12x12xf32>
    %197 = arith.mulf %196, %39 : vector<12x12xf32>
    %198 = arith.addf %194, %197 : vector<12x12xf32>
    %c27 = arith.constant 27 : index
    %199 = memref.load %arg2[%c27] : memref<32xf32, #tpu.memory_space<smem>>
    %200 = vector.broadcast %199 : f32 to vector<12x12xf32>
    %201 = arith.mulf %200, %47 : vector<12x12xf32>
    %202 = arith.addf %198, %201 : vector<12x12xf32>
    %c28 = arith.constant 28 : index
    %203 = memref.load %arg2[%c28] : memref<32xf32, #tpu.memory_space<smem>>
    %204 = vector.broadcast %203 : f32 to vector<12x12xf32>
    %205 = arith.mulf %204, %55 : vector<12x12xf32>
    %206 = arith.addf %202, %205 : vector<12x12xf32>
    %c29 = arith.constant 29 : index
    %207 = memref.load %arg2[%c29] : memref<32xf32, #tpu.memory_space<smem>>
    %208 = vector.broadcast %207 : f32 to vector<12x12xf32>
    %209 = arith.mulf %208, %63 : vector<12x12xf32>
    %210 = arith.addf %206, %209 : vector<12x12xf32>
    %c30 = arith.constant 30 : index
    %211 = memref.load %arg2[%c30] : memref<32xf32, #tpu.memory_space<smem>>
    %212 = vector.broadcast %211 : f32 to vector<12x12xf32>
    %213 = arith.mulf %212, %71 : vector<12x12xf32>
    %214 = arith.addf %210, %213 : vector<12x12xf32>
    %c31 = arith.constant 31 : index
    %215 = memref.load %arg2[%c31] : memref<32xf32, #tpu.memory_space<smem>>
    %216 = vector.broadcast %215 : f32 to vector<12x12xf32>
    %217 = arith.mulf %216, %79 : vector<12x12xf32>
    %218 = arith.addf %214, %217 : vector<12x12xf32>
    %c3_61 = arith.constant 3 : index
    %219 = memref.load %arg3[%c3_61] : memref<4xf32, #tpu.memory_space<smem>>
    %220 = vector.broadcast %219 : f32 to vector<12x12xf32>
    %221 = arith.addf %218, %220 : vector<12x12xf32>
    %cst_62 = arith.constant 0.000000e+00 : f32
    %222 = vector.broadcast %cst_62 : f32 to vector<12x12xf32>
    %223 = arith.maximumf %221, %222 : vector<12x12xf32>
    %224 = vector.extract_strided_slice %115 {offsets = [0, 0], sizes = [10, 10], strides = [1, 1]} : vector<12x12xf32> to vector<10x10xf32>
    %225 = vector.extract_strided_slice %115 {offsets = [0, 1], sizes = [10, 10], strides = [1, 1]} : vector<12x12xf32> to vector<10x10xf32>
    %226 = vector.extract_strided_slice %115 {offsets = [0, 2], sizes = [10, 10], strides = [1, 1]} : vector<12x12xf32> to vector<10x10xf32>
    %227 = vector.extract_strided_slice %115 {offsets = [1, 0], sizes = [10, 10], strides = [1, 1]} : vector<12x12xf32> to vector<10x10xf32>
    %228 = vector.extract_strided_slice %115 {offsets = [1, 1], sizes = [10, 10], strides = [1, 1]} : vector<12x12xf32> to vector<10x10xf32>
    %229 = vector.extract_strided_slice %151 {offsets = [0, 0], sizes = [10, 10], strides = [1, 1]} : vector<12x12xf32> to vector<10x10xf32>
    %230 = vector.extract_strided_slice %151 {offsets = [0, 1], sizes = [10, 10], strides = [1, 1]} : vector<12x12xf32> to vector<10x10xf32>
    %231 = vector.extract_strided_slice %151 {offsets = [0, 2], sizes = [10, 10], strides = [1, 1]} : vector<12x12xf32> to vector<10x10xf32>
    %232 = vector.extract_strided_slice %151 {offsets = [1, 0], sizes = [10, 10], strides = [1, 1]} : vector<12x12xf32> to vector<10x10xf32>
    %233 = vector.extract_strided_slice %151 {offsets = [1, 1], sizes = [10, 10], strides = [1, 1]} : vector<12x12xf32> to vector<10x10xf32>
    %234 = vector.extract_strided_slice %187 {offsets = [0, 0], sizes = [10, 10], strides = [1, 1]} : vector<12x12xf32> to vector<10x10xf32>
    %235 = vector.extract_strided_slice %187 {offsets = [0, 1], sizes = [10, 10], strides = [1, 1]} : vector<12x12xf32> to vector<10x10xf32>
    %236 = vector.extract_strided_slice %187 {offsets = [0, 2], sizes = [10, 10], strides = [1, 1]} : vector<12x12xf32> to vector<10x10xf32>
    %237 = vector.extract_strided_slice %187 {offsets = [1, 0], sizes = [10, 10], strides = [1, 1]} : vector<12x12xf32> to vector<10x10xf32>
    %238 = vector.extract_strided_slice %187 {offsets = [1, 1], sizes = [10, 10], strides = [1, 1]} : vector<12x12xf32> to vector<10x10xf32>
    %239 = vector.extract_strided_slice %223 {offsets = [0, 0], sizes = [10, 10], strides = [1, 1]} : vector<12x12xf32> to vector<10x10xf32>
    %240 = vector.extract_strided_slice %223 {offsets = [0, 1], sizes = [10, 10], strides = [1, 1]} : vector<12x12xf32> to vector<10x10xf32>
    %241 = vector.extract_strided_slice %223 {offsets = [0, 2], sizes = [10, 10], strides = [1, 1]} : vector<12x12xf32> to vector<10x10xf32>
    %242 = vector.extract_strided_slice %223 {offsets = [1, 0], sizes = [10, 10], strides = [1, 1]} : vector<12x12xf32> to vector<10x10xf32>
    %243 = vector.extract_strided_slice %223 {offsets = [1, 1], sizes = [10, 10], strides = [1, 1]} : vector<12x12xf32> to vector<10x10xf32>
    %c0_63 = arith.constant 0 : index
    %244 = memref.load %arg4[%c0_63] : memref<144xf32, #tpu.memory_space<smem>>
    %245 = vector.broadcast %244 : f32 to vector<10x10xf32>
    %246 = arith.mulf %245, %224 : vector<10x10xf32>
    %c1_64 = arith.constant 1 : index
    %247 = memref.load %arg4[%c1_64] : memref<144xf32, #tpu.memory_space<smem>>
    %248 = vector.broadcast %247 : f32 to vector<10x10xf32>
    %249 = arith.mulf %248, %225 : vector<10x10xf32>
    %250 = arith.addf %246, %249 : vector<10x10xf32>
    %c2_65 = arith.constant 2 : index
    %251 = memref.load %arg4[%c2_65] : memref<144xf32, #tpu.memory_space<smem>>
    %252 = vector.broadcast %251 : f32 to vector<10x10xf32>
    %253 = arith.mulf %252, %226 : vector<10x10xf32>
    %254 = arith.addf %250, %253 : vector<10x10xf32>
    %c3_66 = arith.constant 3 : index
    %255 = memref.load %arg4[%c3_66] : memref<144xf32, #tpu.memory_space<smem>>
    %256 = vector.broadcast %255 : f32 to vector<10x10xf32>
    %257 = arith.mulf %256, %227 : vector<10x10xf32>
    %258 = arith.addf %254, %257 : vector<10x10xf32>
    %c4_67 = arith.constant 4 : index
    %259 = memref.load %arg4[%c4_67] : memref<144xf32, #tpu.memory_space<smem>>
    %260 = vector.broadcast %259 : f32 to vector<10x10xf32>
    %261 = arith.mulf %260, %228 : vector<10x10xf32>
    %262 = arith.addf %258, %261 : vector<10x10xf32>
    %c9_68 = arith.constant 9 : index
    %263 = memref.load %arg4[%c9_68] : memref<144xf32, #tpu.memory_space<smem>>
    %264 = vector.broadcast %263 : f32 to vector<10x10xf32>
    %265 = arith.mulf %264, %229 : vector<10x10xf32>
    %266 = arith.addf %262, %265 : vector<10x10xf32>
    %c10_69 = arith.constant 10 : index
    %267 = memref.load %arg4[%c10_69] : memref<144xf32, #tpu.memory_space<smem>>
    %268 = vector.broadcast %267 : f32 to vector<10x10xf32>
    %269 = arith.mulf %268, %230 : vector<10x10xf32>
    %270 = arith.addf %266, %269 : vector<10x10xf32>
    %c11_70 = arith.constant 11 : index
    %271 = memref.load %arg4[%c11_70] : memref<144xf32, #tpu.memory_space<smem>>
    %272 = vector.broadcast %271 : f32 to vector<10x10xf32>
    %273 = arith.mulf %272, %231 : vector<10x10xf32>
    %274 = arith.addf %270, %273 : vector<10x10xf32>
    %c12_71 = arith.constant 12 : index
    %275 = memref.load %arg4[%c12_71] : memref<144xf32, #tpu.memory_space<smem>>
    %276 = vector.broadcast %275 : f32 to vector<10x10xf32>
    %277 = arith.mulf %276, %232 : vector<10x10xf32>
    %278 = arith.addf %274, %277 : vector<10x10xf32>
    %c18_72 = arith.constant 18 : index
    %279 = memref.load %arg4[%c18_72] : memref<144xf32, #tpu.memory_space<smem>>
    %280 = vector.broadcast %279 : f32 to vector<10x10xf32>
    %281 = arith.mulf %280, %234 : vector<10x10xf32>
    %282 = arith.addf %278, %281 : vector<10x10xf32>
    %c19_73 = arith.constant 19 : index
    %283 = memref.load %arg4[%c19_73] : memref<144xf32, #tpu.memory_space<smem>>
    %284 = vector.broadcast %283 : f32 to vector<10x10xf32>
    %285 = arith.mulf %284, %235 : vector<10x10xf32>
    %286 = arith.addf %282, %285 : vector<10x10xf32>
    %c20_74 = arith.constant 20 : index
    %287 = memref.load %arg4[%c20_74] : memref<144xf32, #tpu.memory_space<smem>>
    %288 = vector.broadcast %287 : f32 to vector<10x10xf32>
    %289 = arith.mulf %288, %236 : vector<10x10xf32>
    %290 = arith.addf %286, %289 : vector<10x10xf32>
    %c21_75 = arith.constant 21 : index
    %291 = memref.load %arg4[%c21_75] : memref<144xf32, #tpu.memory_space<smem>>
    %292 = vector.broadcast %291 : f32 to vector<10x10xf32>
    %293 = arith.mulf %292, %237 : vector<10x10xf32>
    %294 = arith.addf %290, %293 : vector<10x10xf32>
    %c22_76 = arith.constant 22 : index
    %295 = memref.load %arg4[%c22_76] : memref<144xf32, #tpu.memory_space<smem>>
    %296 = vector.broadcast %295 : f32 to vector<10x10xf32>
    %297 = arith.mulf %296, %238 : vector<10x10xf32>
    %298 = arith.addf %294, %297 : vector<10x10xf32>
    %c27_77 = arith.constant 27 : index
    %299 = memref.load %arg4[%c27_77] : memref<144xf32, #tpu.memory_space<smem>>
    %300 = vector.broadcast %299 : f32 to vector<10x10xf32>
    %301 = arith.mulf %300, %239 : vector<10x10xf32>
    %302 = arith.addf %298, %301 : vector<10x10xf32>
    %c28_78 = arith.constant 28 : index
    %303 = memref.load %arg4[%c28_78] : memref<144xf32, #tpu.memory_space<smem>>
    %304 = vector.broadcast %303 : f32 to vector<10x10xf32>
    %305 = arith.mulf %304, %240 : vector<10x10xf32>
    %306 = arith.addf %302, %305 : vector<10x10xf32>
    %c29_79 = arith.constant 29 : index
    %307 = memref.load %arg4[%c29_79] : memref<144xf32, #tpu.memory_space<smem>>
    %308 = vector.broadcast %307 : f32 to vector<10x10xf32>
    %309 = arith.mulf %308, %241 : vector<10x10xf32>
    %310 = arith.addf %306, %309 : vector<10x10xf32>
    %c30_80 = arith.constant 30 : index
    %311 = memref.load %arg4[%c30_80] : memref<144xf32, #tpu.memory_space<smem>>
    %312 = vector.broadcast %311 : f32 to vector<10x10xf32>
    %313 = arith.mulf %312, %242 : vector<10x10xf32>
    %314 = arith.addf %310, %313 : vector<10x10xf32>
    %c0_81 = arith.constant 0 : index
    %315 = memref.load %arg5[%c0_81] : memref<4xf32, #tpu.memory_space<smem>>
    %316 = vector.broadcast %315 : f32 to vector<10x10xf32>
    %317 = arith.addf %314, %316 : vector<10x10xf32>
    %cst_82 = arith.constant 0.000000e+00 : f32
    %318 = vector.broadcast %cst_82 : f32 to vector<10x10xf32>
    %319 = arith.maximumf %317, %318 : vector<10x10xf32>
    %c36 = arith.constant 36 : index
    %320 = memref.load %arg4[%c36] : memref<144xf32, #tpu.memory_space<smem>>
    %321 = vector.broadcast %320 : f32 to vector<10x10xf32>
    %322 = arith.mulf %321, %224 : vector<10x10xf32>
    %c37 = arith.constant 37 : index
    %323 = memref.load %arg4[%c37] : memref<144xf32, #tpu.memory_space<smem>>
    %324 = vector.broadcast %323 : f32 to vector<10x10xf32>
    %325 = arith.mulf %324, %225 : vector<10x10xf32>
    %326 = arith.addf %322, %325 : vector<10x10xf32>
    %c38 = arith.constant 38 : index
    %327 = memref.load %arg4[%c38] : memref<144xf32, #tpu.memory_space<smem>>
    %328 = vector.broadcast %327 : f32 to vector<10x10xf32>
    %329 = arith.mulf %328, %226 : vector<10x10xf32>
    %330 = arith.addf %326, %329 : vector<10x10xf32>
    %c39 = arith.constant 39 : index
    %331 = memref.load %arg4[%c39] : memref<144xf32, #tpu.memory_space<smem>>
    %332 = vector.broadcast %331 : f32 to vector<10x10xf32>
    %333 = arith.mulf %332, %227 : vector<10x10xf32>
    %334 = arith.addf %330, %333 : vector<10x10xf32>
    %c40 = arith.constant 40 : index
    %335 = memref.load %arg4[%c40] : memref<144xf32, #tpu.memory_space<smem>>
    %336 = vector.broadcast %335 : f32 to vector<10x10xf32>
    %337 = arith.mulf %336, %228 : vector<10x10xf32>
    %338 = arith.addf %334, %337 : vector<10x10xf32>
    %c45 = arith.constant 45 : index
    %339 = memref.load %arg4[%c45] : memref<144xf32, #tpu.memory_space<smem>>
    %340 = vector.broadcast %339 : f32 to vector<10x10xf32>
    %341 = arith.mulf %340, %229 : vector<10x10xf32>
    %342 = arith.addf %338, %341 : vector<10x10xf32>
    %c46 = arith.constant 46 : index
    %343 = memref.load %arg4[%c46] : memref<144xf32, #tpu.memory_space<smem>>
    %344 = vector.broadcast %343 : f32 to vector<10x10xf32>
    %345 = arith.mulf %344, %230 : vector<10x10xf32>
    %346 = arith.addf %342, %345 : vector<10x10xf32>
    %c47 = arith.constant 47 : index
    %347 = memref.load %arg4[%c47] : memref<144xf32, #tpu.memory_space<smem>>
    %348 = vector.broadcast %347 : f32 to vector<10x10xf32>
    %349 = arith.mulf %348, %231 : vector<10x10xf32>
    %350 = arith.addf %346, %349 : vector<10x10xf32>
    %c48 = arith.constant 48 : index
    %351 = memref.load %arg4[%c48] : memref<144xf32, #tpu.memory_space<smem>>
    %352 = vector.broadcast %351 : f32 to vector<10x10xf32>
    %353 = arith.mulf %352, %232 : vector<10x10xf32>
    %354 = arith.addf %350, %353 : vector<10x10xf32>
    %c49 = arith.constant 49 : index
    %355 = memref.load %arg4[%c49] : memref<144xf32, #tpu.memory_space<smem>>
    %356 = vector.broadcast %355 : f32 to vector<10x10xf32>
    %357 = arith.mulf %356, %233 : vector<10x10xf32>
    %358 = arith.addf %354, %357 : vector<10x10xf32>
    %c54 = arith.constant 54 : index
    %359 = memref.load %arg4[%c54] : memref<144xf32, #tpu.memory_space<smem>>
    %360 = vector.broadcast %359 : f32 to vector<10x10xf32>
    %361 = arith.mulf %360, %234 : vector<10x10xf32>
    %362 = arith.addf %358, %361 : vector<10x10xf32>
    %c55 = arith.constant 55 : index
    %363 = memref.load %arg4[%c55] : memref<144xf32, #tpu.memory_space<smem>>
    %364 = vector.broadcast %363 : f32 to vector<10x10xf32>
    %365 = arith.mulf %364, %235 : vector<10x10xf32>
    %366 = arith.addf %362, %365 : vector<10x10xf32>
    %c56 = arith.constant 56 : index
    %367 = memref.load %arg4[%c56] : memref<144xf32, #tpu.memory_space<smem>>
    %368 = vector.broadcast %367 : f32 to vector<10x10xf32>
    %369 = arith.mulf %368, %236 : vector<10x10xf32>
    %370 = arith.addf %366, %369 : vector<10x10xf32>
    %c57 = arith.constant 57 : index
    %371 = memref.load %arg4[%c57] : memref<144xf32, #tpu.memory_space<smem>>
    %372 = vector.broadcast %371 : f32 to vector<10x10xf32>
    %373 = arith.mulf %372, %237 : vector<10x10xf32>
    %374 = arith.addf %370, %373 : vector<10x10xf32>
    %c58 = arith.constant 58 : index
    %375 = memref.load %arg4[%c58] : memref<144xf32, #tpu.memory_space<smem>>
    %376 = vector.broadcast %375 : f32 to vector<10x10xf32>
    %377 = arith.mulf %376, %238 : vector<10x10xf32>
    %378 = arith.addf %374, %377 : vector<10x10xf32>
    %c63 = arith.constant 63 : index
    %379 = memref.load %arg4[%c63] : memref<144xf32, #tpu.memory_space<smem>>
    %380 = vector.broadcast %379 : f32 to vector<10x10xf32>
    %381 = arith.mulf %380, %239 : vector<10x10xf32>
    %382 = arith.addf %378, %381 : vector<10x10xf32>
    %c64 = arith.constant 64 : index
    %383 = memref.load %arg4[%c64] : memref<144xf32, #tpu.memory_space<smem>>
    %384 = vector.broadcast %383 : f32 to vector<10x10xf32>
    %385 = arith.mulf %384, %240 : vector<10x10xf32>
    %386 = arith.addf %382, %385 : vector<10x10xf32>
    %c65 = arith.constant 65 : index
    %387 = memref.load %arg4[%c65] : memref<144xf32, #tpu.memory_space<smem>>
    %388 = vector.broadcast %387 : f32 to vector<10x10xf32>
    %389 = arith.mulf %388, %241 : vector<10x10xf32>
    %390 = arith.addf %386, %389 : vector<10x10xf32>
    %c66 = arith.constant 66 : index
    %391 = memref.load %arg4[%c66] : memref<144xf32, #tpu.memory_space<smem>>
    %392 = vector.broadcast %391 : f32 to vector<10x10xf32>
    %393 = arith.mulf %392, %242 : vector<10x10xf32>
    %394 = arith.addf %390, %393 : vector<10x10xf32>
    %c67 = arith.constant 67 : index
    %395 = memref.load %arg4[%c67] : memref<144xf32, #tpu.memory_space<smem>>
    %396 = vector.broadcast %395 : f32 to vector<10x10xf32>
    %397 = arith.mulf %396, %243 : vector<10x10xf32>
    %398 = arith.addf %394, %397 : vector<10x10xf32>
    %c1_83 = arith.constant 1 : index
    %399 = memref.load %arg5[%c1_83] : memref<4xf32, #tpu.memory_space<smem>>
    %400 = vector.broadcast %399 : f32 to vector<10x10xf32>
    %401 = arith.addf %398, %400 : vector<10x10xf32>
    %cst_84 = arith.constant 0.000000e+00 : f32
    %402 = vector.broadcast %cst_84 : f32 to vector<10x10xf32>
    %403 = arith.maximumf %401, %402 : vector<10x10xf32>
    %c72 = arith.constant 72 : index
    %404 = memref.load %arg4[%c72] : memref<144xf32, #tpu.memory_space<smem>>
    %405 = vector.broadcast %404 : f32 to vector<10x10xf32>
    %406 = arith.mulf %405, %224 : vector<10x10xf32>
    %c73 = arith.constant 73 : index
    %407 = memref.load %arg4[%c73] : memref<144xf32, #tpu.memory_space<smem>>
    %408 = vector.broadcast %407 : f32 to vector<10x10xf32>
    %409 = arith.mulf %408, %225 : vector<10x10xf32>
    %410 = arith.addf %406, %409 : vector<10x10xf32>
    %c74 = arith.constant 74 : index
    %411 = memref.load %arg4[%c74] : memref<144xf32, #tpu.memory_space<smem>>
    %412 = vector.broadcast %411 : f32 to vector<10x10xf32>
    %413 = arith.mulf %412, %226 : vector<10x10xf32>
    %414 = arith.addf %410, %413 : vector<10x10xf32>
    %c75 = arith.constant 75 : index
    %415 = memref.load %arg4[%c75] : memref<144xf32, #tpu.memory_space<smem>>
    %416 = vector.broadcast %415 : f32 to vector<10x10xf32>
    %417 = arith.mulf %416, %227 : vector<10x10xf32>
    %418 = arith.addf %414, %417 : vector<10x10xf32>
    %c76 = arith.constant 76 : index
    %419 = memref.load %arg4[%c76] : memref<144xf32, #tpu.memory_space<smem>>
    %420 = vector.broadcast %419 : f32 to vector<10x10xf32>
    %421 = arith.mulf %420, %228 : vector<10x10xf32>
    %422 = arith.addf %418, %421 : vector<10x10xf32>
    %c81 = arith.constant 81 : index
    %423 = memref.load %arg4[%c81] : memref<144xf32, #tpu.memory_space<smem>>
    %424 = vector.broadcast %423 : f32 to vector<10x10xf32>
    %425 = arith.mulf %424, %229 : vector<10x10xf32>
    %426 = arith.addf %422, %425 : vector<10x10xf32>
    %c82 = arith.constant 82 : index
    %427 = memref.load %arg4[%c82] : memref<144xf32, #tpu.memory_space<smem>>
    %428 = vector.broadcast %427 : f32 to vector<10x10xf32>
    %429 = arith.mulf %428, %230 : vector<10x10xf32>
    %430 = arith.addf %426, %429 : vector<10x10xf32>
    %c83 = arith.constant 83 : index
    %431 = memref.load %arg4[%c83] : memref<144xf32, #tpu.memory_space<smem>>
    %432 = vector.broadcast %431 : f32 to vector<10x10xf32>
    %433 = arith.mulf %432, %231 : vector<10x10xf32>
    %434 = arith.addf %430, %433 : vector<10x10xf32>
    %c84 = arith.constant 84 : index
    %435 = memref.load %arg4[%c84] : memref<144xf32, #tpu.memory_space<smem>>
    %436 = vector.broadcast %435 : f32 to vector<10x10xf32>
    %437 = arith.mulf %436, %232 : vector<10x10xf32>
    %438 = arith.addf %434, %437 : vector<10x10xf32>
    %c90 = arith.constant 90 : index
    %439 = memref.load %arg4[%c90] : memref<144xf32, #tpu.memory_space<smem>>
    %440 = vector.broadcast %439 : f32 to vector<10x10xf32>
    %441 = arith.mulf %440, %234 : vector<10x10xf32>
    %442 = arith.addf %438, %441 : vector<10x10xf32>
    %c91 = arith.constant 91 : index
    %443 = memref.load %arg4[%c91] : memref<144xf32, #tpu.memory_space<smem>>
    %444 = vector.broadcast %443 : f32 to vector<10x10xf32>
    %445 = arith.mulf %444, %235 : vector<10x10xf32>
    %446 = arith.addf %442, %445 : vector<10x10xf32>
    %c92 = arith.constant 92 : index
    %447 = memref.load %arg4[%c92] : memref<144xf32, #tpu.memory_space<smem>>
    %448 = vector.broadcast %447 : f32 to vector<10x10xf32>
    %449 = arith.mulf %448, %236 : vector<10x10xf32>
    %450 = arith.addf %446, %449 : vector<10x10xf32>
    %c93 = arith.constant 93 : index
    %451 = memref.load %arg4[%c93] : memref<144xf32, #tpu.memory_space<smem>>
    %452 = vector.broadcast %451 : f32 to vector<10x10xf32>
    %453 = arith.mulf %452, %237 : vector<10x10xf32>
    %454 = arith.addf %450, %453 : vector<10x10xf32>
    %c94 = arith.constant 94 : index
    %455 = memref.load %arg4[%c94] : memref<144xf32, #tpu.memory_space<smem>>
    %456 = vector.broadcast %455 : f32 to vector<10x10xf32>
    %457 = arith.mulf %456, %238 : vector<10x10xf32>
    %458 = arith.addf %454, %457 : vector<10x10xf32>
    %c99 = arith.constant 99 : index
    %459 = memref.load %arg4[%c99] : memref<144xf32, #tpu.memory_space<smem>>
    %460 = vector.broadcast %459 : f32 to vector<10x10xf32>
    %461 = arith.mulf %460, %239 : vector<10x10xf32>
    %462 = arith.addf %458, %461 : vector<10x10xf32>
    %c100 = arith.constant 100 : index
    %463 = memref.load %arg4[%c100] : memref<144xf32, #tpu.memory_space<smem>>
    %464 = vector.broadcast %463 : f32 to vector<10x10xf32>
    %465 = arith.mulf %464, %240 : vector<10x10xf32>
    %466 = arith.addf %462, %465 : vector<10x10xf32>
    %c101 = arith.constant 101 : index
    %467 = memref.load %arg4[%c101] : memref<144xf32, #tpu.memory_space<smem>>
    %468 = vector.broadcast %467 : f32 to vector<10x10xf32>
    %469 = arith.mulf %468, %241 : vector<10x10xf32>
    %470 = arith.addf %466, %469 : vector<10x10xf32>
    %c102 = arith.constant 102 : index
    %471 = memref.load %arg4[%c102] : memref<144xf32, #tpu.memory_space<smem>>
    %472 = vector.broadcast %471 : f32 to vector<10x10xf32>
    %473 = arith.mulf %472, %242 : vector<10x10xf32>
    %474 = arith.addf %470, %473 : vector<10x10xf32>
    %c2_85 = arith.constant 2 : index
    %475 = memref.load %arg5[%c2_85] : memref<4xf32, #tpu.memory_space<smem>>
    %476 = vector.broadcast %475 : f32 to vector<10x10xf32>
    %477 = arith.addf %474, %476 : vector<10x10xf32>
    %cst_86 = arith.constant 0.000000e+00 : f32
    %478 = vector.broadcast %cst_86 : f32 to vector<10x10xf32>
    %479 = arith.maximumf %477, %478 : vector<10x10xf32>
    %c108 = arith.constant 108 : index
    %480 = memref.load %arg4[%c108] : memref<144xf32, #tpu.memory_space<smem>>
    %481 = vector.broadcast %480 : f32 to vector<10x10xf32>
    %482 = arith.mulf %481, %224 : vector<10x10xf32>
    %c109 = arith.constant 109 : index
    %483 = memref.load %arg4[%c109] : memref<144xf32, #tpu.memory_space<smem>>
    %484 = vector.broadcast %483 : f32 to vector<10x10xf32>
    %485 = arith.mulf %484, %225 : vector<10x10xf32>
    %486 = arith.addf %482, %485 : vector<10x10xf32>
    %c110 = arith.constant 110 : index
    %487 = memref.load %arg4[%c110] : memref<144xf32, #tpu.memory_space<smem>>
    %488 = vector.broadcast %487 : f32 to vector<10x10xf32>
    %489 = arith.mulf %488, %226 : vector<10x10xf32>
    %490 = arith.addf %486, %489 : vector<10x10xf32>
    %c111 = arith.constant 111 : index
    %491 = memref.load %arg4[%c111] : memref<144xf32, #tpu.memory_space<smem>>
    %492 = vector.broadcast %491 : f32 to vector<10x10xf32>
    %493 = arith.mulf %492, %227 : vector<10x10xf32>
    %494 = arith.addf %490, %493 : vector<10x10xf32>
    %c112 = arith.constant 112 : index
    %495 = memref.load %arg4[%c112] : memref<144xf32, #tpu.memory_space<smem>>
    %496 = vector.broadcast %495 : f32 to vector<10x10xf32>
    %497 = arith.mulf %496, %228 : vector<10x10xf32>
    %498 = arith.addf %494, %497 : vector<10x10xf32>
    %c117 = arith.constant 117 : index
    %499 = memref.load %arg4[%c117] : memref<144xf32, #tpu.memory_space<smem>>
    %500 = vector.broadcast %499 : f32 to vector<10x10xf32>
    %501 = arith.mulf %500, %229 : vector<10x10xf32>
    %502 = arith.addf %498, %501 : vector<10x10xf32>
    %c118 = arith.constant 118 : index
    %503 = memref.load %arg4[%c118] : memref<144xf32, #tpu.memory_space<smem>>
    %504 = vector.broadcast %503 : f32 to vector<10x10xf32>
    %505 = arith.mulf %504, %230 : vector<10x10xf32>
    %506 = arith.addf %502, %505 : vector<10x10xf32>
    %c119 = arith.constant 119 : index
    %507 = memref.load %arg4[%c119] : memref<144xf32, #tpu.memory_space<smem>>
    %508 = vector.broadcast %507 : f32 to vector<10x10xf32>
    %509 = arith.mulf %508, %231 : vector<10x10xf32>
    %510 = arith.addf %506, %509 : vector<10x10xf32>
    %c120 = arith.constant 120 : index
    %511 = memref.load %arg4[%c120] : memref<144xf32, #tpu.memory_space<smem>>
    %512 = vector.broadcast %511 : f32 to vector<10x10xf32>
    %513 = arith.mulf %512, %232 : vector<10x10xf32>
    %514 = arith.addf %510, %513 : vector<10x10xf32>
    %c121 = arith.constant 121 : index
    %515 = memref.load %arg4[%c121] : memref<144xf32, #tpu.memory_space<smem>>
    %516 = vector.broadcast %515 : f32 to vector<10x10xf32>
    %517 = arith.mulf %516, %233 : vector<10x10xf32>
    %518 = arith.addf %514, %517 : vector<10x10xf32>
    %c126 = arith.constant 126 : index
    %519 = memref.load %arg4[%c126] : memref<144xf32, #tpu.memory_space<smem>>
    %520 = vector.broadcast %519 : f32 to vector<10x10xf32>
    %521 = arith.mulf %520, %234 : vector<10x10xf32>
    %522 = arith.addf %518, %521 : vector<10x10xf32>
    %c127 = arith.constant 127 : index
    %523 = memref.load %arg4[%c127] : memref<144xf32, #tpu.memory_space<smem>>
    %524 = vector.broadcast %523 : f32 to vector<10x10xf32>
    %525 = arith.mulf %524, %235 : vector<10x10xf32>
    %526 = arith.addf %522, %525 : vector<10x10xf32>
    %c128 = arith.constant 128 : index
    %527 = memref.load %arg4[%c128] : memref<144xf32, #tpu.memory_space<smem>>
    %528 = vector.broadcast %527 : f32 to vector<10x10xf32>
    %529 = arith.mulf %528, %236 : vector<10x10xf32>
    %530 = arith.addf %526, %529 : vector<10x10xf32>
    %c129 = arith.constant 129 : index
    %531 = memref.load %arg4[%c129] : memref<144xf32, #tpu.memory_space<smem>>
    %532 = vector.broadcast %531 : f32 to vector<10x10xf32>
    %533 = arith.mulf %532, %237 : vector<10x10xf32>
    %534 = arith.addf %530, %533 : vector<10x10xf32>
    %c130 = arith.constant 130 : index
    %535 = memref.load %arg4[%c130] : memref<144xf32, #tpu.memory_space<smem>>
    %536 = vector.broadcast %535 : f32 to vector<10x10xf32>
    %537 = arith.mulf %536, %238 : vector<10x10xf32>
    %538 = arith.addf %534, %537 : vector<10x10xf32>
    %c135 = arith.constant 135 : index
    %539 = memref.load %arg4[%c135] : memref<144xf32, #tpu.memory_space<smem>>
    %540 = vector.broadcast %539 : f32 to vector<10x10xf32>
    %541 = arith.mulf %540, %239 : vector<10x10xf32>
    %542 = arith.addf %538, %541 : vector<10x10xf32>
    %c136 = arith.constant 136 : index
    %543 = memref.load %arg4[%c136] : memref<144xf32, #tpu.memory_space<smem>>
    %544 = vector.broadcast %543 : f32 to vector<10x10xf32>
    %545 = arith.mulf %544, %240 : vector<10x10xf32>
    %546 = arith.addf %542, %545 : vector<10x10xf32>
    %c137 = arith.constant 137 : index
    %547 = memref.load %arg4[%c137] : memref<144xf32, #tpu.memory_space<smem>>
    %548 = vector.broadcast %547 : f32 to vector<10x10xf32>
    %549 = arith.mulf %548, %241 : vector<10x10xf32>
    %550 = arith.addf %546, %549 : vector<10x10xf32>
    %c138 = arith.constant 138 : index
    %551 = memref.load %arg4[%c138] : memref<144xf32, #tpu.memory_space<smem>>
    %552 = vector.broadcast %551 : f32 to vector<10x10xf32>
    %553 = arith.mulf %552, %242 : vector<10x10xf32>
    %554 = arith.addf %550, %553 : vector<10x10xf32>
    %c139 = arith.constant 139 : index
    %555 = memref.load %arg4[%c139] : memref<144xf32, #tpu.memory_space<smem>>
    %556 = vector.broadcast %555 : f32 to vector<10x10xf32>
    %557 = arith.mulf %556, %243 : vector<10x10xf32>
    %558 = arith.addf %554, %557 : vector<10x10xf32>
    %c3_87 = arith.constant 3 : index
    %559 = memref.load %arg5[%c3_87] : memref<4xf32, #tpu.memory_space<smem>>
    %560 = vector.broadcast %559 : f32 to vector<10x10xf32>
    %561 = arith.addf %558, %560 : vector<10x10xf32>
    %cst_88 = arith.constant 0.000000e+00 : f32
    %562 = vector.broadcast %cst_88 : f32 to vector<10x10xf32>
    %563 = arith.maximumf %561, %562 : vector<10x10xf32>
    %c0_89 = arith.constant 0 : index
    %564 = memref.load %arg6[%c0_89] : memref<32xf32, #tpu.memory_space<smem>>
    %565 = vector.broadcast %564 : f32 to vector<10x10xf32>
    %566 = arith.mulf %565, %319 : vector<10x10xf32>
    %c1_90 = arith.constant 1 : index
    %567 = memref.load %arg6[%c1_90] : memref<32xf32, #tpu.memory_space<smem>>
    %568 = vector.broadcast %567 : f32 to vector<10x10xf32>
    %569 = arith.mulf %568, %403 : vector<10x10xf32>
    %570 = arith.addf %566, %569 : vector<10x10xf32>
    %c2_91 = arith.constant 2 : index
    %571 = memref.load %arg6[%c2_91] : memref<32xf32, #tpu.memory_space<smem>>
    %572 = vector.broadcast %571 : f32 to vector<10x10xf32>
    %573 = arith.mulf %572, %479 : vector<10x10xf32>
    %574 = arith.addf %570, %573 : vector<10x10xf32>
    %c3_92 = arith.constant 3 : index
    %575 = memref.load %arg6[%c3_92] : memref<32xf32, #tpu.memory_space<smem>>
    %576 = vector.broadcast %575 : f32 to vector<10x10xf32>
    %577 = arith.mulf %576, %563 : vector<10x10xf32>
    %578 = arith.addf %574, %577 : vector<10x10xf32>
    %579 = vector.extract_strided_slice %1 {offsets = [1, 1], sizes = [10, 10], strides = [1, 1]} : vector<12x12xf32> to vector<10x10xf32>
    %c0_93 = arith.constant 0 : index
    %580 = memref.load %arg7[%c0_93] : memref<8xf32, #tpu.memory_space<smem>>
    %581 = vector.broadcast %580 : f32 to vector<10x10xf32>
    %582 = arith.addf %578, %581 : vector<10x10xf32>
    %583 = arith.addf %582, %579 : vector<10x10xf32>
    %c0_94 = arith.constant 0 : index
    %c0_95 = arith.constant 0 : index
    %c0_96 = arith.constant 0 : index
    %c0_97 = arith.constant 0 : index
    %584 = vector.load %arg10[%c0_94, %c0_95, %c0_96, %c0_97] : memref<8x1x10x10xf32, #tpu.memory_space<vmem>>, vector<1x1x10x10xf32>
    %585 = vector.shape_cast %584 : vector<1x1x10x10xf32> to vector<10x10xf32>
    %586 = vector.shape_cast %583 : vector<10x10xf32> to vector<1x1x10x10xf32>
    tpu.vector_store %arg10[%c0_94, %c0_95, %c0_96, %c0_97], %586 {strides = array<i32>} : memref<8x1x10x10xf32, #tpu.memory_space<vmem>>, vector<1x1x10x10xf32>,
    %c4_98 = arith.constant 4 : index
    %587 = memref.load %arg6[%c4_98] : memref<32xf32, #tpu.memory_space<smem>>
    %588 = vector.broadcast %587 : f32 to vector<10x10xf32>
    %589 = arith.mulf %588, %319 : vector<10x10xf32>
    %c5_99 = arith.constant 5 : index
    %590 = memref.load %arg6[%c5_99] : memref<32xf32, #tpu.memory_space<smem>>
    %591 = vector.broadcast %590 : f32 to vector<10x10xf32>
    %592 = arith.mulf %591, %403 : vector<10x10xf32>
    %593 = arith.addf %589, %592 : vector<10x10xf32>
    %c6_100 = arith.constant 6 : index
    %594 = memref.load %arg6[%c6_100] : memref<32xf32, #tpu.memory_space<smem>>
    %595 = vector.broadcast %594 : f32 to vector<10x10xf32>
    %596 = arith.mulf %595, %479 : vector<10x10xf32>
    %597 = arith.addf %593, %596 : vector<10x10xf32>
    %c7_101 = arith.constant 7 : index
    %598 = memref.load %arg6[%c7_101] : memref<32xf32, #tpu.memory_space<smem>>
    %599 = vector.broadcast %598 : f32 to vector<10x10xf32>
    %600 = arith.mulf %599, %563 : vector<10x10xf32>
    %601 = arith.addf %597, %600 : vector<10x10xf32>
    %602 = vector.extract_strided_slice %3 {offsets = [1, 1], sizes = [10, 10], strides = [1, 1]} : vector<12x12xf32> to vector<10x10xf32>
    %c1_102 = arith.constant 1 : index
    %603 = memref.load %arg7[%c1_102] : memref<8xf32, #tpu.memory_space<smem>>
    %604 = vector.broadcast %603 : f32 to vector<10x10xf32>
    %605 = arith.addf %601, %604 : vector<10x10xf32>
    %606 = arith.addf %605, %602 : vector<10x10xf32>
    %c1_103 = arith.constant 1 : index
    %c0_104 = arith.constant 0 : index
    %c0_105 = arith.constant 0 : index
    %c0_106 = arith.constant 0 : index
    %607 = vector.load %arg10[%c1_103, %c0_104, %c0_105, %c0_106] : memref<8x1x10x10xf32, #tpu.memory_space<vmem>>, vector<1x1x10x10xf32>
    %608 = vector.shape_cast %607 : vector<1x1x10x10xf32> to vector<10x10xf32>
    %609 = vector.shape_cast %606 : vector<10x10xf32> to vector<1x1x10x10xf32>
    tpu.vector_store %arg10[%c1_103, %c0_104, %c0_105, %c0_106], %609 {strides = array<i32>} : memref<8x1x10x10xf32, #tpu.memory_space<vmem>>, vector<1x1x10x10xf32>,
    %c8_107 = arith.constant 8 : index
    %610 = memref.load %arg6[%c8_107] : memref<32xf32, #tpu.memory_space<smem>>
    %611 = vector.broadcast %610 : f32 to vector<10x10xf32>
    %612 = arith.mulf %611, %319 : vector<10x10xf32>
    %c9_108 = arith.constant 9 : index
    %613 = memref.load %arg6[%c9_108] : memref<32xf32, #tpu.memory_space<smem>>
    %614 = vector.broadcast %613 : f32 to vector<10x10xf32>
    %615 = arith.mulf %614, %403 : vector<10x10xf32>
    %616 = arith.addf %612, %615 : vector<10x10xf32>
    %c10_109 = arith.constant 10 : index
    %617 = memref.load %arg6[%c10_109] : memref<32xf32, #tpu.memory_space<smem>>
    %618 = vector.broadcast %617 : f32 to vector<10x10xf32>
    %619 = arith.mulf %618, %479 : vector<10x10xf32>
    %620 = arith.addf %616, %619 : vector<10x10xf32>
    %c11_110 = arith.constant 11 : index
    %621 = memref.load %arg6[%c11_110] : memref<32xf32, #tpu.memory_space<smem>>
    %622 = vector.broadcast %621 : f32 to vector<10x10xf32>
    %623 = arith.mulf %622, %563 : vector<10x10xf32>
    %624 = arith.addf %620, %623 : vector<10x10xf32>
    %625 = vector.extract_strided_slice %5 {offsets = [1, 1], sizes = [10, 10], strides = [1, 1]} : vector<12x12xf32> to vector<10x10xf32>
    %c2_111 = arith.constant 2 : index
    %626 = memref.load %arg7[%c2_111] : memref<8xf32, #tpu.memory_space<smem>>
    %627 = vector.broadcast %626 : f32 to vector<10x10xf32>
    %628 = arith.addf %624, %627 : vector<10x10xf32>
    %629 = arith.addf %628, %625 : vector<10x10xf32>
    %c2_112 = arith.constant 2 : index
    %c0_113 = arith.constant 0 : index
    %c0_114 = arith.constant 0 : index
    %c0_115 = arith.constant 0 : index
    %630 = vector.load %arg10[%c2_112, %c0_113, %c0_114, %c0_115] : memref<8x1x10x10xf32, #tpu.memory_space<vmem>>, vector<1x1x10x10xf32>
    %631 = vector.shape_cast %630 : vector<1x1x10x10xf32> to vector<10x10xf32>
    %632 = vector.shape_cast %629 : vector<10x10xf32> to vector<1x1x10x10xf32>
    tpu.vector_store %arg10[%c2_112, %c0_113, %c0_114, %c0_115], %632 {strides = array<i32>} : memref<8x1x10x10xf32, #tpu.memory_space<vmem>>, vector<1x1x10x10xf32>,
    %c12_116 = arith.constant 12 : index
    %633 = memref.load %arg6[%c12_116] : memref<32xf32, #tpu.memory_space<smem>>
    %634 = vector.broadcast %633 : f32 to vector<10x10xf32>
    %635 = arith.mulf %634, %319 : vector<10x10xf32>
    %c13_117 = arith.constant 13 : index
    %636 = memref.load %arg6[%c13_117] : memref<32xf32, #tpu.memory_space<smem>>
    %637 = vector.broadcast %636 : f32 to vector<10x10xf32>
    %638 = arith.mulf %637, %403 : vector<10x10xf32>
    %639 = arith.addf %635, %638 : vector<10x10xf32>
    %c14_118 = arith.constant 14 : index
    %640 = memref.load %arg6[%c14_118] : memref<32xf32, #tpu.memory_space<smem>>
    %641 = vector.broadcast %640 : f32 to vector<10x10xf32>
    %642 = arith.mulf %641, %479 : vector<10x10xf32>
    %643 = arith.addf %639, %642 : vector<10x10xf32>
    %c15_119 = arith.constant 15 : index
    %644 = memref.load %arg6[%c15_119] : memref<32xf32, #tpu.memory_space<smem>>
    %645 = vector.broadcast %644 : f32 to vector<10x10xf32>
    %646 = arith.mulf %645, %563 : vector<10x10xf32>
    %647 = arith.addf %643, %646 : vector<10x10xf32>
    %648 = vector.extract_strided_slice %7 {offsets = [1, 1], sizes = [10, 10], strides = [1, 1]} : vector<12x12xf32> to vector<10x10xf32>
    %c3_120 = arith.constant 3 : index
    %649 = memref.load %arg7[%c3_120] : memref<8xf32, #tpu.memory_space<smem>>
    %650 = vector.broadcast %649 : f32 to vector<10x10xf32>
    %651 = arith.addf %647, %650 : vector<10x10xf32>
    %652 = arith.addf %651, %648 : vector<10x10xf32>
    %c3_121 = arith.constant 3 : index
    %c0_122 = arith.constant 0 : index
    %c0_123 = arith.constant 0 : index
    %c0_124 = arith.constant 0 : index
    %653 = vector.load %arg10[%c3_121, %c0_122, %c0_123, %c0_124] : memref<8x1x10x10xf32, #tpu.memory_space<vmem>>, vector<1x1x10x10xf32>
    %654 = vector.shape_cast %653 : vector<1x1x10x10xf32> to vector<10x10xf32>
    %655 = vector.shape_cast %652 : vector<10x10xf32> to vector<1x1x10x10xf32>
    tpu.vector_store %arg10[%c3_121, %c0_122, %c0_123, %c0_124], %655 {strides = array<i32>} : memref<8x1x10x10xf32, #tpu.memory_space<vmem>>, vector<1x1x10x10xf32>,
    %c16_125 = arith.constant 16 : index
    %656 = memref.load %arg6[%c16_125] : memref<32xf32, #tpu.memory_space<smem>>
    %657 = vector.broadcast %656 : f32 to vector<10x10xf32>
    %658 = arith.mulf %657, %319 : vector<10x10xf32>
    %c17_126 = arith.constant 17 : index
    %659 = memref.load %arg6[%c17_126] : memref<32xf32, #tpu.memory_space<smem>>
    %660 = vector.broadcast %659 : f32 to vector<10x10xf32>
    %661 = arith.mulf %660, %403 : vector<10x10xf32>
    %662 = arith.addf %658, %661 : vector<10x10xf32>
    %c18_127 = arith.constant 18 : index
    %663 = memref.load %arg6[%c18_127] : memref<32xf32, #tpu.memory_space<smem>>
    %664 = vector.broadcast %663 : f32 to vector<10x10xf32>
    %665 = arith.mulf %664, %479 : vector<10x10xf32>
    %666 = arith.addf %662, %665 : vector<10x10xf32>
    %c19_128 = arith.constant 19 : index
    %667 = memref.load %arg6[%c19_128] : memref<32xf32, #tpu.memory_space<smem>>
    %668 = vector.broadcast %667 : f32 to vector<10x10xf32>
    %669 = arith.mulf %668, %563 : vector<10x10xf32>
    %670 = arith.addf %666, %669 : vector<10x10xf32>
    %671 = vector.extract_strided_slice %9 {offsets = [1, 1], sizes = [10, 10], strides = [1, 1]} : vector<12x12xf32> to vector<10x10xf32>
    %c4_129 = arith.constant 4 : index
    %672 = memref.load %arg7[%c4_129] : memref<8xf32, #tpu.memory_space<smem>>
    %673 = vector.broadcast %672 : f32 to vector<10x10xf32>
    %674 = arith.addf %670, %673 : vector<10x10xf32>
    %675 = arith.addf %674, %671 : vector<10x10xf32>
    %c4_130 = arith.constant 4 : index
    %c0_131 = arith.constant 0 : index
    %c0_132 = arith.constant 0 : index
    %c0_133 = arith.constant 0 : index
    %676 = vector.load %arg10[%c4_130, %c0_131, %c0_132, %c0_133] : memref<8x1x10x10xf32, #tpu.memory_space<vmem>>, vector<1x1x10x10xf32>
    %677 = vector.shape_cast %676 : vector<1x1x10x10xf32> to vector<10x10xf32>
    %678 = vector.shape_cast %675 : vector<10x10xf32> to vector<1x1x10x10xf32>
    tpu.vector_store %arg10[%c4_130, %c0_131, %c0_132, %c0_133], %678 {strides = array<i32>} : memref<8x1x10x10xf32, #tpu.memory_space<vmem>>, vector<1x1x10x10xf32>,
    %c20_134 = arith.constant 20 : index
    %679 = memref.load %arg6[%c20_134] : memref<32xf32, #tpu.memory_space<smem>>
    %680 = vector.broadcast %679 : f32 to vector<10x10xf32>
    %681 = arith.mulf %680, %319 : vector<10x10xf32>
    %c21_135 = arith.constant 21 : index
    %682 = memref.load %arg6[%c21_135] : memref<32xf32, #tpu.memory_space<smem>>
    %683 = vector.broadcast %682 : f32 to vector<10x10xf32>
    %684 = arith.mulf %683, %403 : vector<10x10xf32>
    %685 = arith.addf %681, %684 : vector<10x10xf32>
    %c22_136 = arith.constant 22 : index
    %686 = memref.load %arg6[%c22_136] : memref<32xf32, #tpu.memory_space<smem>>
    %687 = vector.broadcast %686 : f32 to vector<10x10xf32>
    %688 = arith.mulf %687, %479 : vector<10x10xf32>
    %689 = arith.addf %685, %688 : vector<10x10xf32>
    %c23_137 = arith.constant 23 : index
    %690 = memref.load %arg6[%c23_137] : memref<32xf32, #tpu.memory_space<smem>>
    %691 = vector.broadcast %690 : f32 to vector<10x10xf32>
    %692 = arith.mulf %691, %563 : vector<10x10xf32>
    %693 = arith.addf %689, %692 : vector<10x10xf32>
    %694 = vector.extract_strided_slice %11 {offsets = [1, 1], sizes = [10, 10], strides = [1, 1]} : vector<12x12xf32> to vector<10x10xf32>
    %c5_138 = arith.constant 5 : index
    %695 = memref.load %arg7[%c5_138] : memref<8xf32, #tpu.memory_space<smem>>
    %696 = vector.broadcast %695 : f32 to vector<10x10xf32>
    %697 = arith.addf %693, %696 : vector<10x10xf32>
    %698 = arith.addf %697, %694 : vector<10x10xf32>
    %c5_139 = arith.constant 5 : index
    %c0_140 = arith.constant 0 : index
    %c0_141 = arith.constant 0 : index
    %c0_142 = arith.constant 0 : index
    %699 = vector.load %arg10[%c5_139, %c0_140, %c0_141, %c0_142] : memref<8x1x10x10xf32, #tpu.memory_space<vmem>>, vector<1x1x10x10xf32>
    %700 = vector.shape_cast %699 : vector<1x1x10x10xf32> to vector<10x10xf32>
    %701 = vector.shape_cast %698 : vector<10x10xf32> to vector<1x1x10x10xf32>
    tpu.vector_store %arg10[%c5_139, %c0_140, %c0_141, %c0_142], %701 {strides = array<i32>} : memref<8x1x10x10xf32, #tpu.memory_space<vmem>>, vector<1x1x10x10xf32>,
    %c24_143 = arith.constant 24 : index
    %702 = memref.load %arg6[%c24_143] : memref<32xf32, #tpu.memory_space<smem>>
    %703 = vector.broadcast %702 : f32 to vector<10x10xf32>
    %704 = arith.mulf %703, %319 : vector<10x10xf32>
    %c25_144 = arith.constant 25 : index
    %705 = memref.load %arg6[%c25_144] : memref<32xf32, #tpu.memory_space<smem>>
    %706 = vector.broadcast %705 : f32 to vector<10x10xf32>
    %707 = arith.mulf %706, %403 : vector<10x10xf32>
    %708 = arith.addf %704, %707 : vector<10x10xf32>
    %c26_145 = arith.constant 26 : index
    %709 = memref.load %arg6[%c26_145] : memref<32xf32, #tpu.memory_space<smem>>
    %710 = vector.broadcast %709 : f32 to vector<10x10xf32>
    %711 = arith.mulf %710, %479 : vector<10x10xf32>
    %712 = arith.addf %708, %711 : vector<10x10xf32>
    %c27_146 = arith.constant 27 : index
    %713 = memref.load %arg6[%c27_146] : memref<32xf32, #tpu.memory_space<smem>>
    %714 = vector.broadcast %713 : f32 to vector<10x10xf32>
    %715 = arith.mulf %714, %563 : vector<10x10xf32>
    %716 = arith.addf %712, %715 : vector<10x10xf32>
    %717 = vector.extract_strided_slice %13 {offsets = [1, 1], sizes = [10, 10], strides = [1, 1]} : vector<12x12xf32> to vector<10x10xf32>
    %c6_147 = arith.constant 6 : index
    %718 = memref.load %arg7[%c6_147] : memref<8xf32, #tpu.memory_space<smem>>
    %719 = vector.broadcast %718 : f32 to vector<10x10xf32>
    %720 = arith.addf %716, %719 : vector<10x10xf32>
    %721 = arith.addf %720, %717 : vector<10x10xf32>
    %c6_148 = arith.constant 6 : index
    %c0_149 = arith.constant 0 : index
    %c0_150 = arith.constant 0 : index
    %c0_151 = arith.constant 0 : index
    %722 = vector.load %arg10[%c6_148, %c0_149, %c0_150, %c0_151] : memref<8x1x10x10xf32, #tpu.memory_space<vmem>>, vector<1x1x10x10xf32>
    %723 = vector.shape_cast %722 : vector<1x1x10x10xf32> to vector<10x10xf32>
    %724 = vector.shape_cast %721 : vector<10x10xf32> to vector<1x1x10x10xf32>
    tpu.vector_store %arg10[%c6_148, %c0_149, %c0_150, %c0_151], %724 {strides = array<i32>} : memref<8x1x10x10xf32, #tpu.memory_space<vmem>>, vector<1x1x10x10xf32>,
    %c28_152 = arith.constant 28 : index
    %725 = memref.load %arg6[%c28_152] : memref<32xf32, #tpu.memory_space<smem>>
    %726 = vector.broadcast %725 : f32 to vector<10x10xf32>
    %727 = arith.mulf %726, %319 : vector<10x10xf32>
    %c29_153 = arith.constant 29 : index
    %728 = memref.load %arg6[%c29_153] : memref<32xf32, #tpu.memory_space<smem>>
    %729 = vector.broadcast %728 : f32 to vector<10x10xf32>
    %730 = arith.mulf %729, %403 : vector<10x10xf32>
    %731 = arith.addf %727, %730 : vector<10x10xf32>
    %c30_154 = arith.constant 30 : index
    %732 = memref.load %arg6[%c30_154] : memref<32xf32, #tpu.memory_space<smem>>
    %733 = vector.broadcast %732 : f32 to vector<10x10xf32>
    %734 = arith.mulf %733, %479 : vector<10x10xf32>
    %735 = arith.addf %731, %734 : vector<10x10xf32>
    %c31_155 = arith.constant 31 : index
    %736 = memref.load %arg6[%c31_155] : memref<32xf32, #tpu.memory_space<smem>>
    %737 = vector.broadcast %736 : f32 to vector<10x10xf32>
    %738 = arith.mulf %737, %563 : vector<10x10xf32>
    %739 = arith.addf %735, %738 : vector<10x10xf32>
    %740 = vector.extract_strided_slice %15 {offsets = [1, 1], sizes = [10, 10], strides = [1, 1]} : vector<12x12xf32> to vector<10x10xf32>
    %c7_156 = arith.constant 7 : index
    %741 = memref.load %arg7[%c7_156] : memref<8xf32, #tpu.memory_space<smem>>
    %742 = vector.broadcast %741 : f32 to vector<10x10xf32>
    %743 = arith.addf %739, %742 : vector<10x10xf32>
    %744 = arith.addf %743, %740 : vector<10x10xf32>
    %c7_157 = arith.constant 7 : index
    %c0_158 = arith.constant 0 : index
    %c0_159 = arith.constant 0 : index
    %c0_160 = arith.constant 0 : index
    %745 = vector.load %arg10[%c7_157, %c0_158, %c0_159, %c0_160] : memref<8x1x10x10xf32, #tpu.memory_space<vmem>>, vector<1x1x10x10xf32>
    %746 = vector.shape_cast %745 : vector<1x1x10x10xf32> to vector<10x10xf32>
    %747 = vector.shape_cast %744 : vector<10x10xf32> to vector<1x1x10x10xf32>
    tpu.vector_store %arg10[%c7_157, %c0_158, %c0_159, %c0_160], %747 {strides = array<i32>} : memref<8x1x10x10xf32, #tpu.memory_space<vmem>>, vector<1x1x10x10xf32>,
    return
  }
  func.func @transform_0(%arg0: i32) -> (i32, i32, i32, i32) {
    %c0_i32 = arith.constant 0 : i32
    %c0_i32_0 = arith.constant 0 : i32
    %c0_i32_1 = arith.constant 0 : i32
    %c0_i32_2 = arith.constant 0 : i32
    return %c0_i32, %arg0, %c0_i32_0, %c0_i32_1 : i32, i32, i32, i32
  }
  func.func @transform_1(%arg0: i32) -> i32 {
    %c0_i32 = arith.constant 0 : i32
    %c0_i32_0 = arith.constant 0 : i32
    return %c0_i32 : i32
  }
  func.func @transform_2(%arg0: i32) -> i32 {
    %c0_i32 = arith.constant 0 : i32
    %c0_i32_0 = arith.constant 0 : i32
    return %c0_i32 : i32
  }
  func.func @transform_3(%arg0: i32) -> i32 {
    %c0_i32 = arith.constant 0 : i32
    %c0_i32_0 = arith.constant 0 : i32
    return %c0_i32 : i32
  }
  func.func @transform_4(%arg0: i32) -> i32 {
    %c0_i32 = arith.constant 0 : i32
    %c0_i32_0 = arith.constant 0 : i32
    return %c0_i32 : i32
  }
  func.func @transform_5(%arg0: i32) -> i32 {
    %c0_i32 = arith.constant 0 : i32
    %c0_i32_0 = arith.constant 0 : i32
    return %c0_i32 : i32
  }
  func.func @transform_6(%arg0: i32) -> i32 {
    %c0_i32 = arith.constant 0 : i32
    %c0_i32_0 = arith.constant 0 : i32
    return %c0_i32 : i32
  }
  func.func @transform_7(%arg0: i32) -> i32 {
    %c0_i32 = arith.constant 0 : i32
    %c0_i32_0 = arith.constant 0 : i32
    return %c0_i32 : i32
  }
  func.func @transform_8(%arg0: i32) -> i32 {
    %c0_i32 = arith.constant 0 : i32
    %c0_i32_0 = arith.constant 0 : i32
    return %c0_i32 : i32
  }
  func.func @transform_9(%arg0: i32) -> (i32, i32, i32, i32) {
    %c0_i32 = arith.constant 0 : i32
    %c0_i32_0 = arith.constant 0 : i32
    %c0_i32_1 = arith.constant 0 : i32
    %c0_i32_2 = arith.constant 0 : i32
    return %c0_i32, %arg0, %c0_i32_0, %c0_i32_1 : i32, i32, i32, i32
  }
}

module attributes {stable_mosaic.version = 11 : i64} {
  func.func @kernel(%arg0: i32, %arg1: memref<8x1x14x14xf32, #tpu.memory_space<vmem>>, %arg2: memref<32xf32, #tpu.memory_space<smem>>, %arg3: memref<4xf32, #tpu.memory_space<smem>>, %arg4: memref<144xf32, #tpu.memory_space<smem>>, %arg5: memref<4xf32, #tpu.memory_space<smem>>, %arg6: memref<32xf32, #tpu.memory_space<smem>>, %arg7: memref<8xf32, #tpu.memory_space<smem>>, %arg8: memref<8xf32, #tpu.memory_space<smem>>, %arg9: memref<8xf32, #tpu.memory_space<smem>>, %arg10: memref<8x1x12x12xf32, #tpu.memory_space<vmem>>) attributes {dimension_semantics = [#tpu.dimension_semantics<parallel>], iteration_bounds = array<i64: 2>, scalar_prefetch = 0 : i64, scratch_operands = 0 : i64, tpu.core_type = #tpu.core_type<tc>, window_params = [{transform_indices = @transform_0, window_bounds = array<i64: 8, 1, 14, 14>}, {transform_indices = @transform_1, window_bounds = array<i64: 32>}, {transform_indices = @transform_2, window_bounds = array<i64: 4>}, {transform_indices = @transform_3, window_bounds = array<i64: 144>}, {transform_indices = @transform_4, window_bounds = array<i64: 4>}, {transform_indices = @transform_5, window_bounds = array<i64: 32>}, {transform_indices = @transform_6, window_bounds = array<i64: 8>}, {transform_indices = @transform_7, window_bounds = array<i64: 8>}, {transform_indices = @transform_8, window_bounds = array<i64: 8>}, {transform_indices = @transform_9, window_bounds = array<i64: 8, 1, 12, 12>}]} {
    %c0 = arith.constant 0 : index
    %c0_0 = arith.constant 0 : index
    %c0_1 = arith.constant 0 : index
    %c0_2 = arith.constant 0 : index
    %0 = vector.load %arg1[%c0, %c0_0, %c0_1, %c0_2] : memref<8x1x14x14xf32, #tpu.memory_space<vmem>>, vector<1x1x14x14xf32>
    %1 = vector.shape_cast %0 : vector<1x1x14x14xf32> to vector<14x14xf32>
    %c1 = arith.constant 1 : index
    %c0_3 = arith.constant 0 : index
    %c0_4 = arith.constant 0 : index
    %c0_5 = arith.constant 0 : index
    %2 = vector.load %arg1[%c1, %c0_3, %c0_4, %c0_5] : memref<8x1x14x14xf32, #tpu.memory_space<vmem>>, vector<1x1x14x14xf32>
    %3 = vector.shape_cast %2 : vector<1x1x14x14xf32> to vector<14x14xf32>
    %c2 = arith.constant 2 : index
    %c0_6 = arith.constant 0 : index
    %c0_7 = arith.constant 0 : index
    %c0_8 = arith.constant 0 : index
    %4 = vector.load %arg1[%c2, %c0_6, %c0_7, %c0_8] : memref<8x1x14x14xf32, #tpu.memory_space<vmem>>, vector<1x1x14x14xf32>
    %5 = vector.shape_cast %4 : vector<1x1x14x14xf32> to vector<14x14xf32>
    %c3 = arith.constant 3 : index
    %c0_9 = arith.constant 0 : index
    %c0_10 = arith.constant 0 : index
    %c0_11 = arith.constant 0 : index
    %6 = vector.load %arg1[%c3, %c0_9, %c0_10, %c0_11] : memref<8x1x14x14xf32, #tpu.memory_space<vmem>>, vector<1x1x14x14xf32>
    %7 = vector.shape_cast %6 : vector<1x1x14x14xf32> to vector<14x14xf32>
    %c4 = arith.constant 4 : index
    %c0_12 = arith.constant 0 : index
    %c0_13 = arith.constant 0 : index
    %c0_14 = arith.constant 0 : index
    %8 = vector.load %arg1[%c4, %c0_12, %c0_13, %c0_14] : memref<8x1x14x14xf32, #tpu.memory_space<vmem>>, vector<1x1x14x14xf32>
    %9 = vector.shape_cast %8 : vector<1x1x14x14xf32> to vector<14x14xf32>
    %c5 = arith.constant 5 : index
    %c0_15 = arith.constant 0 : index
    %c0_16 = arith.constant 0 : index
    %c0_17 = arith.constant 0 : index
    %10 = vector.load %arg1[%c5, %c0_15, %c0_16, %c0_17] : memref<8x1x14x14xf32, #tpu.memory_space<vmem>>, vector<1x1x14x14xf32>
    %11 = vector.shape_cast %10 : vector<1x1x14x14xf32> to vector<14x14xf32>
    %c6 = arith.constant 6 : index
    %c0_18 = arith.constant 0 : index
    %c0_19 = arith.constant 0 : index
    %c0_20 = arith.constant 0 : index
    %12 = vector.load %arg1[%c6, %c0_18, %c0_19, %c0_20] : memref<8x1x14x14xf32, #tpu.memory_space<vmem>>, vector<1x1x14x14xf32>
    %13 = vector.shape_cast %12 : vector<1x1x14x14xf32> to vector<14x14xf32>
    %c7 = arith.constant 7 : index
    %c0_21 = arith.constant 0 : index
    %c0_22 = arith.constant 0 : index
    %c0_23 = arith.constant 0 : index
    %14 = vector.load %arg1[%c7, %c0_21, %c0_22, %c0_23] : memref<8x1x14x14xf32, #tpu.memory_space<vmem>>, vector<1x1x14x14xf32>
    %15 = vector.shape_cast %14 : vector<1x1x14x14xf32> to vector<14x14xf32>
    %c0_24 = arith.constant 0 : index
    %16 = memref.load %arg8[%c0_24] : memref<8xf32, #tpu.memory_space<smem>>
    %17 = vector.broadcast %16 : f32 to vector<14x14xf32>
    %18 = arith.mulf %1, %17 : vector<14x14xf32>
    %c0_25 = arith.constant 0 : index
    %19 = memref.load %arg9[%c0_25] : memref<8xf32, #tpu.memory_space<smem>>
    %20 = vector.broadcast %19 : f32 to vector<14x14xf32>
    %21 = arith.addf %18, %20 : vector<14x14xf32>
    %cst = arith.constant 0.000000e+00 : f32
    %22 = vector.broadcast %cst : f32 to vector<14x14xf32>
    %23 = arith.maximumf %21, %22 : vector<14x14xf32>
    %c1_26 = arith.constant 1 : index
    %24 = memref.load %arg8[%c1_26] : memref<8xf32, #tpu.memory_space<smem>>
    %25 = vector.broadcast %24 : f32 to vector<14x14xf32>
    %26 = arith.mulf %3, %25 : vector<14x14xf32>
    %c1_27 = arith.constant 1 : index
    %27 = memref.load %arg9[%c1_27] : memref<8xf32, #tpu.memory_space<smem>>
    %28 = vector.broadcast %27 : f32 to vector<14x14xf32>
    %29 = arith.addf %26, %28 : vector<14x14xf32>
    %cst_28 = arith.constant 0.000000e+00 : f32
    %30 = vector.broadcast %cst_28 : f32 to vector<14x14xf32>
    %31 = arith.maximumf %29, %30 : vector<14x14xf32>
    %c2_29 = arith.constant 2 : index
    %32 = memref.load %arg8[%c2_29] : memref<8xf32, #tpu.memory_space<smem>>
    %33 = vector.broadcast %32 : f32 to vector<14x14xf32>
    %34 = arith.mulf %5, %33 : vector<14x14xf32>
    %c2_30 = arith.constant 2 : index
    %35 = memref.load %arg9[%c2_30] : memref<8xf32, #tpu.memory_space<smem>>
    %36 = vector.broadcast %35 : f32 to vector<14x14xf32>
    %37 = arith.addf %34, %36 : vector<14x14xf32>
    %cst_31 = arith.constant 0.000000e+00 : f32
    %38 = vector.broadcast %cst_31 : f32 to vector<14x14xf32>
    %39 = arith.maximumf %37, %38 : vector<14x14xf32>
    %c3_32 = arith.constant 3 : index
    %40 = memref.load %arg8[%c3_32] : memref<8xf32, #tpu.memory_space<smem>>
    %41 = vector.broadcast %40 : f32 to vector<14x14xf32>
    %42 = arith.mulf %7, %41 : vector<14x14xf32>
    %c3_33 = arith.constant 3 : index
    %43 = memref.load %arg9[%c3_33] : memref<8xf32, #tpu.memory_space<smem>>
    %44 = vector.broadcast %43 : f32 to vector<14x14xf32>
    %45 = arith.addf %42, %44 : vector<14x14xf32>
    %cst_34 = arith.constant 0.000000e+00 : f32
    %46 = vector.broadcast %cst_34 : f32 to vector<14x14xf32>
    %47 = arith.maximumf %45, %46 : vector<14x14xf32>
    %c4_35 = arith.constant 4 : index
    %48 = memref.load %arg8[%c4_35] : memref<8xf32, #tpu.memory_space<smem>>
    %49 = vector.broadcast %48 : f32 to vector<14x14xf32>
    %50 = arith.mulf %9, %49 : vector<14x14xf32>
    %c4_36 = arith.constant 4 : index
    %51 = memref.load %arg9[%c4_36] : memref<8xf32, #tpu.memory_space<smem>>
    %52 = vector.broadcast %51 : f32 to vector<14x14xf32>
    %53 = arith.addf %50, %52 : vector<14x14xf32>
    %cst_37 = arith.constant 0.000000e+00 : f32
    %54 = vector.broadcast %cst_37 : f32 to vector<14x14xf32>
    %55 = arith.maximumf %53, %54 : vector<14x14xf32>
    %c5_38 = arith.constant 5 : index
    %56 = memref.load %arg8[%c5_38] : memref<8xf32, #tpu.memory_space<smem>>
    %57 = vector.broadcast %56 : f32 to vector<14x14xf32>
    %58 = arith.mulf %11, %57 : vector<14x14xf32>
    %c5_39 = arith.constant 5 : index
    %59 = memref.load %arg9[%c5_39] : memref<8xf32, #tpu.memory_space<smem>>
    %60 = vector.broadcast %59 : f32 to vector<14x14xf32>
    %61 = arith.addf %58, %60 : vector<14x14xf32>
    %cst_40 = arith.constant 0.000000e+00 : f32
    %62 = vector.broadcast %cst_40 : f32 to vector<14x14xf32>
    %63 = arith.maximumf %61, %62 : vector<14x14xf32>
    %c6_41 = arith.constant 6 : index
    %64 = memref.load %arg8[%c6_41] : memref<8xf32, #tpu.memory_space<smem>>
    %65 = vector.broadcast %64 : f32 to vector<14x14xf32>
    %66 = arith.mulf %13, %65 : vector<14x14xf32>
    %c6_42 = arith.constant 6 : index
    %67 = memref.load %arg9[%c6_42] : memref<8xf32, #tpu.memory_space<smem>>
    %68 = vector.broadcast %67 : f32 to vector<14x14xf32>
    %69 = arith.addf %66, %68 : vector<14x14xf32>
    %cst_43 = arith.constant 0.000000e+00 : f32
    %70 = vector.broadcast %cst_43 : f32 to vector<14x14xf32>
    %71 = arith.maximumf %69, %70 : vector<14x14xf32>
    %c7_44 = arith.constant 7 : index
    %72 = memref.load %arg8[%c7_44] : memref<8xf32, #tpu.memory_space<smem>>
    %73 = vector.broadcast %72 : f32 to vector<14x14xf32>
    %74 = arith.mulf %15, %73 : vector<14x14xf32>
    %c7_45 = arith.constant 7 : index
    %75 = memref.load %arg9[%c7_45] : memref<8xf32, #tpu.memory_space<smem>>
    %76 = vector.broadcast %75 : f32 to vector<14x14xf32>
    %77 = arith.addf %74, %76 : vector<14x14xf32>
    %cst_46 = arith.constant 0.000000e+00 : f32
    %78 = vector.broadcast %cst_46 : f32 to vector<14x14xf32>
    %79 = arith.maximumf %77, %78 : vector<14x14xf32>
    %c0_47 = arith.constant 0 : index
    %80 = memref.load %arg2[%c0_47] : memref<32xf32, #tpu.memory_space<smem>>
    %81 = vector.broadcast %80 : f32 to vector<14x14xf32>
    %82 = arith.mulf %81, %23 : vector<14x14xf32>
    %c1_48 = arith.constant 1 : index
    %83 = memref.load %arg2[%c1_48] : memref<32xf32, #tpu.memory_space<smem>>
    %84 = vector.broadcast %83 : f32 to vector<14x14xf32>
    %85 = arith.mulf %84, %31 : vector<14x14xf32>
    %86 = arith.addf %82, %85 : vector<14x14xf32>
    %c2_49 = arith.constant 2 : index
    %87 = memref.load %arg2[%c2_49] : memref<32xf32, #tpu.memory_space<smem>>
    %88 = vector.broadcast %87 : f32 to vector<14x14xf32>
    %89 = arith.mulf %88, %39 : vector<14x14xf32>
    %90 = arith.addf %86, %89 : vector<14x14xf32>
    %c3_50 = arith.constant 3 : index
    %91 = memref.load %arg2[%c3_50] : memref<32xf32, #tpu.memory_space<smem>>
    %92 = vector.broadcast %91 : f32 to vector<14x14xf32>
    %93 = arith.mulf %92, %47 : vector<14x14xf32>
    %94 = arith.addf %90, %93 : vector<14x14xf32>
    %c4_51 = arith.constant 4 : index
    %95 = memref.load %arg2[%c4_51] : memref<32xf32, #tpu.memory_space<smem>>
    %96 = vector.broadcast %95 : f32 to vector<14x14xf32>
    %97 = arith.mulf %96, %55 : vector<14x14xf32>
    %98 = arith.addf %94, %97 : vector<14x14xf32>
    %c5_52 = arith.constant 5 : index
    %99 = memref.load %arg2[%c5_52] : memref<32xf32, #tpu.memory_space<smem>>
    %100 = vector.broadcast %99 : f32 to vector<14x14xf32>
    %101 = arith.mulf %100, %63 : vector<14x14xf32>
    %102 = arith.addf %98, %101 : vector<14x14xf32>
    %c6_53 = arith.constant 6 : index
    %103 = memref.load %arg2[%c6_53] : memref<32xf32, #tpu.memory_space<smem>>
    %104 = vector.broadcast %103 : f32 to vector<14x14xf32>
    %105 = arith.mulf %104, %71 : vector<14x14xf32>
    %106 = arith.addf %102, %105 : vector<14x14xf32>
    %c7_54 = arith.constant 7 : index
    %107 = memref.load %arg2[%c7_54] : memref<32xf32, #tpu.memory_space<smem>>
    %108 = vector.broadcast %107 : f32 to vector<14x14xf32>
    %109 = arith.mulf %108, %79 : vector<14x14xf32>
    %110 = arith.addf %106, %109 : vector<14x14xf32>
    %c0_55 = arith.constant 0 : index
    %111 = memref.load %arg3[%c0_55] : memref<4xf32, #tpu.memory_space<smem>>
    %112 = vector.broadcast %111 : f32 to vector<14x14xf32>
    %113 = arith.addf %110, %112 : vector<14x14xf32>
    %cst_56 = arith.constant 0.000000e+00 : f32
    %114 = vector.broadcast %cst_56 : f32 to vector<14x14xf32>
    %115 = arith.maximumf %113, %114 : vector<14x14xf32>
    %c8 = arith.constant 8 : index
    %116 = memref.load %arg2[%c8] : memref<32xf32, #tpu.memory_space<smem>>
    %117 = vector.broadcast %116 : f32 to vector<14x14xf32>
    %118 = arith.mulf %117, %23 : vector<14x14xf32>
    %c9 = arith.constant 9 : index
    %119 = memref.load %arg2[%c9] : memref<32xf32, #tpu.memory_space<smem>>
    %120 = vector.broadcast %119 : f32 to vector<14x14xf32>
    %121 = arith.mulf %120, %31 : vector<14x14xf32>
    %122 = arith.addf %118, %121 : vector<14x14xf32>
    %c10 = arith.constant 10 : index
    %123 = memref.load %arg2[%c10] : memref<32xf32, #tpu.memory_space<smem>>
    %124 = vector.broadcast %123 : f32 to vector<14x14xf32>
    %125 = arith.mulf %124, %39 : vector<14x14xf32>
    %126 = arith.addf %122, %125 : vector<14x14xf32>
    %c11 = arith.constant 11 : index
    %127 = memref.load %arg2[%c11] : memref<32xf32, #tpu.memory_space<smem>>
    %128 = vector.broadcast %127 : f32 to vector<14x14xf32>
    %129 = arith.mulf %128, %47 : vector<14x14xf32>
    %130 = arith.addf %126, %129 : vector<14x14xf32>
    %c12 = arith.constant 12 : index
    %131 = memref.load %arg2[%c12] : memref<32xf32, #tpu.memory_space<smem>>
    %132 = vector.broadcast %131 : f32 to vector<14x14xf32>
    %133 = arith.mulf %132, %55 : vector<14x14xf32>
    %134 = arith.addf %130, %133 : vector<14x14xf32>
    %c13 = arith.constant 13 : index
    %135 = memref.load %arg2[%c13] : memref<32xf32, #tpu.memory_space<smem>>
    %136 = vector.broadcast %135 : f32 to vector<14x14xf32>
    %137 = arith.mulf %136, %63 : vector<14x14xf32>
    %138 = arith.addf %134, %137 : vector<14x14xf32>
    %c14 = arith.constant 14 : index
    %139 = memref.load %arg2[%c14] : memref<32xf32, #tpu.memory_space<smem>>
    %140 = vector.broadcast %139 : f32 to vector<14x14xf32>
    %141 = arith.mulf %140, %71 : vector<14x14xf32>
    %142 = arith.addf %138, %141 : vector<14x14xf32>
    %c15 = arith.constant 15 : index
    %143 = memref.load %arg2[%c15] : memref<32xf32, #tpu.memory_space<smem>>
    %144 = vector.broadcast %143 : f32 to vector<14x14xf32>
    %145 = arith.mulf %144, %79 : vector<14x14xf32>
    %146 = arith.addf %142, %145 : vector<14x14xf32>
    %c1_57 = arith.constant 1 : index
    %147 = memref.load %arg3[%c1_57] : memref<4xf32, #tpu.memory_space<smem>>
    %148 = vector.broadcast %147 : f32 to vector<14x14xf32>
    %149 = arith.addf %146, %148 : vector<14x14xf32>
    %cst_58 = arith.constant 0.000000e+00 : f32
    %150 = vector.broadcast %cst_58 : f32 to vector<14x14xf32>
    %151 = arith.maximumf %149, %150 : vector<14x14xf32>
    %c16 = arith.constant 16 : index
    %152 = memref.load %arg2[%c16] : memref<32xf32, #tpu.memory_space<smem>>
    %153 = vector.broadcast %152 : f32 to vector<14x14xf32>
    %154 = arith.mulf %153, %23 : vector<14x14xf32>
    %c17 = arith.constant 17 : index
    %155 = memref.load %arg2[%c17] : memref<32xf32, #tpu.memory_space<smem>>
    %156 = vector.broadcast %155 : f32 to vector<14x14xf32>
    %157 = arith.mulf %156, %31 : vector<14x14xf32>
    %158 = arith.addf %154, %157 : vector<14x14xf32>
    %c18 = arith.constant 18 : index
    %159 = memref.load %arg2[%c18] : memref<32xf32, #tpu.memory_space<smem>>
    %160 = vector.broadcast %159 : f32 to vector<14x14xf32>
    %161 = arith.mulf %160, %39 : vector<14x14xf32>
    %162 = arith.addf %158, %161 : vector<14x14xf32>
    %c19 = arith.constant 19 : index
    %163 = memref.load %arg2[%c19] : memref<32xf32, #tpu.memory_space<smem>>
    %164 = vector.broadcast %163 : f32 to vector<14x14xf32>
    %165 = arith.mulf %164, %47 : vector<14x14xf32>
    %166 = arith.addf %162, %165 : vector<14x14xf32>
    %c20 = arith.constant 20 : index
    %167 = memref.load %arg2[%c20] : memref<32xf32, #tpu.memory_space<smem>>
    %168 = vector.broadcast %167 : f32 to vector<14x14xf32>
    %169 = arith.mulf %168, %55 : vector<14x14xf32>
    %170 = arith.addf %166, %169 : vector<14x14xf32>
    %c21 = arith.constant 21 : index
    %171 = memref.load %arg2[%c21] : memref<32xf32, #tpu.memory_space<smem>>
    %172 = vector.broadcast %171 : f32 to vector<14x14xf32>
    %173 = arith.mulf %172, %63 : vector<14x14xf32>
    %174 = arith.addf %170, %173 : vector<14x14xf32>
    %c22 = arith.constant 22 : index
    %175 = memref.load %arg2[%c22] : memref<32xf32, #tpu.memory_space<smem>>
    %176 = vector.broadcast %175 : f32 to vector<14x14xf32>
    %177 = arith.mulf %176, %71 : vector<14x14xf32>
    %178 = arith.addf %174, %177 : vector<14x14xf32>
    %c23 = arith.constant 23 : index
    %179 = memref.load %arg2[%c23] : memref<32xf32, #tpu.memory_space<smem>>
    %180 = vector.broadcast %179 : f32 to vector<14x14xf32>
    %181 = arith.mulf %180, %79 : vector<14x14xf32>
    %182 = arith.addf %178, %181 : vector<14x14xf32>
    %c2_59 = arith.constant 2 : index
    %183 = memref.load %arg3[%c2_59] : memref<4xf32, #tpu.memory_space<smem>>
    %184 = vector.broadcast %183 : f32 to vector<14x14xf32>
    %185 = arith.addf %182, %184 : vector<14x14xf32>
    %cst_60 = arith.constant 0.000000e+00 : f32
    %186 = vector.broadcast %cst_60 : f32 to vector<14x14xf32>
    %187 = arith.maximumf %185, %186 : vector<14x14xf32>
    %c24 = arith.constant 24 : index
    %188 = memref.load %arg2[%c24] : memref<32xf32, #tpu.memory_space<smem>>
    %189 = vector.broadcast %188 : f32 to vector<14x14xf32>
    %190 = arith.mulf %189, %23 : vector<14x14xf32>
    %c25 = arith.constant 25 : index
    %191 = memref.load %arg2[%c25] : memref<32xf32, #tpu.memory_space<smem>>
    %192 = vector.broadcast %191 : f32 to vector<14x14xf32>
    %193 = arith.mulf %192, %31 : vector<14x14xf32>
    %194 = arith.addf %190, %193 : vector<14x14xf32>
    %c26 = arith.constant 26 : index
    %195 = memref.load %arg2[%c26] : memref<32xf32, #tpu.memory_space<smem>>
    %196 = vector.broadcast %195 : f32 to vector<14x14xf32>
    %197 = arith.mulf %196, %39 : vector<14x14xf32>
    %198 = arith.addf %194, %197 : vector<14x14xf32>
    %c27 = arith.constant 27 : index
    %199 = memref.load %arg2[%c27] : memref<32xf32, #tpu.memory_space<smem>>
    %200 = vector.broadcast %199 : f32 to vector<14x14xf32>
    %201 = arith.mulf %200, %47 : vector<14x14xf32>
    %202 = arith.addf %198, %201 : vector<14x14xf32>
    %c28 = arith.constant 28 : index
    %203 = memref.load %arg2[%c28] : memref<32xf32, #tpu.memory_space<smem>>
    %204 = vector.broadcast %203 : f32 to vector<14x14xf32>
    %205 = arith.mulf %204, %55 : vector<14x14xf32>
    %206 = arith.addf %202, %205 : vector<14x14xf32>
    %c29 = arith.constant 29 : index
    %207 = memref.load %arg2[%c29] : memref<32xf32, #tpu.memory_space<smem>>
    %208 = vector.broadcast %207 : f32 to vector<14x14xf32>
    %209 = arith.mulf %208, %63 : vector<14x14xf32>
    %210 = arith.addf %206, %209 : vector<14x14xf32>
    %c30 = arith.constant 30 : index
    %211 = memref.load %arg2[%c30] : memref<32xf32, #tpu.memory_space<smem>>
    %212 = vector.broadcast %211 : f32 to vector<14x14xf32>
    %213 = arith.mulf %212, %71 : vector<14x14xf32>
    %214 = arith.addf %210, %213 : vector<14x14xf32>
    %c31 = arith.constant 31 : index
    %215 = memref.load %arg2[%c31] : memref<32xf32, #tpu.memory_space<smem>>
    %216 = vector.broadcast %215 : f32 to vector<14x14xf32>
    %217 = arith.mulf %216, %79 : vector<14x14xf32>
    %218 = arith.addf %214, %217 : vector<14x14xf32>
    %c3_61 = arith.constant 3 : index
    %219 = memref.load %arg3[%c3_61] : memref<4xf32, #tpu.memory_space<smem>>
    %220 = vector.broadcast %219 : f32 to vector<14x14xf32>
    %221 = arith.addf %218, %220 : vector<14x14xf32>
    %cst_62 = arith.constant 0.000000e+00 : f32
    %222 = vector.broadcast %cst_62 : f32 to vector<14x14xf32>
    %223 = arith.maximumf %221, %222 : vector<14x14xf32>
    %224 = vector.extract_strided_slice %115 {offsets = [0, 0], sizes = [12, 12], strides = [1, 1]} : vector<14x14xf32> to vector<12x12xf32>
    %225 = vector.extract_strided_slice %115 {offsets = [0, 1], sizes = [12, 12], strides = [1, 1]} : vector<14x14xf32> to vector<12x12xf32>
    %226 = vector.extract_strided_slice %115 {offsets = [0, 2], sizes = [12, 12], strides = [1, 1]} : vector<14x14xf32> to vector<12x12xf32>
    %227 = vector.extract_strided_slice %115 {offsets = [1, 0], sizes = [12, 12], strides = [1, 1]} : vector<14x14xf32> to vector<12x12xf32>
    %228 = vector.extract_strided_slice %115 {offsets = [1, 1], sizes = [12, 12], strides = [1, 1]} : vector<14x14xf32> to vector<12x12xf32>
    %229 = vector.extract_strided_slice %151 {offsets = [0, 0], sizes = [12, 12], strides = [1, 1]} : vector<14x14xf32> to vector<12x12xf32>
    %230 = vector.extract_strided_slice %151 {offsets = [0, 1], sizes = [12, 12], strides = [1, 1]} : vector<14x14xf32> to vector<12x12xf32>
    %231 = vector.extract_strided_slice %151 {offsets = [0, 2], sizes = [12, 12], strides = [1, 1]} : vector<14x14xf32> to vector<12x12xf32>
    %232 = vector.extract_strided_slice %151 {offsets = [1, 0], sizes = [12, 12], strides = [1, 1]} : vector<14x14xf32> to vector<12x12xf32>
    %233 = vector.extract_strided_slice %151 {offsets = [1, 1], sizes = [12, 12], strides = [1, 1]} : vector<14x14xf32> to vector<12x12xf32>
    %234 = vector.extract_strided_slice %187 {offsets = [0, 0], sizes = [12, 12], strides = [1, 1]} : vector<14x14xf32> to vector<12x12xf32>
    %235 = vector.extract_strided_slice %187 {offsets = [0, 1], sizes = [12, 12], strides = [1, 1]} : vector<14x14xf32> to vector<12x12xf32>
    %236 = vector.extract_strided_slice %187 {offsets = [0, 2], sizes = [12, 12], strides = [1, 1]} : vector<14x14xf32> to vector<12x12xf32>
    %237 = vector.extract_strided_slice %187 {offsets = [1, 0], sizes = [12, 12], strides = [1, 1]} : vector<14x14xf32> to vector<12x12xf32>
    %238 = vector.extract_strided_slice %187 {offsets = [1, 1], sizes = [12, 12], strides = [1, 1]} : vector<14x14xf32> to vector<12x12xf32>
    %239 = vector.extract_strided_slice %223 {offsets = [0, 0], sizes = [12, 12], strides = [1, 1]} : vector<14x14xf32> to vector<12x12xf32>
    %240 = vector.extract_strided_slice %223 {offsets = [0, 1], sizes = [12, 12], strides = [1, 1]} : vector<14x14xf32> to vector<12x12xf32>
    %241 = vector.extract_strided_slice %223 {offsets = [0, 2], sizes = [12, 12], strides = [1, 1]} : vector<14x14xf32> to vector<12x12xf32>
    %242 = vector.extract_strided_slice %223 {offsets = [1, 0], sizes = [12, 12], strides = [1, 1]} : vector<14x14xf32> to vector<12x12xf32>
    %243 = vector.extract_strided_slice %223 {offsets = [1, 1], sizes = [12, 12], strides = [1, 1]} : vector<14x14xf32> to vector<12x12xf32>
    %c0_63 = arith.constant 0 : index
    %244 = memref.load %arg4[%c0_63] : memref<144xf32, #tpu.memory_space<smem>>
    %245 = vector.broadcast %244 : f32 to vector<12x12xf32>
    %246 = arith.mulf %245, %224 : vector<12x12xf32>
    %c1_64 = arith.constant 1 : index
    %247 = memref.load %arg4[%c1_64] : memref<144xf32, #tpu.memory_space<smem>>
    %248 = vector.broadcast %247 : f32 to vector<12x12xf32>
    %249 = arith.mulf %248, %225 : vector<12x12xf32>
    %250 = arith.addf %246, %249 : vector<12x12xf32>
    %c2_65 = arith.constant 2 : index
    %251 = memref.load %arg4[%c2_65] : memref<144xf32, #tpu.memory_space<smem>>
    %252 = vector.broadcast %251 : f32 to vector<12x12xf32>
    %253 = arith.mulf %252, %226 : vector<12x12xf32>
    %254 = arith.addf %250, %253 : vector<12x12xf32>
    %c3_66 = arith.constant 3 : index
    %255 = memref.load %arg4[%c3_66] : memref<144xf32, #tpu.memory_space<smem>>
    %256 = vector.broadcast %255 : f32 to vector<12x12xf32>
    %257 = arith.mulf %256, %227 : vector<12x12xf32>
    %258 = arith.addf %254, %257 : vector<12x12xf32>
    %c4_67 = arith.constant 4 : index
    %259 = memref.load %arg4[%c4_67] : memref<144xf32, #tpu.memory_space<smem>>
    %260 = vector.broadcast %259 : f32 to vector<12x12xf32>
    %261 = arith.mulf %260, %228 : vector<12x12xf32>
    %262 = arith.addf %258, %261 : vector<12x12xf32>
    %c9_68 = arith.constant 9 : index
    %263 = memref.load %arg4[%c9_68] : memref<144xf32, #tpu.memory_space<smem>>
    %264 = vector.broadcast %263 : f32 to vector<12x12xf32>
    %265 = arith.mulf %264, %229 : vector<12x12xf32>
    %266 = arith.addf %262, %265 : vector<12x12xf32>
    %c10_69 = arith.constant 10 : index
    %267 = memref.load %arg4[%c10_69] : memref<144xf32, #tpu.memory_space<smem>>
    %268 = vector.broadcast %267 : f32 to vector<12x12xf32>
    %269 = arith.mulf %268, %230 : vector<12x12xf32>
    %270 = arith.addf %266, %269 : vector<12x12xf32>
    %c11_70 = arith.constant 11 : index
    %271 = memref.load %arg4[%c11_70] : memref<144xf32, #tpu.memory_space<smem>>
    %272 = vector.broadcast %271 : f32 to vector<12x12xf32>
    %273 = arith.mulf %272, %231 : vector<12x12xf32>
    %274 = arith.addf %270, %273 : vector<12x12xf32>
    %c12_71 = arith.constant 12 : index
    %275 = memref.load %arg4[%c12_71] : memref<144xf32, #tpu.memory_space<smem>>
    %276 = vector.broadcast %275 : f32 to vector<12x12xf32>
    %277 = arith.mulf %276, %232 : vector<12x12xf32>
    %278 = arith.addf %274, %277 : vector<12x12xf32>
    %c18_72 = arith.constant 18 : index
    %279 = memref.load %arg4[%c18_72] : memref<144xf32, #tpu.memory_space<smem>>
    %280 = vector.broadcast %279 : f32 to vector<12x12xf32>
    %281 = arith.mulf %280, %234 : vector<12x12xf32>
    %282 = arith.addf %278, %281 : vector<12x12xf32>
    %c19_73 = arith.constant 19 : index
    %283 = memref.load %arg4[%c19_73] : memref<144xf32, #tpu.memory_space<smem>>
    %284 = vector.broadcast %283 : f32 to vector<12x12xf32>
    %285 = arith.mulf %284, %235 : vector<12x12xf32>
    %286 = arith.addf %282, %285 : vector<12x12xf32>
    %c20_74 = arith.constant 20 : index
    %287 = memref.load %arg4[%c20_74] : memref<144xf32, #tpu.memory_space<smem>>
    %288 = vector.broadcast %287 : f32 to vector<12x12xf32>
    %289 = arith.mulf %288, %236 : vector<12x12xf32>
    %290 = arith.addf %286, %289 : vector<12x12xf32>
    %c21_75 = arith.constant 21 : index
    %291 = memref.load %arg4[%c21_75] : memref<144xf32, #tpu.memory_space<smem>>
    %292 = vector.broadcast %291 : f32 to vector<12x12xf32>
    %293 = arith.mulf %292, %237 : vector<12x12xf32>
    %294 = arith.addf %290, %293 : vector<12x12xf32>
    %c22_76 = arith.constant 22 : index
    %295 = memref.load %arg4[%c22_76] : memref<144xf32, #tpu.memory_space<smem>>
    %296 = vector.broadcast %295 : f32 to vector<12x12xf32>
    %297 = arith.mulf %296, %238 : vector<12x12xf32>
    %298 = arith.addf %294, %297 : vector<12x12xf32>
    %c27_77 = arith.constant 27 : index
    %299 = memref.load %arg4[%c27_77] : memref<144xf32, #tpu.memory_space<smem>>
    %300 = vector.broadcast %299 : f32 to vector<12x12xf32>
    %301 = arith.mulf %300, %239 : vector<12x12xf32>
    %302 = arith.addf %298, %301 : vector<12x12xf32>
    %c28_78 = arith.constant 28 : index
    %303 = memref.load %arg4[%c28_78] : memref<144xf32, #tpu.memory_space<smem>>
    %304 = vector.broadcast %303 : f32 to vector<12x12xf32>
    %305 = arith.mulf %304, %240 : vector<12x12xf32>
    %306 = arith.addf %302, %305 : vector<12x12xf32>
    %c29_79 = arith.constant 29 : index
    %307 = memref.load %arg4[%c29_79] : memref<144xf32, #tpu.memory_space<smem>>
    %308 = vector.broadcast %307 : f32 to vector<12x12xf32>
    %309 = arith.mulf %308, %241 : vector<12x12xf32>
    %310 = arith.addf %306, %309 : vector<12x12xf32>
    %c30_80 = arith.constant 30 : index
    %311 = memref.load %arg4[%c30_80] : memref<144xf32, #tpu.memory_space<smem>>
    %312 = vector.broadcast %311 : f32 to vector<12x12xf32>
    %313 = arith.mulf %312, %242 : vector<12x12xf32>
    %314 = arith.addf %310, %313 : vector<12x12xf32>
    %c0_81 = arith.constant 0 : index
    %315 = memref.load %arg5[%c0_81] : memref<4xf32, #tpu.memory_space<smem>>
    %316 = vector.broadcast %315 : f32 to vector<12x12xf32>
    %317 = arith.addf %314, %316 : vector<12x12xf32>
    %cst_82 = arith.constant 0.000000e+00 : f32
    %318 = vector.broadcast %cst_82 : f32 to vector<12x12xf32>
    %319 = arith.maximumf %317, %318 : vector<12x12xf32>
    %c36 = arith.constant 36 : index
    %320 = memref.load %arg4[%c36] : memref<144xf32, #tpu.memory_space<smem>>
    %321 = vector.broadcast %320 : f32 to vector<12x12xf32>
    %322 = arith.mulf %321, %224 : vector<12x12xf32>
    %c37 = arith.constant 37 : index
    %323 = memref.load %arg4[%c37] : memref<144xf32, #tpu.memory_space<smem>>
    %324 = vector.broadcast %323 : f32 to vector<12x12xf32>
    %325 = arith.mulf %324, %225 : vector<12x12xf32>
    %326 = arith.addf %322, %325 : vector<12x12xf32>
    %c38 = arith.constant 38 : index
    %327 = memref.load %arg4[%c38] : memref<144xf32, #tpu.memory_space<smem>>
    %328 = vector.broadcast %327 : f32 to vector<12x12xf32>
    %329 = arith.mulf %328, %226 : vector<12x12xf32>
    %330 = arith.addf %326, %329 : vector<12x12xf32>
    %c39 = arith.constant 39 : index
    %331 = memref.load %arg4[%c39] : memref<144xf32, #tpu.memory_space<smem>>
    %332 = vector.broadcast %331 : f32 to vector<12x12xf32>
    %333 = arith.mulf %332, %227 : vector<12x12xf32>
    %334 = arith.addf %330, %333 : vector<12x12xf32>
    %c40 = arith.constant 40 : index
    %335 = memref.load %arg4[%c40] : memref<144xf32, #tpu.memory_space<smem>>
    %336 = vector.broadcast %335 : f32 to vector<12x12xf32>
    %337 = arith.mulf %336, %228 : vector<12x12xf32>
    %338 = arith.addf %334, %337 : vector<12x12xf32>
    %c45 = arith.constant 45 : index
    %339 = memref.load %arg4[%c45] : memref<144xf32, #tpu.memory_space<smem>>
    %340 = vector.broadcast %339 : f32 to vector<12x12xf32>
    %341 = arith.mulf %340, %229 : vector<12x12xf32>
    %342 = arith.addf %338, %341 : vector<12x12xf32>
    %c46 = arith.constant 46 : index
    %343 = memref.load %arg4[%c46] : memref<144xf32, #tpu.memory_space<smem>>
    %344 = vector.broadcast %343 : f32 to vector<12x12xf32>
    %345 = arith.mulf %344, %230 : vector<12x12xf32>
    %346 = arith.addf %342, %345 : vector<12x12xf32>
    %c47 = arith.constant 47 : index
    %347 = memref.load %arg4[%c47] : memref<144xf32, #tpu.memory_space<smem>>
    %348 = vector.broadcast %347 : f32 to vector<12x12xf32>
    %349 = arith.mulf %348, %231 : vector<12x12xf32>
    %350 = arith.addf %346, %349 : vector<12x12xf32>
    %c48 = arith.constant 48 : index
    %351 = memref.load %arg4[%c48] : memref<144xf32, #tpu.memory_space<smem>>
    %352 = vector.broadcast %351 : f32 to vector<12x12xf32>
    %353 = arith.mulf %352, %232 : vector<12x12xf32>
    %354 = arith.addf %350, %353 : vector<12x12xf32>
    %c49 = arith.constant 49 : index
    %355 = memref.load %arg4[%c49] : memref<144xf32, #tpu.memory_space<smem>>
    %356 = vector.broadcast %355 : f32 to vector<12x12xf32>
    %357 = arith.mulf %356, %233 : vector<12x12xf32>
    %358 = arith.addf %354, %357 : vector<12x12xf32>
    %c54 = arith.constant 54 : index
    %359 = memref.load %arg4[%c54] : memref<144xf32, #tpu.memory_space<smem>>
    %360 = vector.broadcast %359 : f32 to vector<12x12xf32>
    %361 = arith.mulf %360, %234 : vector<12x12xf32>
    %362 = arith.addf %358, %361 : vector<12x12xf32>
    %c55 = arith.constant 55 : index
    %363 = memref.load %arg4[%c55] : memref<144xf32, #tpu.memory_space<smem>>
    %364 = vector.broadcast %363 : f32 to vector<12x12xf32>
    %365 = arith.mulf %364, %235 : vector<12x12xf32>
    %366 = arith.addf %362, %365 : vector<12x12xf32>
    %c56 = arith.constant 56 : index
    %367 = memref.load %arg4[%c56] : memref<144xf32, #tpu.memory_space<smem>>
    %368 = vector.broadcast %367 : f32 to vector<12x12xf32>
    %369 = arith.mulf %368, %236 : vector<12x12xf32>
    %370 = arith.addf %366, %369 : vector<12x12xf32>
    %c57 = arith.constant 57 : index
    %371 = memref.load %arg4[%c57] : memref<144xf32, #tpu.memory_space<smem>>
    %372 = vector.broadcast %371 : f32 to vector<12x12xf32>
    %373 = arith.mulf %372, %237 : vector<12x12xf32>
    %374 = arith.addf %370, %373 : vector<12x12xf32>
    %c58 = arith.constant 58 : index
    %375 = memref.load %arg4[%c58] : memref<144xf32, #tpu.memory_space<smem>>
    %376 = vector.broadcast %375 : f32 to vector<12x12xf32>
    %377 = arith.mulf %376, %238 : vector<12x12xf32>
    %378 = arith.addf %374, %377 : vector<12x12xf32>
    %c63 = arith.constant 63 : index
    %379 = memref.load %arg4[%c63] : memref<144xf32, #tpu.memory_space<smem>>
    %380 = vector.broadcast %379 : f32 to vector<12x12xf32>
    %381 = arith.mulf %380, %239 : vector<12x12xf32>
    %382 = arith.addf %378, %381 : vector<12x12xf32>
    %c64 = arith.constant 64 : index
    %383 = memref.load %arg4[%c64] : memref<144xf32, #tpu.memory_space<smem>>
    %384 = vector.broadcast %383 : f32 to vector<12x12xf32>
    %385 = arith.mulf %384, %240 : vector<12x12xf32>
    %386 = arith.addf %382, %385 : vector<12x12xf32>
    %c65 = arith.constant 65 : index
    %387 = memref.load %arg4[%c65] : memref<144xf32, #tpu.memory_space<smem>>
    %388 = vector.broadcast %387 : f32 to vector<12x12xf32>
    %389 = arith.mulf %388, %241 : vector<12x12xf32>
    %390 = arith.addf %386, %389 : vector<12x12xf32>
    %c66 = arith.constant 66 : index
    %391 = memref.load %arg4[%c66] : memref<144xf32, #tpu.memory_space<smem>>
    %392 = vector.broadcast %391 : f32 to vector<12x12xf32>
    %393 = arith.mulf %392, %242 : vector<12x12xf32>
    %394 = arith.addf %390, %393 : vector<12x12xf32>
    %c67 = arith.constant 67 : index
    %395 = memref.load %arg4[%c67] : memref<144xf32, #tpu.memory_space<smem>>
    %396 = vector.broadcast %395 : f32 to vector<12x12xf32>
    %397 = arith.mulf %396, %243 : vector<12x12xf32>
    %398 = arith.addf %394, %397 : vector<12x12xf32>
    %c1_83 = arith.constant 1 : index
    %399 = memref.load %arg5[%c1_83] : memref<4xf32, #tpu.memory_space<smem>>
    %400 = vector.broadcast %399 : f32 to vector<12x12xf32>
    %401 = arith.addf %398, %400 : vector<12x12xf32>
    %cst_84 = arith.constant 0.000000e+00 : f32
    %402 = vector.broadcast %cst_84 : f32 to vector<12x12xf32>
    %403 = arith.maximumf %401, %402 : vector<12x12xf32>
    %c72 = arith.constant 72 : index
    %404 = memref.load %arg4[%c72] : memref<144xf32, #tpu.memory_space<smem>>
    %405 = vector.broadcast %404 : f32 to vector<12x12xf32>
    %406 = arith.mulf %405, %224 : vector<12x12xf32>
    %c73 = arith.constant 73 : index
    %407 = memref.load %arg4[%c73] : memref<144xf32, #tpu.memory_space<smem>>
    %408 = vector.broadcast %407 : f32 to vector<12x12xf32>
    %409 = arith.mulf %408, %225 : vector<12x12xf32>
    %410 = arith.addf %406, %409 : vector<12x12xf32>
    %c74 = arith.constant 74 : index
    %411 = memref.load %arg4[%c74] : memref<144xf32, #tpu.memory_space<smem>>
    %412 = vector.broadcast %411 : f32 to vector<12x12xf32>
    %413 = arith.mulf %412, %226 : vector<12x12xf32>
    %414 = arith.addf %410, %413 : vector<12x12xf32>
    %c75 = arith.constant 75 : index
    %415 = memref.load %arg4[%c75] : memref<144xf32, #tpu.memory_space<smem>>
    %416 = vector.broadcast %415 : f32 to vector<12x12xf32>
    %417 = arith.mulf %416, %227 : vector<12x12xf32>
    %418 = arith.addf %414, %417 : vector<12x12xf32>
    %c76 = arith.constant 76 : index
    %419 = memref.load %arg4[%c76] : memref<144xf32, #tpu.memory_space<smem>>
    %420 = vector.broadcast %419 : f32 to vector<12x12xf32>
    %421 = arith.mulf %420, %228 : vector<12x12xf32>
    %422 = arith.addf %418, %421 : vector<12x12xf32>
    %c81 = arith.constant 81 : index
    %423 = memref.load %arg4[%c81] : memref<144xf32, #tpu.memory_space<smem>>
    %424 = vector.broadcast %423 : f32 to vector<12x12xf32>
    %425 = arith.mulf %424, %229 : vector<12x12xf32>
    %426 = arith.addf %422, %425 : vector<12x12xf32>
    %c82 = arith.constant 82 : index
    %427 = memref.load %arg4[%c82] : memref<144xf32, #tpu.memory_space<smem>>
    %428 = vector.broadcast %427 : f32 to vector<12x12xf32>
    %429 = arith.mulf %428, %230 : vector<12x12xf32>
    %430 = arith.addf %426, %429 : vector<12x12xf32>
    %c83 = arith.constant 83 : index
    %431 = memref.load %arg4[%c83] : memref<144xf32, #tpu.memory_space<smem>>
    %432 = vector.broadcast %431 : f32 to vector<12x12xf32>
    %433 = arith.mulf %432, %231 : vector<12x12xf32>
    %434 = arith.addf %430, %433 : vector<12x12xf32>
    %c84 = arith.constant 84 : index
    %435 = memref.load %arg4[%c84] : memref<144xf32, #tpu.memory_space<smem>>
    %436 = vector.broadcast %435 : f32 to vector<12x12xf32>
    %437 = arith.mulf %436, %232 : vector<12x12xf32>
    %438 = arith.addf %434, %437 : vector<12x12xf32>
    %c90 = arith.constant 90 : index
    %439 = memref.load %arg4[%c90] : memref<144xf32, #tpu.memory_space<smem>>
    %440 = vector.broadcast %439 : f32 to vector<12x12xf32>
    %441 = arith.mulf %440, %234 : vector<12x12xf32>
    %442 = arith.addf %438, %441 : vector<12x12xf32>
    %c91 = arith.constant 91 : index
    %443 = memref.load %arg4[%c91] : memref<144xf32, #tpu.memory_space<smem>>
    %444 = vector.broadcast %443 : f32 to vector<12x12xf32>
    %445 = arith.mulf %444, %235 : vector<12x12xf32>
    %446 = arith.addf %442, %445 : vector<12x12xf32>
    %c92 = arith.constant 92 : index
    %447 = memref.load %arg4[%c92] : memref<144xf32, #tpu.memory_space<smem>>
    %448 = vector.broadcast %447 : f32 to vector<12x12xf32>
    %449 = arith.mulf %448, %236 : vector<12x12xf32>
    %450 = arith.addf %446, %449 : vector<12x12xf32>
    %c93 = arith.constant 93 : index
    %451 = memref.load %arg4[%c93] : memref<144xf32, #tpu.memory_space<smem>>
    %452 = vector.broadcast %451 : f32 to vector<12x12xf32>
    %453 = arith.mulf %452, %237 : vector<12x12xf32>
    %454 = arith.addf %450, %453 : vector<12x12xf32>
    %c94 = arith.constant 94 : index
    %455 = memref.load %arg4[%c94] : memref<144xf32, #tpu.memory_space<smem>>
    %456 = vector.broadcast %455 : f32 to vector<12x12xf32>
    %457 = arith.mulf %456, %238 : vector<12x12xf32>
    %458 = arith.addf %454, %457 : vector<12x12xf32>
    %c99 = arith.constant 99 : index
    %459 = memref.load %arg4[%c99] : memref<144xf32, #tpu.memory_space<smem>>
    %460 = vector.broadcast %459 : f32 to vector<12x12xf32>
    %461 = arith.mulf %460, %239 : vector<12x12xf32>
    %462 = arith.addf %458, %461 : vector<12x12xf32>
    %c100 = arith.constant 100 : index
    %463 = memref.load %arg4[%c100] : memref<144xf32, #tpu.memory_space<smem>>
    %464 = vector.broadcast %463 : f32 to vector<12x12xf32>
    %465 = arith.mulf %464, %240 : vector<12x12xf32>
    %466 = arith.addf %462, %465 : vector<12x12xf32>
    %c101 = arith.constant 101 : index
    %467 = memref.load %arg4[%c101] : memref<144xf32, #tpu.memory_space<smem>>
    %468 = vector.broadcast %467 : f32 to vector<12x12xf32>
    %469 = arith.mulf %468, %241 : vector<12x12xf32>
    %470 = arith.addf %466, %469 : vector<12x12xf32>
    %c102 = arith.constant 102 : index
    %471 = memref.load %arg4[%c102] : memref<144xf32, #tpu.memory_space<smem>>
    %472 = vector.broadcast %471 : f32 to vector<12x12xf32>
    %473 = arith.mulf %472, %242 : vector<12x12xf32>
    %474 = arith.addf %470, %473 : vector<12x12xf32>
    %c2_85 = arith.constant 2 : index
    %475 = memref.load %arg5[%c2_85] : memref<4xf32, #tpu.memory_space<smem>>
    %476 = vector.broadcast %475 : f32 to vector<12x12xf32>
    %477 = arith.addf %474, %476 : vector<12x12xf32>
    %cst_86 = arith.constant 0.000000e+00 : f32
    %478 = vector.broadcast %cst_86 : f32 to vector<12x12xf32>
    %479 = arith.maximumf %477, %478 : vector<12x12xf32>
    %c108 = arith.constant 108 : index
    %480 = memref.load %arg4[%c108] : memref<144xf32, #tpu.memory_space<smem>>
    %481 = vector.broadcast %480 : f32 to vector<12x12xf32>
    %482 = arith.mulf %481, %224 : vector<12x12xf32>
    %c109 = arith.constant 109 : index
    %483 = memref.load %arg4[%c109] : memref<144xf32, #tpu.memory_space<smem>>
    %484 = vector.broadcast %483 : f32 to vector<12x12xf32>
    %485 = arith.mulf %484, %225 : vector<12x12xf32>
    %486 = arith.addf %482, %485 : vector<12x12xf32>
    %c110 = arith.constant 110 : index
    %487 = memref.load %arg4[%c110] : memref<144xf32, #tpu.memory_space<smem>>
    %488 = vector.broadcast %487 : f32 to vector<12x12xf32>
    %489 = arith.mulf %488, %226 : vector<12x12xf32>
    %490 = arith.addf %486, %489 : vector<12x12xf32>
    %c111 = arith.constant 111 : index
    %491 = memref.load %arg4[%c111] : memref<144xf32, #tpu.memory_space<smem>>
    %492 = vector.broadcast %491 : f32 to vector<12x12xf32>
    %493 = arith.mulf %492, %227 : vector<12x12xf32>
    %494 = arith.addf %490, %493 : vector<12x12xf32>
    %c112 = arith.constant 112 : index
    %495 = memref.load %arg4[%c112] : memref<144xf32, #tpu.memory_space<smem>>
    %496 = vector.broadcast %495 : f32 to vector<12x12xf32>
    %497 = arith.mulf %496, %228 : vector<12x12xf32>
    %498 = arith.addf %494, %497 : vector<12x12xf32>
    %c117 = arith.constant 117 : index
    %499 = memref.load %arg4[%c117] : memref<144xf32, #tpu.memory_space<smem>>
    %500 = vector.broadcast %499 : f32 to vector<12x12xf32>
    %501 = arith.mulf %500, %229 : vector<12x12xf32>
    %502 = arith.addf %498, %501 : vector<12x12xf32>
    %c118 = arith.constant 118 : index
    %503 = memref.load %arg4[%c118] : memref<144xf32, #tpu.memory_space<smem>>
    %504 = vector.broadcast %503 : f32 to vector<12x12xf32>
    %505 = arith.mulf %504, %230 : vector<12x12xf32>
    %506 = arith.addf %502, %505 : vector<12x12xf32>
    %c119 = arith.constant 119 : index
    %507 = memref.load %arg4[%c119] : memref<144xf32, #tpu.memory_space<smem>>
    %508 = vector.broadcast %507 : f32 to vector<12x12xf32>
    %509 = arith.mulf %508, %231 : vector<12x12xf32>
    %510 = arith.addf %506, %509 : vector<12x12xf32>
    %c120 = arith.constant 120 : index
    %511 = memref.load %arg4[%c120] : memref<144xf32, #tpu.memory_space<smem>>
    %512 = vector.broadcast %511 : f32 to vector<12x12xf32>
    %513 = arith.mulf %512, %232 : vector<12x12xf32>
    %514 = arith.addf %510, %513 : vector<12x12xf32>
    %c121 = arith.constant 121 : index
    %515 = memref.load %arg4[%c121] : memref<144xf32, #tpu.memory_space<smem>>
    %516 = vector.broadcast %515 : f32 to vector<12x12xf32>
    %517 = arith.mulf %516, %233 : vector<12x12xf32>
    %518 = arith.addf %514, %517 : vector<12x12xf32>
    %c126 = arith.constant 126 : index
    %519 = memref.load %arg4[%c126] : memref<144xf32, #tpu.memory_space<smem>>
    %520 = vector.broadcast %519 : f32 to vector<12x12xf32>
    %521 = arith.mulf %520, %234 : vector<12x12xf32>
    %522 = arith.addf %518, %521 : vector<12x12xf32>
    %c127 = arith.constant 127 : index
    %523 = memref.load %arg4[%c127] : memref<144xf32, #tpu.memory_space<smem>>
    %524 = vector.broadcast %523 : f32 to vector<12x12xf32>
    %525 = arith.mulf %524, %235 : vector<12x12xf32>
    %526 = arith.addf %522, %525 : vector<12x12xf32>
    %c128 = arith.constant 128 : index
    %527 = memref.load %arg4[%c128] : memref<144xf32, #tpu.memory_space<smem>>
    %528 = vector.broadcast %527 : f32 to vector<12x12xf32>
    %529 = arith.mulf %528, %236 : vector<12x12xf32>
    %530 = arith.addf %526, %529 : vector<12x12xf32>
    %c129 = arith.constant 129 : index
    %531 = memref.load %arg4[%c129] : memref<144xf32, #tpu.memory_space<smem>>
    %532 = vector.broadcast %531 : f32 to vector<12x12xf32>
    %533 = arith.mulf %532, %237 : vector<12x12xf32>
    %534 = arith.addf %530, %533 : vector<12x12xf32>
    %c130 = arith.constant 130 : index
    %535 = memref.load %arg4[%c130] : memref<144xf32, #tpu.memory_space<smem>>
    %536 = vector.broadcast %535 : f32 to vector<12x12xf32>
    %537 = arith.mulf %536, %238 : vector<12x12xf32>
    %538 = arith.addf %534, %537 : vector<12x12xf32>
    %c135 = arith.constant 135 : index
    %539 = memref.load %arg4[%c135] : memref<144xf32, #tpu.memory_space<smem>>
    %540 = vector.broadcast %539 : f32 to vector<12x12xf32>
    %541 = arith.mulf %540, %239 : vector<12x12xf32>
    %542 = arith.addf %538, %541 : vector<12x12xf32>
    %c136 = arith.constant 136 : index
    %543 = memref.load %arg4[%c136] : memref<144xf32, #tpu.memory_space<smem>>
    %544 = vector.broadcast %543 : f32 to vector<12x12xf32>
    %545 = arith.mulf %544, %240 : vector<12x12xf32>
    %546 = arith.addf %542, %545 : vector<12x12xf32>
    %c137 = arith.constant 137 : index
    %547 = memref.load %arg4[%c137] : memref<144xf32, #tpu.memory_space<smem>>
    %548 = vector.broadcast %547 : f32 to vector<12x12xf32>
    %549 = arith.mulf %548, %241 : vector<12x12xf32>
    %550 = arith.addf %546, %549 : vector<12x12xf32>
    %c138 = arith.constant 138 : index
    %551 = memref.load %arg4[%c138] : memref<144xf32, #tpu.memory_space<smem>>
    %552 = vector.broadcast %551 : f32 to vector<12x12xf32>
    %553 = arith.mulf %552, %242 : vector<12x12xf32>
    %554 = arith.addf %550, %553 : vector<12x12xf32>
    %c139 = arith.constant 139 : index
    %555 = memref.load %arg4[%c139] : memref<144xf32, #tpu.memory_space<smem>>
    %556 = vector.broadcast %555 : f32 to vector<12x12xf32>
    %557 = arith.mulf %556, %243 : vector<12x12xf32>
    %558 = arith.addf %554, %557 : vector<12x12xf32>
    %c3_87 = arith.constant 3 : index
    %559 = memref.load %arg5[%c3_87] : memref<4xf32, #tpu.memory_space<smem>>
    %560 = vector.broadcast %559 : f32 to vector<12x12xf32>
    %561 = arith.addf %558, %560 : vector<12x12xf32>
    %cst_88 = arith.constant 0.000000e+00 : f32
    %562 = vector.broadcast %cst_88 : f32 to vector<12x12xf32>
    %563 = arith.maximumf %561, %562 : vector<12x12xf32>
    %c0_89 = arith.constant 0 : index
    %564 = memref.load %arg6[%c0_89] : memref<32xf32, #tpu.memory_space<smem>>
    %565 = vector.broadcast %564 : f32 to vector<12x12xf32>
    %566 = arith.mulf %565, %319 : vector<12x12xf32>
    %c1_90 = arith.constant 1 : index
    %567 = memref.load %arg6[%c1_90] : memref<32xf32, #tpu.memory_space<smem>>
    %568 = vector.broadcast %567 : f32 to vector<12x12xf32>
    %569 = arith.mulf %568, %403 : vector<12x12xf32>
    %570 = arith.addf %566, %569 : vector<12x12xf32>
    %c2_91 = arith.constant 2 : index
    %571 = memref.load %arg6[%c2_91] : memref<32xf32, #tpu.memory_space<smem>>
    %572 = vector.broadcast %571 : f32 to vector<12x12xf32>
    %573 = arith.mulf %572, %479 : vector<12x12xf32>
    %574 = arith.addf %570, %573 : vector<12x12xf32>
    %c3_92 = arith.constant 3 : index
    %575 = memref.load %arg6[%c3_92] : memref<32xf32, #tpu.memory_space<smem>>
    %576 = vector.broadcast %575 : f32 to vector<12x12xf32>
    %577 = arith.mulf %576, %563 : vector<12x12xf32>
    %578 = arith.addf %574, %577 : vector<12x12xf32>
    %579 = vector.extract_strided_slice %1 {offsets = [1, 1], sizes = [12, 12], strides = [1, 1]} : vector<14x14xf32> to vector<12x12xf32>
    %c0_93 = arith.constant 0 : index
    %580 = memref.load %arg7[%c0_93] : memref<8xf32, #tpu.memory_space<smem>>
    %581 = vector.broadcast %580 : f32 to vector<12x12xf32>
    %582 = arith.addf %578, %581 : vector<12x12xf32>
    %583 = arith.addf %582, %579 : vector<12x12xf32>
    %c0_94 = arith.constant 0 : index
    %c0_95 = arith.constant 0 : index
    %c0_96 = arith.constant 0 : index
    %c0_97 = arith.constant 0 : index
    %584 = vector.load %arg10[%c0_94, %c0_95, %c0_96, %c0_97] : memref<8x1x12x12xf32, #tpu.memory_space<vmem>>, vector<1x1x12x12xf32>
    %585 = vector.shape_cast %584 : vector<1x1x12x12xf32> to vector<12x12xf32>
    %586 = vector.shape_cast %583 : vector<12x12xf32> to vector<1x1x12x12xf32>
    tpu.vector_store %arg10[%c0_94, %c0_95, %c0_96, %c0_97], %586 {strides = array<i32>} : memref<8x1x12x12xf32, #tpu.memory_space<vmem>>, vector<1x1x12x12xf32>,
    %c4_98 = arith.constant 4 : index
    %587 = memref.load %arg6[%c4_98] : memref<32xf32, #tpu.memory_space<smem>>
    %588 = vector.broadcast %587 : f32 to vector<12x12xf32>
    %589 = arith.mulf %588, %319 : vector<12x12xf32>
    %c5_99 = arith.constant 5 : index
    %590 = memref.load %arg6[%c5_99] : memref<32xf32, #tpu.memory_space<smem>>
    %591 = vector.broadcast %590 : f32 to vector<12x12xf32>
    %592 = arith.mulf %591, %403 : vector<12x12xf32>
    %593 = arith.addf %589, %592 : vector<12x12xf32>
    %c6_100 = arith.constant 6 : index
    %594 = memref.load %arg6[%c6_100] : memref<32xf32, #tpu.memory_space<smem>>
    %595 = vector.broadcast %594 : f32 to vector<12x12xf32>
    %596 = arith.mulf %595, %479 : vector<12x12xf32>
    %597 = arith.addf %593, %596 : vector<12x12xf32>
    %c7_101 = arith.constant 7 : index
    %598 = memref.load %arg6[%c7_101] : memref<32xf32, #tpu.memory_space<smem>>
    %599 = vector.broadcast %598 : f32 to vector<12x12xf32>
    %600 = arith.mulf %599, %563 : vector<12x12xf32>
    %601 = arith.addf %597, %600 : vector<12x12xf32>
    %602 = vector.extract_strided_slice %3 {offsets = [1, 1], sizes = [12, 12], strides = [1, 1]} : vector<14x14xf32> to vector<12x12xf32>
    %c1_102 = arith.constant 1 : index
    %603 = memref.load %arg7[%c1_102] : memref<8xf32, #tpu.memory_space<smem>>
    %604 = vector.broadcast %603 : f32 to vector<12x12xf32>
    %605 = arith.addf %601, %604 : vector<12x12xf32>
    %606 = arith.addf %605, %602 : vector<12x12xf32>
    %c1_103 = arith.constant 1 : index
    %c0_104 = arith.constant 0 : index
    %c0_105 = arith.constant 0 : index
    %c0_106 = arith.constant 0 : index
    %607 = vector.load %arg10[%c1_103, %c0_104, %c0_105, %c0_106] : memref<8x1x12x12xf32, #tpu.memory_space<vmem>>, vector<1x1x12x12xf32>
    %608 = vector.shape_cast %607 : vector<1x1x12x12xf32> to vector<12x12xf32>
    %609 = vector.shape_cast %606 : vector<12x12xf32> to vector<1x1x12x12xf32>
    tpu.vector_store %arg10[%c1_103, %c0_104, %c0_105, %c0_106], %609 {strides = array<i32>} : memref<8x1x12x12xf32, #tpu.memory_space<vmem>>, vector<1x1x12x12xf32>,
    %c8_107 = arith.constant 8 : index
    %610 = memref.load %arg6[%c8_107] : memref<32xf32, #tpu.memory_space<smem>>
    %611 = vector.broadcast %610 : f32 to vector<12x12xf32>
    %612 = arith.mulf %611, %319 : vector<12x12xf32>
    %c9_108 = arith.constant 9 : index
    %613 = memref.load %arg6[%c9_108] : memref<32xf32, #tpu.memory_space<smem>>
    %614 = vector.broadcast %613 : f32 to vector<12x12xf32>
    %615 = arith.mulf %614, %403 : vector<12x12xf32>
    %616 = arith.addf %612, %615 : vector<12x12xf32>
    %c10_109 = arith.constant 10 : index
    %617 = memref.load %arg6[%c10_109] : memref<32xf32, #tpu.memory_space<smem>>
    %618 = vector.broadcast %617 : f32 to vector<12x12xf32>
    %619 = arith.mulf %618, %479 : vector<12x12xf32>
    %620 = arith.addf %616, %619 : vector<12x12xf32>
    %c11_110 = arith.constant 11 : index
    %621 = memref.load %arg6[%c11_110] : memref<32xf32, #tpu.memory_space<smem>>
    %622 = vector.broadcast %621 : f32 to vector<12x12xf32>
    %623 = arith.mulf %622, %563 : vector<12x12xf32>
    %624 = arith.addf %620, %623 : vector<12x12xf32>
    %625 = vector.extract_strided_slice %5 {offsets = [1, 1], sizes = [12, 12], strides = [1, 1]} : vector<14x14xf32> to vector<12x12xf32>
    %c2_111 = arith.constant 2 : index
    %626 = memref.load %arg7[%c2_111] : memref<8xf32, #tpu.memory_space<smem>>
    %627 = vector.broadcast %626 : f32 to vector<12x12xf32>
    %628 = arith.addf %624, %627 : vector<12x12xf32>
    %629 = arith.addf %628, %625 : vector<12x12xf32>
    %c2_112 = arith.constant 2 : index
    %c0_113 = arith.constant 0 : index
    %c0_114 = arith.constant 0 : index
    %c0_115 = arith.constant 0 : index
    %630 = vector.load %arg10[%c2_112, %c0_113, %c0_114, %c0_115] : memref<8x1x12x12xf32, #tpu.memory_space<vmem>>, vector<1x1x12x12xf32>
    %631 = vector.shape_cast %630 : vector<1x1x12x12xf32> to vector<12x12xf32>
    %632 = vector.shape_cast %629 : vector<12x12xf32> to vector<1x1x12x12xf32>
    tpu.vector_store %arg10[%c2_112, %c0_113, %c0_114, %c0_115], %632 {strides = array<i32>} : memref<8x1x12x12xf32, #tpu.memory_space<vmem>>, vector<1x1x12x12xf32>,
    %c12_116 = arith.constant 12 : index
    %633 = memref.load %arg6[%c12_116] : memref<32xf32, #tpu.memory_space<smem>>
    %634 = vector.broadcast %633 : f32 to vector<12x12xf32>
    %635 = arith.mulf %634, %319 : vector<12x12xf32>
    %c13_117 = arith.constant 13 : index
    %636 = memref.load %arg6[%c13_117] : memref<32xf32, #tpu.memory_space<smem>>
    %637 = vector.broadcast %636 : f32 to vector<12x12xf32>
    %638 = arith.mulf %637, %403 : vector<12x12xf32>
    %639 = arith.addf %635, %638 : vector<12x12xf32>
    %c14_118 = arith.constant 14 : index
    %640 = memref.load %arg6[%c14_118] : memref<32xf32, #tpu.memory_space<smem>>
    %641 = vector.broadcast %640 : f32 to vector<12x12xf32>
    %642 = arith.mulf %641, %479 : vector<12x12xf32>
    %643 = arith.addf %639, %642 : vector<12x12xf32>
    %c15_119 = arith.constant 15 : index
    %644 = memref.load %arg6[%c15_119] : memref<32xf32, #tpu.memory_space<smem>>
    %645 = vector.broadcast %644 : f32 to vector<12x12xf32>
    %646 = arith.mulf %645, %563 : vector<12x12xf32>
    %647 = arith.addf %643, %646 : vector<12x12xf32>
    %648 = vector.extract_strided_slice %7 {offsets = [1, 1], sizes = [12, 12], strides = [1, 1]} : vector<14x14xf32> to vector<12x12xf32>
    %c3_120 = arith.constant 3 : index
    %649 = memref.load %arg7[%c3_120] : memref<8xf32, #tpu.memory_space<smem>>
    %650 = vector.broadcast %649 : f32 to vector<12x12xf32>
    %651 = arith.addf %647, %650 : vector<12x12xf32>
    %652 = arith.addf %651, %648 : vector<12x12xf32>
    %c3_121 = arith.constant 3 : index
    %c0_122 = arith.constant 0 : index
    %c0_123 = arith.constant 0 : index
    %c0_124 = arith.constant 0 : index
    %653 = vector.load %arg10[%c3_121, %c0_122, %c0_123, %c0_124] : memref<8x1x12x12xf32, #tpu.memory_space<vmem>>, vector<1x1x12x12xf32>
    %654 = vector.shape_cast %653 : vector<1x1x12x12xf32> to vector<12x12xf32>
    %655 = vector.shape_cast %652 : vector<12x12xf32> to vector<1x1x12x12xf32>
    tpu.vector_store %arg10[%c3_121, %c0_122, %c0_123, %c0_124], %655 {strides = array<i32>} : memref<8x1x12x12xf32, #tpu.memory_space<vmem>>, vector<1x1x12x12xf32>,
    %c16_125 = arith.constant 16 : index
    %656 = memref.load %arg6[%c16_125] : memref<32xf32, #tpu.memory_space<smem>>
    %657 = vector.broadcast %656 : f32 to vector<12x12xf32>
    %658 = arith.mulf %657, %319 : vector<12x12xf32>
    %c17_126 = arith.constant 17 : index
    %659 = memref.load %arg6[%c17_126] : memref<32xf32, #tpu.memory_space<smem>>
    %660 = vector.broadcast %659 : f32 to vector<12x12xf32>
    %661 = arith.mulf %660, %403 : vector<12x12xf32>
    %662 = arith.addf %658, %661 : vector<12x12xf32>
    %c18_127 = arith.constant 18 : index
    %663 = memref.load %arg6[%c18_127] : memref<32xf32, #tpu.memory_space<smem>>
    %664 = vector.broadcast %663 : f32 to vector<12x12xf32>
    %665 = arith.mulf %664, %479 : vector<12x12xf32>
    %666 = arith.addf %662, %665 : vector<12x12xf32>
    %c19_128 = arith.constant 19 : index
    %667 = memref.load %arg6[%c19_128] : memref<32xf32, #tpu.memory_space<smem>>
    %668 = vector.broadcast %667 : f32 to vector<12x12xf32>
    %669 = arith.mulf %668, %563 : vector<12x12xf32>
    %670 = arith.addf %666, %669 : vector<12x12xf32>
    %671 = vector.extract_strided_slice %9 {offsets = [1, 1], sizes = [12, 12], strides = [1, 1]} : vector<14x14xf32> to vector<12x12xf32>
    %c4_129 = arith.constant 4 : index
    %672 = memref.load %arg7[%c4_129] : memref<8xf32, #tpu.memory_space<smem>>
    %673 = vector.broadcast %672 : f32 to vector<12x12xf32>
    %674 = arith.addf %670, %673 : vector<12x12xf32>
    %675 = arith.addf %674, %671 : vector<12x12xf32>
    %c4_130 = arith.constant 4 : index
    %c0_131 = arith.constant 0 : index
    %c0_132 = arith.constant 0 : index
    %c0_133 = arith.constant 0 : index
    %676 = vector.load %arg10[%c4_130, %c0_131, %c0_132, %c0_133] : memref<8x1x12x12xf32, #tpu.memory_space<vmem>>, vector<1x1x12x12xf32>
    %677 = vector.shape_cast %676 : vector<1x1x12x12xf32> to vector<12x12xf32>
    %678 = vector.shape_cast %675 : vector<12x12xf32> to vector<1x1x12x12xf32>
    tpu.vector_store %arg10[%c4_130, %c0_131, %c0_132, %c0_133], %678 {strides = array<i32>} : memref<8x1x12x12xf32, #tpu.memory_space<vmem>>, vector<1x1x12x12xf32>,
    %c20_134 = arith.constant 20 : index
    %679 = memref.load %arg6[%c20_134] : memref<32xf32, #tpu.memory_space<smem>>
    %680 = vector.broadcast %679 : f32 to vector<12x12xf32>
    %681 = arith.mulf %680, %319 : vector<12x12xf32>
    %c21_135 = arith.constant 21 : index
    %682 = memref.load %arg6[%c21_135] : memref<32xf32, #tpu.memory_space<smem>>
    %683 = vector.broadcast %682 : f32 to vector<12x12xf32>
    %684 = arith.mulf %683, %403 : vector<12x12xf32>
    %685 = arith.addf %681, %684 : vector<12x12xf32>
    %c22_136 = arith.constant 22 : index
    %686 = memref.load %arg6[%c22_136] : memref<32xf32, #tpu.memory_space<smem>>
    %687 = vector.broadcast %686 : f32 to vector<12x12xf32>
    %688 = arith.mulf %687, %479 : vector<12x12xf32>
    %689 = arith.addf %685, %688 : vector<12x12xf32>
    %c23_137 = arith.constant 23 : index
    %690 = memref.load %arg6[%c23_137] : memref<32xf32, #tpu.memory_space<smem>>
    %691 = vector.broadcast %690 : f32 to vector<12x12xf32>
    %692 = arith.mulf %691, %563 : vector<12x12xf32>
    %693 = arith.addf %689, %692 : vector<12x12xf32>
    %694 = vector.extract_strided_slice %11 {offsets = [1, 1], sizes = [12, 12], strides = [1, 1]} : vector<14x14xf32> to vector<12x12xf32>
    %c5_138 = arith.constant 5 : index
    %695 = memref.load %arg7[%c5_138] : memref<8xf32, #tpu.memory_space<smem>>
    %696 = vector.broadcast %695 : f32 to vector<12x12xf32>
    %697 = arith.addf %693, %696 : vector<12x12xf32>
    %698 = arith.addf %697, %694 : vector<12x12xf32>
    %c5_139 = arith.constant 5 : index
    %c0_140 = arith.constant 0 : index
    %c0_141 = arith.constant 0 : index
    %c0_142 = arith.constant 0 : index
    %699 = vector.load %arg10[%c5_139, %c0_140, %c0_141, %c0_142] : memref<8x1x12x12xf32, #tpu.memory_space<vmem>>, vector<1x1x12x12xf32>
    %700 = vector.shape_cast %699 : vector<1x1x12x12xf32> to vector<12x12xf32>
    %701 = vector.shape_cast %698 : vector<12x12xf32> to vector<1x1x12x12xf32>
    tpu.vector_store %arg10[%c5_139, %c0_140, %c0_141, %c0_142], %701 {strides = array<i32>} : memref<8x1x12x12xf32, #tpu.memory_space<vmem>>, vector<1x1x12x12xf32>,
    %c24_143 = arith.constant 24 : index
    %702 = memref.load %arg6[%c24_143] : memref<32xf32, #tpu.memory_space<smem>>
    %703 = vector.broadcast %702 : f32 to vector<12x12xf32>
    %704 = arith.mulf %703, %319 : vector<12x12xf32>
    %c25_144 = arith.constant 25 : index
    %705 = memref.load %arg6[%c25_144] : memref<32xf32, #tpu.memory_space<smem>>
    %706 = vector.broadcast %705 : f32 to vector<12x12xf32>
    %707 = arith.mulf %706, %403 : vector<12x12xf32>
    %708 = arith.addf %704, %707 : vector<12x12xf32>
    %c26_145 = arith.constant 26 : index
    %709 = memref.load %arg6[%c26_145] : memref<32xf32, #tpu.memory_space<smem>>
    %710 = vector.broadcast %709 : f32 to vector<12x12xf32>
    %711 = arith.mulf %710, %479 : vector<12x12xf32>
    %712 = arith.addf %708, %711 : vector<12x12xf32>
    %c27_146 = arith.constant 27 : index
    %713 = memref.load %arg6[%c27_146] : memref<32xf32, #tpu.memory_space<smem>>
    %714 = vector.broadcast %713 : f32 to vector<12x12xf32>
    %715 = arith.mulf %714, %563 : vector<12x12xf32>
    %716 = arith.addf %712, %715 : vector<12x12xf32>
    %717 = vector.extract_strided_slice %13 {offsets = [1, 1], sizes = [12, 12], strides = [1, 1]} : vector<14x14xf32> to vector<12x12xf32>
    %c6_147 = arith.constant 6 : index
    %718 = memref.load %arg7[%c6_147] : memref<8xf32, #tpu.memory_space<smem>>
    %719 = vector.broadcast %718 : f32 to vector<12x12xf32>
    %720 = arith.addf %716, %719 : vector<12x12xf32>
    %721 = arith.addf %720, %717 : vector<12x12xf32>
    %c6_148 = arith.constant 6 : index
    %c0_149 = arith.constant 0 : index
    %c0_150 = arith.constant 0 : index
    %c0_151 = arith.constant 0 : index
    %722 = vector.load %arg10[%c6_148, %c0_149, %c0_150, %c0_151] : memref<8x1x12x12xf32, #tpu.memory_space<vmem>>, vector<1x1x12x12xf32>
    %723 = vector.shape_cast %722 : vector<1x1x12x12xf32> to vector<12x12xf32>
    %724 = vector.shape_cast %721 : vector<12x12xf32> to vector<1x1x12x12xf32>
    tpu.vector_store %arg10[%c6_148, %c0_149, %c0_150, %c0_151], %724 {strides = array<i32>} : memref<8x1x12x12xf32, #tpu.memory_space<vmem>>, vector<1x1x12x12xf32>,
    %c28_152 = arith.constant 28 : index
    %725 = memref.load %arg6[%c28_152] : memref<32xf32, #tpu.memory_space<smem>>
    %726 = vector.broadcast %725 : f32 to vector<12x12xf32>
    %727 = arith.mulf %726, %319 : vector<12x12xf32>
    %c29_153 = arith.constant 29 : index
    %728 = memref.load %arg6[%c29_153] : memref<32xf32, #tpu.memory_space<smem>>
    %729 = vector.broadcast %728 : f32 to vector<12x12xf32>
    %730 = arith.mulf %729, %403 : vector<12x12xf32>
    %731 = arith.addf %727, %730 : vector<12x12xf32>
    %c30_154 = arith.constant 30 : index
    %732 = memref.load %arg6[%c30_154] : memref<32xf32, #tpu.memory_space<smem>>
    %733 = vector.broadcast %732 : f32 to vector<12x12xf32>
    %734 = arith.mulf %733, %479 : vector<12x12xf32>
    %735 = arith.addf %731, %734 : vector<12x12xf32>
    %c31_155 = arith.constant 31 : index
    %736 = memref.load %arg6[%c31_155] : memref<32xf32, #tpu.memory_space<smem>>
    %737 = vector.broadcast %736 : f32 to vector<12x12xf32>
    %738 = arith.mulf %737, %563 : vector<12x12xf32>
    %739 = arith.addf %735, %738 : vector<12x12xf32>
    %740 = vector.extract_strided_slice %15 {offsets = [1, 1], sizes = [12, 12], strides = [1, 1]} : vector<14x14xf32> to vector<12x12xf32>
    %c7_156 = arith.constant 7 : index
    %741 = memref.load %arg7[%c7_156] : memref<8xf32, #tpu.memory_space<smem>>
    %742 = vector.broadcast %741 : f32 to vector<12x12xf32>
    %743 = arith.addf %739, %742 : vector<12x12xf32>
    %744 = arith.addf %743, %740 : vector<12x12xf32>
    %c7_157 = arith.constant 7 : index
    %c0_158 = arith.constant 0 : index
    %c0_159 = arith.constant 0 : index
    %c0_160 = arith.constant 0 : index
    %745 = vector.load %arg10[%c7_157, %c0_158, %c0_159, %c0_160] : memref<8x1x12x12xf32, #tpu.memory_space<vmem>>, vector<1x1x12x12xf32>
    %746 = vector.shape_cast %745 : vector<1x1x12x12xf32> to vector<12x12xf32>
    %747 = vector.shape_cast %744 : vector<12x12xf32> to vector<1x1x12x12xf32>
    tpu.vector_store %arg10[%c7_157, %c0_158, %c0_159, %c0_160], %747 {strides = array<i32>} : memref<8x1x12x12xf32, #tpu.memory_space<vmem>>, vector<1x1x12x12xf32>,
    return
  }
  func.func @transform_0(%arg0: i32) -> (i32, i32, i32, i32) {
    %c0_i32 = arith.constant 0 : i32
    %c0_i32_0 = arith.constant 0 : i32
    %c0_i32_1 = arith.constant 0 : i32
    %c0_i32_2 = arith.constant 0 : i32
    return %c0_i32, %arg0, %c0_i32_0, %c0_i32_1 : i32, i32, i32, i32
  }
  func.func @transform_1(%arg0: i32) -> i32 {
    %c0_i32 = arith.constant 0 : i32
    %c0_i32_0 = arith.constant 0 : i32
    return %c0_i32 : i32
  }
  func.func @transform_2(%arg0: i32) -> i32 {
    %c0_i32 = arith.constant 0 : i32
    %c0_i32_0 = arith.constant 0 : i32
    return %c0_i32 : i32
  }
  func.func @transform_3(%arg0: i32) -> i32 {
    %c0_i32 = arith.constant 0 : i32
    %c0_i32_0 = arith.constant 0 : i32
    return %c0_i32 : i32
  }
  func.func @transform_4(%arg0: i32) -> i32 {
    %c0_i32 = arith.constant 0 : i32
    %c0_i32_0 = arith.constant 0 : i32
    return %c0_i32 : i32
  }
  func.func @transform_5(%arg0: i32) -> i32 {
    %c0_i32 = arith.constant 0 : i32
    %c0_i32_0 = arith.constant 0 : i32
    return %c0_i32 : i32
  }
  func.func @transform_6(%arg0: i32) -> i32 {
    %c0_i32 = arith.constant 0 : i32
    %c0_i32_0 = arith.constant 0 : i32
    return %c0_i32 : i32
  }
  func.func @transform_7(%arg0: i32) -> i32 {
    %c0_i32 = arith.constant 0 : i32
    %c0_i32_0 = arith.constant 0 : i32
    return %c0_i32 : i32
  }
  func.func @transform_8(%arg0: i32) -> i32 {
    %c0_i32 = arith.constant 0 : i32
    %c0_i32_0 = arith.constant 0 : i32
    return %c0_i32 : i32
  }
  func.func @transform_9(%arg0: i32) -> (i32, i32, i32, i32) {
    %c0_i32 = arith.constant 0 : i32
    %c0_i32_0 = arith.constant 0 : i32
    %c0_i32_1 = arith.constant 0 : i32
    %c0_i32_2 = arith.constant 0 : i32
    return %c0_i32, %arg0, %c0_i32_0, %c0_i32_1 : i32, i32, i32, i32
  }
}

module attributes {stable_mosaic.version = 11 : i64} {
  func.func @kernel(%arg0: i32, %arg1: memref<8x200xf32, #tpu.memory_space<vmem>>, %arg2: memref<256x8xf32, #tpu.memory_space<vmem>>, %arg3: memref<256x1xf32, #tpu.memory_space<vmem>>, %arg4: memref<4x256xf32, #tpu.memory_space<vmem>>, %arg5: memref<4x1xf32, #tpu.memory_space<vmem>>, %arg6: memref<4x200xf32, #tpu.memory_space<vmem>>) attributes {dimension_semantics = [#tpu.dimension_semantics<parallel>], iteration_bounds = array<i64: 1>, scalar_prefetch = 0 : i64, scratch_operands = 0 : i64, tpu.core_type = #tpu.core_type<tc>, window_params = [{transform_indices = @transform_0, window_bounds = array<i64: 8, 200>}, {pipeline_mode = #tpu.pipeline_mode<synchronous>, transform_indices = @transform_1, window_bounds = array<i64: 256, 8>}, {pipeline_mode = #tpu.pipeline_mode<synchronous>, transform_indices = @transform_2, window_bounds = array<i64: 256, 1>}, {pipeline_mode = #tpu.pipeline_mode<synchronous>, transform_indices = @transform_3, window_bounds = array<i64: 4, 256>}, {pipeline_mode = #tpu.pipeline_mode<synchronous>, transform_indices = @transform_4, window_bounds = array<i64: 4, 1>}, {transform_indices = @transform_5, window_bounds = array<i64: 4, 200>}]} {
    %c0 = arith.constant 0 : index
    %c0_0 = arith.constant 0 : index
    %0 = vector.load %arg2[%c0, %c0_0] : memref<256x8xf32, #tpu.memory_space<vmem>>, vector<256x8xf32>
    %c0_1 = arith.constant 0 : index
    %c0_2 = arith.constant 0 : index
    %1 = vector.load %arg1[%c0_1, %c0_2] : memref<8x200xf32, #tpu.memory_space<vmem>>, vector<8x200xf32>
    %cst = arith.constant dense<0.000000e+00> : vector<256x200xf32>
    %2 = tpu.matmul %0, %1, %cst {dimension_numbers = #tpu.dot_dimension_numbers<[1], [0], [0], [1], [0, 0, 1, 1], [], []>} : vector<256x8xf32>, vector<8x200xf32>, vector<256x200xf32> -> vector<256x200xf32>
    %c0_3 = arith.constant 0 : index
    %c0_4 = arith.constant 0 : index
    %3 = vector.load %arg3[%c0_3, %c0_4] : memref<256x1xf32, #tpu.memory_space<vmem>>, vector<256x1xf32>
    %4 = vector.broadcast %3 : vector<256x1xf32> to vector<256x200xf32>
    %5 = arith.addf %2, %4 : vector<256x200xf32>
    %cst_5 = arith.constant 0.000000e+00 : f32
    %6 = vector.broadcast %cst_5 : f32 to vector<256x200xf32>
    %7 = arith.maximumf %5, %6 : vector<256x200xf32>
    %c0_6 = arith.constant 0 : index
    %c0_7 = arith.constant 0 : index
    %8 = vector.load %arg4[%c0_6, %c0_7] : memref<4x256xf32, #tpu.memory_space<vmem>>, vector<4x256xf32>
    %cst_8 = arith.constant dense<0.000000e+00> : vector<4x200xf32>
    %9 = tpu.matmul %8, %7, %cst_8 {dimension_numbers = #tpu.dot_dimension_numbers<[1], [0], [0], [1], [0, 0, 1, 1], [], []>} : vector<4x256xf32>, vector<256x200xf32>, vector<4x200xf32> -> vector<4x200xf32>
    %c0_9 = arith.constant 0 : index
    %c0_10 = arith.constant 0 : index
    %10 = vector.load %arg5[%c0_9, %c0_10] : memref<4x1xf32, #tpu.memory_space<vmem>>, vector<4x1xf32>
    %11 = vector.broadcast %10 : vector<4x1xf32> to vector<4x200xf32>
    %12 = arith.addf %9, %11 : vector<4x200xf32>
    %c0_11 = arith.constant 0 : index
    %c0_12 = arith.constant 0 : index
    %13 = vector.load %arg6[%c0_11, %c0_12] : memref<4x200xf32, #tpu.memory_space<vmem>>, vector<4x200xf32>
    tpu.vector_store %arg6[%c0_11, %c0_12], %12 {strides = array<i32>} : memref<4x200xf32, #tpu.memory_space<vmem>>, vector<4x200xf32>,
    return
  }
  func.func @transform_0(%arg0: i32) -> (i32, i32) {
    %c0_i32 = arith.constant 0 : i32
    %c0_i32_0 = arith.constant 0 : i32
    return %c0_i32, %arg0 : i32, i32
  }
  func.func @transform_1(%arg0: i32) -> (i32, i32) {
    %c0_i32 = arith.constant 0 : i32
    %c0_i32_0 = arith.constant 0 : i32
    %c0_i32_1 = arith.constant 0 : i32
    return %c0_i32, %c0_i32_0 : i32, i32
  }
  func.func @transform_2(%arg0: i32) -> (i32, i32) {
    %c0_i32 = arith.constant 0 : i32
    %c0_i32_0 = arith.constant 0 : i32
    %c0_i32_1 = arith.constant 0 : i32
    return %c0_i32, %c0_i32_0 : i32, i32
  }
  func.func @transform_3(%arg0: i32) -> (i32, i32) {
    %c0_i32 = arith.constant 0 : i32
    %c0_i32_0 = arith.constant 0 : i32
    %c0_i32_1 = arith.constant 0 : i32
    return %c0_i32, %c0_i32_0 : i32, i32
  }
  func.func @transform_4(%arg0: i32) -> (i32, i32) {
    %c0_i32 = arith.constant 0 : i32
    %c0_i32_0 = arith.constant 0 : i32
    %c0_i32_1 = arith.constant 0 : i32
    return %c0_i32, %c0_i32_0 : i32, i32
  }
  func.func @transform_5(%arg0: i32) -> (i32, i32) {
    %c0_i32 = arith.constant 0 : i32
    %c0_i32_0 = arith.constant 0 : i32
    return %c0_i32, %arg0 : i32, i32
  }
}

</mosaic_0001>

<bundles_post_ra>
// kernel: mul.0
= control target key start
LH: loop header
LB: loop body
LE: loop exit
PB: predicated region body
PF: predicated region fallthrough
CT: control target
= control target key end

     0   :  { %s34_s0 = inlined_call_operand.vmem [shape: f32[32], index: 0, kind: input, shape index: {}]   ;;  %s35_s1 = inlined_call_operand.vmem [shape: f32[32], index: 1, kind: input, shape index: {}]   ;;  %s36_s2 = inlined_call_operand.vmem [shape: f32[32], index: 2, kind: output, shape index: {}]  }
   0x1   :  { %v3_v0 = vld [vmem:[%s34_s0] sm:$0x1] }
   0x2   :  { %v4_v1 = vld [vmem:[%s35_s1] sm:$0x1] }
   0x3   :  { %v7_v2 = vmul.f32 %v4_v1, %v3_v0 }
   0x5   :  { %9 = vst [vmem:[%s36_s2] sm:$0x1] %v7_v2 }

// kernel: _lambda_.4
= control target key start
LH: loop header
LB: loop body
LE: loop exit
PB: predicated region body
PF: predicated region fallthrough
CT: control target
= control target key end

     0   :  { %8 = vsyncpa [#allocation4], 0  ;;  %s2082_s0 = inlined_call_operand.vmem [shape: f32[2,2,16,16], index: 0, kind: input, shape index: {}]   ;;  %s2083_s1 = inlined_call_operand.vmem [shape: f32[144], index: 1, kind: input, shape index: {}]   ;;  %s2084_s2 = inlined_call_operand.vmem [shape: f32[8], index: 2, kind: input, shape index: {}]   ;;  %s2085_s3 = inlined_call_operand.vmem [shape: f32[8,2,14,14], index: 3, kind: output, shape index: {}]  }
   0x1   :  { %9 = vsyncpa [#allocation6], 0  ;;  %s1480_s12 = smov 0   ;;  %s1482_s13 = smov 0  }
   0x2   :  { %s1484_s14 = smov 0  }
   0x3 LB: > { %s1496_s15 = sadd.s32 4294967295, %s1454_s14   ;;  %s1499_s16 = sadd.s32 1, %s1454_s14   ;;  %s1454_s14 = sphi %s1484_s14, %s2091_s14   ;;  %s1450_s13 = sphi %s1482_s13, %s2090_s13   ;;  %s1446_s12 = sphi %s1480_s12, %s2089_s12  }
   0x4   : > { %s19_s17 = ssub.s32 %s1454_s14, %s1499_s16  ;;  %s22_s18 = sadd.s32 1, %s1450_s13 }
   0x5   : > { %p20_p0 = scmp.eq.s32.totalorder %s19_s17, 0  ;;  %p29_p1 = scmp.ne.s32.totalorder %s1450_s13, %s1446_s12 }
   0x6   : > { %p30_p2 = scmp.eq.s32.totalorder %s1454_s14, 0  ;;  %p101_p3 = scmp.eq.s32.totalorder %s1496_s15, 1 }
   0x7   : > { %s1509_s19 = scalar_select %p20_p0, %s1450_s13, %s22_s18  }
   0x8   : > { %p1511_p4 = por %p30_p2, %p29_p1  ;;  %p1515_p5 = por %p101_p3, %p29_p1 }
   0x9   : > { %p1238_p6 = scmp.ge.s32.totalorder %s1454_s14, 1  ;;  %p114_p7 = scmp.lt.s32.totalorder %s1454_s14, 3 }
   0xa   : > { %p1358_p8 = scmp.eq.s32.totalorder %s1496_s15, 0  ;;  %s126_s25 = sshll.u32 %s2083_s1, 4  ;;  %s127_s25 = int_to_ptr.vmem [resolvable:$true] %s126_s25 }
   0xb   : > { %p1522_p9 = pnand %p1238_p6, %p114_p7  ;;  %s136_s28 = sshll.u32 %s2084_s2, 4  ;;  %s137_s28 = int_to_ptr.vmem [resolvable:$true] %s136_s28 }
   0xc   : > { %s1456_s29 = smov [#allocation3]   ;;  %s1457_s30 = smov [#allocation5]  }
   0xd   : > { %p1351_p10 = pneg %p1522_p9  ;;  %p1241_p12 = scmp.ge.s32.totalorder %s1454_s14, 2 }
   0xf   : > { %p1352_p11 = pnand %p1358_p8, %p1351_p10  ;;  %143 = sbr.rel (%p1241_p12) target bundleno = 28 (0x1c), region = 24 }
  0x11   : > { %1354 = dma.vmem_to_smem (!%p1352_p11), %s127_s25, 32, %s1456_s29, [#allocation4]  }
  0x12   : > { %1357 = dma.vmem_to_smem (!%p1352_p11), %s137_s28, 16, %s1457_s30, [#allocation6]  }
  0x14   : > { %146 = sbr.rel (!%p1511_p4) target bundleno = 28 (0x1c), region = 28  ;;  %s148_s4 = sand.u32 (%p1511_p4), 1, %s1450_s13  }
  0x15   : > { %s1341_s5 = sshll.u32 (%p1511_p4), %s1454_s14, 4  ;;  %s1242_s6 = sshll.u32 (%p1511_p4), %s148_s4, 5 }
  0x16   : > { %s153_s9 = scalar_lea.vmem (%p1511_p4), %s2082_s0, %s1341_s5  ;;  %s150_s10 = scalar_lea.vmem (%p1511_p4), [#allocation2], %s1242_s6 }
  0x17   : > { %v188_v0 = vld [vmem:[%s153_s9] sm:$0xff] (%p1511_p4)  ;;  %v190_v1 = vld [vmem:[%s153_s9 + $0x8] sm:$0xff] (%p1511_p4) }
  0x18   : > { %v192_v2 = vld [vmem:[%s153_s9 + $0x20] sm:$0xff] (%p1511_p4)  ;;  %189 = vst [vmem:[%s150_s10] sm:$0xff] (%p1511_p4), %v188_v0  ;;  %v194_v3 = vld [vmem:[%s153_s9 + $0x28] sm:$0xff] (%p1511_p4) }
  0x19   : > { %191 = vst [vmem:[%s150_s10 + $0x8] sm:$0xff] %v190_v1 }
  0x1a   : > { %193 = vst [vmem:[%s150_s10 + $0x10] sm:$0xff] %v192_v2 }
  0x1b   : > { %195 = vst [vmem:[%s150_s10 + $0x18] sm:$0xff] %v194_v3 }
  0x1c PF: > { %204 = sbr.rel (%p1522_p9) target bundleno = 349 (0x15d), region = 66  ;;  %s207_s11 = sand.u32 (!%p1522_p9), 1, %s1446_s12  }
  0x1d   : > { %s1246_s14 = sshll.u32 (!%p1522_p9), %s207_s11, 5 }
  0x1e   : > { %s1549_s17 = scalar_lea.vmem (!%p1522_p9), [#allocation2], %s1246_s14 }
  0x21   : > { %1437 = dma.done.wait (%p1358_p8), [#allocation4], 32  }
  0x22   : > { %1439 = vsyncadd (%p1358_p8), [#allocation4], 4294967264 }
  0x23   : > { %1441 = dma.done.wait (%p1358_p8), [#allocation6], 16  }
  0x24   : > { %1443 = vsyncadd (%p1358_p8), [#allocation6], 4294967280 }
  0x25   : > { %223 = sfence }
  0x26   : > { %s1256_s18 = sld [smem:[#allocation3 + $0xa]]  ;;  %v1560_v4 = vld [vmem:[%s1549_s17 + $0x10] sm:$0xff]  ;;  %v1563_v5 = vld [vmem:[%s1549_s17] sm:$0xff]  ;;  %s1458_s23 = smov 127   ;;  %v1570_v12 = vld [vmem:[%s1549_s17 + $0x18] sm:$0xff]  ;;  %vm283_vm0 = vcmask 1046528  }
  0x27   : > { %s1253_s20 = sld [smem:[#allocation3 + $0x2]]  ;;  %s1459_s24 = smov 126   ;;  %v1574_v13 = vld [vmem:[%s1549_s17 + $0x8] sm:$0xff]  ;;  %vm344_vm1 = vcmask 113664   ;;  %vm346_vm2 = vcmask 111616  }
  0x28   : > { %s1252_s22 = sld [smem:[#allocation3 + $0x1]] }
  0x29   : > { %s1260_s25 = sld [smem:[#allocation3 + $0x13]] }
  0x2a   : > { %s1257_s26 = sld [smem:[#allocation3 + $0xb]] }
  0x2b   : > { %s1261_s27 = sld [smem:[#allocation3 + $0x14]] }
  0x2c   : > { %v298_v6 = vstv %s1256_s18  ;;  %s1265_s28 = sld [smem:[#allocation3 + $0x1d]] }
  0x2d   : > { %v299_v7 = vmul.f32 %v1560_v4, %v298_v6  ;;  %v264_v8 = vstv %s1253_s20  ;;  %v300_v14 = vmul.f32 %v1570_v12, %v298_v6  ;;  %s1264_s29 = sld [smem:[#allocation3 + $0x1c]] }
  0x2e   : > { %v265_v9 = vmul.f32 %v264_v8, %v1563_v5  ;;  %v250_v10 = vstv %s1252_s22  ;;  %v266_v15 = vmul.f32 %v264_v8, %v1574_v13  ;;  %s1271_s30 = sld [smem:[#allocation3 + $0x25]] }
  0x2f   : > { %303 = vrot.lane.b32.xlu2 %v299_v7, %s1458_s23  ;;  %v251_v11 = vmul.f32 %v250_v10, %v1563_v5  ;;  %v252_v16 = vmul.f32 %v250_v10, %v1574_v13  ;;  %v353_v17 = vstv %s1260_s25  ;;  %s1275_s4 = sld [smem:[#allocation3 + $0x2e]] }
  0x30   : > { %269 = vrot.lane.b32.xlu1 %v265_v9, %s1459_s24  ;;  %v312_v18 = vstv %s1257_s26  ;;  %v354_v19 = vmul.f32 %v353_v17, %v1563_v5  ;;  %v355_v25 = vmul.f32 %v353_v17, %v1574_v13  ;;  %s1272_s5 = sld [smem:[#allocation3 + $0x26]] }
  0x31   : > { %255 = vrot.lane.b32.xlu0 %v251_v11, %s1458_s23  ;;  %v314_v20 = vmul.f32 %v1570_v12, %v312_v18  ;;  %v313_v21 = vmul.f32 %v1560_v4, %v312_v18  ;;  %v367_v22 = vstv %s1261_s27  ;;  %s1276_s6 = sld [smem:[#allocation3 + $0x2f]] }
  0x32   : > { %v369_v23 = vmul.f32 %v367_v22, %v1574_v13  ;;  %v368_v24 = vmul.f32 %v367_v22, %v1563_v5  ;;  %v414_v26 = vstv %s1265_s28  ;;  %s1283_s7 = sld [smem:[#allocation3 + $0x38]] }
  0x33   : > { %v400_v27 = vstv %s1264_s29  ;;  %v415_v28 = vmul.f32 %v1560_v4, %v414_v26  ;;  %v416_v34 = vmul.f32 %v1570_v12, %v414_v26  ;;  %s1282_s8 = sld [smem:[#allocation3 + $0x37]] }
  0x34   : > { %v402_v29 = vmul.f32 %v1570_v12, %v400_v27  ;;  %v401_v30 = vmul.f32 %v1560_v4, %v400_v27  ;;  %v454_v31 = vstv %s1271_s30  ;;  %s1286_s9 = sld [smem:[#allocation3 + $0x40]] }
  0x35   : > { %v456_v32 = vmul.f32 %v454_v31, %v1574_v13  ;;  %v455_v33 = vmul.f32 %v454_v31, %v1563_v5  ;;  %v501_v35 = vstv %s1275_s4  ;;  %s1293_s10 = sld [smem:[#allocation3 + $0x49]] }
  0x36   : > { %v468_v36 = vstv %s1272_s5  ;;  %v502_v37 = vmul.f32 %v1560_v4, %v501_v35  ;;  %v503_v43 = vmul.f32 %v1570_v12, %v501_v35  ;;  %s1287_s14 = sld [smem:[#allocation3 + $0x41]] }
  0x37   : > { %305 = vrot.lane.b32.xlu2 %v300_v14, %s1458_s23  ;;  %v470_v38 = vmul.f32 %v468_v36, %v1574_v13  ;;  %v469_v39 = vmul.f32 %v468_v36, %v1563_v5  ;;  %v515_v40 = vstv %s1276_s6  ;;  %s1294_s18 = sld [smem:[#allocation3 + $0x4a]] }
  0x38   : > { %271 = vrot.lane.b32.xlu1 %v266_v15, %s1459_s24  ;;  %v517_v41 = vmul.f32 %v1570_v12, %v515_v40  ;;  %v516_v42 = vmul.f32 %v1560_v4, %v515_v40  ;;  %v569_v44 = vstv %s1283_s7  ;;  %s1298_s20 = sld [smem:[#allocation3 + $0x53]] }
  0x39   : > { %257 = vrot.lane.b32.xlu0 %v252_v16, %s1458_s23  ;;  %v555_v45 = vstv %s1282_s8  ;;  %v570_v46 = vmul.f32 %v569_v44, %v1563_v5  ;;  %v571_v52 = vmul.f32 %v569_v44, %v1574_v13  ;;  %s1297_s22 = sld [smem:[#allocation3 + $0x52]] }
  0x3a   : > { %v557_v47 = vmul.f32 %v555_v45, %v1574_v13  ;;  %v556_v48 = vmul.f32 %v555_v45, %v1563_v5  ;;  %v602_v49 = vstv %s1286_s9  ;;  %s1304_s25 = sld [smem:[#allocation3 + $0x5b]] }
  0x3b   : > { %v604_v50 = vmul.f32 %v1570_v12, %v602_v49  ;;  %v603_v51 = vmul.f32 %v1560_v4, %v602_v49  ;;  %v656_v53 = vstv %s1293_s10  ;;  %s1650_s26 = sld [smem:[#allocation3 + $0x64]] }
  0x3c   : > { %v616_v54 = vstv %s1287_s14  ;;  %v657_v55 = vmul.f32 %v656_v53, %v1563_v5  ;;  %v658_v61 = vmul.f32 %v656_v53, %v1574_v13  ;;  %s1305_s27 = sld [smem:[#allocation3 + $0x5c]] }
  0x3d   : > { %v618_v56 = vmul.f32 %v1570_v12, %v616_v54  ;;  %v617_v57 = vmul.f32 %v1560_v4, %v616_v54  ;;  %v670_v58 = vstv %s1294_s18  ;;  %s1254_s28 = sld [smem:[#allocation3 + $0x3]] }
  0x3e   : > { %v672_v59 = vmul.f32 %v670_v58, %v1574_v13  ;;  %v671_v60 = vmul.f32 %v670_v58, %v1563_v5  ;;  %v717_v62 = vstv %s1298_s20  ;;  %s1658_s29 = sld [smem:[#allocation3]] }
  0x3f   : > { %358 = vrot.lane.b32.xlu2 %v354_v19, %s1458_s23  ;;  %v703_v0 = vstv %s1297_s22  ;;  %v718_v1 = vmul.f32 %v1560_v4, %v717_v62  ;;  %v719_v10 = vmul.f32 %v1570_v12, %v717_v62  ;;  %s1663_s30 = sld [smem:[#allocation3 + $0x7f]] }
  0x40   : > { %319 = vrot.lane.b32.xlu1 %v314_v20, %s1459_s24  ;;  %v705_v2 = vmul.f32 %v1570_v12, %v703_v0  ;;  %v704_v3 = vmul.f32 %v1560_v4, %v703_v0  ;;  %v757_v6 = vstv %s1304_s25  ;;  %s1315_s4 = sld [smem:[#allocation3 + $0x6d]] }
  0x41   : > { %317 = vrot.lane.b32.xlu0 %v313_v21, %s1459_s24  ;;  %v759_v8 = vmul.f32 %v757_v6, %v1574_v13  ;;  %v758_v9 = vmul.f32 %v757_v6, %v1563_v5  ;;  %v804_v11 = vstv %s1650_s26  ;;  %s1674_s5 = sld [smem:[#allocation3 + $0x6e]] }
  0x42   : > { %v771_v15 = vstv %s1305_s27  ;;  %v805_v16 = vmul.f32 %v1560_v4, %v804_v11  ;;  %s1679_s6 = sld [smem:[#allocation3 + $0x9]]  ;;  %s1249_s27 = sshll.u32 %s207_s11, 7 }
  0x43   : > { %v773_v17 = vmul.f32 %v771_v15, %v1574_v13  ;;  %v278_v18 = vstv %s1254_s28  ;;  %v772_v19 = vmul.f32 %v771_v15, %v1563_v5  ;;  %s1684_s7 = sld [smem:[#allocation3 + $0xc]]  ;;  %s1765_s11 = scalar_lea.vmem [#allocation7], %s1249_s27 }
  0x44   : > { %v246_v20 = vstv %s1658_s29  ;;  %v279_v21 = vmul.f32 %v278_v18, %v1563_v5  ;;  %v280_v22 = vmul.f32 %v278_v18, %v1574_v13  ;;  %s1695_s8 = sld [smem:[#allocation3 + $0x15]] }
  0x45   : > { %s1697_s9 = sld [smem:[#allocation3 + $0x12]] }
  0x46   : > { %v858_v26 = vstv %s1315_s4  ;;  %s1706_s10 = sld [smem:[#allocation3 + $0x80]] }
  0x47   : > { %374 = vrot.lane.b32.xlu2 %v369_v23, %s1459_s24  ;;  %v247_v23 = vmul.f32 %v246_v20, %v1563_v5  ;;  %s1714_s14 = sld [smem:[#allocation5]] }
  0x48   : > { %372 = vrot.lane.b32.xlu1 %v368_v24, %s1459_s24  ;;  %v959_v24 = vstv %s1663_s30  ;;  %s1719_s18 = sld [smem:[#allocation3 + $0x88]] }
  0x49   : > { %360 = vrot.lane.b32.xlu0 %v355_v25, %s1458_s23  ;;  %v960_v31 = vmul.f32 %v959_v24, %v1563_v5  ;;  %v326_v40 = vstv %s1684_s7  ;;  %s1723_s20 = sld [smem:[#allocation3 + $0x76]] }
  0x4a   : > { %s1729_s22 = sld [smem:[#allocation3 + $0x1b]] }
  0x4b   : > { %v349_v58 = vstv %s1697_s9  ;;  %s1736_s25 = sld [smem:[#allocation3 + $0x1e]] }
  0x4c   : > { %v350_v6 = vmul.f32 %v349_v58, %v1563_v5  ;;  %s1755_s12 = sld [smem:[#allocation3 + $0x65]] }
  0x4d   : > { %s1771_s26 = sld [smem:[#allocation3 + $0x24]] }
  0x4e   : > { %s1779_s28 = sld [smem:[#allocation5 + $0x1]] }
  0x4f   : > { %419 = vrot.lane.b32.xlu2 %v415_v28, %s1459_s24  ;;  %v284_v28 = vrot.slane %v279_v21, 1  ;;  %s1782_s29 = sld [smem:[#allocation3 + $0x27]] }
  0x50   : > { %407 = vrot.lane.b32.xlu1 %v402_v29, %s1458_s23  ;;  %v285_v29 = vrot.slane %v280_v22, 1  ;;  %s1786_s30 = sld [smem:[#allocation3 + $0x89]] }
  0x51   : > { %405 = vrot.lane.b32.xlu0 %v401_v30, %s1458_s23  ;;  %s1791_s4 = sld [smem:[#allocation3 + $0x77]] }
  0x52   : > { %v286_v36 = vsel %vm283_vm0, %v284_v28, %v285_v29  ;;  %v905_v28 = vstv %s1723_s20  ;;  %s1284_s7 = sld [smem:[#allocation3 + $0x39]] }
  0x53   : > { %s1288_s9 = sld [smem:[#allocation3 + $0x42]] }
  0x54   : > { %s1876_s20 = sld [smem:[#allocation3 + $0x51]] }
  0x55   : > { %s1902_s27 = sld [smem:[#allocation3 + $0x5a]] }
  0x57   : > { %461 = vrot.lane.b32.xlu2 %v456_v32, %s1458_s23 }
  0x58   : > { %459 = vrot.lane.b32.xlu1 %v455_v33, %s1458_s23  ;;  %v860_v33 = vmul.f32 %v858_v26, %v1574_v13 }
  0x59   : > { %421 = vrot.lane.b32.xlu0 %v416_v34, %s1459_s24  ;;  %v859_v34 = vmul.f32 %v858_v26, %v1563_v5  ;;  %v1006_v26 = vstv %s1719_s18  ;;  %s1289_s18 = sld [smem:[#allocation5 + $0x3]] }
  0x5f   : > { %506 = vrot.lane.b32.xlu2 %v502_v37, %s1458_s23  ;;  %v292_v37 = vstv %s1679_s6  ;;  %s1811_s6 = sld [smem:[#allocation3 + $0x2d]] }
  0x60   : > { %475 = vrot.lane.b32.xlu1 %v470_v38, %s1459_s24  ;;  %v248_v38 = vmul.f32 %v246_v20, %v1574_v13  ;;  %v293_v44 = vmul.f32 %v1560_v4, %v292_v37  ;;  %v294_v53 = vmul.f32 %v1570_v12, %v292_v37 }
  0x61   : > { %473 = vrot.lane.b32.xlu0 %v469_v39, %s1459_s24  ;;  %v872_v39 = vstv %s1674_s5  ;;  %s1804_s5 = sld [smem:[#allocation3 + $0x30]] }
  0x67   : > { %522 = vrot.lane.b32.xlu2 %v517_v41, %s1459_s24 }
  0x68   : > { %520 = vrot.lane.b32.xlu1 %v516_v42, %s1459_s24 }
  0x69   : > { %508 = vrot.lane.b32.xlu0 %v503_v43, %s1458_s23 }
  0x6f   : > { %574 = vrot.lane.b32.xlu2 %v570_v46, %s1459_s24  ;;  %v874_v46 = vmul.f32 %v872_v39, %v1574_v13 }
  0x70   : > { %562 = vrot.lane.b32.xlu1 %v557_v47, %s1458_s23  ;;  %v327_v47 = vmul.f32 %v1560_v4, %v326_v40 }
  0x71   : > { %560 = vrot.lane.b32.xlu0 %v556_v48, %s1458_s23  ;;  %v328_v48 = vmul.f32 %v1570_v12, %v326_v40 }
  0x77   : > { %609 = vrot.lane.b32.xlu2 %v604_v50, %s1458_s23  ;;  %v873_v50 = vmul.f32 %v872_v39, %v1563_v5  ;;  %v907_v39 = vmul.f32 %v1570_v12, %v905_v28 }
  0x78   : > { %607 = vrot.lane.b32.xlu1 %v603_v51, %s1458_s23  ;;  %v961_v51 = vmul.f32 %v959_v24, %v1574_v13  ;;  %v351_v24 = vmul.f32 %v349_v58, %v1574_v13 }
  0x79   : > { %576 = vrot.lane.b32.xlu0 %v571_v52, %s1459_s24 }
  0x7f   : > { %661 = vrot.lane.b32.xlu2 %v657_v55, %s1458_s23  ;;  %v331_v55 = vrot.slane %v327_v47, 1 }
  0x80   : > { %623 = vrot.lane.b32.xlu1 %v618_v56, %s1459_s24  ;;  %v332_v56 = vrot.slane %v328_v48, 1  ;;  %v818_v48 = vstv %s1755_s12  ;;  %s1907_s12 = sld [smem:[#allocation3 + $0x5d]] }
  0x81   : > { %621 = vrot.lane.b32.xlu0 %v617_v57, %s1459_s24  ;;  %v381_v57 = vstv %s1695_s8  ;;  %s1840_s8 = sld [smem:[#allocation3 + $0x36]] }
  0x87   : > { %677 = vrot.lane.b32.xlu2 %v672_v59, %s1459_s24 }
  0x88   : > { %675 = vrot.lane.b32.xlu1 %v671_v60, %s1459_s24 }
  0x89   : > { %663 = vrot.lane.b32.xlu0 %v658_v61, %s1458_s23  ;;  %v1643_v63 = vpop.permute.xlu2 %303  ;;  %v973_v61 = vstv %s1706_s10  ;;  %s1295_s10 = sld [smem:[#allocation3 + $0x4b]] }
  0x8a   : > { %v974_v18 = vmul.f32 %v973_v61, %v1563_v5 }
  0x8f   : > { %722 = vrot.lane.b32.xlu2 %v718_v1, %s1459_s24 }
  0x90   : > { %710 = vrot.lane.b32.xlu1 %v705_v2, %s1458_s23  ;;  %v382_v2 = vmul.f32 %v381_v57, %v1563_v5 }
  0x91   : > { %708 = vrot.lane.b32.xlu0 %v704_v3, %s1458_s23  ;;  %v1653_v7 = vpop.permute.xlu2 %305  ;;  %v1734_v3 = vmul.f32 %v381_v57, %v1574_v13  ;;  %v819_v57 = vmul.f32 %v1560_v4, %v818_v48 }
  0x92   : > { %v386_v21 = vrot.slane %v382_v2, 1  ;;  %v482_v2 = vstv %s1782_s29  ;;  %s1328_s29 = sld [smem:[#allocation3 + $0x81]] }
  0x93   : > { %v387_v22 = vrot.slane %v1734_v3, 1  ;;  %v1020_v3 = vstv %s1786_s30  ;;  %s1931_s30 = sld [smem:[#allocation3 + $0x7e]] }
  0x97   : > { %764 = vrot.lane.b32.xlu2 %v759_v8, %s1458_s23  ;;  %v333_v8 = vsel %vm283_vm0, %v331_v55, %v332_v56  ;;  %v820_v55 = vmul.f32 %v1570_v12, %v818_v48 }
  0x98   : > { %762 = vrot.lane.b32.xlu1 %v758_v9, %s1458_s23 }
  0x99   : > { %724 = vrot.lane.b32.xlu0 %v719_v10, %s1459_s24  ;;  %v1666_v14 = vpop.permute.xlu2 %358  ;;  %v806_v10 = vmul.f32 %v1570_v12, %v804_v11 }
  0x9a   : > { %v364_v11 = vadd.f32 %v1666_v14, %v350_v6  ;;  %v450_v6 = vstv %s1771_s26  ;;  %s1916_s26 = sld [smem:[#allocation3 + $0x63]] }
  0x9f   : > { %809 = vrot.lane.b32.xlu2 %v805_v16, %s1458_s23 }
  0xa0   : > { %778 = vrot.lane.b32.xlu1 %v773_v17, %s1459_s24  ;;  %v339_v17 = vstv %s1714_s14  ;;  %s1865_s14 = sld [smem:[#allocation3 + $0x48]] }
  0xa1   : > { %776 = vrot.lane.b32.xlu0 %v772_v19, %s1459_s24  ;;  %v1687_v25 = vpop.permute.xlu2 %374 }
  0xa2   : > { %v270_v27 = vpop.permute.xlu1 %269 }
  0xa3   : > { %v256_v30 = vpop.permute.xlu0 %255 }
  0xa4   : > { %v261_v32 = vadd.f32 %v256_v30, %v247_v23 }
  0xa6   : > { %v275_v35 = vadd.f32 %v270_v27, %v261_v32 }
  0xa7   : > { %964 = vrot.lane.b32.xlu2 %v960_v31, %s1458_s23  ;;  %v388_v31 = vsel %vm283_vm0, %v386_v21, %v387_v22 }
  0xa8   : > { %865 = vrot.lane.b32.xlu1 %v860_v33, %s1458_s23  ;;  %v289_v42 = vadd.f32 %v286_v36, %v275_v35  ;;  %v428_v33 = vstv %s1736_s25  ;;  %v1007_v36 = vmul.f32 %v1560_v4, %v1006_v26  ;;  %s1897_s25 = sld [smem:[#allocation5 + $0x4]] }
  0xa9   : > { %863 = vrot.lane.b32.xlu0 %v859_v34, %s1458_s23  ;;  %v1704_v41 = vpop.permute.xlu2 %419 }
  0xaa   : > { %v272_v43 = vpop.permute.xlu1 %271  ;;  %v295_v54 = vadd.f32 %v293_v44, %v289_v42  ;;  %v429_v44 = vmul.f32 %v1560_v4, %v428_v33 }
  0xab   : > { %v258_v45 = vpop.permute.xlu0 %257 }
  0xac   : > { %v262_v49 = vadd.f32 %v258_v45, %v248_v38  ;;  %v309_v1 = vadd.f32 %v1643_v63, %v295_v54  ;;  %v975_v63 = vmul.f32 %v973_v61, %v1574_v13  ;;  %v430_v45 = vmul.f32 %v1570_v12, %v428_v33 }
  0xae   : > { %v276_v52 = vadd.f32 %v272_v43, %v262_v49  ;;  %v906_v43 = vmul.f32 %v1560_v4, %v905_v28 }
  0xaf   : > { %879 = vrot.lane.b32.xlu2 %v874_v46, %s1459_s24 }
  0xb0   : > { %v290_v59 = vadd.f32 %v285_v29, %v276_v52  ;;  %877 = vrot.lane.b32.xlu1 %v873_v50, %s1459_s24  ;;  %v394_v29 = vstv %s1729_s22  ;;  %v433_v50 = vrot.slane %v429_v44, 1  ;;  %v1022_v44 = vmul.f32 %v1570_v12, %v1020_v3  ;;  %s1299_s22 = sld [smem:[#allocation3 + $0x54]] }
  0xb1   : > { %966 = vrot.lane.b32.xlu0 %v961_v51, %s1458_s23  ;;  %v1726_v60 = vpop.permute.xlu2 %461  ;;  %v395_v40 = vmul.f32 %v1560_v4, %v394_v29  ;;  %v434_v51 = vrot.slane %v430_v45, 1 }
  0xb2   : > { %v320_v62 = vpop.permute.xlu1 %319  ;;  %v296_v0 = vadd.f32 %v294_v53, %v290_v59  ;;  %v1008_v59 = vmul.f32 %v1570_v12, %v1006_v26 }
  0xb3   : > { %v318_v9 = vpop.permute.xlu0 %317  ;;  %v435_v58 = vsel %vm283_vm0, %v433_v50, %v434_v51 }
  0xb4   : > { %v310_v15 = vadd.f32 %v1653_v7, %v296_v0  ;;  %v323_v16 = vadd.f32 %v318_v9, %v309_v1  ;;  %v441_v0 = vstv %s1779_s28  ;;  %v919_v9 = vstv %s1791_s4  ;;  %s1919_s28 = sld [smem:[#allocation3 + $0x66]] }
  0xb5   : > { %s1937_s4 = sld [smem:[#allocation5 + $0x5]] }
  0xb6   : > { %v324_v19 = vadd.f32 %v320_v62, %v310_v15  ;;  %v336_v20 = vadd.f32 %v333_v8, %v323_v16  ;;  %v452_v16 = vmul.f32 %v450_v6, %v1574_v13 }
  0xb7   : > { %811 = vrot.lane.b32.xlu2 %v806_v10, %s1458_s23 }
  0xb8   : > { %v337_v7 = vadd.f32 %v332_v56, %v324_v19  ;;  %v340_v23 = vadd.f32 %v339_v17, %v336_v20  ;;  %980 = vrot.lane.b32.xlu1 %v975_v63, %s1459_s24  ;;  %v1021_v19 = vmul.f32 %v1560_v4, %v1020_v3  ;;  %v451_v20 = vmul.f32 %v450_v6, %v1563_v5 }
  0xb9   : > { %978 = vrot.lane.b32.xlu0 %v974_v18, %s1459_s24  ;;  %v1758_v27 = vpop.permute.xlu2 %506  ;;  %v484_v18 = vmul.f32 %v482_v2, %v1574_v13 }
  0xba   : > { %v341_v14 = vadd.f32 %v339_v17, %v337_v7  ;;  %v342_v30 = vmax.f32 %v340_v23, 0.0  ;;  %v373_v32 = vpop.permute.xlu1 %372  ;;  %v483_v17 = vmul.f32 %v482_v2, %v1563_v5  ;;  %v920_v7 = vmul.f32 %v1560_v4, %v919_v9 }
  0xbb   : > { %v378_v34 = vadd.f32 %v373_v32, %v364_v11  ;;  %v361_v35 = vpop.permute.xlu0 %360  ;;  %v921_v11 = vmul.f32 %v1570_v12, %v919_v9  ;;  %v488_v28 = vrot.slane %v484_v18, 1  ;;  %v495_v32 = vstv %s1811_s6  ;;  %s1947_s6 = sld [smem:[#allocation3 + $0x87]] }
  0xbc   : > { %v343_v37 = vmax.f32 %v341_v14, 0.0  ;;  %345 = vst.msk [vmem:[%s1765_s11] sm:$0xff] %vm344_vm1, %v342_v30  ;;  %v365_v38 = vadd.f32 %v361_v35, %v351_v24  ;;  %v466_v24 = vadd.f32 %v1726_v60, %v452_v16  ;;  %v487_v26 = vrot.slane %v483_v17, 1 }
  0xbd   : > { %v391_v42 = vadd.f32 %v388_v31, %v378_v34  ;;  %v529_v30 = vstv %s1804_s5  ;;  %s1945_s5 = sld [smem:[#allocation3 + $0x8a]] }
  0xbe   : > { %347 = vst.msk [vmem:[%s1765_s11 + $0x8] sm:$0x3f] %vm346_vm2, %v343_v37  ;;  %v379_v46 = vadd.f32 %v1687_v25, %v365_v38  ;;  %v396_v25 = vmul.f32 %v1570_v12, %v394_v29  ;;  %v489_v60 = vsel %vm283_vm0, %v487_v26, %v488_v28  ;;  %v530_v37 = vmul.f32 %v1560_v4, %v529_v30 }
  0xbf   : > { %1011 = vrot.lane.b32.xlu2 %v1007_v36, %s1458_s23  ;;  %v397_v47 = vadd.f32 %v395_v40, %v391_v42  ;;  %v531_v38 = vmul.f32 %v1570_v12, %v529_v30  ;;  %v496_v40 = vmul.f32 %v1560_v4, %v495_v32  ;;  %v497_v42 = vmul.f32 %v1570_v12, %v495_v32 }
  0xc0   : > { %912 = vrot.lane.b32.xlu1 %v907_v39, %s1458_s23  ;;  %v392_v53 = vadd.f32 %v387_v22, %v379_v46  ;;  %v534_v46 = vrot.slane %v530_v37, 1 }
  0xc1   : > { %910 = vrot.lane.b32.xlu0 %v906_v43, %s1458_s23  ;;  %v1789_v49 = vpop.permute.xlu2 %522 }
  0xc2   : > { %v408_v52 = vpop.permute.xlu1 %407  ;;  %v398_v61 = vadd.f32 %v396_v25, %v392_v53 }
  0xc3   : > { %v406_v54 = vpop.permute.xlu0 %405 }
  0xc4   : > { %v411_v56 = vadd.f32 %v406_v54, %v397_v47  ;;  %v535_v47 = vrot.slane %v531_v38, 1 }
  0xc6   : > { %v425_v62 = vadd.f32 %v1704_v41, %v411_v56  ;;  %v412_v41 = vadd.f32 %v408_v52, %v398_v61  ;;  %v536_v53 = vsel %vm283_vm0, %v534_v46, %v535_v47 }
  0xc7   : > { %825 = vrot.lane.b32.xlu2 %v820_v55, %s1459_s24 }
  0xc8   : > { %v438_v1 = vadd.f32 %v435_v58, %v425_v62  ;;  %823 = vrot.lane.b32.xlu1 %v819_v57, %s1459_s24  ;;  %v583_v57 = vstv %s1284_s7  ;;  %s1970_s7 = sld [smem:[#allocation3 + $0x6f]] }
  0xc9   : > { %1013 = vrot.lane.b32.xlu0 %v1008_v59, %s1458_s23  ;;  %v1808_v8 = vpop.permute.xlu2 %574  ;;  %s1833_s23 = sld [smem:[#allocation5 + $0x2]]  ;;  %v551_v59 = vstv %s1840_s8 }
  0xca   : > { %v460_v10 = vpop.permute.xlu1 %459  ;;  %v442_v15 = vadd.f32 %v441_v0, %v438_v1  ;;  %v585_v1 = vmul.f32 %v583_v57, %v1574_v13  ;;  %v552_v3 = vmul.f32 %v551_v59, %v1563_v5  ;;  %v553_v17 = vmul.f32 %v551_v59, %v1574_v13  ;;  %s1992_s8 = sld [smem:[#allocation5 + $0x7]] }
  0xcb   : > { %v422_v63 = vpop.permute.xlu0 %421  ;;  %v465_v29 = vadd.f32 %v460_v10, %v451_v20 }
  0xcc   : > { %v444_v21 = vmax.f32 %v442_v15, 0.0  ;;  %v426_v22 = vadd.f32 %v422_v63, %v412_v41  ;;  %v589_v16 = vrot.slane %v585_v1, 1 }
  0xce   : > { %v439_v23 = vadd.f32 %v434_v51, %v426_v22  ;;  %1268 = vst.msk [vmem:[%s1765_s11 + $0x10] sm:$0xff] %vm344_vm1, %v444_v21 }
  0xcf   : > { %1025 = vrot.lane.b32.xlu2 %v1021_v19, %s1459_s24  ;;  %v542_v58 = vstv %s1833_s23  ;;  %s1962_s23 = sld [smem:[#allocation3 + $0x6c]] }
  0xd0   : > { %v443_v14 = vadd.f32 %v441_v0, %v439_v23  ;;  %926 = vrot.lane.b32.xlu1 %v921_v11, %s1459_s24  ;;  %v584_v0 = vmul.f32 %v583_v57, %v1563_v5  ;;  %v630_v11 = vstv %s1288_s9  ;;  %s2002_s9 = sld [smem:[#allocation3 + $0x75]] }
  0xd1   : > { %924 = vrot.lane.b32.xlu0 %v920_v7, %s1459_s24  ;;  %v1827_v31 = vpop.permute.xlu2 %609 }
  0xd2   : > { %v445_v33 = vmax.f32 %v443_v14, 0.0  ;;  %v476_v34 = vpop.permute.xlu1 %475 }
  0xd3   : > { %v480_v35 = vadd.f32 %v476_v34, %v466_v24  ;;  %v474_v36 = vpop.permute.xlu0 %473 }
  0xd4   : > { %1269 = vst.msk [vmem:[%s1765_s11 + $0x18] sm:$0x3f] %vm346_vm2, %v445_v33  ;;  %v479_v39 = vadd.f32 %v474_v36, %v465_v29  ;;  %v631_v29 = vmul.f32 %v1560_v4, %v630_v11  ;;  %v652_v36 = vstv %s1865_s14 }
  0xd5   : > { %v493_v43 = vadd.f32 %v488_v28, %v480_v35 }
  0xd6   : > { %v492_v45 = vadd.f32 %v489_v60, %v479_v39  ;;  %v635_v34 = vrot.slane %v631_v29, 1  ;;  %v684_v60 = vstv %s1295_s10  ;;  %s1342_s10 = sshll.u32 (%p1515_p5), %s1496_s15, 4 }
  0xd7   : > { %v499_v50 = vadd.f32 %v497_v42, %v493_v43  ;;  %v685_v43 = vmul.f32 %v684_v60, %v1563_v5 }
  0xd8   : > { %v498_v48 = vadd.f32 %v496_v40, %v492_v45  ;;  %v653_v45 = vmul.f32 %v652_v36, %v1563_v5 }
  0xd9   : > { %1027 = vrot.lane.b32.xlu0 %v1022_v44, %s1459_s24  ;;  %v1843_v51 = vpop.permute.xlu2 %661  ;;  %s1852_s24 = sld [smem:[#allocation3 + $0x3f]]  ;;  %v686_v44 = vmul.f32 %v684_v60, %v1574_v13 }
  0xda   : > { %v521_v25 = vpop.permute.xlu1 %520  ;;  %v512_v52 = vadd.f32 %v1758_v27, %v498_v48 }
  0xdb   : > { %v509_v54 = vpop.permute.xlu0 %508 }
  0xdc   : > { %v526_v55 = vadd.f32 %v521_v25, %v512_v52  ;;  %v513_v56 = vadd.f32 %v509_v54, %v499_v50  ;;  %v643_v25 = vstv %s1289_s18  ;;  %v689_v54 = vrot.slane %v685_v43, 1 }
  0xde   : > { %v539_v61 = vadd.f32 %v536_v53, %v526_v55  ;;  %v527_v62 = vadd.f32 %v1789_v49, %v513_v56  ;;  %v588_v49 = vrot.slane %v584_v0, 1  ;;  %v690_v55 = vrot.slane %v686_v44, 1 }
  0xdf   : > { %v596_v21 = vstv %s1852_s24  ;;  %s1999_s24 = sld [smem:[#allocation3 + $0x78]] }
  0xe0   : > { %v543_v27 = vadd.f32 %v542_v58, %v539_v61  ;;  %v540_v2 = vadd.f32 %v535_v47, %v527_v62  ;;  %v590_v20 = vsel %vm283_vm0, %v588_v49, %v589_v16  ;;  %v597_v23 = vmul.f32 %v1560_v4, %v596_v21 }
  0xe1   : > { %v1855_v6 = vpop.permute.xlu2 %677  ;;  %v598_v30 = vmul.f32 %v1570_v12, %v596_v21  ;;  %v697_v61 = vstv %s1876_s20  ;;  %v691_v1 = vsel %vm283_vm0, %v689_v54, %v690_v55  ;;  %s1064_s20 = scalar_lea.vmem (%p1515_p5), %s2085_s3, %s1342_s10 }
  0xe2   : > { %v545_v9 = vmax.f32 %v543_v27, 0.0  ;;  %v544_v41 = vadd.f32 %v542_v58, %v540_v2  ;;  %v563_v10 = vpop.permute.xlu1 %562  ;;  %v654_v58 = vmul.f32 %v652_v36, %v1574_v13  ;;  %v731_v2 = vstv %s1299_s22 }
  0xe3   : > { %v561_v15 = vpop.permute.xlu0 %560  ;;  %v567_v22 = vadd.f32 %v563_v10, %v553_v17  ;;  %v733_v49 = vmul.f32 %v1570_v12, %v731_v2 }
  0xe4   : > { %1279 = vst.msk [vmem:[%s1765_s11 + $0x20] sm:$0xff] %vm344_vm1, %v545_v9  ;;  %v546_v63 = vmax.f32 %v544_v41, 0.0  ;;  %v566_v18 = vadd.f32 %v561_v15, %v552_v3  ;;  %v732_v15 = vmul.f32 %v1560_v4, %v731_v2 }
  0xe6   : > { %1280 = vst.msk [vmem:[%s1765_s11 + $0x28] sm:$0x3f] %vm346_vm2, %v546_v63  ;;  %v580_v19 = vadd.f32 %v1808_v8, %v566_v18  ;;  %v632_v8 = vmul.f32 %v1570_v12, %v630_v11  ;;  %v736_v18 = vrot.slane %v732_v15, 1 }
  0xe8   : > { %v593_v26 = vadd.f32 %v590_v20, %v580_v19  ;;  %v636_v35 = vrot.slane %v632_v8, 1  ;;  %v737_v19 = vrot.slane %v733_v49, 1  ;;  %v699_v20 = vmul.f32 %v1570_v12, %v697_v61 }
  0xe9   : > { %v1867_v7 = vpop.permute.xlu2 %722 }
  0xea   : > { %v608_v24 = vpop.permute.xlu1 %607  ;;  %v599_v32 = vadd.f32 %v597_v23, %v593_v26  ;;  %v637_v46 = vsel %vm283_vm0, %v635_v34, %v636_v35  ;;  %v738_v23 = vsel %vm283_vm0, %v736_v18, %v737_v19  ;;  %v744_v26 = vstv %s1897_s25 }
  0xeb   : > { %v577_v28 = vpop.permute.xlu0 %576 }
  0xec   : > { %v581_v14 = vadd.f32 %v577_v28, %v567_v22  ;;  %v613_v39 = vadd.f32 %v608_v24, %v599_v32  ;;  %v753_v32 = vstv %s1902_s27 }
  0xed   : > { %v755_v34 = vmul.f32 %v753_v32, %v1574_v13 }
  0xee   : > { %v594_v33 = vadd.f32 %v589_v16, %v581_v14 }
  0xf0   : > { %v600_v37 = vadd.f32 %v598_v30, %v594_v33 }
  0xf1   : > { %v1874_v38 = vpop.permute.xlu2 %764 }
  0xf2   : > { %v624_v40 = vpop.permute.xlu1 %623  ;;  %v614_v42 = vadd.f32 %v1827_v31, %v600_v37  ;;  %v667_v31 = vadd.f32 %v1843_v51, %v653_v45  ;;  %v698_v51 = vmul.f32 %v1560_v4, %v697_v61  ;;  %v769_v37 = vadd.f32 %v1874_v38, %v755_v34 }
  0xf3   : > { %v622_v47 = vpop.permute.xlu0 %621 }
  0xf4   : > { %v628_v48 = vadd.f32 %v624_v40, %v614_v42  ;;  %v627_v50 = vadd.f32 %v622_v47, %v613_v39 }
  0xf6   : > { %v641_v52 = vadd.f32 %v636_v35, %v628_v48  ;;  %v640_v53 = vadd.f32 %v637_v46, %v627_v50  ;;  %v798_v48 = vstv %s1916_s26 }
  0xf7   : > { %v800_v38 = vmul.f32 %v1570_v12, %v798_v48 }
  0xf8   : > { %v645_v56 = vadd.f32 %v643_v25, %v641_v52  ;;  %v644_v57 = vadd.f32 %v643_v25, %v640_v53  ;;  %v832_v52 = vstv %s1919_s28 }
  0xf9   : > { %v1885_v59 = vpop.permute.xlu2 %809 }
  0xfa   : > { %v647_v62 = vmax.f32 %v645_v56, 0.0  ;;  %v646_v0 = vmax.f32 %v644_v57, 0.0  ;;  %v676_v27 = vpop.permute.xlu1 %675 }
  0xfb   : > { %v681_v3 = vadd.f32 %v676_v27, %v667_v31  ;;  %v664_v9 = vpop.permute.xlu0 %663  ;;  %v845_v27 = vstv %s1937_s4 }
  0xfc   : > { %1291 = vst.msk [vmem:[%s1765_s11 + $0x38] sm:$0x3f] %vm346_vm2, %v647_v62  ;;  %v668_v41 = vadd.f32 %v664_v9, %v654_v58  ;;  %v987_v58 = vstv %s1328_s29 }
  0xfd   : > { %1290 = vst.msk [vmem:[%s1765_s11 + $0x30] sm:$0xff] %vm344_vm1, %v646_v0  ;;  %v694_v10 = vadd.f32 %v691_v1, %v681_v3  ;;  %v955_v1 = vstv %s1931_s30  ;;  %v988_v2 = vmul.f32 %v987_v58, %v1563_v5  ;;  %v1957_v3 = vmul.f32 %v987_v58, %v1574_v13 }
  0xfe   : > { %v682_v16 = vadd.f32 %v1855_v6, %v668_v41  ;;  %v754_v41 = vmul.f32 %v753_v32, %v1563_v5 }
  0xff   : > { %v700_v63 = vadd.f32 %v698_v51, %v694_v10  ;;  %v956_v51 = vmul.f32 %v955_v1, %v1563_v5  ;;  %v993_v49 = vrot.slane %v1957_v3, 1 }
 0x100   : > { %v695_v22 = vadd.f32 %v690_v55, %v682_v16  ;;  %v1942_v55 = vmul.f32 %v1570_v12, %v832_v52 }
 0x101   : > { %v1899_v17 = vpop.permute.xlu2 %964 }
 0x102   : > { %v711_v21 = vpop.permute.xlu1 %710  ;;  %v701_v6 = vadd.f32 %v699_v20, %v695_v22  ;;  %v838_v56 = vrot.slane %v1942_v55, 1  ;;  %v970_v20 = vadd.f32 %v1899_v17, %v956_v51  ;;  %v933_v51 = vstv %s1999_s24 }
 0x103   : > { %v709_v4 = vpop.permute.xlu0 %708 }
 0x104   : > { %v714_v11 = vadd.f32 %v709_v4, %v700_v63  ;;  %v715_v8 = vadd.f32 %v711_v21, %v701_v6  ;;  %v1034_v63 = vstv %s1945_s5  ;;  %v1985_v6 = vld [vmem:[%s1549_s17 + $0x18] sm:$0xff] }
 0x106   : > { %v728_v24 = vadd.f32 %v1867_v7, %v714_v11  ;;  %v785_v7 = vstv %s1907_s12  ;;  %v1390_v11 = vld [vmem:[%s1549_s17 + $0x10] sm:$0xff] }
 0x107   : > { %v787_v43 = vmul.f32 %v785_v7, %v1574_v13  ;;  %v786_v10 = vmul.f32 %v785_v7, %v1563_v5  ;;  %v992_v13 = vrot.slane %v988_v2, 1 }
 0x108   : > { %v741_v28 = vadd.f32 %v738_v23, %v728_v24  ;;  %v1035_v23 = vmul.f32 %v1390_v11, %v1034_v63  ;;  %v1988_v24 = vmul.f32 %v1985_v6, %v1034_v63 }
 0x109   : > { %v1909_v29 = vpop.permute.xlu2 %879  ;;  %v791_v47 = vrot.slane %v787_v43, 1  ;;  %v790_v21 = vrot.slane %v786_v10, 1  ;;  %v994_v22 = vsel %vm283_vm0, %v992_v13, %v993_v49  ;;  %v799_v43 = vmul.f32 %v1390_v11, %v798_v48 }
 0x10a   : > { %v763_v14 = vpop.permute.xlu1 %762  ;;  %v745_v30 = vadd.f32 %v744_v26, %v741_v28  ;;  %v1047_v48 = vstv %s1992_s8 }
 0x10b   : > { %v725_v33 = vpop.permute.xlu0 %724  ;;  %v768_v18 = vadd.f32 %v763_v14, %v754_v41  ;;  %v854_v14 = vstv %s1962_s23 }
 0x10c   : > { %v747_v35 = vmax.f32 %v745_v30, 0.0  ;;  %v729_v60 = vadd.f32 %v725_v33, %v715_v8  ;;  %v792_v8 = vsel %vm283_vm0, %v790_v21, %v791_v47  ;;  %v886_v30 = vstv %s1970_s7  ;;  %v1392_v33 = vld [vmem:[%s1549_s17 + $0x8] sm:$0xff] }
 0x10d   : > { %v856_v34 = vmul.f32 %v1392_v33, %v854_v14 }
 0x10e   : > { %v742_v36 = vadd.f32 %v737_v19, %v729_v60  ;;  %1301 = vst.msk [vmem:[%s1765_s11 + $0x40] sm:$0xff] %vm344_vm1, %v747_v35  ;;  %v1000_v19 = vstv %s1947_s6  ;;  %v1039_v35 = vrot.slane %v1035_v23, 1  ;;  %v1040_v60 = vrot.slane %v1988_v24, 1  ;;  %v1123_v24 = vld [vmem:[%s1765_s11] sm:$0xff] (%p1515_p5) }
 0x10f   : > { %1124 = vst [vmem:[%s1064_s20] sm:$0xff] (%p1515_p5), %v1123_v24 }
 0x110   : > { %v746_v39 = vadd.f32 %v744_v26, %v742_v36  ;;  %v1001_v26 = vmul.f32 %v1390_v11, %v1000_v19 }
 0x111   : > { %v812_v40 = vpop.permute.xlu2 %811 }
 0x112   : > { %v748_v42 = vmax.f32 %v746_v39, 0.0  ;;  %v779_v44 = vpop.permute.xlu1 %778 }
 0x113   : > { %v777_v45 = vpop.permute.xlu0 %776  ;;  %v783_v46 = vadd.f32 %v779_v44, %v769_v37  ;;  %v1393_v37 = vld [vmem:[%s1549_s17] sm:$0xff]  ;;  %s1322_s17 = sld [smem:[#allocation5 + $0x6]] }
 0x114   : > { %1302 = vst.msk [vmem:[%s1765_s11 + $0x48] sm:$0x3f] %vm346_vm2, %v748_v42  ;;  %v782_v28 = vadd.f32 %v777_v45, %v768_v18  ;;  %v887_v39 = vmul.f32 %v1393_v37, %v886_v30  ;;  %v855_v44 = vmul.f32 %v1393_v37, %v854_v14  ;;  %v833_v45 = vmul.f32 %v1390_v11, %v832_v52 }
 0x115   : > { %v796_v50 = vadd.f32 %v791_v47, %v783_v46 }
 0x116   : > { %v795_v7 = vadd.f32 %v792_v8, %v782_v28  ;;  %v891_v58 = vrot.slane %v887_v39, 1  ;;  %v837_v2 = vrot.slane %v833_v45, 1 }
 0x117   : > { %v802_v31 = vadd.f32 %v800_v38, %v796_v50  ;;  %v1041_v38 = vsel %vm283_vm0, %v1039_v35, %v1040_v60 }
 0x119   : > { %v1928_v25 = vpop.permute.xlu2 %1011  ;;  %v816_v57 = vadd.f32 %v812_v40, %v802_v31  ;;  %v888_v40 = vmul.f32 %v1392_v33, %v886_v30 }
 0x11a   : > { %v1933_v53 = vpop.permute.xlu1 %865 }
 0x11b   : > { %v1935_v54 = vpop.permute.xlu0 %863  ;;  %v870_v50 = vadd.f32 %v1933_v53, %v856_v34 }
 0x11c   : > { %v869_v52 = vadd.f32 %v1935_v54, %v855_v44 }
 0x121   : > { %v826_v61 = vpop.permute.xlu2 %825 }
 0x122   : > { %v830_v62 = vadd.f32 %v826_v61, %v816_v57  ;;  %v1949_v0 = vpop.permute.xlu1 %877  ;;  %v892_v61 = vrot.slane %v888_v40, 1 }
 0x123   : > { %v1953_v12 = vpop.permute.xlu0 %966  ;;  %v883_v53 = vadd.f32 %v1949_v0, %v869_v52 }
 0x124   : > { %v843_v9 = vadd.f32 %v838_v56, %v830_v62  ;;  %v801_v62 = vadd.f32 %v799_v43, %v795_v7  ;;  %v893_v10 = vsel %vm283_vm0, %v891_v58, %v892_v61  ;;  %v1135_v58 = vld [vmem:[%s1765_s11 + $0x30] sm:$0xff] (%p1515_p5) }
 0x125   : > { %v896_v23 = vadd.f32 %v893_v10, %v883_v53  ;;  %1136 = vst [vmem:[%s1064_s20 + $0x60] sm:$0xff] (%p1515_p5), %v1135_v58 }
 0x126   : > { %v847_v15 = vadd.f32 %v845_v27, %v843_v9  ;;  %v884_v9 = vadd.f32 %v1909_v29, %v870_v50  ;;  %v815_v13 = vadd.f32 %v1885_v59, %v801_v62  ;;  %v839_v29 = vsel %vm283_vm0, %v837_v2, %v838_v56  ;;  %v1127_v50 = vld [vmem:[%s1765_s11 + $0x10] sm:$0xff] (%p1515_p5)  ;;  %v1141_v62 = vld [vmem:[%s1765_s11 + $0x48] sm:$0xff] (%p1515_p5) }
 0x127   : > { %1128 = vst [vmem:[%s1064_s20 + $0x20] sm:$0xff] (%p1515_p5), %v1127_v50 }
 0x128   : > { %v849_v16 = vmax.f32 %v847_v15, 0.0  ;;  %v899_v15 = vstv %s2002_s9  ;;  %v897_v0 = vadd.f32 %v892_v61, %v884_v9  ;;  %v1137_v61 = vld [vmem:[%s1765_s11 + $0x38] sm:$0xff] (%p1515_p5)  ;;  %1142 = vst [vmem:[%s1064_s20 + $0x88] sm:$0xff] (%p1515_p5), %v1141_v62 }
 0x129   : > { %v1026_v42 = vpop.permute.xlu2 %1025  ;;  %v901_v54 = vmul.f32 %v1985_v6, %v899_v15  ;;  %v900_v59 = vmul.f32 %v1390_v11, %v899_v15  ;;  %1138 = vst [vmem:[%s1064_s20 + $0x68] sm:$0xff] (%p1515_p5), %v1137_v61 }
 0x12a   : > { %1313 = vst.msk [vmem:[%s1765_s11 + $0x58] sm:$0x3f] %vm346_vm2, %v849_v16  ;;  %v1978_v5 = vpop.permute.xlu1 %980  ;;  %v957_v16 = vmul.f32 %v1392_v33, %v955_v1 }
 0x12b   : > { %v979_v4 = vpop.permute.xlu0 %978  ;;  %v903_v55 = vadd.f32 %v901_v54, %v897_v0  ;;  %v902_v14 = vadd.f32 %v900_v59, %v896_v23 }
 0x12c   : > { %v984_v17 = vadd.f32 %v979_v4, %v970_v20  ;;  %v935_v4 = vmul.f32 %v1985_v6, %v933_v51 }
 0x12e   : > { %v997_v32 = vadd.f32 %v994_v22, %v984_v17  ;;  %v934_v22 = vmul.f32 %v1390_v11, %v933_v51  ;;  %v971_v17 = vadd.f32 %v1953_v12, %v957_v16  ;;  %v939_v28 = vrot.slane %v935_v4, 1 }
 0x130   : > { %v1003_v36 = vadd.f32 %v1001_v26, %v997_v32  ;;  %v938_v26 = vrot.slane %v934_v22, 1  ;;  %v985_v8 = vadd.f32 %v1978_v5, %v971_v17  ;;  %v946_v5 = vstv %s1322_s17 }
 0x131   : > { %v1145_v2 = vld [vmem:[%s1765_s11 + $0x58] sm:$0xff] (%p1515_p5) }
 0x132   : > { %v1017_v46 = vadd.f32 %v1928_v25, %v1003_v36  ;;  %v913_v47 = vpop.permute.xlu1 %912  ;;  %v940_v35 = vsel %vm283_vm0, %v938_v26, %v939_v28  ;;  %v1002_v36 = vmul.f32 %v1985_v6, %v1000_v19  ;;  %1146 = vst [vmem:[%s1064_s20 + $0xa8] sm:$0xff] (%p1515_p5), %v1145_v2 }
 0x133   : > { %v911_v31 = vpop.permute.xlu0 %910  ;;  %v917_v30 = vadd.f32 %v913_v47, %v903_v55 }
 0x134   : > { %v1031_v57 = vadd.f32 %v1026_v42, %v1017_v46  ;;  %v916_v33 = vadd.f32 %v911_v31, %v902_v14  ;;  %v1131_v31 = vld [vmem:[%s1765_s11 + $0x20] sm:$0xff] (%p1515_p5) }
 0x135   : > { %1132 = vst [vmem:[%s1064_s20 + $0x40] sm:$0xff] (%p1515_p5), %v1131_v31 }
 0x136   : > { %v1044_v25 = vadd.f32 %v1041_v38, %v1031_v57  ;;  %v1129_v38 = vld [vmem:[%s1765_s11 + $0x18] sm:$0xff] (%p1515_p5)  ;;  %v1133_v57 = vld [vmem:[%s1765_s11 + $0x28] sm:$0xff] (%p1515_p5) }
 0x137   : > { %1130 = vst [vmem:[%s1064_s20 + $0x28] sm:$0xff] (%p1515_p5), %v1129_v38 }
 0x138   : > { %v1048_v41 = vadd.f32 %v1047_v48, %v1044_v25  ;;  %1134 = vst [vmem:[%s1064_s20 + $0x48] sm:$0xff] (%p1515_p5), %v1133_v57 }
 0x13a   : > { %v1050_v63 = vmax.f32 %v1048_v41, 0.0  ;;  %v824_v18 = vpop.permute.xlu1 %823 }
 0x13b   : > { %v829_v20 = vadd.f32 %v824_v18, %v815_v13  ;;  %v1014_v21 = vpop.permute.xlu0 %1013 }
 0x13c   : > { %1334 = vst.msk [vmem:[%s1765_s11 + $0x70] sm:$0xff] %vm344_vm1, %v1050_v63 }
 0x13d   : > { %v842_v1 = vadd.f32 %v839_v29, %v829_v20 }
 0x13f   : > { %v846_v56 = vadd.f32 %v845_v27, %v842_v1  ;;  %v998_v27 = vadd.f32 %v993_v49, %v985_v8 }
 0x141   : > { %v848_v32 = vmax.f32 %v846_v56, 0.0  ;;  %v1004_v42 = vadd.f32 %v1002_v36, %v998_v27 }
 0x142   : > { %v927_v34 = vpop.permute.xlu1 %926 }
 0x143   : > { %1312 = vst.msk [vmem:[%s1765_s11 + $0x50] sm:$0xff] %vm344_vm1, %v848_v32  ;;  %v931_v11 = vadd.f32 %v927_v34, %v917_v30  ;;  %v925_v12 = vpop.permute.xlu0 %924  ;;  %v1018_v45 = vadd.f32 %v1014_v21, %v1004_v42  ;;  %v1151_v53 = vld [vmem:[%s1765_s11 + $0x70] sm:$0xff] (%p1515_p5) }
 0x144   : > { %v930_v7 = vadd.f32 %v925_v12, %v916_v33  ;;  %1152 = vst [vmem:[%s1064_s20 + $0xe0] sm:$0xff] (%p1515_p5), %v1151_v53 }
 0x145   : > { %v944_v37 = vadd.f32 %v939_v28, %v931_v11 }
 0x146   : > { %v943_v39 = vadd.f32 %v940_v35, %v930_v7 }
 0x147   : > { %v948_v40 = vadd.f32 %v946_v5, %v944_v37 }
 0x148   : > { %v947_v43 = vadd.f32 %v946_v5, %v943_v39 }
 0x149   : > { %v950_v44 = vmax.f32 %v948_v40, 0.0 }
 0x14a   : > { %v949_v46 = vmax.f32 %v947_v43, 0.0  ;;  %v1143_v52 = vld [vmem:[%s1765_s11 + $0x50] sm:$0xff] (%p1515_p5) }
 0x14b   : > { %1324 = vst.msk [vmem:[%s1765_s11 + $0x68] sm:$0x3f] %vm346_vm2, %v950_v44  ;;  %v1028_v47 = vpop.permute.xlu0 %1027 }
 0x14c   : > { %1323 = vst.msk [vmem:[%s1765_s11 + $0x60] sm:$0xff] %vm344_vm1, %v949_v46  ;;  %v1032_v3 = vadd.f32 %v1028_v47, %v1018_v45 }
 0x14d   : > { %1144 = vst [vmem:[%s1064_s20 + $0xa0] sm:$0xff] (%p1515_p5), %v1143_v52 }
 0x14e   : > { %v1045_v49 = vadd.f32 %v1040_v60, %v1032_v3  ;;  %v1125_v60 = vld [vmem:[%s1765_s11 + $0x8] sm:$0xff] (%p1515_p5) }
 0x14f   : > { %1126 = vst [vmem:[%s1064_s20 + $0x8] sm:$0xff] (%p1515_p5), %v1125_v60 }
 0x150   : > { %v1049_v19 = vadd.f32 %v1047_v48, %v1045_v49  ;;  %1061 = sbr.rel (!%p1515_p5) target bundleno = 349 (0x15d), region = 82  ;;  %v1139_v48 = vld [vmem:[%s1765_s11 + $0x40] sm:$0xff] (%p1515_p5) }
 0x151   : > { %1140 = vst [vmem:[%s1064_s20 + $0x80] sm:$0xff] (%p1515_p5), %v1139_v48 }
 0x152   : > { %v1051_v6 = vmax.f32 %v1049_v19, 0.0  ;;  %v1149_v9 = vld [vmem:[%s1765_s11 + $0x68] sm:$0xff] (%p1515_p5) }
 0x153   : > { %v1147_v25 = vld [vmem:[%s1765_s11 + $0x60] sm:$0xff] (%p1515_p5)  ;;  %1150 = vst [vmem:[%s1064_s20 + $0xc8] sm:$0xff] (%p1515_p5), %v1149_v9 }
 0x154   : > { %1335 = vst.msk [vmem:[%s1765_s11 + $0x78] sm:$0x3f] %vm346_vm2, %v1051_v6 }
 0x155   : > { %1148 = vst [vmem:[%s1064_s20 + $0xc0] sm:$0xff] %v1147_v25 }
 0x15b   : > { %v1153_v41 = vld [vmem:[%s1765_s11 + $0x78] sm:$0xff] }
 0x15c   : > { %1154 = vst [vmem:[%s1064_s20 + $0xe8] sm:$0xff] %v1153_v41 }
 0x15d PF: > { %p12_p13 = scmp.ge.s32.totalorder %s1499_s16, 4   ;;  %s2089_s12 = smov %s1450_s13 }
 0x15e   : > { %s2090_s13 = smov %s1509_s19  ;;  %s2091_s14 = smov %s1499_s16 }
 0x15f   :  { %14 = sbr.rel (!%p12_p13) target bundleno = 3 (0x3), region = 160 }
 0x164   :  { %1170 = vsyncpa [#allocation4], 1 }
 0x165   :  { %1172 = vsyncpa [#allocation4 + $0x1], 1 }
 0x166   :  { %1173 = vsyncpa [#allocation6], 1 }

// kernel: _lambda_.7
= control target key start
LH: loop header
LB: loop body
LE: loop exit
PB: predicated region body
PF: predicated region fallthrough
CT: control target
= control target key end

     0   :  { %v809_v0 = vmov 0   ;;  %vm246_vm0 = vcmask 64512   ;;  %vm729_vm1 = vcmask 1043456   ;;  %vm732_vm2 = vcmask 588804   ;;  %s1362_s2 = inlined_call_operand.vmem [shape: f32[256,1], index: 2, kind: input, shape index: {}]   ;;  %s1363_s0 = inlined_call_operand.vmem [shape: f32[8,200], index: 0, kind: input, shape index: {}]   ;;  %s1364_s1 = inlined_call_operand.vmem [shape: f32[256,8], index: 1, kind: input, shape index: {}]   ;;  %s1365_s4 = inlined_call_operand.vmem [shape: f32[4,1], index: 4, kind: input, shape index: {}]   ;;  %s1366_s3 = inlined_call_operand.vmem [shape: f32[4,256], index: 3, kind: input, shape index: {}]   ;;  %s1367_s5 = inlined_call_operand.vmem [shape: f32[4,200], index: 5, kind: output, shape index: {}]  }
   0x1   :  { %808 = vset.pattern.permute.xlu2 %v809_v0  ;;  %807 = vset.pattern.permute.xlu1 %v809_v0  ;;  %v85_v1 = vld [vmem:[%s1362_s2 + $0xf8] sm:$0xff]  ;;  %v84_v2 = vld [vmem:[%s1362_s2 + $0xf0] sm:$0xff]  ;;  %v52_v4 = vld [vmem:[%s1363_s0] sm:$0xff] }
   0x2   :  { %v69_v3 = vld [vmem:[%s1362_s2 + $0x78] sm:$0xff]  ;;  %806 = vset.pattern.permute.xlu0 %v809_v0  ;;  %243 = vperm.xlu1 %807, %v85_v1   ;;  %v53_v5 = vld [vmem:[%s1363_s0 + $0x8] sm:$0xff]  ;;  %v20_v6 = vld [vmem:[%s1364_s1] sm:$0xff] }
   0x3   :  { %238 = vperm.xlu2 %808, %v84_v2   ;;  %163 = vperm.xlu0 %806, %v69_v3   ;;  %v40_v7 = vld [vmem:[%s1364_s1 + $0xa0] sm:$0xff]  ;;  %v865_v8 = vld [vmem:[%s1364_s1 + $0x98] sm:$0xff]  ;;  %v67_v9 = vld [vmem:[%s1362_s2 + $0x68] sm:$0xff] }
   0x4   :  { %358 = vmatpush.msra.mxu0 %v52_v4  ;;  %803 = vmatpush.msra.mxu2 %v52_v4  ;;  %v68_v10 = vld [vmem:[%s1362_s2 + $0x70] sm:$0xff]  ;;  %v66_v11 = vld [vmem:[%s1362_s2 + $0x60] sm:$0xff]  ;;  %v21_v12 = vld [vmem:[%s1364_s1 + $0x8] sm:$0xff] }
   0x5   :  { %471 = vmatpush.msra.mxu1 %v53_v5  ;;  %739 = vmatmul.msk.f32.vlgmr.msra.gmra.mxu0 %vm246_vm0, %v20_v6  ;;  %v41_v13 = vld [vmem:[%s1364_s1 + $0xa8] sm:$0xff]  ;;  %v65_v14 = vld [vmem:[%s1362_s2 + $0x58] sm:$0xff]  ;;  %v82_v16 = vld [vmem:[%s1362_s2 + $0xe0] sm:$0xff] }
   0x6   :  { %759 = vmatmul.msk.f32.vlgmr.msra.gmra.mxu2 %vm246_vm0, %v40_v7  ;;  %771 = vmatmul.msk.f32.vlgmr.msra.gmra.mxu1 %vm246_vm0, %v20_v6  ;;  %v83_v15 = vld [vmem:[%s1362_s2 + $0xe8] sm:$0xff]  ;;  %v22_v17 = vld [vmem:[%s1364_s1 + $0x10] sm:$0xff]  ;;  %v81_v19 = vld [vmem:[%s1362_s2 + $0xd8] sm:$0xff] }
   0x7   :  { %804 = vmatpush.msra.mxu3 %v53_v5  ;;  %v42_v18 = vld [vmem:[%s1364_s1 + $0xb0] sm:$0xff]  ;;  %v63_v21 = vld [vmem:[%s1362_s2 + $0x48] sm:$0xff]  ;;  %v23_v22 = vld [vmem:[%s1364_s1 + $0x18] sm:$0xff] }
   0x8   :  { %790 = vmatmul.msk.f32.vlgmr.msra.gmra.mxu3 %vm246_vm0, %v865_v8  ;;  %v64_v20 = vld [vmem:[%s1362_s2 + $0x50] sm:$0xff]  ;;  %v43_v23 = vld [vmem:[%s1364_s1 + $0xb8] sm:$0xff]  ;;  %v62_v24 = vld [vmem:[%s1362_s2 + $0x40] sm:$0xff] }
   0x9   :  { %v80_v25 = vld [vmem:[%s1362_s2 + $0xd0] sm:$0xff]  ;;  %v79_v26 = vld [vmem:[%s1362_s2 + $0xc8] sm:$0xff]  ;;  %v24_v27 = vld [vmem:[%s1364_s1 + $0x20] sm:$0xff] }
   0xa   :  { %153 = vperm.xlu1 %807, %v67_v9   ;;  %v44_v28 = vld [vmem:[%s1364_s1 + $0xc0] sm:$0xff]  ;;  %v61_v30 = vld [vmem:[%s1362_s2 + $0x38] sm:$0xff]  ;;  %v60_v31 = vld [vmem:[%s1362_s2 + $0x30] sm:$0xff] }
   0xb   :  { %158 = vperm.xlu0 %806, %v68_v10   ;;  %148 = vperm.xlu2 %808, %v66_v11   ;;  %v78_v29 = vld [vmem:[%s1362_s2 + $0xc0] sm:$0xff]  ;;  %v25_v32 = vld [vmem:[%s1364_s1 + $0x28] sm:$0xff]  ;;  %v77_v35 = vld [vmem:[%s1362_s2 + $0xb8] sm:$0xff] }
   0xc   :  { %v45_v33 = vld [vmem:[%s1364_s1 + $0xc8] sm:$0xff]  ;;  %v76_v36 = vld [vmem:[%s1362_s2 + $0xb0] sm:$0xff]  ;;  %v58_v40 = vld [vmem:[%s1362_s2 + $0x20] sm:$0xff] }
   0xd   :  { %740 = vmatmul.msk.f32.gmra.mxu0 %vm246_vm0, %v21_v12  ;;  %v59_v34 = vld [vmem:[%s1362_s2 + $0x28] sm:$0xff]  ;;  %v26_v37 = vld [vmem:[%s1364_s1 + $0x30] sm:$0xff]  ;;  %v57_v41 = vld [vmem:[%s1362_s2 + $0x18] sm:$0xff] }
   0xe   :  { %760 = vmatmul.msk.f32.gmra.mxu2 %vm246_vm0, %v41_v13  ;;  %772 = vmatmul.msk.f32.gmra.mxu1 %vm246_vm0, %v21_v12  ;;  %v46_v38 = vld [vmem:[%s1364_s1 + $0xd0] sm:$0xff]  ;;  %v75_v39 = vld [vmem:[%s1362_s2 + $0xa8] sm:$0xff]  ;;  %v27_v42 = vld [vmem:[%s1364_s1 + $0x38] sm:$0xff] }
   0xf   :  { %v47_v43 = vld [vmem:[%s1364_s1 + $0xd8] sm:$0xff]  ;;  %v56_v44 = vld [vmem:[%s1362_s2 + $0x10] sm:$0xff]  ;;  %v74_v45 = vld [vmem:[%s1362_s2 + $0xa0] sm:$0xff] }
  0x10   :  { %791 = vmatmul.msk.f32.gmra.mxu3 %vm246_vm0, %v40_v7  ;;  %v73_v46 = vld [vmem:[%s1362_s2 + $0x98] sm:$0xff]  ;;  %v28_v47 = vld [vmem:[%s1364_s1 + $0x40] sm:$0xff]  ;;  %v72_v49 = vld [vmem:[%s1362_s2 + $0x90] sm:$0xff] }
  0x11   :  { %v48_v48 = vld [vmem:[%s1364_s1 + $0xe0] sm:$0xff]  ;;  %v55_v50 = vld [vmem:[%s1362_s2 + $0x8] sm:$0xff]  ;;  %v30_v56 = vld [vmem:[%s1364_s1 + $0x50] sm:$0xff] }
  0x12   :  { %143 = vperm.xlu1 %807, %v65_v14   ;;  %v54_v51 = vld [vmem:[%s1362_s2] sm:$0xff]  ;;  %v29_v52 = vld [vmem:[%s1364_s1 + $0x48] sm:$0xff]  ;;  %v50_v57 = vld [vmem:[%s1364_s1 + $0xf0] sm:$0xff] }
  0x13   :  { %233 = vperm.xlu0 %806, %v83_v15   ;;  %228 = vperm.xlu2 %808, %v82_v16   ;;  %v49_v53 = vld [vmem:[%s1364_s1 + $0xe8] sm:$0xff]  ;;  %v70_v54 = vld [vmem:[%s1362_s2 + $0x80] sm:$0xff]  ;;  %v31_v58 = vld [vmem:[%s1364_s1 + $0x58] sm:$0xff] }
  0x14   :  { %v71_v55 = vld [vmem:[%s1362_s2 + $0x88] sm:$0xff]  ;;  %v51_v59 = vld [vmem:[%s1364_s1 + $0xf8] sm:$0xff]  ;;  %v634_v60 = vld [vmem:[%s1365_s4] sm:$0xf] }
  0x15   :  { %741 = vmatmul.msk.f32.gmra.mxu0 %vm246_vm0, %v22_v17  ;;  %v32_v61 = vld [vmem:[%s1364_s1 + $0x60] sm:$0xff]  ;;  %v33_v63 = vld [vmem:[%s1364_s1 + $0x68] sm:$0xff]  ;;  %v34_v1 = vld [vmem:[%s1364_s1 + $0x70] sm:$0xff] }
  0x16   :  { %761 = vmatmul.msk.f32.gmra.mxu2 %vm246_vm0, %v42_v18  ;;  %773 = vmatmul.msk.f32.gmra.mxu1 %vm246_vm0, %v22_v17  ;;  %v35_v5 = vld [vmem:[%s1364_s1 + $0x78] sm:$0xff]  ;;  %v36_v10 = vld [vmem:[%s1364_s1 + $0x80] sm:$0xff]  ;;  %v37_v17 = vld [vmem:[%s1364_s1 + $0x88] sm:$0xff] }
  0x17   :  { %vm733_vm3 = vmor %vm732_vm2, %vm729_vm1 }
  0x18   :  { %792 = vmatmul.msk.f32.gmra.mxu3 %vm246_vm0, %v41_v13 }
  0x1a   :  { %223 = vperm.xlu1 %807, %v81_v19  }
  0x1b   :  { %138 = vperm.xlu0 %806, %v64_v20   ;;  %133 = vperm.xlu2 %808, %v63_v21  }
  0x1d   :  { %742 = vmatmul.msk.f32.gmra.mxu0 %vm246_vm0, %v23_v22 }
  0x1e   :  { %762 = vmatmul.msk.f32.gmra.mxu2 %vm246_vm0, %v43_v23  ;;  %774 = vmatmul.msk.f32.gmra.mxu1 %vm246_vm0, %v23_v22 }
  0x20   :  { %793 = vmatmul.msk.f32.gmra.mxu3 %vm246_vm0, %v42_v18 }
  0x22   :  { %128 = vperm.xlu1 %807, %v62_v24  }
  0x23   :  { %218 = vperm.xlu0 %806, %v80_v25   ;;  %213 = vperm.xlu2 %808, %v79_v26   ;;  %v38_v25 = vld [vmem:[%s1364_s1 + $0x90] sm:$0xff] }
  0x25   :  { %743 = vmatmul.msk.f32.gmra.mxu0 %vm246_vm0, %v24_v27 }
  0x26   :  { %763 = vmatmul.msk.f32.gmra.mxu2 %vm246_vm0, %v44_v28  ;;  %775 = vmatmul.msk.f32.gmra.mxu1 %vm246_vm0, %v24_v27 }
  0x28   :  { %794 = vmatmul.msk.f32.gmra.mxu3 %vm246_vm0, %v43_v23 }
  0x2a   :  { %208 = vperm.xlu1 %807, %v78_v29  }
  0x2b   :  { %123 = vperm.xlu0 %806, %v61_v30   ;;  %118 = vperm.xlu2 %808, %v60_v31  }
  0x2d   :  { %744 = vmatmul.msk.f32.gmra.mxu0 %vm246_vm0, %v25_v32 }
  0x2e   :  { %764 = vmatmul.msk.f32.gmra.mxu2 %vm246_vm0, %v45_v33  ;;  %776 = vmatmul.msk.f32.gmra.mxu1 %vm246_vm0, %v25_v32 }
  0x30   :  { %795 = vmatmul.msk.f32.gmra.mxu3 %vm246_vm0, %v44_v28 }
  0x32   :  { %113 = vperm.xlu1 %807, %v59_v34  }
  0x33   :  { %203 = vperm.xlu0 %806, %v77_v35   ;;  %198 = vperm.xlu2 %808, %v76_v36  }
  0x35   :  { %745 = vmatmul.msk.f32.gmra.mxu0 %vm246_vm0, %v26_v37 }
  0x36   :  { %765 = vmatmul.msk.f32.gmra.mxu2 %vm246_vm0, %v46_v38  ;;  %777 = vmatmul.msk.f32.gmra.mxu1 %vm246_vm0, %v26_v37 }
  0x38   :  { %796 = vmatmul.msk.f32.gmra.mxu3 %vm246_vm0, %v45_v33 }
  0x3a   :  { %193 = vperm.xlu1 %807, %v75_v39  }
  0x3b   :  { %108 = vperm.xlu0 %806, %v58_v40   ;;  %103 = vperm.xlu2 %808, %v57_v41  }
  0x3d   :  { %746 = vmatmul.msk.f32.gmra.mxu0 %vm246_vm0, %v27_v42 }
  0x3e   :  { %766 = vmatmul.msk.f32.gmra.mxu2 %vm246_vm0, %v47_v43  ;;  %778 = vmatmul.msk.f32.gmra.mxu1 %vm246_vm0, %v27_v42 }
  0x40   :  { %797 = vmatmul.msk.f32.gmra.mxu3 %vm246_vm0, %v46_v38 }
  0x42   :  { %98 = vperm.xlu1 %807, %v56_v44  }
  0x43   :  { %188 = vperm.xlu0 %806, %v74_v45   ;;  %183 = vperm.xlu2 %808, %v73_v46  }
  0x45   :  { %747 = vmatmul.msk.f32.gmra.mxu0 %vm246_vm0, %v28_v47 }
  0x46   :  { %767 = vmatmul.msk.f32.gmra.mxu2 %vm246_vm0, %v48_v48  ;;  %779 = vmatmul.msk.f32.gmra.mxu1 %vm246_vm0, %v28_v47 }
  0x48   :  { %798 = vmatmul.msk.f32.gmra.mxu3 %vm246_vm0, %v47_v43 }
  0x4a   :  { %178 = vperm.xlu1 %807, %v72_v49  }
  0x4b   :  { %93 = vperm.xlu0 %806, %v55_v50   ;;  %88 = vperm.xlu2 %808, %v54_v51  }
  0x4d   :  { %748 = vmatmul.msk.f32.gmra.mxu0 %vm246_vm0, %v29_v52 }
  0x4e   :  { %768 = vmatmul.msk.f32.gmra.mxu2 %vm246_vm0, %v49_v53  ;;  %780 = vmatmul.msk.f32.gmra.mxu1 %vm246_vm0, %v29_v52 }
  0x50   :  { %799 = vmatmul.msk.f32.gmra.mxu3 %vm246_vm0, %v48_v48 }
  0x52   :  { %168 = vperm.xlu1 %807, %v70_v54  }
  0x53   :  { %173 = vperm.xlu0 %806, %v71_v55   ;;  %637 = vperm.xlu2 %808, %v634_v60  }
  0x55   :  { %749 = vmatmul.msk.f32.gmra.mxu0 %vm246_vm0, %v30_v56 }
  0x56   :  { %769 = vmatmul.msk.f32.gmra.mxu2 %vm246_vm0, %v50_v57  ;;  %781 = vmatmul.msk.f32.gmra.mxu1 %vm246_vm0, %v30_v56 }
  0x58   :  { %800 = vmatmul.msk.f32.gmra.mxu3 %vm246_vm0, %v49_v53 }
  0x5d   :  { %750 = vmatmul.msk.f32.gmra.mxu0 %vm246_vm0, %v31_v58  ;;  %v1075_v62 = vpop.permute.xlu2 %238 }
  0x5e   :  { %770 = vmatmul.msk.f32.gmra.mxu2 %vm246_vm0, %v51_v59  ;;  %782 = vmatmul.msk.f32.gmra.mxu1 %vm246_vm0, %v31_v58 }
  0x60   :  { %801 = vmatmul.msk.f32.gmra.mxu3 %vm246_vm0, %v50_v57 }
  0x65   :  { %751 = vmatmul.msk.f32.gmra.mxu0 %vm246_vm0, %v32_v61  ;;  %v1084_v0 = vpop.permute.xlu2 %148 }
  0x66   :  { %783 = vmatmul.msk.f32.gmra.mxu1 %vm246_vm0, %v32_v61 }
  0x68   :  { %802 = vmatmul.msk.f32.gmra.mxu3 %vm246_vm0, %v51_v59 }
  0x6d   :  { %752 = vmatmul.msk.f32.gmra.mxu0 %vm246_vm0, %v33_v63  ;;  %v1095_v4 = vpop.permute.xlu2 %228 }
  0x6e   :  { %784 = vmatmul.msk.f32.gmra.mxu1 %vm246_vm0, %v33_v63 }
  0x74   :  { %v1089_v2 = vpop.permute.xlu1 %243 }
  0x75   :  { %753 = vmatmul.msk.f32.gmra.mxu0 %vm246_vm0, %v34_v1  ;;  %v1092_v3 = vpop.permute.xlu0 %163  ;;  %v1113_v12 = vpop.permute.xlu2 %133 }
  0x76   :  { %785 = vmatmul.msk.f32.gmra.mxu1 %vm246_vm0, %v34_v1 }
  0x7c   :  { %v1100_v6 = vpop.permute.xlu1 %153 }
  0x7d   :  { %754 = vmatmul.msk.f32.gmra.mxu0 %vm246_vm0, %v35_v5  ;;  %v1103_v7 = vpop.permute.xlu0 %158  ;;  %v1137_v22 = vpop.permute.xlu2 %213 }
  0x7e   :  { %786 = vmatmul.msk.f32.gmra.mxu1 %vm246_vm0, %v35_v5 }
  0x82   :  { %v1106_v9 = vpop.f32.mrf.mxu0 }
  0x83   :  { %v1111_v11 = vpop.f32.mrf.mxu1 }
  0x84   :  { %1368 = vst [vmem:[#allocation2_spill] sm:$0xff] %v1111_v11  ;;  %v1115_v13 = vpop.permute.xlu1 %143 }
  0x85   :  { %755 = vmatmul.msk.f32.gmra.mxu0 %vm246_vm0, %v36_v10  ;;  %v1118_v14 = vpop.permute.xlu0 %233  ;;  %v1155_v30 = vpop.permute.xlu2 %118 }
  0x86   :  { %787 = vmatmul.msk.f32.gmra.mxu1 %vm246_vm0, %v36_v10 }
  0x89   :  { %v1121_v15 = vpop.f32.mrf.mxu2 }
  0x8a   :  { %v1123_v16 = vpop.f32.mrf.mxu0 }
  0x8b   :  { %v1128_v18 = vpop.f32.mrf.mxu1  ;;  %v1130_v19 = vpop.f32.mrf.mxu3 }
  0x8c   :  { %1369 = vst [vmem:[#allocation3_spill] sm:$0xff] %v1128_v18  ;;  %v1132_v20 = vpop.permute.xlu1 %223 }
  0x8d   :  { %1370 = vst [vmem:[#allocation4_spill] sm:$0xff] %v1130_v19  ;;  %756 = vmatmul.msk.f32.gmra.mxu0 %vm246_vm0, %v37_v17  ;;  %v1135_v21 = vpop.permute.xlu0 %138  ;;  %v1171_v38 = vpop.permute.xlu2 %198 }
  0x8e   :  { %788 = vmatmul.msk.f32.gmra.mxu1 %vm246_vm0, %v37_v17 }
  0x91   :  { %v1140_v23 = vpop.f32.mrf.mxu2 }
  0x92   :  { %v1142_v24 = vpop.f32.mrf.mxu0 }
  0x93   :  { %v1147_v26 = vpop.f32.mrf.mxu1  ;;  %v533_v27 = vpop.f32.mrf.mxu3 }
  0x94   :  { %1371 = vst [vmem:[#allocation5_spill] sm:$0xff] %v1147_v26  ;;  %v1149_v28 = vpop.permute.xlu1 %128 }
  0x95   :  { %757 = vmatmul.msk.f32.gmra.mxu0 %vm246_vm0, %v38_v25  ;;  %v1152_v29 = vpop.permute.xlu0 %218 }
  0x96   :  { %789 = vmatmul.msk.f32.gmra.mxu1 %vm246_vm0, %v38_v25 }
  0x99   :  { %v1157_v31 = vpop.f32.mrf.mxu2 }
  0x9a   :  { %v1159_v32 = vpop.f32.mrf.mxu0 }
  0x9b   :  { %v1161_v33 = vpop.f32.mrf.mxu1  ;;  %v536_v34 = vpop.f32.mrf.mxu3 }
  0x9c   :  { %1372 = vst [vmem:[#allocation6_spill] sm:$0xff] %v1161_v33  ;;  %v1163_v35 = vpop.permute.xlu1 %208 }
  0x9d   :  { %758 = vmatmul.msk.f32.gmra.mxu0 %vm246_vm0, %v865_v8  ;;  %v1167_v36 = vpop.permute.xlu0 %123 }
  0xa1   :  { %v1169_v37 = vpop.f32.mrf.mxu2 }
  0xa2   :  { %v1173_v39 = vpop.f32.mrf.mxu0 }
  0xa3   :  { %v485_v40 = vpop.f32.mrf.mxu1  ;;  %v539_v41 = vpop.f32.mrf.mxu3 }
  0xa4   :  { %v1175_v42 = vpop.permute.xlu1 %113  ;;  %v1178_v43 = vadd.f32 %v539_v41, %v1171_v38 }
  0xa5   :  { %v204_v44 = vpop.permute.xlu0 %203 }
  0xa6   :  { %1373 = vst [vmem:[#allocation7_spill] sm:$0xff] %v1178_v43 }
  0xa9   :  { %v432_v45 = vpop.f32.mrf.mxu2 }
  0xaa   :  { %v1180_v46 = vpop.f32.mrf.mxu0 }
  0xab   :  { %v488_v8 = vpop.f32.mrf.mxu1  ;;  %v542_v47 = vpop.f32.mrf.mxu3 }
  0xac   :  { %v1183_v48 = vadd.f32 %v488_v8, %v1175_v42  ;;  %v194_v49 = vpop.permute.xlu1 %193  ;;  %v1185_v50 = vadd.f32 %v542_v47, %v204_v44 }
  0xad   :  { %v1187_v51 = vadd.f32 %v536_v34, %v194_v49  ;;  %v1189_v52 = vpop.permute.xlu0 %108 }
  0xae   :  { %1374 = vst [vmem:[#allocation8_spill] sm:$0xff] %v1183_v48  ;;  %v1192_v53 = vadd.f32 %v485_v40, %v1189_v52 }
  0xaf   :  { %1375 = vst [vmem:[#allocation9_spill] sm:$0xff] %v1185_v50 }
  0xb0   :  { %1376 = vst [vmem:[#allocation10_spill] sm:$0xff] %v1187_v51 }
  0xb1   :  { %1377 = vst [vmem:[#allocation11_spill] sm:$0xff] %v1192_v53  ;;  %v435_v54 = vpop.f32.mrf.mxu2 }
  0xb2   :  { %v1194_v55 = vpop.f32.mrf.mxu0 }
  0xb3   :  { %v491_v56 = vpop.f32.mrf.mxu1  ;;  %v545_v57 = vpop.f32.mrf.mxu3 }
  0xb4   :  { %v1197_v58 = vadd.f32 %v491_v56, %v1155_v30  ;;  %v1200_v59 = vadd.f32 %v545_v57, %v1163_v35 }
  0xb5   :  { %v189_v60 = vpop.permute.xlu0 %188 }
  0xb6   :  { %1378 = vst [vmem:[#allocation12_spill] sm:$0xff] %v1197_v58  ;;  %v1202_v61 = vadd.f32 %v533_v27, %v189_v60 }
  0xb7   :  { %1379 = vst [vmem:[#allocation13_spill] sm:$0xff] %v1200_v59 }
  0xb8   :  { %1380 = vst [vmem:[#allocation14_spill] sm:$0xff] %v1202_v61 }
  0xb9   :  { %v438_v63 = vpop.f32.mrf.mxu2 }
  0xba   :  { %v1204_v1 = vpop.f32.mrf.mxu0  ;;  %v439_v33 = vadd.f32 %v438_v63, %v1152_v29 }
  0xbb   :  { %v494_v5 = vpop.f32.mrf.mxu1 }
  0xbc   :  { %v1207_v10 = vadd.f32 %v494_v5, %v1167_v36  ;;  %v1220_v5 = vpop.f32.mrf.mxu3 }
  0xbd   :  { %1381 = vst [vmem:[#allocation15_spill] sm:$0xff] %v1220_v5 }
  0xc1   :  { %v441_v17 = vpop.f32.mrf.mxu2 }
  0xc2   :  { %v1209_v25 = vpop.f32.mrf.mxu0  ;;  %v442_v53 = vadd.f32 %v441_v17, %v1132_v20  ;;  %v1251_v17 = vpop.permute.xlu2 %103 }
  0xc3   :  { %v497_v34 = vpop.f32.mrf.mxu1 }
  0xc4   :  { %v1212_v40 = vadd.f32 %v497_v34, %v1149_v28  ;;  %v623_v5 = vmax.f32 %v442_v53, 0.0  ;;  %v424_v53 = vadd.f32 %v1140_v23, %v194_v49 }
  0xc9   :  { %v444_v41 = vpop.f32.mrf.mxu2 }
  0xca   :  { %v1214_v8 = vpop.f32.mrf.mxu0  ;;  %v445_v59 = vadd.f32 %v444_v41, %v1095_v4  ;;  %v621_v41 = vmax.f32 %v439_v33, 0.0  ;;  %v421_v33 = vadd.f32 %v1121_v15, %v189_v60 }
  0xcb   :  { %v1218_v57 = vpop.f32.mrf.mxu1 }
  0xcc   :  { %v625_v58 = vmax.f32 %v445_v59, 0.0  ;;  %v609_v23 = vmax.f32 %v421_v33, 0.0 }
  0xd1   :  { %v447_v47 = vpop.f32.mrf.mxu2 }
  0xd2   :  { %v1216_v27 = vpop.f32.mrf.mxu0  ;;  %v448_v34 = vadd.f32 %v447_v47, %v1118_v14  ;;  %v1231_v47 = vpop.f32.mrf.mxu3 }
  0xd3   :  { %v1225_v18 = vpop.f32.mrf.mxu1 }
  0xd4   :  { %v627_v48 = vmax.f32 %v448_v34, 0.0 }
  0xd9   :  { %v450_v56 = vpop.f32.mrf.mxu2 }
  0xda   :  { %v393_v61 = vpop.f32.mrf.mxu0  ;;  %v451_v19 = vadd.f32 %v450_v56, %v1075_v62 }
  0xdc   :  { %v629_v26 = vmax.f32 %v451_v19, 0.0  ;;  %v1234_v19 = vpop.f32.mrf.mxu1 }
  0xe1   :  { %v453_v51 = vpop.f32.mrf.mxu2 }
  0xe2   :  { %v454_v43 = vadd.f32 %v453_v51, %v1089_v2  ;;  %v396_v11 = vpop.f32.mrf.mxu0  ;;  %v436_v51 = vadd.f32 %v435_v54, %v1137_v22 }
  0xe4   :  { %v631_v50 = vmax.f32 %v454_v43, 0.0  ;;  %v433_v43 = vadd.f32 %v432_v45, %v1163_v35  ;;  %v1241_v35 = vpop.f32.mrf.mxu3  ;;  %v1243_v45 = vpop.f32.mrf.mxu1 }
  0xe6   :  { %666 = vmatpush.msrb.mxu3 %v631_v50  ;;  %v430_v50 = vadd.f32 %v1169_v37, %v204_v44  ;;  %v617_v59 = vmax.f32 %v433_v43, 0.0  ;;  %v611_v37 = vmax.f32 %v424_v53, 0.0  ;;  %v394_v43 = vadd.f32 %v393_v61, %v1115_v13  ;;  %v1265_v61 = vpop.permute.xlu2 %183 }
  0xe8   :  { %667 = vmatpush.msrb.mxu3 %v629_v26  ;;  %v619_v26 = vmax.f32 %v436_v51, 0.0 }
  0xea   :  { %668 = vmatpush.msrb.mxu3 %v627_v48  ;;  %v399_v56 = vpop.f32.mrf.mxu0  ;;  %v427_v48 = vadd.f32 %v1157_v31, %v1171_v38  ;;  %v633_v31 = vld [vmem:[%s1366_s3] sm:$0xff] }
  0xeb   :  { %641 = vst [vmem:[#allocation1] ss:$2 sm:$0xff] %v633_v31  ;;  %v400_v15 = vadd.f32 %v399_v56, %v1100_v6  ;;  %v1273_v31 = vpop.permute.xlu1 %98 }
  0xec   :  { %669 = vmatpush.msrb.mxu3 %v625_v58  ;;  %v615_v58 = vmax.f32 %v430_v50, 0.0  ;;  %v613_v63 = vmax.f32 %v427_v48, 0.0  ;;  %v1254_v51 = vpop.f32.mrf.mxu3  ;;  %v512_v50 = vpop.f32.mrf.mxu1  ;;  %v391_v48 = vadd.f32 %v1216_v27, %v1135_v21 }
  0xee   :  { %670 = vmatpush.msrb.mxu3 %v623_v5  ;;  %v397_v5 = vadd.f32 %v396_v11, %v1084_v0  ;;  %v591_v11 = vmax.f32 %v394_v43, 0.0  ;;  %v589_v53 = vmax.f32 %v391_v48, 0.0 }
  0xf0   :  { %671 = vmatpush.msrb.mxu3 %v621_v41  ;;  %v595_v41 = vmax.f32 %v400_v15, 0.0  ;;  %v593_v56 = vmax.f32 %v397_v5, 0.0 }
  0xf2   :  { %672 = vmatpush.msrb.mxu3 %v619_v26  ;;  %v402_v54 = vpop.f32.mrf.mxu0 }
  0xf3   :  { %v403_v44 = vadd.f32 %v402_v54, %v1103_v7  ;;  %v385_v54 = vadd.f32 %v1209_v25, %v1149_v28  ;;  %v376_v25 = vadd.f32 %v1180_v46, %v1175_v42  ;;  %v367_v42 = vadd.f32 %v1142_v24, %v1273_v31  ;;  %v1287_v15 = vpop.permute.xlu1 %178 }
  0xf4   :  { %673 = vmatpush.msrb.mxu3 %v617_v59  ;;  %v388_v59 = vadd.f32 %v1214_v8, %v1113_v12  ;;  %v1269_v27 = vpop.f32.mrf.mxu3  ;;  %v379_v8 = vadd.f32 %v1194_v55, %v1155_v30  ;;  %v515_v28 = vpop.f32.mrf.mxu1 }
  0xf5   :  { %v597_v34 = vmax.f32 %v403_v44, 0.0  ;;  %v579_v44 = vmax.f32 %v376_v25, 0.0  ;;  %v1281_v30 = vpop.permute.xlu0 %93  ;;  %v516_v48 = vadd.f32 %v515_v28, %v1103_v7 }
  0xf6   :  { %674 = vmatpush.msrb.mxu3 %v615_v58  ;;  %v382_v58 = vadd.f32 %v1204_v1, %v1167_v36  ;;  %v373_v36 = vadd.f32 %v1173_v39, %v1189_v52  ;;  %v581_v1 = vmax.f32 %v379_v8, 0.0  ;;  %v510_v8 = vadd.f32 %v1243_v45, %v1084_v0 }
  0xf8   :  { %675 = vmatpush.msrb.mxu3 %v613_v63  ;;  %v587_v63 = vmax.f32 %v388_v59, 0.0  ;;  %v577_v46 = vmax.f32 %v373_v36, 0.0  ;;  %v504_v36 = vadd.f32 %v1225_v18, %v1135_v21  ;;  %v594_v0 = vmax.f32 %v510_v8, 0.0  ;;  %v1393_v8 = vld [vmem:[#allocation4_spill] sm:$0xff] }
  0xf9   :  { %v558_v18 = vadd.f32 %v1254_v51, %v1095_v4  ;;  %v584_v4 = vmax.f32 %v1207_v10, 0.0  ;;  %v1382_v51 = vld [vmem:[#allocation15_spill] sm:$0xff] }
  0xfa   :  { %676 = vmatpush.msrb.mxu3 %v611_v37  ;;  %v405_v38 = vpop.f32.mrf.mxu0  ;;  %v585_v37 = vmax.f32 %v385_v54, 0.0  ;;  %v1386_v10 = vld [vmem:[#allocation11_spill] sm:$0xff] }
  0xfb   :  { %v406_v49 = vadd.f32 %v405_v38, %v1092_v3  ;;  %v583_v38 = vmax.f32 %v382_v58, 0.0 }
  0xfc   :  { %677 = vmatpush.msrb.mxu3 %v609_v23  ;;  %v370_v23 = vadd.f32 %v1159_v32, %v1251_v17  ;;  %v563_v39 = vpop.f32.mrf.mxu3  ;;  %v518_v32 = vpop.f32.mrf.mxu1 }
  0xfd   :  { %v599_v60 = vmax.f32 %v406_v49, 0.0  ;;  %v1283_v49 = vpop.permute.xlu2 %88  ;;  %v519_v43 = vadd.f32 %v518_v32, %v1092_v3  ;;  %v1299_v54 = vpop.permute.xlu0 %173  ;;  %v564_v45 = vadd.f32 %v563_v39, %v1075_v62  ;;  %v590_v62 = vmax.f32 %v504_v36, 0.0 }
  0xfe   :  { %v575_v52 = vmax.f32 %v370_v23, 0.0  ;;  %v361_v5 = vadd.f32 %v1106_v9, %v1283_v49  ;;  %v513_v9 = vadd.f32 %v512_v50, %v1100_v6  ;;  %v507_v6 = vadd.f32 %v1234_v19, %v1115_v13 }
  0xff   :  { %646 = vmatpush.msrb.mxu2 %v599_v60  ;;  %v364_v60 = vadd.f32 %v1123_v16, %v1281_v30  ;;  %v501_v13 = vadd.f32 %v1218_v57, %v1113_v12  ;;  %v561_v19 = vadd.f32 %v1269_v27, %v1118_v14  ;;  %v630_v21 = vmax.f32 %v564_v45, 0.0 }
 0x100   :  { %v569_v16 = vmax.f32 %v361_v5, 0.0  ;;  %v596_v50 = vmax.f32 %v513_v9, 0.0  ;;  %v555_v12 = vadd.f32 %v1241_v35, %v1132_v20  ;;  %v586_v14 = vmax.f32 %v1212_v40, 0.0  ;;  %v1383_v35 = vld [vmem:[#allocation12_spill] sm:$0xff]  ;;  %v1384_v40 = vld [vmem:[#allocation6_spill] sm:$0xff] }
 0x101   :  { %647 = vmatpush.msrb.mxu2 %v597_v34  ;;  %v573_v34 = vmax.f32 %v367_v42, 0.0  ;;  %v571_v24 = vmax.f32 %v364_v60, 0.0  ;;  %v628_v57 = vmax.f32 %v561_v19, 0.0  ;;  %v552_v27 = vadd.f32 %v1231_v47, %v1152_v29  ;;  %v1385_v47 = vld [vmem:[#allocation8_spill] sm:$0xff]  ;;  %v1391_v9 = vld [vmem:[#allocation2_spill] sm:$0xff] }
 0x102   :  { %v1257_v26 = vpop.f32.mrf.mxu0  ;;  %v626_v42 = vmax.f32 %v558_v18, 0.0  ;;  %v624_v39 = vmax.f32 %v555_v12, 0.0  ;;  %v483_v29 = vadd.f32 %v1384_v40, %v1251_v17  ;;  %v580_v32 = vmax.f32 %v1385_v47, 0.0 }
 0x103   :  { %648 = vmatpush.msrb.mxu2 %v595_v41  ;;  %v622_v60 = vmax.f32 %v552_v27, 0.0 }
 0x104   :  { %v566_v7 = vpop.f32.mrf.mxu3  ;;  %v1318_v23 = vpop.f32.mrf.mxu1 }
 0x105   :  { %649 = vmatpush.msrb.mxu2 %v593_v56 }
 0x107   :  { %650 = vmatpush.msrb.mxu2 %v591_v11  ;;  %v1297_v11 = vld.sshfl [vmem:[#allocation1] sm:$0xff pattern:$0x75316420] }
 0x109   :  { %651 = vmatpush.msrb.mxu2 %v589_v53  ;;  %v600_v53 = vmax.f32 %v519_v43, 0.0 }
 0x10a   :  { %v411_v33 = vpop.f32.mrf.mxu0 }
 0x10b   :  { %652 = vmatpush.msrb.mxu2 %v587_v63  ;;  %v412_v3 = vadd.f32 %v411_v33, %v1299_v54  ;;  %v1303_v63 = vpop.permute.xlu1 %168  ;;  %v567_v33 = vadd.f32 %v566_v7, %v1089_v2  ;;  %v592_v2 = vmax.f32 %v507_v6, 0.0 }
 0x10c   :  { %v409_v28 = vadd.f32 %v1257_v26, %v1303_v63  ;;  %v1316_v26 = vld.sshfl [vmem:[#allocation1 + $0x8] sm:$0xff pattern:$0x75316420]  ;;  %v524_v20 = vpop.f32.mrf.mxu1 }
 0x10d   :  { %653 = vmatpush.msrb.mxu2 %v585_v37  ;;  %v598_v37 = vmax.f32 %v516_v48, 0.0  ;;  %v576_v48 = vmax.f32 %v483_v29, 0.0  ;;  %v525_v36 = vadd.f32 %v524_v20, %v1299_v54  ;;  %v638_v54 = vpop.permute.xlu2 %637 }
 0x10f   :  { %654 = vmatpush.msrb.mxu2 %v583_v38  ;;  %v603_v38 = vmax.f32 %v412_v3, 0.0  ;;  %v1392_v3 = vld [vmem:[#allocation7_spill] sm:$0xff]  ;;  %v604_v45 = vmax.f32 %v525_v36, 0.0 }
 0x111   :  { %655 = vmatpush.msrb.mxu2 %v581_v1  ;;  %v601_v1 = vmax.f32 %v409_v28, 0.0  ;;  %v1394_v28 = vld [vmem:[#allocation10_spill] sm:$0xff] }
 0x112   :  { %v414_v55 = vpop.f32.mrf.mxu0 }
 0x113   :  { %656 = vmatpush.msrb.mxu2 %v579_v44  ;;  %v415_v56 = vadd.f32 %v414_v55, %v1287_v15  ;;  %v632_v44 = vmax.f32 %v567_v33, 0.0  ;;  %v588_v55 = vmax.f32 %v501_v13, 0.0 }
 0x115   :  { %657 = vmatpush.msrb.mxu2 %v577_v46  ;;  %v605_v25 = vmax.f32 %v415_v56, 0.0  ;;  %v549_v46 = vadd.f32 %v1382_v51, %v1137_v22  ;;  %v1387_v22 = vld [vmem:[#allocation5_spill] sm:$0xff] }
 0x116   :  { %v480_v43 = vadd.f32 %v1387_v22, %v1273_v31  ;;  %v1389_v56 = vld [vmem:[#allocation9_spill] sm:$0xff]  ;;  %v527_v31 = vpop.f32.mrf.mxu1 }
 0x117   :  { %658 = vmatpush.msrb.mxu2 %v575_v52  ;;  %v582_v52 = vmax.f32 %v1383_v35, 0.0  ;;  %v620_v5 = vmax.f32 %v549_v46, 0.0 }
 0x118   :  { %v574_v7 = vmax.f32 %v480_v43, 0.0 }
 0x119   :  { %659 = vmatpush.msrb.mxu2 %v573_v34  ;;  %v578_v34 = vmax.f32 %v1386_v10, 0.0 }
 0x11a   :  { %v417_v41 = vpop.f32.mrf.mxu0 }
 0x11b   :  { %v418_v59 = vadd.f32 %v417_v41, %v1265_v61  ;;  %660 = vmatpush.msrb.mxu2 %v571_v24  ;;  %v1388_v24 = vld [vmem:[#allocation13_spill] sm:$0xff] }
 0x11c   :  { %v618_v41 = vmax.f32 %v1388_v24, 0.0 }
 0x11d   :  { %v607_v58 = vmax.f32 %v418_v59, 0.0  ;;  %661 = vmatpush.msrb.mxu2 %v569_v16  ;;  %v616_v59 = vmax.f32 %v1389_v56, 0.0  ;;  %v1390_v16 = vld [vmem:[#allocation3_spill] sm:$0xff] }
 0x11e   :  { %662 = vmatmul.f32.vlgmr.msrb.gmra.mxu2 %v1297_v11  ;;  %v477_v17 = vadd.f32 %v1390_v16, %v1281_v30 }
 0x11f   :  { %686 = vmatpush.msra.mxu2 %v600_v53  ;;  %678 = vmatpush.msrb.mxu3 %v607_v58  ;;  %v474_v53 = vadd.f32 %v1391_v9, %v1283_v49  ;;  %v614_v58 = vmax.f32 %v1392_v3, 0.0 }
 0x120   :  { %v572_v6 = vmax.f32 %v477_v17, 0.0 }
 0x121   :  { %687 = vmatpush.msra.mxu2 %v598_v37  ;;  %679 = vmatpush.msrb.mxu3 %v605_v25  ;;  %v531_v37 = vadd.f32 %v1393_v8, %v1265_v61  ;;  %v612_v25 = vmax.f32 %v1394_v28, 0.0  ;;  %v570_v30 = vmax.f32 %v474_v53, 0.0  ;;  %v522_v61 = vadd.f32 %v1318_v23, %v1303_v63 }
 0x123   :  { %688 = vmatpush.msra.mxu2 %v596_v50  ;;  %680 = vmatpush.msrb.mxu3 %v603_v38  ;;  %v1395_v50 = vld [vmem:[#allocation14_spill] sm:$0xff]  ;;  %v528_v38 = vadd.f32 %v527_v31, %v1287_v15  ;;  %v608_v49 = vmax.f32 %v531_v37, 0.0 }
 0x124   :  { %v610_v33 = vmax.f32 %v1395_v50, 0.0 }
 0x125   :  { %689 = vmatpush.msra.mxu2 %v594_v0  ;;  %681 = vmatpush.msrb.mxu3 %v601_v1  ;;  %v606_v0 = vmax.f32 %v528_v38, 0.0  ;;  %v602_v1 = vmax.f32 %v522_v61, 0.0 }
 0x126   :  { %682 = vmatmul.f32.vlgmr.msrb.gmra.mxu3 %v1316_v26 }
 0x127   :  { %690 = vmatpush.msra.mxu2 %v592_v2  ;;  %706 = vmatpush.msra.mxu3 %v632_v44 }
 0x129   :  { %691 = vmatpush.msra.mxu2 %v590_v62  ;;  %707 = vmatpush.msra.mxu3 %v630_v21 }
 0x12b   :  { %692 = vmatpush.msra.mxu2 %v588_v55  ;;  %708 = vmatpush.msra.mxu3 %v628_v57 }
 0x12d   :  { %693 = vmatpush.msra.mxu2 %v586_v14  ;;  %709 = vmatpush.msra.mxu3 %v626_v42 }
 0x12f   :  { %694 = vmatpush.msra.mxu2 %v584_v4  ;;  %710 = vmatpush.msra.mxu3 %v624_v39 }
 0x131   :  { %695 = vmatpush.msra.mxu2 %v582_v52  ;;  %711 = vmatpush.msra.mxu3 %v622_v60 }
 0x133   :  { %696 = vmatpush.msra.mxu2 %v580_v32  ;;  %712 = vmatpush.msra.mxu3 %v620_v5 }
 0x135   :  { %697 = vmatpush.msra.mxu2 %v578_v34  ;;  %713 = vmatpush.msra.mxu3 %v618_v41 }
 0x137   :  { %698 = vmatpush.msra.mxu2 %v576_v48  ;;  %714 = vmatpush.msra.mxu3 %v616_v59 }
 0x139   :  { %699 = vmatpush.msra.mxu2 %v574_v7  ;;  %715 = vmatpush.msra.mxu3 %v614_v58 }
 0x13b   :  { %700 = vmatpush.msra.mxu2 %v572_v6  ;;  %716 = vmatpush.msra.mxu3 %v612_v25 }
 0x13d   :  { %701 = vmatpush.msra.mxu2 %v570_v30  ;;  %717 = vmatpush.msra.mxu3 %v610_v33 }
 0x13e   :  { %702 = vmatmul.f32.vlgmr.msra.gmra.mxu2 %v1297_v11 }
 0x13f   :  { %718 = vmatpush.msra.mxu3 %v608_v49 }
 0x141   :  { %719 = vmatpush.msra.mxu3 %v606_v0 }
 0x143   :  { %720 = vmatpush.msra.mxu3 %v604_v45 }
 0x145   :  { %721 = vmatpush.msra.mxu3 %v602_v1 }
 0x146   :  { %722 = vmatmul.f32.vlgmr.msra.gmra.mxu3 %v1316_v26 }
 0x1a1   :  { %v663_v15 = vpop.f32.mrf.mxu2 }
 0x1a2   :  { %v664_v11 = vadd.f32 %v663_v15, %v638_v54 }
 0x1a9   :  { %v683_v13 = vpop.f32.mrf.mxu3 }
 0x1aa   :  { %v684_v63 = vadd.f32 %v683_v13, %v664_v11 }
 0x1c1   :  { %v703_v2 = vpop.f32.mrf.mxu2 }
 0x1c2   :  { %v704_v19 = vadd.f32 %v703_v2, %v638_v54 }
 0x1c9   :  { %v723_v44 = vpop.f32.mrf.mxu3 }
 0x1ca   :  { %v724_v62 = vadd.f32 %v723_v44, %v704_v19 }
 0x1cc   :  { %v728_v23 = vrot.slane %v724_v62, 4 }
 0x1ce   :  { %v730_v18 = vsel %vm729_vm1, %v684_v63, %v728_v23 }
 0x1cf   :  { %734 = vst.msk [vmem:[%s1367_s5] sm:$0xff] %vm733_vm3, %v730_v18 }

// kernel: _lambda_.6
= control target key start
LH: loop header
LB: loop body
LE: loop exit
PB: predicated region body
PF: predicated region fallthrough
CT: control target
= control target key end

     0   :  { %s4348_s0 = inlined_call_operand.vmem [shape: f32[8,2,12,12], index: 0, kind: input, shape index: {}]   ;;  %s4349_s1 = inlined_call_operand.vmem [shape: f32[32], index: 1, kind: input, shape index: {}]   ;;  %s4350_s2 = inlined_call_operand.vmem [shape: f32[4], index: 2, kind: input, shape index: {}]   ;;  %s4351_s3 = inlined_call_operand.vmem [shape: f32[144], index: 3, kind: input, shape index: {}]   ;;  %s4352_s4 = inlined_call_operand.vmem [shape: f32[4], index: 4, kind: input, shape index: {}]   ;;  %s4353_s5 = inlined_call_operand.vmem [shape: f32[32], index: 5, kind: input, shape index: {}]   ;;  %s4354_s6 = inlined_call_operand.vmem [shape: f32[8], index: 6, kind: input, shape index: {}]   ;;  %s4355_s7 = inlined_call_operand.vmem [shape: f32[8], index: 7, kind: input, shape index: {}]   ;;  %s4356_s8 = inlined_call_operand.vmem [shape: f32[8], index: 8, kind: input, shape index: {}]   ;;  %s4357_s9 = inlined_call_operand.vmem [shape: f32[8,2,10,10], index: 9, kind: output, shape index: {}]  }
   0x1   :  { %4358 = sst [smem:[#allocation22_spill]] %s4349_s1 }
   0x2   :  { %4359 = sst [smem:[#allocation23_spill]] %s4350_s2 }
   0x3   :  { %14 = vsyncpa [#allocation4], 0 }
   0x4   :  { %15 = vsyncpa [#allocation6], 0 }
   0x5   :  { %16 = vsyncpa [#allocation9], 0 }
   0x6   :  { %17 = vsyncpa [#allocation12], 0 }
   0x7   :  { %18 = vsyncpa [#allocation15], 0  ;;  %s2956_s30 = smov 0   ;;  %s2958_s10 = smov 0  }
   0x8   :  { %s2960_s11 = smov 0  }
   0x9 LB: > { %s2972_s12 = sadd.s32 4294967295, %s2894_s11   ;;  %s2975_s13 = sadd.s32 1, %s2894_s11   ;;  %s2894_s11 = sphi %s2960_s11, %s4368_s11   ;;  %s2890_s10 = sphi %s2958_s10, %s4367_s10   ;;  %s2886_s30 = sphi %s2956_s30, %s4366_s30  }
   0xa   : > { %s28_s14 = ssub.s32 %s2894_s11, %s2975_s13  ;;  %s31_s15 = sadd.s32 1, %s2890_s10 }
   0xb   : > { %p29_p0 = scmp.eq.s32.totalorder %s28_s14, 0  ;;  %p38_p1 = scmp.ne.s32.totalorder %s2890_s10, %s2886_s30 }
   0xc   : > { %p39_p2 = scmp.eq.s32.totalorder %s2894_s11, 0  ;;  %p236_p3 = scmp.eq.s32.totalorder %s2972_s12, 1 }
   0xd   : > { %s2985_s16 = scalar_select %p29_p0, %s2890_s10, %s31_s15  }
   0xe   : > { %p2987_p4 = por %p39_p2, %p38_p1  ;;  %p2991_p5 = por %p236_p3, %p38_p1 }
   0xf   : > { %p2386_p6 = scmp.ge.s32.totalorder %s2894_s11, 1  ;;  %p249_p7 = scmp.lt.s32.totalorder %s2894_s11, 3 }
  0x10   : > { %p2666_p8 = scmp.eq.s32.totalorder %s2972_s12, 0  ;;  %s4363_s2 = sld [smem:[#allocation23_spill]] }
  0x11   : > { %p2998_p9 = pnand %p2386_p6, %p249_p7  ;;  %s291_s25 = sshll.u32 %s4352_s4, 4  ;;  %s292_s25 = int_to_ptr.vmem [resolvable:$true] %s291_s25 }
  0x12   : > { %s311_s29 = sshll.u32 %s4354_s6, 4  ;;  %s4365_s1 = sld [smem:[#allocation22_spill]]  ;;  %s312_s29 = int_to_ptr.vmem [resolvable:$true] %s311_s29 }
  0x13   : > { %p2641_p10 = pneg %p2998_p9  ;;  %s2896_s21 = smov [#allocation5]  }
  0x14   : > { %s2897_s23 = smov [#allocation8]   ;;  %s2898_s24 = smov [#allocation11]  }
  0x15   : > { %p3012_p11 = pnand %p2666_p8, %p2641_p10  ;;  %s2899_s27 = smov [#allocation3]  }
  0x16   : > { %s271_s22 = sshll.u32 %s4363_s2, 4  ;;  %s281_s14 = sshll.u32 %s4351_s3, 4  ;;  %s272_s22 = int_to_ptr.vmem [resolvable:$true] %s271_s22  ;;  %s282_s14 = int_to_ptr.vmem [resolvable:$true] %s281_s14 }
  0x17   : > { %2647 = dma.vmem_to_smem (!%p3012_p11), %s272_s22, 16, %s2896_s21, [#allocation6]  }
  0x18   : > { %s261_s20 = sshll.u32 %s4365_s1, 4  ;;  %s301_s22 = sshll.u32 %s4353_s5, 4  ;;  %s262_s20 = int_to_ptr.vmem [resolvable:$true] %s261_s20  ;;  %s302_s22 = int_to_ptr.vmem [resolvable:$true] %s301_s22 }
  0x19   : > { %2653 = dma.vmem_to_smem (!%p3012_p11), %s292_s25, 16, %s2897_s23, [#allocation9]  }
  0x1a   : > { %2659 = dma.vmem_to_smem (!%p3012_p11), %s312_s29, 16, %s2898_s24, [#allocation12]  }
  0x1b   : > { %2644 = dma.vmem_to_smem (!%p3012_p11), %s262_s20, 16, %s2899_s27, [#allocation4]  }
  0x1c   : > { %s2900_s21 = smov [#allocation7]   ;;  %s2901_s25 = smov [#allocation10]  }
  0x1d   : > { %2650 = dma.vmem_to_smem (!%p3012_p11), %s282_s14, 32, %s2900_s21, [#allocation6]  }
  0x1e   : > { %2656 = dma.vmem_to_smem (!%p3012_p11), %s302_s22, 16, %s2901_s25, [#allocation9]  }
  0x1f   : > { %s321_s20 = sshll.u32 %s4355_s7, 4  ;;  %s331_s27 = sshll.u32 %s4356_s8, 4  ;;  %s322_s20 = int_to_ptr.vmem [resolvable:$true] %s321_s20  ;;  %s332_s27 = int_to_ptr.vmem [resolvable:$true] %s331_s27 }
  0x20   : > { %s2902_s28 = smov [#allocation13]   ;;  %s2903_s1 = smov [#allocation14]  }
  0x21   : > { %2662 = dma.vmem_to_smem (!%p3012_p11), %s322_s20, 16, %s2902_s28, [#allocation12]  }
  0x22   : > { %2665 = dma.vmem_to_smem (!%p3012_p11), %s332_s27, 16, %s2903_s1, [#allocation15]  }
  0x23   : > { %p2395_p12 = scmp.ge.s32.totalorder %s2894_s11, 2 }
  0x25   : > { %338 = sbr.rel (%p2395_p12) target bundleno = 62 (0x3e), region = 48 }
  0x2a   : > { %341 = sbr.rel (!%p2987_p4) target bundleno = 62 (0x3e), region = 52  ;;  %s343_s14 = sand.u32 (%p2987_p4), 1, %s2890_s10  }
  0x2b   : > { %s2607_s15 = sshll.u32 (%p2987_p4), %s2894_s11, 4  ;;  %s2396_s22 = sshll.u32 (%p2987_p4), %s343_s14, 7 }
  0x2c   : > { %s3058_s29 = scalar_lea.vmem (%p2987_p4), %s4348_s0, %s2607_s15  ;;  %s345_s11 = scalar_lea.vmem (%p2987_p4), [#allocation2], %s2396_s22 }
  0x2d   : > { %v407_v0 = vld [vmem:[%s3058_s29] sm:$0xff] (%p2987_p4)  ;;  %v409_v1 = vld [vmem:[%s3058_s29 + $0x8] sm:$0xff] (%p2987_p4) }
  0x2e   : > { %v411_v2 = vld [vmem:[%s3058_s29 + $0x20] sm:$0xff] (%p2987_p4)  ;;  %408 = vst [vmem:[%s345_s11] sm:$0xff] (%p2987_p4), %v407_v0  ;;  %v413_v3 = vld [vmem:[%s3058_s29 + $0x28] sm:$0xff] (%p2987_p4) }
  0x2f   : > { %410 = vst [vmem:[%s345_s11 + $0x8] sm:$0xff] %v409_v1  ;;  %v415_v4 = vld [vmem:[%s3058_s29 + $0x40] sm:$0xff]  ;;  %v417_v5 = vld [vmem:[%s3058_s29 + $0x48] sm:$0xff] }
  0x30   : > { %412 = vst [vmem:[%s345_s11 + $0x10] sm:$0xff] %v411_v2  ;;  %v419_v6 = vld [vmem:[%s3058_s29 + $0x60] sm:$0xff]  ;;  %v421_v7 = vld [vmem:[%s3058_s29 + $0x68] sm:$0xff] }
  0x31   : > { %414 = vst [vmem:[%s345_s11 + $0x18] sm:$0xff] %v413_v3  ;;  %v423_v8 = vld [vmem:[%s3058_s29 + $0x80] sm:$0xff]  ;;  %v425_v9 = vld [vmem:[%s3058_s29 + $0x88] sm:$0xff] }
  0x32   : > { %416 = vst [vmem:[%s345_s11 + $0x20] sm:$0xff] %v415_v4  ;;  %v427_v10 = vld [vmem:[%s3058_s29 + $0xa0] sm:$0xff]  ;;  %v429_v11 = vld [vmem:[%s3058_s29 + $0xa8] sm:$0xff] }
  0x33   : > { %418 = vst [vmem:[%s345_s11 + $0x28] sm:$0xff] %v417_v5  ;;  %v431_v12 = vld [vmem:[%s3058_s29 + $0xc0] sm:$0xff]  ;;  %v433_v13 = vld [vmem:[%s3058_s29 + $0xc8] sm:$0xff] }
  0x34   : > { %420 = vst [vmem:[%s345_s11 + $0x30] sm:$0xff] %v419_v6  ;;  %v435_v14 = vld [vmem:[%s3058_s29 + $0xe0] sm:$0xff]  ;;  %v437_v15 = vld [vmem:[%s3058_s29 + $0xe8] sm:$0xff] }
  0x35   : > { %422 = vst [vmem:[%s345_s11 + $0x38] sm:$0xff] %v421_v7 }
  0x36   : > { %424 = vst [vmem:[%s345_s11 + $0x40] sm:$0xff] %v423_v8 }
  0x37   : > { %426 = vst [vmem:[%s345_s11 + $0x48] sm:$0xff] %v425_v9 }
  0x38   : > { %428 = vst [vmem:[%s345_s11 + $0x50] sm:$0xff] %v427_v10 }
  0x39   : > { %430 = vst [vmem:[%s345_s11 + $0x58] sm:$0xff] %v429_v11 }
  0x3a   : > { %432 = vst [vmem:[%s345_s11 + $0x60] sm:$0xff] %v431_v12 }
  0x3b   : > { %434 = vst [vmem:[%s345_s11 + $0x68] sm:$0xff] %v433_v13 }
  0x3c   : > { %436 = vst [vmem:[%s345_s11 + $0x70] sm:$0xff] %v435_v14 }
  0x3d   : > { %438 = vst [vmem:[%s345_s11 + $0x78] sm:$0xff] %v437_v15 }
  0x3e PF: > { %447 = sbr.rel (%p2998_p9) target bundleno = 523 (0x20b), region = 90  ;;  %s450_s17 = sand.u32 (!%p2998_p9), 1, %s2886_s30  }
  0x3f   : > { %s3079_s26 = sshll.u32 (!%p2998_p9), %s450_s17, 7 }
  0x40   : > { %s3082_s23 = scalar_lea.vmem (!%p2998_p9), [#allocation2], %s3079_s26 }
  0x43   : > { %2865 = dma.done.wait (%p2666_p8), [#allocation4], 16  }
  0x44   : > { %2867 = vsyncadd (%p2666_p8), [#allocation4], 4294967280 }
  0x45   : > { %2869 = dma.done.wait (%p2666_p8), [#allocation6], 48  }
  0x46   : > { %2871 = vsyncadd (%p2666_p8), [#allocation6], 4294967248 }
  0x47   : > { %2873 = dma.done.wait (%p2666_p8), [#allocation9], 32  }
  0x48   : > { %2875 = vsyncadd (%p2666_p8), [#allocation9], 4294967264 }
  0x49   : > { %2877 = dma.done.wait (%p2666_p8), [#allocation12], 32  }
  0x4a   : > { %2879 = vsyncadd (%p2666_p8), [#allocation12], 4294967264 }
  0x4b   : > { %2881 = dma.done.wait (%p2666_p8), [#allocation15], 16  }
  0x4c   : > { %2883 = vsyncadd (%p2666_p8), [#allocation15], 4294967280 }
  0x4d   : > { %496 = sfence }
  0x4e   : > { %s548_s30 = sld [smem:[#allocation13]]  ;;  %v525_v16 = vld [vmem:[%s3082_s23] sm:$0xff]  ;;  %v526_v17 = vld [vmem:[%s3082_s23 + $0x8] sm:$0xf]  ;;  %v2410_v21 = vld [vmem:[%s3082_s23 + $0x10] sm:$0xff]  ;;  %vm874_vm0 = vcmask 1046528  }
  0x4f   : > { %s552_s19 = sld [smem:[#allocation14]]  ;;  %v2411_v22 = vld [vmem:[%s3082_s23 + $0x18] sm:$0xf]  ;;  %v2412_v24 = vld [vmem:[%s3082_s23 + $0x20] sm:$0xff]  ;;  %v2413_v25 = vld [vmem:[%s3082_s23 + $0x28] sm:$0xf] }
  0x50   : > { %s2424_s20 = sld [smem:[#allocation13 + $0x1]]  ;;  %v2414_v33 = vld [vmem:[%s3082_s23 + $0x30] sm:$0xff]  ;;  %v2415_v34 = vld [vmem:[%s3082_s23 + $0x38] sm:$0xf]  ;;  %v2416_v38 = vld [vmem:[%s3082_s23 + $0x40] sm:$0xff]  ;;  %vm1848_vm1 = vcmask 80896  }
  0x51   : > { %s3106_s2 = sld [smem:[#allocation14 + $0x1]]  ;;  %v2417_v39 = vld [vmem:[%s3082_s23 + $0x48] sm:$0xf]  ;;  %v2418_v46 = vld [vmem:[%s3082_s23 + $0x50] sm:$0xff]  ;;  %v2419_v47 = vld [vmem:[%s3082_s23 + $0x58] sm:$0xf] }
  0x52   : > { %s2426_s24 = sld [smem:[#allocation13 + $0x2]]  ;;  %v2420_v60 = vld [vmem:[%s3082_s23 + $0x60] sm:$0xff]  ;;  %v2421_v61 = vld [vmem:[%s3082_s23 + $0x68] sm:$0xf]  ;;  %v2422_v2 = vld [vmem:[%s3082_s23 + $0x70] sm:$0xff]  ;;  %vm1850_vm2 = vcmask 74752  }
  0x53   : > { %s3108_s27 = sld [smem:[#allocation14 + $0x2]]  ;;  %v2423_v3 = vld [vmem:[%s3082_s23 + $0x78] sm:$0xf] }
  0x54   : > { %v549_v18 = vstv %s548_s30  ;;  %s3112_s28 = sld [smem:[#allocation13 + $0x3]] }
  0x55   : > { %v550_v19 = vmul.f32 %v549_v18, %v525_v16  ;;  %v551_v20 = vmul.f32 %v549_v18, %v526_v17  ;;  %v553_v23 = vstv %s552_s19  ;;  %s3114_s1 = sld [smem:[#allocation14 + $0x3]] }
  0x56   : > { %v559_v26 = vstv %s2424_s20  ;;  %s3118_s14 = sld [smem:[#allocation13 + $0x4]] }
  0x57   : > { %v554_v27 = vadd.f32 %v553_v23, %v550_v19  ;;  %v555_v28 = vadd.f32 %v553_v23, %v551_v20  ;;  %v560_v29 = vmul.f32 %v2410_v21, %v559_v26  ;;  %v561_v30 = vmul.f32 %v2411_v22, %v559_v26  ;;  %s3120_s15 = sld [smem:[#allocation14 + $0x4]] }
  0x58   : > { %v563_v31 = vstv %s3106_s2  ;;  %v569_v32 = vstv %s2426_s24  ;;  %s3123_s22 = sld [smem:[#allocation13 + $0x5]] }
  0x59   : > { %v564_v35 = vadd.f32 %v563_v31, %v560_v29  ;;  %v570_v36 = vmul.f32 %v2412_v24, %v569_v32  ;;  %v571_v37 = vmul.f32 %v2413_v25, %v569_v32  ;;  %s3127_s21 = sld [smem:[#allocation14 + $0x5]]  ;;  %v565_v40 = vadd.f32 %v563_v31, %v561_v30 }
  0x5a   : > { %v573_v41 = vstv %s3108_s27  ;;  %v579_v42 = vstv %s3112_s28  ;;  %s3133_s25 = sld [smem:[#allocation13 + $0x6]]  ;;  %v3135_v43 = vmax.f32 %v554_v27, 0.0  ;;  %v3137_v44 = vmax.f32 %v555_v28, 0.0 }
  0x5b   : > { %v574_v45 = vadd.f32 %v573_v41, %v570_v36  ;;  %s3139_s29 = sld [smem:[#allocation14 + $0x6]]  ;;  %v580_v48 = vmul.f32 %v2414_v33, %v579_v42  ;;  %v581_v49 = vmul.f32 %v2415_v34, %v579_v42  ;;  %v583_v50 = vstv %s3114_s1 }
  0x5c   : > { %v589_v51 = vstv %s3118_s14  ;;  %s3145_s11 = sld [smem:[#allocation13 + $0x7]]  ;;  %v3147_v52 = vmax.f32 %v564_v35, 0.0  ;;  %v575_v53 = vadd.f32 %v573_v41, %v571_v37  ;;  %v3151_v56 = vmax.f32 %v565_v40, 0.0 }
  0x5d   : > { %v590_v54 = vmul.f32 %v2416_v38, %v589_v51  ;;  %v591_v55 = vmul.f32 %v2417_v39, %v589_v51  ;;  %s3149_s17 = sld [smem:[#allocation14 + $0x7]]  ;;  %v584_v57 = vadd.f32 %v583_v50, %v580_v48  ;;  %v593_v58 = vstv %s3120_s15 }
  0x5e   : > { %v599_v59 = vstv %s3123_s22  ;;  %s3155_s30 = sld [smem:[#allocation3]]  ;;  %v585_v62 = vadd.f32 %v583_v50, %v581_v49  ;;  %v3163_v4 = vmax.f32 %v574_v45, 0.0  ;;  %v3169_v8 = vmax.f32 %v575_v53, 0.0 }
  0x5f   : > { %v594_v63 = vadd.f32 %v593_v58, %v590_v54  ;;  %v600_v0 = vmul.f32 %v2418_v46, %v599_v59  ;;  %v601_v1 = vmul.f32 %v2419_v47, %v599_v59  ;;  %s3159_s19 = sld [smem:[#allocation3 + $0x1]]  ;;  %v595_v5 = vadd.f32 %v593_v58, %v591_v55 }
  0x60   : > { %v603_v6 = vstv %s3127_s21  ;;  %v609_v7 = vstv %s3133_s25  ;;  %s3167_s20 = sld [smem:[#allocation3 + $0x2]]  ;;  %v3171_v9 = vmax.f32 %v584_v57, 0.0  ;;  %v3179_v16 = vmax.f32 %v585_v62, 0.0 }
  0x61   : > { %v604_v10 = vadd.f32 %v603_v6, %v600_v0  ;;  %v605_v11 = vadd.f32 %v603_v6, %v601_v1  ;;  %s3173_s2 = sld [smem:[#allocation3 + $0x3]]  ;;  %v610_v12 = vmul.f32 %v2420_v60, %v609_v7  ;;  %v611_v13 = vmul.f32 %v2421_v61, %v609_v7 }
  0x62   : > { %v613_v14 = vstv %s3139_s29  ;;  %v619_v15 = vstv %s3145_s11  ;;  %s3177_s24 = sld [smem:[#allocation3 + $0x4]]  ;;  %v3181_v17 = vmax.f32 %v594_v63, 0.0  ;;  %v3185_v20 = vmax.f32 %v595_v5, 0.0 }
  0x63   : > { %v620_v18 = vmul.f32 %v2422_v2, %v619_v15  ;;  %v621_v19 = vmul.f32 %v2423_v3, %v619_v15  ;;  %s3183_s27 = sld [smem:[#allocation3 + $0x5]]  ;;  %v614_v21 = vadd.f32 %v613_v14, %v610_v12  ;;  %v623_v22 = vstv %s3149_s17 }
  0x64   : > { %v629_v23 = vstv %s3155_s30  ;;  %s3189_s28 = sld [smem:[#allocation3 + $0x6]]  ;;  %v3191_v24 = vmax.f32 %v604_v10, 0.0  ;;  %v3193_v25 = vmax.f32 %v605_v11, 0.0  ;;  %v615_v28 = vadd.f32 %v613_v14, %v611_v13 }
  0x65   : > { %v630_v26 = vmul.f32 %v629_v23, %v3135_v43  ;;  %v631_v27 = vmul.f32 %v629_v23, %v3137_v44  ;;  %s3197_s1 = sld [smem:[#allocation3 + $0x7]]  ;;  %v624_v29 = vadd.f32 %v623_v22, %v620_v18  ;;  %v633_v30 = vstv %s3159_s19 }
  0x66   : > { %v639_v31 = vstv %s3167_s20  ;;  %s3201_s14 = sld [smem:[#allocation5]]  ;;  %v3203_v32 = vmax.f32 %v614_v21, 0.0  ;;  %v625_v33 = vadd.f32 %v623_v22, %v621_v19  ;;  %v634_v34 = vmul.f32 %v633_v30, %v3147_v52 }
  0x67   : > { %v635_v35 = vmul.f32 %v633_v30, %v3151_v56  ;;  %s3207_s15 = sld [smem:[#allocation7 + $0x2]]  ;;  %v640_v36 = vmul.f32 %v639_v31, %v3163_v4  ;;  %v641_v37 = vmul.f32 %v639_v31, %v3169_v8  ;;  %v645_v38 = vstv %s3173_s2 }
  0x68   : > { %v651_v39 = vstv %s3177_s24  ;;  %s3213_s22 = sld [smem:[#allocation7 + $0x1]]  ;;  %v636_v40 = vadd.f32 %v634_v34, %v630_v26  ;;  %v646_v42 = vmul.f32 %v645_v38, %v3171_v9  ;;  %v647_v45 = vmul.f32 %v645_v38, %v3179_v16 }
  0x69   : > { %v637_v41 = vadd.f32 %v635_v35, %v631_v27  ;;  %s2445_s21 = sld [smem:[#allocation3 + $0x8]]  ;;  %v3217_v46 = vmax.f32 %v615_v28, 0.0  ;;  %v3219_v47 = vmax.f32 %v624_v29, 0.0  ;;  %v652_v48 = vmul.f32 %v651_v39, %v3181_v17 }
  0x6a   : > { %v657_v49 = vstv %s3183_s27  ;;  %s3223_s25 = sld [smem:[#allocation3 + $0x9]]  ;;  %v642_v50 = vadd.f32 %v640_v36, %v636_v40  ;;  %v653_v53 = vmul.f32 %v651_v39, %v3185_v20  ;;  %v663_v54 = vstv %s3189_s28 }
  0x6b   : > { %v643_v51 = vadd.f32 %v641_v37, %v637_v41  ;;  %s3227_s29 = sld [smem:[#allocation3 + $0xa]]  ;;  %v3229_v55 = vmax.f32 %v625_v33, 0.0  ;;  %v669_v57 = vstv %s3197_s1  ;;  %v658_v60 = vmul.f32 %v657_v49, %v3191_v24 }
  0x6c   : > { %s3232_s11 = sld [smem:[#allocation3 + $0xb]]  ;;  %v648_v58 = vadd.f32 %v646_v42, %v642_v50  ;;  %v659_v61 = vmul.f32 %v657_v49, %v3193_v25  ;;  %v664_v62 = vmul.f32 %v663_v54, %v3203_v32  ;;  %v665_v63 = vmul.f32 %v663_v54, %v3217_v46 }
  0x6d   : > { %v649_v59 = vadd.f32 %v647_v45, %v643_v51  ;;  %s3236_s17 = sld [smem:[#allocation3 + $0xc]]  ;;  %v675_v0 = vstv %s3201_s14  ;;  %v670_v3 = vmul.f32 %v669_v57, %v3219_v47  ;;  %v671_v6 = vmul.f32 %v669_v57, %v3229_v55 }
  0x6e   : > { %s3241_s30 = sld [smem:[#allocation3 + $0xd]]  ;;  %v654_v1 = vadd.f32 %v652_v48, %v648_v58  ;;  %v855_v18 = vstv %s3207_s15  ;;  %v841_v19 = vstv %s3213_s22 }
  0x6f   : > { %v655_v2 = vadd.f32 %v653_v53, %v649_v59  ;;  %v681_v5 = vstv %s2445_s21  ;;  %s3244_s19 = sld [smem:[#allocation3 + $0xe]]  ;;  %s2904_s21 = smov 126  }
  0x70   : > { %v682_v7 = vmul.f32 %v681_v5, %v3135_v43  ;;  %v683_v10 = vmul.f32 %v681_v5, %v3137_v44  ;;  %v685_v11 = vstv %s3223_s25  ;;  %s3250_s20 = sld [smem:[#allocation3 + $0xf]]  ;;  %v660_v12 = vadd.f32 %v658_v60, %v654_v1  ;;  %s2905_s25 = smov 127  }
  0x71   : > { %v661_v13 = vadd.f32 %v659_v61, %v655_v2  ;;  %v686_v14 = vmul.f32 %v685_v11, %v3147_v52  ;;  %v687_v15 = vmul.f32 %v685_v11, %v3151_v56  ;;  %v691_v21 = vstv %s3227_s29  ;;  %s3258_s2 = sld [smem:[#allocation5 + $0x1]] }
  0x72   : > { %v697_v22 = vstv %s3232_s11  ;;  %v666_v23 = vadd.f32 %v664_v62, %v660_v12  ;;  %s3260_s24 = sld [smem:[#allocation3 + $0x10]]  ;;  %v692_v29 = vmul.f32 %v691_v21, %v3163_v4  ;;  %v693_v30 = vmul.f32 %v691_v21, %v3169_v8 }
  0x73   : > { %v667_v26 = vadd.f32 %v665_v63, %v661_v13  ;;  %v688_v27 = vadd.f32 %v686_v14, %v682_v7  ;;  %v689_v28 = vadd.f32 %v687_v15, %v683_v10  ;;  %v698_v31 = vmul.f32 %v697_v22, %v3171_v9  ;;  %s3266_s27 = sld [smem:[#allocation3 + $0x11]] }
  0x74   : > { %v699_v33 = vmul.f32 %v697_v22, %v3179_v16  ;;  %v672_v34 = vadd.f32 %v670_v3, %v666_v23  ;;  %v703_v36 = vstv %s3236_s17  ;;  %v709_v37 = vstv %s3241_s30  ;;  %s3270_s28 = sld [smem:[#allocation3 + $0x12]] }
  0x75   : > { %v673_v35 = vadd.f32 %v671_v6, %v667_v26  ;;  %v694_v38 = vadd.f32 %v692_v29, %v688_v27  ;;  %v695_v39 = vadd.f32 %v693_v30, %v689_v28  ;;  %v704_v40 = vmul.f32 %v703_v36, %v3181_v17  ;;  %s3274_s1 = sld [smem:[#allocation3 + $0x13]] }
  0x76   : > { %v705_v41 = vmul.f32 %v703_v36, %v3185_v20  ;;  %v676_v42 = vadd.f32 %v675_v0, %v672_v34  ;;  %v710_v48 = vmul.f32 %v709_v37, %v3191_v24  ;;  %v711_v49 = vmul.f32 %v709_v37, %v3193_v25  ;;  %s3278_s14 = sld [smem:[#allocation3 + $0x14]] }
  0x77   : > { %v677_v45 = vadd.f32 %v675_v0, %v673_v35  ;;  %v700_v50 = vadd.f32 %v698_v31, %v694_v38  ;;  %v701_v51 = vadd.f32 %v699_v33, %v695_v39  ;;  %v715_v53 = vstv %s3244_s19  ;;  %s3290_s15 = sld [smem:[#allocation3 + $0x15]] }
  0x78   : > { %v721_v54 = vstv %s3250_s20  ;;  %v3282_v57 = vmax.f32 %v676_v42, 0.0  ;;  %v716_v59 = vmul.f32 %v715_v53, %v3203_v32  ;;  %v717_v60 = vmul.f32 %v715_v53, %v3217_v46  ;;  %s3296_s22 = sld [smem:[#allocation3 + $0x16]] }
  0x79   : > { %v3284_v58 = vmax.f32 %v677_v45, 0.0  ;;  %v706_v61 = vadd.f32 %v704_v40, %v700_v50  ;;  %v707_v62 = vadd.f32 %v705_v41, %v701_v51  ;;  %v722_v63 = vmul.f32 %v721_v54, %v3219_v47  ;;  %s3306_s29 = sld [smem:[#allocation3 + $0x17]] }
  0x7a   : > { %v723_v0 = vmul.f32 %v721_v54, %v3229_v55  ;;  %v856_v1 = vmul.f32 %v855_v18, %v3282_v57  ;;  %v842_v3 = vmul.f32 %v841_v19, %v3282_v57  ;;  %v727_v10 = vstv %s3258_s2  ;;  %s3310_s11 = sld [smem:[#allocation7 + $0xb]] }
  0x7b   : > { %v857_v2 = vmul.f32 %v855_v18, %v3284_v58  ;;  %v843_v5 = vmul.f32 %v841_v19, %v3284_v58  ;;  %v712_v6 = vadd.f32 %v710_v48, %v706_v61  ;;  %v713_v7 = vadd.f32 %v711_v49, %v707_v62  ;;  %s3316_s17 = sld [smem:[#allocation7 + $0xa]] }
  0x7c   : > { %v733_v11 = vstv %s3260_s24  ;;  %860 = vrot.lane.b32.xlu1 %v856_v1, %s2904_s21  ;;  %846 = vrot.lane.b32.xlu0 %v842_v3, %s2905_s25  ;;  %v737_v14 = vstv %s3266_s27  ;;  %s3318_s30 = sld [smem:[#allocation5 + $0x2]] }
  0x7d   : > { %v734_v12 = vmul.f32 %v733_v11, %v3135_v43  ;;  %v735_v13 = vmul.f32 %v733_v11, %v3137_v44  ;;  %v743_v15 = vstv %s3270_s28  ;;  %v718_v18 = vadd.f32 %v716_v59, %v712_v6  ;;  %s3324_s19 = sld [smem:[#allocation7 + $0x13]] }
  0x7e   : > { %v719_v19 = vadd.f32 %v717_v60, %v713_v7  ;;  %v738_v21 = vmul.f32 %v737_v14, %v3147_v52  ;;  %v739_v22 = vmul.f32 %v737_v14, %v3151_v56  ;;  %v744_v23 = vmul.f32 %v743_v15, %v3163_v4  ;;  %s3326_s20 = sld [smem:[#allocation3 + $0x18]] }
  0x7f   : > { %v745_v26 = vmul.f32 %v743_v15, %v3169_v8  ;;  %v749_v27 = vstv %s3274_s1  ;;  %v755_v28 = vstv %s3278_s14  ;;  %v724_v29 = vadd.f32 %v722_v63, %v718_v18  ;;  %s3330_s2 = sld [smem:[#allocation3 + $0x19]] }
  0x80   : > { %v725_v30 = vadd.f32 %v723_v0, %v719_v19  ;;  %v740_v31 = vadd.f32 %v738_v21, %v734_v12  ;;  %v741_v33 = vadd.f32 %v739_v22, %v735_v13  ;;  %v750_v34 = vmul.f32 %v749_v27, %v3171_v9  ;;  %s3334_s24 = sld [smem:[#allocation3 + $0x1a]] }
  0x81   : > { %v751_v35 = vmul.f32 %v749_v27, %v3179_v16  ;;  %v756_v36 = vmul.f32 %v755_v28, %v3181_v17  ;;  %v757_v37 = vmul.f32 %v755_v28, %v3185_v20  ;;  %v728_v38 = vadd.f32 %v727_v10, %v724_v29  ;;  %s3342_s27 = sld [smem:[#allocation3 + $0x1b]] }
  0x82   : > { %v729_v39 = vadd.f32 %v727_v10, %v725_v30  ;;  %v746_v40 = vadd.f32 %v744_v23, %v740_v31  ;;  %v747_v41 = vadd.f32 %v745_v26, %v741_v33  ;;  %v761_v42 = vstv %s3290_s15  ;;  %s3347_s28 = sld [smem:[#allocation7 + $0x4]] }
  0x83   : > { %v767_v45 = vstv %s3296_s22  ;;  %v3332_v48 = vmax.f32 %v728_v38, 0.0  ;;  %v762_v53 = vmul.f32 %v761_v42, %v3191_v24  ;;  %v763_v54 = vmul.f32 %v761_v42, %v3193_v25  ;;  %s3352_s1 = sld [smem:[#allocation3 + $0x1c]] }
  0x84   : > { %v752_v49 = vadd.f32 %v750_v34, %v746_v40  ;;  %v753_v50 = vadd.f32 %v751_v35, %v747_v41  ;;  %v3336_v51 = vmax.f32 %v729_v39, 0.0  ;;  %v773_v59 = vstv %s3306_s29  ;;  %862 = vrot.lane.b32.xlu1 %v857_v2, %s2904_s21  ;;  %848 = vrot.lane.b32.xlu0 %v843_v5, %s2905_s25  ;;  %s3356_s14 = sld [smem:[#allocation3 + $0x1d]] }
  0x85   : > { %v768_v62 = vmul.f32 %v767_v45, %v3203_v32  ;;  %v769_v63 = vmul.f32 %v767_v45, %v3217_v46  ;;  %v774_v0 = vmul.f32 %v773_v59, %v3219_v47  ;;  %v920_v1 = vstv %s3310_s11  ;;  %s3361_s15 = sld [smem:[#allocation3 + $0x1e]] }
  0x86   : > { %v758_v60 = vadd.f32 %v756_v36, %v752_v49  ;;  %v759_v61 = vadd.f32 %v757_v37, %v753_v50  ;;  %v906_v3 = vstv %s3316_s17  ;;  %v775_v7 = vmul.f32 %v773_v59, %v3229_v55  ;;  %s3367_s22 = sld [smem:[#allocation3 + $0x1f]] }
  0x87   : > { %v921_v10 = vmul.f32 %v920_v1, %v3332_v48  ;;  %v908_v5 = vmul.f32 %v906_v3, %v3336_v51  ;;  %v907_v13 = vmul.f32 %v906_v3, %v3332_v48  ;;  %v779_v14 = vstv %s3318_s30  ;;  %s3374_s29 = sld [smem:[#allocation7 + $0x14]] }
  0x88   : > { %v764_v2 = vadd.f32 %v762_v53, %v758_v60  ;;  %v765_v6 = vadd.f32 %v763_v54, %v759_v61  ;;  %v785_v15 = vstv %s3326_s20  ;;  %v789_v22 = vstv %s3330_s2  ;;  %s3391_s11 = sld [smem:[#allocation5 + $0x3]] }
  0x89   : > { %925 = vrot.lane.b32.xlu2 %v921_v10, %s2904_s21  ;;  %v786_v21 = vmul.f32 %v785_v15, %v3135_v43  ;;  %v790_v23 = vmul.f32 %v789_v22, %v3147_v52  ;;  %v795_v26 = vstv %s3334_s24  ;;  %v801_v27 = vstv %s3342_s27  ;;  %s3401_s17 = sld [smem:[#allocation7 + $0x16]] }
  0x8a   : > { %v770_v11 = vadd.f32 %v768_v62, %v764_v2  ;;  %v771_v12 = vadd.f32 %v769_v63, %v765_v6  ;;  %v796_v43 = vmul.f32 %v795_v26, %v3163_v4  ;;  %v953_v30 = vstv %s3324_s19  ;;  %s3406_s30 = sld [smem:[#allocation7 + $0x1c]] }
  0x8b   : > { %v792_v31 = vadd.f32 %v790_v23, %v786_v21  ;;  %v802_v33 = vmul.f32 %v801_v27, %v3171_v9  ;;  %v807_v34 = vstv %s3352_s1  ;;  %v883_v36 = vstv %s3347_s28  ;;  %s2487_s19 = sld [smem:[#allocation7 + $0x1d]] }
  0x8c   : > { %v776_v18 = vadd.f32 %v774_v0, %v770_v11  ;;  %v777_v19 = vadd.f32 %v775_v7, %v771_v12  ;;  %913 = vrot.lane.b32.xlu1 %v908_v5, %s2905_s25  ;;  %911 = vrot.lane.b32.xlu0 %v907_v13, %s2905_s25  ;;  %v813_v37 = vstv %s3356_s14  ;;  %v808_v39 = vmul.f32 %v807_v34, %v3181_v17  ;;  %s3432_s20 = sld [smem:[#allocation7 + $0x26]] }
  0x8d   : > { %v798_v38 = vadd.f32 %v796_v43, %v792_v31  ;;  %v922_v40 = vmul.f32 %v920_v1, %v3336_v51  ;;  %v819_v42 = vstv %s3361_s15  ;;  %v885_v9 = vmul.f32 %v883_v36, %v3284_v58  ;;  %s2493_s2 = sld [smem:[#allocation7 + $0x28]] }
  0x8e   : > { %v780_v28 = vadd.f32 %v779_v14, %v776_v18  ;;  %v781_v29 = vadd.f32 %v779_v14, %v777_v19  ;;  %v814_v49 = vmul.f32 %v813_v37, %v3191_v24  ;;  %v825_v50 = vstv %s3367_s22  ;;  %s2490_s24 = sld [smem:[#allocation7 + $0x25]] }
  0x8f   : > { %v804_v45 = vadd.f32 %v802_v33, %v798_v38  ;;  %v787_v17 = vmul.f32 %v785_v15, %v3137_v44  ;;  %v791_v53 = vmul.f32 %v789_v22, %v3151_v56  ;;  %v797_v54 = vmul.f32 %v795_v26, %v3169_v8  ;;  %s3451_s27 = sld [smem:[#allocation7 + $0x2f]] }
  0x90   : > { %v3380_v35 = vmax.f32 %v780_v28, 0.0  ;;  %v3382_v52 = vmax.f32 %v781_v29, 0.0  ;;  %v820_v60 = vmul.f32 %v819_v42, %v3203_v32  ;;  %v967_v24 = vstv %s3374_s29  ;;  %s2498_s28 = sld [smem:[#allocation7 + $0x31]] }
  0x91   : > { %v810_v59 = vadd.f32 %v808_v39, %v804_v45  ;;  %v793_v61 = vadd.f32 %v791_v53, %v787_v17  ;;  %v803_v44 = vmul.f32 %v801_v27, %v3179_v16  ;;  %v826_v56 = vmul.f32 %v825_v50, %v3219_v47  ;;  %s2495_s1 = sld [smem:[#allocation7 + $0x2e]] }
  0x92   : > { %v955_v41 = vmul.f32 %v953_v30, %v3382_v52  ;;  %v954_v4 = vmul.f32 %v953_v30, %v3380_v35  ;;  %v889_v8 = vrot.slane %v885_v9, 1  ;;  %v809_v0 = vmul.f32 %v807_v34, %v3185_v20  ;;  %s3467_s14 = sld [smem:[#allocation7 + $0x38]] }
  0x93   : > { %v816_v62 = vadd.f32 %v814_v49, %v810_v59  ;;  %v799_v63 = vadd.f32 %v797_v54, %v793_v61  ;;  %v884_v1 = vmul.f32 %v883_v36, %v3282_v57  ;;  %v969_v32 = vmul.f32 %v967_v24, %v3382_v52  ;;  %s2503_s15 = sld [smem:[#allocation7 + $0x3a]] }
  0x94   : > { %960 = vrot.lane.b32.xlu2 %v955_v41, %s2905_s25  ;;  %958 = vrot.lane.b32.xlu1 %v954_v4, %s2905_s25  ;;  %v968_v2 = vmul.f32 %v967_v24, %v3380_v35  ;;  %v831_v6 = vstv %s3391_s11  ;;  %v815_v16 = vmul.f32 %v813_v37, %v3193_v25  ;;  %v821_v5 = vmul.f32 %v819_v42, %v3217_v46  ;;  %s2500_s22 = sld [smem:[#allocation7 + $0x37]] }
  0x95   : > { %927 = vrot.lane.b32.xlu0 %v922_v40, %s2904_s21  ;;  %v822_v3 = vadd.f32 %v820_v60, %v816_v62  ;;  %v805_v7 = vadd.f32 %v803_v44, %v799_v63  ;;  %v888_v11 = vrot.slane %v884_v1, 1  ;;  %v994_v20 = vstv %s3401_s17  ;;  %s3483_s29 = sld [smem:[#allocation7 + $0x41]] }
  0x96   : > { %v1017_v13 = vstv %s3406_s30  ;;  %v827_v15 = vmul.f32 %v825_v50, %v3229_v55  ;;  %v996_v18 = vmul.f32 %v994_v20, %v3382_v52  ;;  %v995_v21 = vmul.f32 %v994_v20, %v3380_v35  ;;  %s2508_s11 = sld [smem:[#allocation7 + $0x43]] }
  0x97   : > { %v828_v10 = vadd.f32 %v826_v56, %v822_v3  ;;  %v811_v47 = vadd.f32 %v809_v0, %v805_v7  ;;  %v890_v46 = vsel %vm874_vm0, %v888_v11, %v889_v8  ;;  %v1031_v55 = vstv %s2487_s19  ;;  %s2505_s17 = sld [smem:[#allocation7 + $0x40]] }
  0x98   : > { %v1000_v26 = vrot.slane %v996_v18, 1  ;;  %v999_v28 = vrot.slane %v995_v21, 1  ;;  %v1082_v33 = vstv %s3432_s20  ;;  %v1109_v36 = vstv %s2493_s2  ;;  %s3493_s30 = sld [smem:[#allocation7]] }
  0x99   : > { %v832_v12 = vadd.f32 %v831_v6, %v828_v10  ;;  %v817_v14 = vadd.f32 %v815_v16, %v811_v47  ;;  %v1068_v37 = vstv %s2490_s24  ;;  %v1083_v38 = vmul.f32 %v1082_v33, %v3282_v57  ;;  %s2474_s19 = sld [smem:[#allocation7 + $0x3]] }
  0x9a   : > { %v1001_v43 = vsel %vm874_vm0, %v999_v28, %v1000_v26  ;;  %v1070_v39 = vmul.f32 %v1068_v37, %v3284_v58  ;;  %v1110_v40 = vmul.f32 %v1109_v36, %v3282_v57  ;;  %v1111_v41 = vmul.f32 %v1109_v36, %v3284_v58  ;;  %s3503_s20 = sld [smem:[#allocation7 + $0x4a]] }
  0x9b   : > { %v3423_v25 = vmax.f32 %v832_v12, 0.0  ;;  %v823_v19 = vadd.f32 %v821_v5, %v817_v14  ;;  %v1069_v9 = vmul.f32 %v1068_v37, %v3282_v57  ;;  %v1146_v49 = vstv %s3451_s27  ;;  %s2514_s2 = sld [smem:[#allocation7 + $0x4c]] }
  0x9c   : > { %893 = vrot.lane.b32.xlu2 %v889_v8, %s2905_s25  ;;  %974 = vrot.lane.b32.xlu1 %v969_v32, %s2904_s21  ;;  %v1115_v4 = vrot.slane %v1111_v41, 1  ;;  %v1114_v42 = vrot.slane %v1110_v40, 1  ;;  %v1084_v50 = vmul.f32 %v1082_v33, %v3284_v58  ;;  %v1173_v17 = vstv %s2498_s28  ;;  %s3507_s24 = sld [smem:[#allocation7 + $0x49]] }
  0x9d   : > { %972 = vrot.lane.b32.xlu0 %v968_v2, %s2904_s21  ;;  %v1018_v22 = vmul.f32 %v1017_v13, %v3423_v25  ;;  %v829_v23 = vadd.f32 %v827_v15, %v823_v19  ;;  %v1032_v31 = vmul.f32 %v1031_v55, %v3423_v25  ;;  %v1132_v53 = vstv %s2495_s1  ;;  %s2479_s27 = sld [smem:[#allocation7 + $0xc]] }
  0x9e   : > { %v1116_v45 = vsel %vm874_vm0, %v1114_v42, %v1115_v4  ;;  %v1147_v54 = vmul.f32 %v1146_v49, %v3332_v48  ;;  %v1134_v59 = vmul.f32 %v1132_v53, %v3336_v51  ;;  %v1174_v60 = vmul.f32 %v1173_v17, %v3332_v48  ;;  %s3523_s28 = sld [smem:[#allocation7 + $0x9]] }
  0x9f   : > { %v833_v27 = vadd.f32 %v831_v6, %v829_v23  ;;  %v1175_v24 = vmul.f32 %v1173_v17, %v3336_v51  ;;  %v1133_v62 = vmul.f32 %v1132_v53, %v3332_v48  ;;  %v1210_v8 = vstv %s3467_s14  ;;  %s3531_s1 = sld [smem:[#allocation7 + $0x53]] }
  0xa0   : > { %v1178_v44 = vrot.slane %v1174_v60, 1  ;;  %v1148_v63 = vmul.f32 %v1146_v49, %v3336_v51  ;;  %v1237_v0 = vstv %s2503_s15  ;;  %v1196_v1 = vstv %s2500_s22  ;;  %s3535_s14 = sld [smem:[#allocation7 + $0x52]] }
  0xa1   : > { %v3434_v29 = vmax.f32 %v833_v27, 0.0  ;;  %v1179_v61 = vrot.slane %v1175_v24, 1  ;;  %v1211_v32 = vmul.f32 %v1210_v8, %v3380_v35  ;;  %v1198_v3 = vmul.f32 %v1196_v1, %v3382_v52  ;;  %s3538_s15 = sld [smem:[#allocation7 + $0x12]] }
  0xa2   : > { %v1238_v2 = vmul.f32 %v1237_v0, %v3380_v35  ;;  %v1239_v6 = vmul.f32 %v1237_v0, %v3382_v52  ;;  %v1197_v10 = vmul.f32 %v1196_v1, %v3380_v35  ;;  %v1274_v5 = vstv %s3483_s29  ;;  %s3547_s22 = sld [smem:[#allocation7 + $0x15]] }
  0xa3   : > { %v1033_v30 = vmul.f32 %v1031_v55, %v3434_v29  ;;  %v1019_v34 = vmul.f32 %v1017_v13, %v3434_v29  ;;  %v1180_v56 = vsel %vm874_vm0, %v1178_v44, %v1179_v61  ;;  %v1212_v11 = vmul.f32 %v1210_v8, %v3382_v52  ;;  %s3551_s29 = sld [smem:[#allocation7 + $0x5b]] }
  0xa4   : > { %891 = vrot.lane.b32.xlu2 %v890_v46, %s2905_s25  ;;  %1022 = vrot.lane.b32.xlu1 %v1018_v22, %s2905_s25  ;;  %v1243_v7 = vrot.slane %v1239_v6, 1  ;;  %v1242_v16 = vrot.slane %v1238_v2, 1  ;;  %v1301_v20 = vstv %s2508_s11  ;;  %v1260_v12 = vstv %s2505_s17  ;;  %s3553_s11 = sld [smem:[#allocation7 + $0x5e]] }
  0xa5   : > { %1004 = vrot.lane.b32.xlu0 %v1000_v26, %s2905_s25  ;;  %v1275_v13 = vmul.f32 %v1274_v5, %v3423_v25  ;;  %v1262_v14 = vmul.f32 %v1260_v12, %v3434_v29  ;;  %v1302_v15 = vmul.f32 %v1301_v20, %v3423_v25  ;;  %v1303_v18 = vmul.f32 %v1301_v20, %v3434_v29  ;;  %s3572_s17 = sld [smem:[#allocation7 + $0x1b]] }
  0xa6   : > { %v1244_v47 = vsel %vm874_vm0, %v1242_v16, %v1243_v7  ;;  %v1261_v22 = vmul.f32 %v1260_v12, %v3423_v25  ;;  %v837_v23 = vstv %s3493_s30  ;;  %v869_v28 = vstv %s2474_s19  ;;  %s3576_s30 = sld [smem:[#allocation7 + $0x5c]] }
  0xa7   : > { %v1307_v46 = vrot.slane %v1303_v18, 1  ;;  %v1306_v21 = vrot.slane %v1302_v15, 1  ;;  %v838_v27 = vmul.f32 %v837_v23, %v3282_v57  ;;  %v871_v36 = vmul.f32 %v869_v28, %v3284_v58  ;;  %s3587_s19 = sld [smem:[#allocation7 + $0x64]] }
  0xa8   : > { %v870_v37 = vmul.f32 %v869_v28, %v3282_v57  ;;  %v1406_v16 = vstv %s3531_s1  ;;  %v1392_v18 = vstv %s3535_s14  ;;  %s3629_s1 = sld [smem:[#allocation7 + $0x2d]] }
  0xa9   : > { %v1308_v26 = vsel %vm874_vm0, %v1306_v21, %v1307_v46  ;;  %v1394_v21 = vmul.f32 %v1392_v18, %v3336_v51  ;;  %s3633_s14 = sld [smem:[#allocation7 + $0x70]] }
  0xaa   : > { %v875_v49 = vrot.slane %v870_v37, 1  ;;  %v1480_v37 = vstv %s3553_s11  ;;  %s3660_s11 = sld [smem:[#allocation7 + $0x36]] }
  0xac   : > { %1002 = vrot.lane.b32.xlu2 %v1001_v43, %s2905_s25  ;;  %1038 = vrot.lane.b32.xlu1 %v1033_v30, %s2904_s21  ;;  %v1342_v43 = vstv %s3503_s20  ;;  %v1276_v30 = vmul.f32 %v1274_v5, %v3434_v29  ;;  %s3598_s20 = sld [smem:[#allocation7 + $0x24]] }
  0xad   : > { %1036 = vrot.lane.b32.xlu0 %v1032_v31, %s2904_s21  ;;  %v1343_v40 = vmul.f32 %v1342_v43, %v3282_v57 }
  0xb4   : > { %1024 = vrot.lane.b32.xlu2 %v1019_v34, %s2905_s25  ;;  %1087 = vrot.lane.b32.xlu1 %v1083_v38, %s2904_s21  ;;  %v1369_v38 = vstv %s2514_s2  ;;  %s3603_s2 = sld [smem:[#allocation7 + $0x6d]] }
  0xb5   : > { %1075 = vrot.lane.b32.xlu0 %v1070_v39, %s2905_s25  ;;  %v1328_v39 = vstv %s3507_s24  ;;  %v1370_v42 = vmul.f32 %v1369_v38, %v3282_v57  ;;  %s3607_s24 = sld [smem:[#allocation7 + $0x65]] }
  0xb6   : > { %v1329_v60 = vmul.f32 %v1328_v39, %v3282_v57 }
  0xbc   : > { %1073 = vrot.lane.b32.xlu2 %v1069_v9, %s2905_s25  ;;  %1119 = vrot.lane.b32.xlu1 %v1115_v4, %s2905_s25  ;;  %v1330_v4 = vmul.f32 %v1328_v39, %v3284_v58  ;;  %v1371_v9 = vmul.f32 %v1369_v38, %v3284_v58  ;;  %v1393_v38 = vmul.f32 %v1392_v18, %v3332_v48 }
  0xbd   : > { %1117 = vrot.lane.b32.xlu0 %v1116_v45, %s2905_s25  ;;  %v876_v45 = vrot.slane %v871_v36, 1 }
  0xbf   : > { %v877_v24 = vsel %vm874_vm0, %v875_v49, %v876_v45  ;;  %v1481_v49 = vmul.f32 %v1480_v37, %v3380_v35 }
  0xc4   : > { %1089 = vrot.lane.b32.xlu2 %v1084_v50, %s2904_s21  ;;  %1151 = vrot.lane.b32.xlu1 %v1147_v54, %s2904_s21  ;;  %v839_v50 = vmul.f32 %v837_v23, %v3284_v58  ;;  %v1375_v54 = vrot.slane %v1371_v9, 1 }
  0xc5   : > { %1139 = vrot.lane.b32.xlu0 %v1134_v59, %s2905_s25  ;;  %v1374_v59 = vrot.slane %v1370_v42, 1 }
  0xc7   : > { %v1376_v0 = vsel %vm874_vm0, %v1374_v59, %v1375_v54 }
  0xcc   : > { %1137 = vrot.lane.b32.xlu2 %v1133_v62, %s2905_s25  ;;  %1183 = vrot.lane.b32.xlu1 %v1179_v61, %s2905_s25  ;;  %v934_v62 = vstv %s2479_s27  ;;  %s2492_s27 = sld [smem:[#allocation7 + $0x27]] }
  0xcd   : > { %1181 = vrot.lane.b32.xlu0 %v1180_v56, %s2905_s25  ;;  %v900_v56 = vstv %s3523_s28  ;;  %v935_v1 = vmul.f32 %v934_v62, %v3332_v48  ;;  %s3616_s28 = sld [smem:[#allocation7 + $0x6e]] }
  0xce   : > { %v902_v2 = vmul.f32 %v900_v56, %v3336_v51  ;;  %v901_v6 = vmul.f32 %v900_v56, %v3332_v48 }
  0xcf   : > { %v939_v12 = vrot.slane %v935_v1, 1  ;;  %v1011_v1 = vstv %s3572_s17  ;;  %s3663_s17 = sld [smem:[#allocation7 + $0x79]] }
  0xd4   : > { %1153 = vrot.lane.b32.xlu2 %v1148_v63, %s2904_s21  ;;  %1215 = vrot.lane.b32.xlu1 %v1211_v32, %s2904_s21  ;;  %v936_v32 = vmul.f32 %v934_v62, %v3336_v51 }
  0xd5   : > { %1203 = vrot.lane.b32.xlu0 %v1198_v3, %s2905_s25 }
  0xdc   : > { %1201 = vrot.lane.b32.xlu2 %v1197_v10, %s2905_s25  ;;  %1247 = vrot.lane.b32.xlu1 %v1243_v7, %s2905_s25 }
  0xdd   : > { %1245 = vrot.lane.b32.xlu0 %v1244_v47, %s2905_s25 }
  0xe3   : > { %v3499_v19 = vpop.permute.xlu2 %925 }
  0xe4   : > { %1217 = vrot.lane.b32.xlu2 %v1212_v11, %s2904_s21  ;;  %1279 = vrot.lane.b32.xlu1 %v1275_v13, %s2904_s21  ;;  %v1344_v11 = vmul.f32 %v1342_v43, %v3284_v58  ;;  %v940_v13 = vrot.slane %v936_v32, 1 }
  0xe5   : > { %1267 = vrot.lane.b32.xlu0 %v1262_v14, %s2905_s25 }
  0xec   : > { %1265 = vrot.lane.b32.xlu2 %v1261_v22, %s2905_s25  ;;  %1311 = vrot.lane.b32.xlu1 %v1307_v46, %s2905_s25  ;;  %v1407_v46 = vmul.f32 %v1406_v16, %v3332_v48  ;;  %v947_v22 = vstv %s3538_s15  ;;  %s3637_s15 = sld [smem:[#allocation7 + $0x76]] }
  0xed   : > { %1309 = vrot.lane.b32.xlu0 %v1308_v26, %s2905_s25  ;;  %v948_v43 = vmul.f32 %v947_v22, %v3380_v35  ;;  %v949_v9 = vmul.f32 %v947_v22, %v3382_v52 }
  0xee   : > { %v3513_v55 = vpop.permute.xlu2 %960  ;;  %v861_v31 = vpop.permute.xlu1 %860 }
  0xef   : > { %v847_v33 = vpop.permute.xlu0 %846 }
  0xf0   : > { %v852_v34 = vadd.f32 %v847_v33, %v838_v27  ;;  %v941_v27 = vsel %vm874_vm0, %v939_v12, %v940_v13  ;;  %v1439_v33 = vstv %s3551_s29  ;;  %s3649_s29 = sld [smem:[#allocation7 + $0x77]] }
  0xf1   : > { %v1441_v42 = vmul.f32 %v1439_v33, %v3382_v52 }
  0xf2   : > { %v866_v41 = vadd.f32 %v861_v31, %v852_v34 }
  0xf4   : > { %1281 = vrot.lane.b32.xlu2 %v1276_v30, %s2904_s21  ;;  %1347 = vrot.lane.b32.xlu1 %v1343_v40, %s2904_s21  ;;  %v880_v8 = vadd.f32 %v877_v24, %v866_v41  ;;  %v981_v30 = vstv %s3547_s22  ;;  %s2497_s22 = sld [smem:[#allocation7 + $0x30]] }
  0xf5   : > { %1335 = vrot.lane.b32.xlu0 %v1330_v4, %s2905_s25  ;;  %v982_v40 = vmul.f32 %v981_v30, %v3380_v35  ;;  %v983_v41 = vmul.f32 %v981_v30, %v3382_v52 }
  0xf6   : > { %v894_v17 = vpop.permute.xlu2 %893  ;;  %v863_v53 = vpop.permute.xlu1 %862 }
  0xf7   : > { %v849_v61 = vpop.permute.xlu0 %848  ;;  %v987_v59 = vrot.slane %v983_v41, 1 }
  0xf8   : > { %v853_v44 = vadd.f32 %v849_v61, %v839_v50  ;;  %v3581_v50 = vmul.f32 %v1480_v37, %v3382_v52  ;;  %v1485_v61 = vrot.slane %v1481_v49, 1  ;;  %v1517_v37 = vstv %s3607_s24  ;;  %s3696_s24 = sld [smem:[#allocation8]] }
  0xfa   : > { %v867_v63 = vadd.f32 %v863_v53, %v853_v44  ;;  %v1486_v44 = vrot.slane %v3581_v50, 1  ;;  %v1518_v50 = vmul.f32 %v1517_v37, %v3423_v25 }
  0xfc   : > { %1333 = vrot.lane.b32.xlu2 %v1329_v60, %s2905_s25  ;;  %v881_v3 = vadd.f32 %v876_v45, %v867_v63  ;;  %1379 = vrot.lane.b32.xlu1 %v1375_v54, %s2905_s25  ;;  %v1440_v45 = vmul.f32 %v1439_v33, %v3380_v35  ;;  %v986_v54 = vrot.slane %v982_v40, 1  ;;  %v1519_v40 = vmul.f32 %v1517_v37, %v3434_v29 }
  0xfd   : > { %1377 = vrot.lane.b32.xlu0 %v1376_v0, %s2905_s25 }
  0xfe   : > { %v892_v7 = vpop.permute.xlu2 %891  ;;  %v914_v47 = vpop.permute.xlu1 %913  ;;  %v898_v5 = vadd.f32 %v894_v17, %v881_v3  ;;  %v988_v63 = vsel %vm874_vm0, %v986_v54, %v987_v59 }
  0xff   : > { %v897_v10 = vadd.f32 %v892_v7, %v880_v8  ;;  %v912_v20 = vpop.permute.xlu0 %911  ;;  %v1408_v8 = vmul.f32 %v1406_v16, %v3336_v51 }
 0x100   : > { %v904_v14 = vadd.f32 %v902_v2, %v898_v5  ;;  %v1453_v2 = vstv %s3576_s30  ;;  %v1503_v5 = vstv %s3587_s19  ;;  %s3667_s30 = sld [smem:[#allocation7 + $0x7f]] }
 0x101   : > { %v903_v15 = vadd.f32 %v901_v6, %v897_v10  ;;  %v1487_v6 = vsel %vm874_vm0, %v1485_v61, %v1486_v44  ;;  %v1455_v7 = vmul.f32 %v1453_v2, %v3382_v52  ;;  %v1504_v22 = vmul.f32 %v1503_v5, %v3423_v25  ;;  %s3669_s19 = sld [smem:[#allocation7 + $0x1e]] }
 0x102   : > { %v918_v23 = vadd.f32 %v914_v47, %v904_v14  ;;  %v1012_v47 = vmul.f32 %v1011_v1, %v3423_v25  ;;  %v1454_v14 = vmul.f32 %v1453_v2, %v3380_v35 }
 0x103   : > { %v917_v26 = vadd.f32 %v912_v20, %v903_v15 }
 0x104   : > { %1349 = vrot.lane.b32.xlu2 %v1344_v11, %s2904_s21  ;;  %1411 = vrot.lane.b32.xlu1 %v1407_v46, %s2904_s21 }
 0x105   : > { %v931_v28 = vadd.f32 %v3499_v19, %v917_v26  ;;  %1399 = vrot.lane.b32.xlu0 %v1394_v21, %s2905_s25  ;;  %v1505_v21 = vmul.f32 %v1503_v5, %v3434_v29  ;;  %v1064_v26 = vstv %s3598_s20  ;;  %s3673_s20 = sld [smem:[#allocation7 + $0x39]] }
 0x106   : > { %v1003_v31 = vpop.permute.xlu2 %1002  ;;  %v959_v34 = vpop.permute.xlu1 %958 }
 0x107   : > { %v944_v36 = vadd.f32 %v941_v27, %v931_v28  ;;  %v928_v39 = vpop.permute.xlu0 %927 }
 0x108   : > { %v932_v4 = vadd.f32 %v928_v39, %v918_v23  ;;  %v1096_v39 = vstv %s2492_s27  ;;  %s3702_s27 = sld [smem:[#allocation7 + $0x3f]] }
 0x109   : > { %v950_v19 = vadd.f32 %v948_v43, %v944_v36  ;;  %v1554_v43 = vstv %s3603_s2  ;;  %s3683_s2 = sld [smem:[#allocation7 + $0x80]] }
 0x10a   : > { %v945_v53 = vadd.f32 %v940_v13, %v932_v4  ;;  %v1013_v13 = vmul.f32 %v1011_v1, %v3434_v29  ;;  %v1098_v4 = vmul.f32 %v1096_v39, %v3284_v58  ;;  %v1618_v1 = vstv %s3637_s15  ;;  %s3715_s15 = sld [smem:[#allocation10 + $0x14]] }
 0x10b   : > { %v964_v17 = vadd.f32 %v959_v34, %v950_v19  ;;  %v1097_v19 = vmul.f32 %v1096_v39, %v3282_v57  ;;  %v1619_v5 = vmul.f32 %v1618_v1, %v3332_v48 }
 0x10c   : > { %1397 = vrot.lane.b32.xlu2 %v1393_v38, %s2905_s25  ;;  %1446 = vrot.lane.b32.xlu1 %v1441_v42, %s2905_s25  ;;  %v951_v60 = vadd.f32 %v949_v9, %v945_v53  ;;  %v1555_v38 = vmul.f32 %v1554_v43, %v3282_v57  ;;  %v1066_v42 = vmul.f32 %v1064_v26, %v3284_v58 }
 0x10d   : > { %1444 = vrot.lane.b32.xlu0 %v1440_v45, %s2905_s25  ;;  %v1568_v45 = vstv %s3616_s28  ;;  %v1101_v54 = vrot.slane %v1097_v19, 1  ;;  %v1659_v19 = vstv %s3663_s17  ;;  %s3705_s28 = sld [smem:[#allocation7 + $0x82]] }
 0x10e   : > { %v1025_v24 = vpop.permute.xlu2 %1024  ;;  %v975_v62 = vpop.permute.xlu1 %974  ;;  %v965_v56 = vadd.f32 %v3513_v55, %v951_v60  ;;  %v1569_v61 = vmul.f32 %v1568_v45, %v3282_v57  ;;  %s3730_s17 = sld [smem:[#allocation10 + $0xc]] }
 0x10f   : > { %v973_v0 = vpop.permute.xlu0 %972 }
 0x110   : > { %v979_v32 = vadd.f32 %v975_v62, %v965_v56  ;;  %v978_v3 = vadd.f32 %v973_v0, %v964_v17  ;;  %v1126_v56 = vstv %s3629_s1  ;;  %s3711_s1 = sld [smem:[#allocation7 + $0x88]] }
 0x111   : > { %v1127_v2 = vmul.f32 %v1126_v56, %v3332_v48 }
 0x112   : > { %v991_v10 = vadd.f32 %v988_v63, %v978_v3  ;;  %v992_v12 = vadd.f32 %v987_v59, %v979_v32  ;;  %v1102_v59 = vrot.slane %v1098_v4, 1 }
 0x114   : > { %1413 = vrot.lane.b32.xlu2 %v1408_v8, %s2904_s21  ;;  %1488 = vrot.lane.b32.xlu1 %v1487_v6, %s2905_s25  ;;  %v1008_v55 = vadd.f32 %v1003_v31, %v991_v10  ;;  %v1065_v31 = vmul.f32 %v1064_v26, %v3282_v57  ;;  %v1103_v62 = vsel %vm874_vm0, %v1101_v54, %v1102_v59  ;;  %v1595_v8 = vstv %s3633_s14  ;;  %s3713_s14 = sld [smem:[#allocation10]] }
 0x115   : > { %1460 = vrot.lane.b32.xlu0 %v1455_v7, %s2904_s21  ;;  %v1556_v6 = vmul.f32 %v1554_v43, %v3284_v58 }
 0x116   : > { %v1074_v16 = vpop.permute.xlu2 %1073  ;;  %v1023_v11 = vpop.permute.xlu1 %1022  ;;  %v1014_v20 = vadd.f32 %v1012_v47, %v1008_v55  ;;  %v1597_v47 = vmul.f32 %v1595_v8, %v3284_v58 }
 0x117   : > { %v1005_v15 = vpop.permute.xlu0 %1004  ;;  %v1079_v41 = vadd.f32 %v1074_v16, %v1065_v31  ;;  %v1596_v16 = vmul.f32 %v1595_v8, %v3282_v57 }
 0x118   : > { %v1028_v18 = vadd.f32 %v1023_v11, %v1014_v20  ;;  %v1009_v46 = vadd.f32 %v1005_v15, %v992_v12  ;;  %v1160_v11 = vstv %s2497_s22  ;;  %v1128_v12 = vmul.f32 %v1126_v56, %v3336_v51  ;;  %s3719_s22 = sld [smem:[#allocation7 + $0x42]] }
 0x119   : > { %v1162_v15 = vmul.f32 %v1160_v11, %v3336_v51 }
 0x11a   : > { %v1015_v23 = vadd.f32 %v1013_v13, %v1009_v46  ;;  %v1601_v13 = vrot.slane %v1597_v47, 1 }
 0x11c   : > { %1458 = vrot.lane.b32.xlu2 %v1454_v14, %s2904_s21  ;;  %1510 = vrot.lane.b32.xlu1 %v1505_v21, %s2905_s25  ;;  %v1029_v27 = vadd.f32 %v1025_v24, %v1015_v23  ;;  %v1570_v24 = vmul.f32 %v1568_v45, %v3284_v58  ;;  %v1161_v14 = vmul.f32 %v1160_v11, %v3332_v48 }
 0x11d   : > { %1508 = vrot.lane.b32.xlu0 %v1504_v22, %s2905_s25  ;;  %v1632_v22 = vstv %s3649_s29  ;;  %s3722_s29 = sld [smem:[#allocation10 + $0x4]] }
 0x11e   : > { %v1090_v28 = vpop.permute.xlu2 %1089  ;;  %v1039_v30 = vpop.permute.xlu1 %1038  ;;  %v1165_v43 = vrot.slane %v1161_v14, 1  ;;  %v1634_v37 = vmul.f32 %v1632_v22, %v3336_v51 }
 0x11f   : > { %v3619_v33 = vadd.f32 %v1039_v30, %v1029_v27  ;;  %v1037_v34 = vpop.permute.xlu0 %1036  ;;  %v1166_v30 = vrot.slane %v1162_v15, 1 }
 0x120   : > { %v3621_v36 = vadd.f32 %v1037_v34, %v1028_v18  ;;  %v1600_v18 = vrot.slane %v1596_v16, 1 }
 0x122   : > { %v1602_v31 = vsel %vm874_vm0, %v1600_v18, %v1601_v13 }
 0x124   : > { %1490 = vrot.lane.b32.xlu2 %v1486_v44, %s2905_s25  ;;  %1559 = vrot.lane.b32.xlu1 %v1555_v38, %s2905_s25  ;;  %v1633_v38 = vmul.f32 %v1632_v22, %v3332_v48 }
 0x125   : > { %1524 = vrot.lane.b32.xlu0 %v1519_v40, %s2904_s21  ;;  %v1167_v40 = vsel %vm874_vm0, %v1165_v43, %v1166_v30 }
 0x126   : > { %v1138_v9 = vpop.permute.xlu2 %1137  ;;  %v1088_v49 = vpop.permute.xlu1 %1087 }
 0x127   : > { %v1093_v17 = vadd.f32 %v1088_v49, %v1079_v41  ;;  %v1076_v53 = vpop.permute.xlu0 %1075  ;;  %v1190_v41 = vstv %s3660_s11  ;;  %s3725_s11 = sld [smem:[#allocation10 + $0x18]] }
 0x128   : > { %v1080_v60 = vadd.f32 %v1076_v53, %v1066_v42  ;;  %v1620_v53 = vmul.f32 %v1618_v1, %v3336_v51 }
 0x129   : > { %v1106_v3 = vadd.f32 %v1103_v62, %v1093_v17  ;;  %v1045_v17 = vstv %s3669_s19  ;;  %v1224_v62 = vstv %s3673_s20  ;;  %s3734_s19 = sld [smem:[#allocation10 + $0x8]] }
 0x12a   : > { %v1094_v44 = vadd.f32 %v1090_v28, %v1080_v60  ;;  %v1661_v60 = vmul.f32 %v1659_v19, %v3336_v51  ;;  %v1046_v56 = vmul.f32 %v1045_v17, %v3423_v25  ;;  %v1047_v8 = vmul.f32 %v1045_v17, %v3434_v29  ;;  %s3740_s20 = sld [smem:[#allocation7 + $0x89]] }
 0x12c   : > { %1522 = vrot.lane.b32.xlu2 %v1518_v50, %s2904_s21  ;;  %1575 = vrot.lane.b32.xlu1 %v1570_v24, %s2904_s21  ;;  %v1107_v0 = vadd.f32 %v1102_v59, %v1094_v44  ;;  %v1191_v50 = vmul.f32 %v1190_v41, %v3380_v35  ;;  %v1665_v1 = vrot.slane %v1661_v60, 1  ;;  %v1050_v47 = vrot.slane %v1046_v56, 1 }
 0x12d   : > { %1573 = vrot.lane.b32.xlu0 %v1569_v61, %s2904_s21  ;;  %v1660_v61 = vmul.f32 %v1659_v19, %v3332_v48  ;;  %v1853_v56 = vstv %s3722_s29  ;;  %s3806_s29 = sld [smem:[#allocation10 + $0x15]] }
 0x12e   : > { %v1154_v63 = vpop.permute.xlu2 %1153  ;;  %v1120_v32 = vpop.permute.xlu1 %1119 }
 0x12f   : > { %v1124_v7 = vadd.f32 %v1120_v32, %v1107_v0  ;;  %v1118_v10 = vpop.permute.xlu0 %1117  ;;  %v1192_v0 = vmul.f32 %v1190_v41, %v3382_v52  ;;  %v1225_v32 = vmul.f32 %v1224_v62, %v3380_v35 }
 0x130   : > { %v1123_v55 = vadd.f32 %v1118_v10, %v1106_v3  ;;  %v1226_v3 = vmul.f32 %v1224_v62, %v3382_v52  ;;  %v1696_v10 = vstv %s3683_s2  ;;  %s3744_s2 = sld [smem:[#allocation10 + $0x10]]  ;;  %v2021_v62 = vstv %s3715_s15 }
 0x131   : > { %v1130_v26 = vadd.f32 %v1128_v12, %v1124_v7  ;;  %v1229_v12 = vrot.slane %v1225_v32, 1  ;;  %v1698_v18 = vmul.f32 %v1696_v10, %v3382_v52  ;;  %v2063_v32 = vstv %s3725_s11  ;;  %s3899_s15 = sld [smem:[#allocation10 + $0x1d]] }
 0x132   : > { %v1129_v20 = vadd.f32 %v1127_v2, %v1123_v55  ;;  %v1664_v2 = vrot.slane %v1660_v61, 1  ;;  %v1051_v55 = vrot.slane %v1047_v8, 1  ;;  %s3968_s11 = sld [smem:[#allocation7 + $0x5a]] }
 0x134   : > { %1561 = vrot.lane.b32.xlu2 %v1556_v6, %s2905_s25  ;;  %1623 = vrot.lane.b32.xlu1 %v1619_v5, %s2905_s25  ;;  %v1143_v46 = vadd.f32 %v1138_v9, %v1129_v20  ;;  %v1682_v9 = vstv %s3667_s30  ;;  %v1666_v14 = vsel %vm874_vm0, %v1664_v2, %v1665_v1  ;;  %s3764_s30 = sld [smem:[#allocation7 + $0x48]] }
 0x135   : > { %1605 = vrot.lane.b32.xlu0 %v1601_v13, %s2905_s25  ;;  %v1683_v44 = vmul.f32 %v1682_v9, %v3380_v35  ;;  %v1230_v13 = vrot.slane %v1226_v3, 1 }
 0x136   : > { %v1202_v21 = vpop.permute.xlu2 %1201  ;;  %v1152_v23 = vpop.permute.xlu1 %1151 }
 0x137   : > { %v1157_v27 = vadd.f32 %v1152_v23, %v1143_v46  ;;  %v1140_v28 = vpop.permute.xlu0 %1139  ;;  %v1697_v46 = vmul.f32 %v1696_v10, %v3380_v35  ;;  %v1231_v23 = vsel %vm874_vm0, %v1229_v12, %v1230_v13  ;;  %v1979_v10 = vstv %s3744_s2  ;;  %s3851_s2 = sld [smem:[#allocation10 + $0x9]] }
 0x138   : > { %v1144_v34 = vadd.f32 %v1140_v28, %v1130_v26  ;;  %v1254_v26 = vstv %s3702_s27  ;;  %v1056_v28 = vadd.f32 %v1051_v55, %v3619_v33  ;;  %v1684_v33 = vmul.f32 %v1682_v9, %v3382_v52  ;;  %s3750_s27 = sld [smem:[#allocation7 + $0x8b]] }
 0x139   : > { %v1170_v49 = vadd.f32 %v1167_v40, %v1157_v27  ;;  %v1723_v27 = vstv %s3705_s28  ;;  %v1255_v40 = vmul.f32 %v1254_v26, %v3423_v25  ;;  %s3778_s28 = sld [smem:[#allocation7 + $0x4b]] }
 0x13a   : > { %v1158_v39 = vadd.f32 %v1154_v63, %v1144_v34  ;;  %v1746_v34 = vstv %s3711_s1  ;;  %v1725_v19 = vmul.f32 %v1723_v27, %v3382_v52  ;;  %s3879_s1 = sld [smem:[#allocation7 + $0x54]] }
 0x13c   : > { %1603 = vrot.lane.b32.xlu2 %v1602_v31, %s2905_s25  ;;  %1639 = vrot.lane.b32.xlu1 %v1634_v37, %s2904_s21  ;;  %v1171_v42 = vadd.f32 %v1166_v30, %v1158_v39  ;;  %v1058_v37 = vstv %s3696_s24  ;;  %s3757_s24 = sld [smem:[#allocation10 + $0x1c]] }
 0x13d   : > { %1637 = vrot.lane.b32.xlu0 %v1633_v38, %s2904_s21 }
 0x13e   : > { %v1218_v4 = vpop.permute.xlu2 %1217  ;;  %v1184_v45 = vpop.permute.xlu1 %1183 }
 0x13f   : > { %v1188_v54 = vadd.f32 %v1184_v45, %v1171_v42  ;;  %v1182_v59 = vpop.permute.xlu0 %1181  ;;  %v1724_v42 = vmul.f32 %v1723_v27, %v3380_v35  ;;  %v1747_v45 = vmul.f32 %v1746_v34, %v3423_v25 }
 0x140   : > { %v1187_v24 = vadd.f32 %v1182_v59, %v1170_v49  ;;  %v1288_v49 = vstv %s3719_s22  ;;  %s3791_s22 = sld [smem:[#allocation10 + $0x1]] }
 0x141   : > { %v1194_v5 = vadd.f32 %v1192_v0, %v1188_v54  ;;  %v1729_v54 = vrot.slane %v1725_v19, 1  ;;  %v1289_v59 = vmul.f32 %v1288_v49, %v3423_v25  ;;  %v1290_v60 = vmul.f32 %v1288_v49, %v3434_v29 }
 0x142   : > { %v1193_v63 = vadd.f32 %v1191_v50, %v1187_v24  ;;  %v1060_v50 = vadd.f32 %v1058_v37, %v1056_v28  ;;  %v1810_v24 = vstv %s3713_s14  ;;  %v1728_v61 = vrot.slane %v1724_v42, 1  ;;  %s3781_s14 = sld [smem:[#allocation8 + $0x1]] }
 0x144   : > { %1625 = vrot.lane.b32.xlu2 %v1620_v53, %s2905_s25  ;;  %1687 = vrot.lane.b32.xlu1 %v1683_v44, %s2905_s25  ;;  %v1207_v6 = vadd.f32 %v1202_v21, %v1193_v63  ;;  %v1052_v21 = vsel %vm874_vm0, %v1050_v47, %v1051_v55  ;;  %v1256_v53 = vmul.f32 %v1254_v26, %v3434_v29  ;;  %v3770_v8 = vmax.f32 %v1060_v50, 0.0 }
 0x145   : > { %1669 = vrot.lane.b32.xlu0 %v1665_v1, %s2905_s25  ;;  %v1055_v43 = vadd.f32 %v1052_v21, %v3621_v36  ;;  %v1760_v1 = vstv %s3740_s20  ;;  %s3848_s20 = sld [smem:[#allocation10 + $0xd]] }
 0x146   : > { %v3707_v7 = vpop.permute.xlu2 %1265  ;;  %v1216_v16 = vpop.permute.xlu1 %1215  ;;  %v3809_v27 = vmul.f32 %v1853_v56, %v3770_v8 }
 0x147   : > { %v1221_v11 = vadd.f32 %v1216_v16, %v1207_v6  ;;  %v1204_v20 = vpop.permute.xlu0 %1203  ;;  %v1059_v9 = vadd.f32 %v1058_v37, %v1055_v43  ;;  %v1937_v6 = vstv %s3730_s17  ;;  %v1293_v16 = vrot.slane %v1289_v59, 1  ;;  %s3813_s17 = sld [smem:[#allocation10 + $0x5]] }
 0x148   : > { %v1208_v15 = vadd.f32 %v1204_v20, %v1194_v5  ;;  %v1294_v5 = vrot.slane %v1290_v60, 1  ;;  %v1730_v20 = vsel %vm874_vm0, %v1728_v61, %v1729_v54  ;;  %v1324_v37 = vstv %s3764_s30  ;;  %s3973_s30 = sld [smem:[#allocation7 + $0x5d]] }
 0x149   : > { %v1234_v39 = vadd.f32 %v1231_v23, %v1221_v11  ;;  %v3772_v63 = vmax.f32 %v1059_v9, 0.0  ;;  %v1787_v11 = vstv %s3750_s27  ;;  %v1318_v49 = vstv %s3781_s14  ;;  %s3863_s27 = sld [smem:[#allocation7 + $0x51]] }
 0x14a   : > { %v1222_v22 = vadd.f32 %v1218_v4, %v1208_v15  ;;  %v1761_v15 = vmul.f32 %v1760_v1, %v3423_v25  ;;  %v1788_v23 = vmul.f32 %v1787_v11, %v3423_v25  ;;  %v1789_v26 = vmul.f32 %v1787_v11, %v3434_v29  ;;  %s4058_s14 = sld [smem:[#allocation7 + $0x6c]] }
 0x14b   : > { %v3802_v21 = vmul.f32 %v2021_v62, %v3772_v63  ;;  %v1295_v28 = vsel %vm874_vm0, %v1293_v16, %v1294_v5  ;;  %v3816_v43 = vmul.f32 %v1853_v56, %v3772_v63  ;;  %v1748_v59 = vmul.f32 %v1746_v34, %v3434_v29 }
 0x14c   : > { %1667 = vrot.lane.b32.xlu2 %v1666_v14, %s2905_s25  ;;  %1703 = vrot.lane.b32.xlu1 %v1698_v18, %s2904_s21  ;;  %v1235_v31 = vadd.f32 %v1230_v13, %v1222_v22  ;;  %v1762_v13 = vmul.f32 %v1760_v1, %v3434_v29  ;;  %v2105_v14 = vstv %s3757_s24  ;;  %v3794_v18 = vmul.f32 %v1810_v24, %v3772_v63  ;;  %s4040_s24 = sld [smem:[#allocation7 + $0x66]] }
 0x14d   : > { %1701 = vrot.lane.b32.xlu0 %v1697_v46, %s2904_s21  ;;  %v3797_v46 = vmul.f32 %v1810_v24, %v3770_v8  ;;  %v3860_v61 = vmul.f32 %v1979_v10, %v3770_v8  ;;  %v3866_v1 = vmul.f32 %v1979_v10, %v3772_v63  ;;  %v3871_v34 = vmul.f32 %v2063_v32, %v3772_v63 }
 0x14e   : > { %v1282_v30 = vpop.permute.xlu2 %1281  ;;  %v1248_v38 = vpop.permute.xlu1 %1247  ;;  %v2025_v11 = vstv %s3806_s29  ;;  %s4066_s29 = sld [smem:[#allocation10 + $0x2]] }
 0x14f   : > { %v1252_v36 = vadd.f32 %v1248_v38, %v1235_v31  ;;  %v1246_v41 = vpop.permute.xlu0 %1245  ;;  %v3824_v31 = vmul.f32 %v1937_v6, %v3772_v63  ;;  %v3831_v38 = vmul.f32 %v1937_v6, %v3770_v8 }
 0x150   : > { %v1251_v4 = vadd.f32 %v1246_v41, %v1234_v39  ;;  %v2716_v41 = vld [vmem:[%s3082_s23] sm:$0xff] }
 0x151   : > { %v1258_v2 = vadd.f32 %v1256_v53, %v1252_v36  ;;  %v1837_v19 = vrot.slane %v2716_v41, 1  ;;  %v1793_v53 = vrot.slane %v1789_v26, 1 }
 0x152   : > { %v1257_v17 = vadd.f32 %v1255_v40, %v1251_v4  ;;  %v3844_v4 = vld [vmem:[%s3082_s23 + $0x8] sm:$0xf] }
 0x153   : > { %v1838_v42 = vrot.slane %v3844_v4, 1 }
 0x154   : > { %1689 = vrot.lane.b32.xlu2 %v1684_v33, %s2905_s25  ;;  %1751 = vrot.lane.b32.xlu1 %v1747_v45, %s2905_s25  ;;  %v1271_v44 = vadd.f32 %v3707_v7, %v1257_v17  ;;  %v1895_v7 = vstv %s3734_s19  ;;  %s3828_s19 = sld [smem:[#allocation10 + $0x19]]  ;;  %v1356_v45 = vstv %s3778_s28  ;;  %v1792_v17 = vrot.slane %v1788_v23, 1 }
 0x155   : > { %1733 = vrot.lane.b32.xlu0 %v1729_v54, %s2905_s25  ;;  %v3834_v39 = vmul.f32 %v1895_v7, %v3770_v8  ;;  %v3837_v40 = vmul.f32 %v1895_v7, %v3772_v63  ;;  %v1325_v54 = vmul.f32 %v1324_v37, %v3282_v57  ;;  %v1357_v56 = vmul.f32 %v1356_v45, %v3282_v57  ;;  %v2719_v23 = vld [vmem:[%s3082_s23 + $0x10] sm:$0xff]  ;;  %s4042_s28 = sld [smem:[#allocation7 + $0x63]] }
 0x156   : > { %v3774_v0 = vpop.permute.xlu2 %1333  ;;  %v1280_v3 = vpop.permute.xlu1 %1279  ;;  %v3877_v6 = vmul.f32 %v1356_v45, %v3284_v58  ;;  %v3884_v7 = vmul.f32 %v2021_v62, %v3770_v8  ;;  %v1880_v26 = vrot.slane %v2719_v23, 1 }
 0x157   : > { %v1285_v47 = vadd.f32 %v1280_v3, %v1271_v44  ;;  %v1268_v55 = vpop.permute.xlu0 %1267  ;;  %v1339_v16 = vadd.f32 %v3774_v0, %v1325_v54  ;;  %v2718_v0 = vld [vmem:[%s3082_s23 + $0x18] sm:$0xf]  ;;  %v1899_v54 = vstv %s3851_s2  ;;  %s4082_s2 = sld [smem:[#allocation10 + $0xe]] }
 0x158   : > { %v1272_v12 = vadd.f32 %v1268_v55, %v1258_v2  ;;  %v1839_v2 = vsel %vm874_vm0, %v1837_v19, %v1838_v42  ;;  %v3891_v55 = vmul.f32 %v2105_v14, %v3770_v8 }
 0x159   : > { %v1298_v9 = vadd.f32 %v1295_v28, %v1285_v47  ;;  %v1794_v47 = vsel %vm874_vm0, %v1792_v17, %v1793_v53  ;;  %v1362_v28 = vrot.slane %v3877_v6, 1 }
 0x15a   : > { %v1286_v22 = vadd.f32 %v1282_v30, %v1272_v12  ;;  %v3821_v30 = vmul.f32 %v2063_v32, %v3770_v8  ;;  %v1814_v32 = vstv %s3791_s22  ;;  %v1326_v8 = vmul.f32 %v1324_v37, %v3284_v58  ;;  %s4062_s22 = sld [smem:[#allocation8 + $0x2]] }
 0x15b   : > { %v1361_v12 = vrot.slane %v1357_v56, 1 }
 0x15c   : > { %1731 = vrot.lane.b32.xlu2 %v1730_v20, %s2905_s25  ;;  %1767 = vrot.lane.b32.xlu1 %v1762_v13, %s2904_s21  ;;  %v1299_v36 = vadd.f32 %v1294_v5, %v1286_v22  ;;  %v1857_v20 = vstv %s3813_s17  ;;  %v2067_v13 = vstv %s3828_s19  ;;  %v1881_v22 = vrot.slane %v2718_v0, 1  ;;  %s4074_s17 = sld [smem:[#allocation10 + $0x16]] }
 0x15d   : > { %1765 = vrot.lane.b32.xlu0 %v1761_v15, %s2904_s21  ;;  %s3857_s21 = sld [smem:[#allocation10 + $0x11]]  ;;  %v3951_v0 = vld [vmem:[%s3082_s23 + $0x38] sm:$0xf] }
 0x15e   : > { %v3839_v33 = vpop.permute.xlu2 %1349  ;;  %v1312_v50 = vpop.permute.xlu1 %1311  ;;  %v1882_v56 = vsel %vm874_vm0, %v1880_v26, %v1881_v22  ;;  %s4077_s19 = sld [smem:[#allocation10 + $0x6]] }
 0x15f   : > { %v1316_v60 = vadd.f32 %v1312_v50, %v1299_v36  ;;  %v1310_v24 = vpop.permute.xlu0 %1309 }
 0x160   : > { %v1315_v44 = vadd.f32 %v1310_v24, %v1298_v9 }
 0x161   : > { %v1320_v3 = vadd.f32 %v1318_v49, %v1316_v60  ;;  %v1386_v60 = vstv %s3863_s27  ;;  %s4086_s27 = sld [smem:[#allocation10 + $0x12]] }
 0x162   : > { %v1319_v10 = vadd.f32 %v1318_v49, %v1315_v44  ;;  %v1941_v49 = vstv %s3848_s20  ;;  %s4080_s20 = sld [smem:[#allocation10 + $0x1a]] }
 0x163   : > { %v3895_v5 = vmax.f32 %v1320_v3, 0.0  ;;  %v1420_v3 = vstv %s3879_s1  ;;  %s4089_s1 = sld [smem:[#allocation10 + $0x1e]] }
 0x164   : > { %1753 = vrot.lane.b32.xlu2 %v1748_v59, %s2905_s25  ;;  %v3901_v62 = vmax.f32 %v1319_v10, 0.0  ;;  %1840 = vrot.lane.b32.xlu1 %v1839_v2, %s2905_s25  ;;  %v1983_v2 = vstv %s3857_s21  ;;  %v1421_v23 = vmul.f32 %v1420_v3, %v3332_v48  ;;  %v3956_v26 = vmul.f32 %v1420_v3, %v3336_v51  ;;  %s4084_s21 = sld [smem:[#allocation10 + $0xa]] }
 0x165   : > { %1797 = vrot.lane.b32.xlu0 %v1793_v53, %s2905_s25  ;;  %v1816_v36 = vmul.f32 %v1814_v32, %v3895_v5  ;;  %v1859_v45 = vmul.f32 %v1857_v20, %v3895_v5 }
 0x166   : > { %v3906_v15 = vpop.permute.xlu2 %1397  ;;  %v1348_v41 = vpop.permute.xlu1 %1347  ;;  %v1815_v37 = vmul.f32 %v1814_v32, %v3901_v62  ;;  %v2026_v19 = vmul.f32 %v2025_v11, %v3901_v62  ;;  %v1858_v53 = vmul.f32 %v1857_v20, %v3901_v62  ;;  %v1942_v32 = vmul.f32 %v1941_v49, %v3901_v62 }
 0x167   : > { %v1353_v50 = vadd.f32 %v1348_v41, %v1339_v16  ;;  %v1336_v9 = vpop.permute.xlu0 %1335  ;;  %v3920_v17 = vadd.f32 %v1816_v36, %v3797_v46  ;;  %v3934_v46 = vadd.f32 %v1859_v45, %v3809_v27  ;;  %v1387_v16 = vmul.f32 %v1386_v60, %v3332_v48 }
 0x168   : > { %v1340_v59 = vadd.f32 %v1336_v9, %v1326_v8  ;;  %v3926_v24 = vadd.f32 %v1815_v37, %v3794_v18  ;;  %v3929_v44 = vadd.f32 %v2026_v19, %v3802_v21  ;;  %v3939_v10 = vadd.f32 %v1858_v53, %v3816_v43  ;;  %v2720_v8 = vld [vmem:[%s3082_s23 + $0x30] sm:$0xff] }
 0x169   : > { %v2069_v18 = vmul.f32 %v2067_v13, %v3895_v5  ;;  %v1363_v21 = vsel %vm874_vm0, %v1361_v12, %v1362_v28  ;;  %v1943_v20 = vmul.f32 %v1941_v49, %v3895_v5  ;;  %v2109_v27 = vstv %s3899_s15  ;;  %s4116_s15 = sld [smem:[#allocation7 + $0x78]] }
 0x16a   : > { %v1354_v6 = vadd.f32 %v3839_v33, %v1340_v59  ;;  %v1964_v33 = vrot.slane %v2720_v8, 1  ;;  %v1965_v43 = vrot.slane %v3951_v0, 1  ;;  %v1366_v19 = vadd.f32 %v1363_v21, %v1353_v50 }
 0x16b   : > { %v3960_v36 = vadd.f32 %v2069_v18, %v3821_v30  ;;  %v3966_v41 = vadd.f32 %v1943_v20, %v3831_v38  ;;  %v1900_v45 = vmul.f32 %v1899_v54, %v3901_v62  ;;  %v1901_v49 = vmul.f32 %v1899_v54, %v3895_v5 }
 0x16c   : > { %1795 = vrot.lane.b32.xlu2 %v1794_v47, %s2905_s25  ;;  %1885 = vrot.lane.b32.xlu1 %v1881_v22, %s2905_s25  ;;  %v1367_v12 = vadd.f32 %v1362_v28, %v1354_v6  ;;  %v3963_v22 = vadd.f32 %v1942_v32, %v3824_v31  ;;  %v1985_v28 = vmul.f32 %v1983_v2, %v3895_v5  ;;  %v1425_v18 = vrot.slane %v1421_v23, 1 }
 0x16d   : > { %1883 = vrot.lane.b32.xlu0 %v1882_v56, %s2905_s25  ;;  %v1984_v31 = vmul.f32 %v1983_v2, %v3901_v62  ;;  %v2068_v38 = vmul.f32 %v2067_v13, %v3901_v62  ;;  %v2027_v50 = vmul.f32 %v2025_v11, %v3895_v5  ;;  %v3981_v59 = vadd.f32 %v1901_v49, %v3834_v39 }
 0x16e   : > { %v1414_v47 = vpop.permute.xlu2 %1413  ;;  %v1380_v37 = vpop.permute.xlu1 %1379  ;;  %v3984_v54 = vadd.f32 %v1900_v45, %v3837_v40  ;;  %v3987_v56 = vadd.f32 %v1985_v28, %v3860_v61  ;;  %v1966_v3 = vsel %vm874_vm0, %v1964_v33, %v1965_v43  ;;  %v2106_v39 = vmul.f32 %v2105_v14, %v3772_v63  ;;  %v2723_v14 = vld [vmem:[%s3082_s23 + $0x20] sm:$0xff] }
 0x16f   : > { %v1384_v9 = vadd.f32 %v1380_v37, %v1367_v12  ;;  %v1378_v30 = vpop.permute.xlu0 %1377  ;;  %v3993_v13 = vadd.f32 %v1984_v31, %v3866_v1  ;;  %v3996_v11 = vadd.f32 %v2068_v38, %v3871_v34  ;;  %v1388_v40 = vmul.f32 %v1386_v60, %v3336_v51  ;;  %v2722_v1 = vld [vmem:[%s3082_s23 + $0x28] sm:$0xf] }
 0x170   : > { %v1383_v53 = vadd.f32 %v1378_v30, %v1366_v19  ;;  %v4003_v61 = vadd.f32 %v2027_v50, %v3884_v7  ;;  %v2111_v6 = vmul.f32 %v2109_v27, %v3895_v5  ;;  %v1923_v34 = vrot.slane %v2722_v1, 1 }
 0x171   : > { %v1426_v32 = vrot.slane %v3956_v26, 1  ;;  %v2110_v63 = vmul.f32 %v2109_v27, %v3901_v62  ;;  %v1922_v60 = vrot.slane %v2723_v14, 1  ;;  %v1390_v27 = vadd.f32 %v1388_v40, %v1384_v9 }
 0x172   : > { %v1389_v2 = vadd.f32 %v1387_v16, %v1383_v53  ;;  %v4016_v5 = vadd.f32 %v2111_v6, %v3891_v55  ;;  %v2725_v16 = vld [vmem:[%s3082_s23 + $0x40] sm:$0xff]  ;;  %v1433_v33 = vstv %s3968_s11  ;;  %s2539_s11 = sld [smem:[#allocation7 + $0x7e]] }
 0x173   : > { %v2006_v20 = vrot.slane %v2725_v16, 1  ;;  %v4021_v8 = vadd.f32 %v2110_v63, %v2106_v39  ;;  %v1427_v23 = vsel %vm874_vm0, %v1425_v18, %v1426_v32  ;;  %v1924_v55 = vsel %vm874_vm0, %v1922_v60, %v1923_v34  ;;  %v2726_v53 = vld [vmem:[%s3082_s23 + $0x60] sm:$0xff]  ;;  %v4037_v39 = vld [vmem:[%s3082_s23 + $0x68] sm:$0xf]  ;;  %v2729_v16 = vld [vmem:[%s3082_s23 + $0x50] sm:$0xff] }
 0x174   : > { %1842 = vrot.lane.b32.xlu2 %v1838_v42, %s2905_s25  ;;  %1967 = vrot.lane.b32.xlu1 %v1966_v3, %s2905_s25  ;;  %v1403_v7 = vadd.f32 %v3906_v15, %v1389_v2  ;;  %v2724_v42 = vld [vmem:[%s3082_s23 + $0x48] sm:$0xf]  ;;  %v1467_v15 = vstv %s3973_s30  ;;  %v1435_v45 = vmul.f32 %v1433_v33, %v3382_v52  ;;  %v1434_v49 = vmul.f32 %v1433_v33, %v3380_v35  ;;  %s2542_s30 = sld [smem:[#allocation7 + $0x81]] }
 0x175   : > { %1927 = vrot.lane.b32.xlu0 %v1923_v34, %s2905_s25  ;;  %v2007_v21 = vrot.slane %v2724_v42, 1  ;;  %v1468_v9 = vmul.f32 %v1467_v15, %v3380_v35  ;;  %v1469_v31 = vmul.f32 %v1467_v15, %v3382_v52  ;;  %v2090_v3 = vrot.slane %v2726_v53, 1  ;;  %v2728_v42 = vld [vmem:[%s3082_s23 + $0x58] sm:$0xf] }
 0x176   : > { %v1459_v4 = vpop.permute.xlu2 %1458  ;;  %v1412_v62 = vpop.permute.xlu1 %1411  ;;  %v2091_v2 = vrot.slane %v4037_v39, 1  ;;  %v1531_v15 = vstv %s4040_s24  ;;  %s2544_s24 = sld [smem:[#allocation7 + $0x87]] }
 0x177   : > { %v1417_v26 = vadd.f32 %v1412_v62, %v1403_v7  ;;  %v1400_v12 = vpop.permute.xlu0 %1399  ;;  %v2008_v19 = vsel %vm874_vm0, %v2006_v20, %v2007_v21  ;;  %v1472_v1 = vrot.slane %v1468_v9, 1  ;;  %v1473_v34 = vrot.slane %v1469_v31, 1 }
 0x178   : > { %v1404_v37 = vadd.f32 %v1400_v12, %v1390_v27  ;;  %v2092_v14 = vsel %vm874_vm0, %v2090_v3, %v2091_v2  ;;  %v2048_v20 = vrot.slane %v2729_v16, 1 }
 0x179   : > { %v1430_v28 = vadd.f32 %v1427_v23, %v1417_v26  ;;  %v1474_v7 = vsel %vm874_vm0, %v1472_v1, %v1473_v34  ;;  %v2731_v26 = vld [vmem:[%s3082_s23 + $0x70] sm:$0xff] }
 0x17a   : > { %v1418_v30 = vadd.f32 %v1414_v47, %v1404_v37  ;;  %v2132_v12 = vrot.slane %v2731_v26, 1  ;;  %v1947_v26 = vstv %s4082_s2  ;;  %s4201_s2 = sld [smem:[#allocation11 + $0x5]] }
 0x17b   : > { %v1436_v6 = vadd.f32 %v1434_v49, %v1430_v28  ;;  %v1533_v49 = vmul.f32 %v1531_v15, %v3434_v29 }
 0x17c   : > { %1925 = vrot.lane.b32.xlu2 %v1924_v55, %s2905_s25  ;;  %2011 = vrot.lane.b32.xlu1 %v2007_v21, %s2905_s25  ;;  %v1431_v38 = vadd.f32 %v1426_v32, %v1418_v30  ;;  %v2049_v21 = vrot.slane %v2728_v42, 1  ;;  %v1497_v55 = vstv %s4042_s28  ;;  %v1550_v42 = vstv %s4058_s14  ;;  %s2547_s28 = sld [smem:[#allocation7 + $0x8a]] }
 0x17d   : > { %2009 = vrot.lane.b32.xlu0 %v2008_v19, %s2905_s25  ;;  %v1499_v9 = vmul.f32 %v1497_v55, %v3434_v29  ;;  %v1498_v31 = vmul.f32 %v1497_v55, %v3423_v25  ;;  %v1551_v55 = vmul.f32 %v1550_v42, %v3282_v57  ;;  %s4184_s14 = sld [smem:[#allocation8 + $0x3]] }
 0x17e   : > { %v1491_v50 = vpop.permute.xlu2 %1490  ;;  %v1447_v47 = vpop.permute.xlu1 %1446  ;;  %v1437_v40 = vadd.f32 %v1435_v45, %v1431_v38  ;;  %v2050_v37 = vsel %vm874_vm0, %v2048_v20, %v2049_v21  ;;  %v1532_v45 = vmul.f32 %v1531_v15, %v3423_v25  ;;  %v1552_v20 = vmul.f32 %v1550_v42, %v3284_v58 }
 0x17f   : > { %v1445_v18 = vpop.permute.xlu0 %1444 }
 0x180   : > { %v1451_v32 = vadd.f32 %v1447_v47, %v1437_v40  ;;  %v1450_v63 = vadd.f32 %v1445_v18, %v1436_v6  ;;  %v1536_v3 = vrot.slane %v1532_v45, 1  ;;  %v1537_v47 = vrot.slane %v1533_v49, 1 }
 0x181   : > { %v2115_v45 = vstv %s4089_s1  ;;  %s4208_s1 = sld [smem:[#allocation10 + $0x13]] }
 0x182   : > { %v1464_v60 = vadd.f32 %v1459_v4, %v1450_v63  ;;  %v2730_v4 = vld [vmem:[%s3082_s23 + $0x78] sm:$0xf]  ;;  %s4071_s23 = sld [smem:[#allocation7 + $0x6f]] }
 0x183   : > { %v2133_v23 = vrot.slane %v2730_v4, 1  ;;  %v2031_v4 = vstv %s4074_s17  ;;  %s4195_s17 = sld [smem:[#allocation10 + $0xf]] }
 0x184   : > { %1969 = vrot.lane.b32.xlu2 %v1965_v43, %s2905_s25  ;;  %2093 = vrot.lane.b32.xlu1 %v2092_v14, %s2905_s25  ;;  %v1477_v27 = vadd.f32 %v1474_v7, %v1464_v60  ;;  %v1544_v60 = vstv %s4062_s22  ;;  %s4186_s22 = sld [smem:[#allocation10 + $0x3]] }
 0x185   : > { %2053 = vrot.lane.b32.xlu0 %v2049_v21, %s2905_s25  ;;  %v2134_v30 = vsel %vm874_vm0, %v2132_v12, %v2133_v23 }
 0x186   : > { %v1523_v62 = vpop.permute.xlu2 %1522  ;;  %v1489_v33 = vpop.permute.xlu1 %1488 }
 0x187   : > { %v1494_v0 = vadd.f32 %v1489_v33, %v1477_v27  ;;  %v1461_v43 = vpop.permute.xlu0 %1460 }
 0x188   : > { %v1465_v19 = vadd.f32 %v1461_v43, %v1451_v32  ;;  %v1538_v32 = vsel %vm874_vm0, %v1536_v3, %v1537_v47  ;;  %v1582_v14 = vstv %s4071_s23  ;;  %v1989_v43 = vstv %s4086_s27  ;;  %s4192_s23 = sld [smem:[#allocation10 + $0x7]] }
 0x189   : > { %v1500_v1 = vadd.f32 %v1498_v31, %v1494_v0  ;;  %v1583_v16 = vmul.f32 %v1582_v14, %v3282_v57  ;;  %v4102_v33 = vmul.f32 %v1582_v14, %v3284_v58  ;;  %v1905_v0 = vstv %s4084_s21  ;;  %s4204_s21 = sld [smem:[#allocation10 + $0x1b]] }
 0x18a   : > { %v1478_v28 = vadd.f32 %v1473_v34, %v1465_v19  ;;  %v2073_v19 = vstv %s4080_s20  ;;  %s4199_s20 = sld [smem:[#allocation11]] }
 0x18b   : > { %v1588_v58 = vrot.slane %v4102_v33, 1  ;;  %s4206_s27 = sld [smem:[#allocation11 + $0x1]] }
 0x18c   : > { %2051 = vrot.lane.b32.xlu2 %v2050_v37, %s2905_s25  ;;  %2137 = vrot.lane.b32.xlu1 %v2133_v23, %s2905_s25  ;;  %v1495_v38 = vadd.f32 %v1491_v50, %v1478_v28  ;;  %v1863_v23 = vstv %s4077_s19  ;;  %v1587_v37 = vrot.slane %v1583_v16, 1  ;;  %s4197_s19 = sld [smem:[#allocation10 + $0xb]] }
 0x18d   : > { %2135 = vrot.lane.b32.xlu0 %v2134_v30, %s2905_s25 }
 0x18e   : > { %v1562_v53 = vpop.permute.xlu2 %1561  ;;  %v1511_v40 = vpop.permute.xlu1 %1510  ;;  %v1501_v6 = vadd.f32 %v1499_v9, %v1495_v38 }
 0x18f   : > { %v1509_v34 = vpop.permute.xlu0 %1508 }
 0x190   : > { %v1515_v50 = vadd.f32 %v1511_v40, %v1501_v6  ;;  %v1514_v18 = vadd.f32 %v1509_v34, %v1500_v1 }
 0x192   : > { %v1528_v63 = vadd.f32 %v1523_v62, %v1514_v18 }
 0x194   : > { %2095 = vrot.lane.b32.xlu2 %v2091_v2, %s2905_s25  ;;  %v1541_v7 = vadd.f32 %v1538_v32, %v1528_v63  ;;  %s4104_s25 = sld [smem:[#allocation7 + $0x75]]  ;;  %v1820_v2 = vstv %s4066_s29 }
 0x195   : > { %s4190_s29 = sld [smem:[#allocation10 + $0x17]] }
 0x196   : > { %v4097_v21 = vpop.permute.xlu2 %1603  ;;  %v1560_v62 = vpop.permute.xlu1 %1559  ;;  %v1545_v27 = vadd.f32 %v1544_v60, %v1541_v7 }
 0x197   : > { %v1525_v39 = vpop.permute.xlu0 %1524  ;;  %v1565_v63 = vadd.f32 %v1560_v62, %v1551_v55 }
 0x198   : > { %v1547_v12 = vmax.f32 %v1545_v27, 0.0  ;;  %v1529_v15 = vadd.f32 %v1525_v39, %v1515_v50 }
 0x19a   : > { %v1542_v49 = vadd.f32 %v1537_v47, %v1529_v15  ;;  %v1821_v28 = vmul.f32 %v1820_v2, %v1547_v12  ;;  %v2032_v30 = vmul.f32 %v2031_v4, %v1547_v12  ;;  %v1864_v9 = vmul.f32 %v1863_v23, %v1547_v12 }
 0x19b   : > { %v1948_v31 = vmul.f32 %v1947_v26, %v1547_v12  ;;  %v1906_v38 = vmul.f32 %v1905_v0, %v1547_v12  ;;  %v1990_v3 = vmul.f32 %v1989_v43, %v1547_v12  ;;  %v2074_v1 = vmul.f32 %v2073_v19, %v1547_v12 }
 0x19c   : > { %v1546_v40 = vadd.f32 %v1544_v60, %v1542_v49  ;;  %v4119_v6 = vadd.f32 %v1821_v28, %v3926_v24  ;;  %v4122_v57 = vadd.f32 %v2032_v30, %v3929_v44  ;;  %v1566_v47 = vadd.f32 %v1562_v53, %v1552_v20 }
 0x19d   : > { %v4125_v50 = vadd.f32 %v1864_v9, %v3939_v10  ;;  %v4128_v18 = vadd.f32 %v1948_v31, %v3963_v22  ;;  %v4131_v32 = vadd.f32 %v1906_v38, %v3984_v54  ;;  %v4134_v24 = vadd.f32 %v1990_v3, %v3993_v13 }
 0x19e   : > { %v1626_v34 = vpop.permute.xlu2 %1625  ;;  %v1548_v14 = vmax.f32 %v1546_v40, 0.0  ;;  %v1576_v60 = vpop.permute.xlu1 %1575  ;;  %v1589_v44 = vsel %vm874_vm0, %v1587_v37, %v1588_v58  ;;  %v1612_v53 = vstv %s4104_s25  ;;  %v4139_v42 = vadd.f32 %v2074_v1, %v3996_v11  ;;  %s4210_s25 = sld [smem:[#allocation11 + $0x2]] }
 0x19f   : > { %v1574_v7 = vpop.permute.xlu0 %1573  ;;  %v2116_v10 = vmul.f32 %v2115_v45, %v1547_v12  ;;  %v1580_v27 = vadd.f32 %v1576_v60, %v1566_v47 }
 0x1a0   : > { %v1579_v16 = vadd.f32 %v1574_v7, %v1565_v63  ;;  %v1822_v22 = vmul.f32 %v1820_v2, %v1548_v14  ;;  %v1865_v20 = vmul.f32 %v1863_v23, %v1548_v14  ;;  %v2075_v54 = vmul.f32 %v2073_v19, %v1548_v14 }
 0x1a1   : > { %v1949_v62 = vmul.f32 %v1947_v26, %v1548_v14  ;;  %v1907_v33 = vmul.f32 %v1905_v0, %v1548_v14  ;;  %v1991_v39 = vmul.f32 %v1989_v43, %v1548_v14  ;;  %v2033_v26 = vmul.f32 %v2031_v4, %v1548_v14 }
 0x1a2   : > { %v1592_v15 = vadd.f32 %v1589_v44, %v1579_v16  ;;  %v4142_v13 = vadd.f32 %v1822_v22, %v3920_v17  ;;  %v4145_v55 = vadd.f32 %v1865_v20, %v3934_v46  ;;  %v4148_v11 = vadd.f32 %v2075_v54, %v3960_v36 }
 0x1a3   : > { %v4151_v12 = vadd.f32 %v1949_v62, %v3966_v41  ;;  %v4154_v2 = vadd.f32 %v1907_v33, %v3981_v59  ;;  %v4157_v23 = vadd.f32 %v1991_v39, %v3987_v56  ;;  %v1646_v0 = vstv %s4116_s15  ;;  %s4215_s15 = sld [smem:[#allocation11 + $0x3]] }
 0x1a4   : > { %v2117_v43 = vmul.f32 %v2115_v45, %v1548_v14  ;;  %v4161_v17 = vadd.f32 %v2116_v10, %v4021_v8  ;;  %v4164_v37 = vadd.f32 %v2033_v26, %v4003_v61  ;;  %v1613_v36 = vmul.f32 %v1612_v53, %v3332_v48 }
 0x1a5   : > { %v1609_v19 = vadd.f32 %v4097_v21, %v1592_v15  ;;  %v1593_v59 = vadd.f32 %v1588_v58, %v1580_v27  ;;  %v1647_v4 = vmul.f32 %v1646_v0, %v3332_v48  ;;  %v1648_v45 = vmul.f32 %v1646_v0, %v3336_v51 }
 0x1a6   : > { %v1668_v46 = vpop.permute.xlu2 %1667  ;;  %v1624_v41 = vpop.permute.xlu1 %1623  ;;  %v4169_v49 = vadd.f32 %v2117_v43, %v4016_v5  ;;  %v1614_v8 = vmul.f32 %v1612_v53, %v3336_v51  ;;  %v1676_v63 = vstv %s2539_s11  ;;  %v1710_v14 = vstv %s2542_s30  ;;  %s4250_s11 = sld [smem:[#allocation11 + $0x6]]  ;;  %s4254_s30 = scalar_lea.vmem [#allocation16], %s3079_s26 }
 0x1a7   : > { %v1606_v56 = vpop.permute.xlu0 %1605  ;;  %v1615_v30 = vadd.f32 %v1613_v36, %v1609_v19  ;;  %v1651_v61 = vrot.slane %v1647_v4, 1  ;;  %v1652_v9 = vrot.slane %v1648_v45, 1  ;;  %v1677_v60 = vmul.f32 %v1676_v63, %v3380_v35  ;;  %s4264_s26 = sld [smem:[#allocation11 + $0x4]] }
 0x1a8   : > { %v1610_v28 = vadd.f32 %v1606_v56, %v1593_v59  ;;  %v1711_v16 = vmul.f32 %v1710_v14, %v3380_v35  ;;  %v1712_v22 = vmul.f32 %v1710_v14, %v3382_v52  ;;  %v1678_v20 = vmul.f32 %v1676_v63, %v3382_v52 }
 0x1a9   : > { %v1629_v21 = vadd.f32 %v1624_v41, %v1615_v30  ;;  %v1653_v5 = vsel %vm874_vm0, %v1651_v61, %v1652_v9  ;;  %v1740_v19 = vstv %s2544_s24  ;;  %v1774_v59 = vstv %s2547_s28  ;;  %s2598_s24 = sld [smem:[#allocation10 + $0x1f]] }
 0x1aa   : > { %v1616_v31 = vadd.f32 %v1614_v8, %v1610_v28  ;;  %v1715_v27 = vrot.slane %v1711_v16, 1  ;;  %v1716_v62 = vrot.slane %v1712_v22, 1  ;;  %v1741_v56 = vmul.f32 %v1740_v19, %v3423_v25  ;;  %s2599_s28 = sld [smem:[#allocation11 + $0x7]] }
 0x1ab   : > { %v1775_v30 = vmul.f32 %v1774_v59, %v3423_v25  ;;  %v1776_v61 = vmul.f32 %v1774_v59, %v3434_v29  ;;  %v1826_v16 = vstv %s4186_s22  ;;  %v1875_v59 = vstv %s4206_s27 }
 0x1ac   : > { %v1630_v40 = vadd.f32 %v1626_v34, %v1616_v31  ;;  %v1717_v0 = vsel %vm874_vm0, %v1715_v27, %v1716_v62 }
 0x1ae   : > { %v1690_v38 = vpop.permute.xlu2 %1689  ;;  %v1640_v58 = vpop.permute.xlu1 %1639 }
 0x1af   : > { %v1638_v3 = vpop.permute.xlu0 %1637  ;;  %v1644_v48 = vadd.f32 %v1640_v58, %v1630_v40  ;;  %v1780_v58 = vrot.slane %v1776_v61, 1 }
 0x1b0   : > { %v1643_v1 = vadd.f32 %v1638_v3, %v1629_v21  ;;  %v1779_v21 = vrot.slane %v1775_v30, 1 }
 0x1b1   : > { %v1657_v53 = vadd.f32 %v1652_v9, %v1644_v48  ;;  %v1742_v9 = vmul.f32 %v1740_v19, %v3434_v29 }
 0x1b2   : > { %v1656_v47 = vadd.f32 %v1653_v5, %v1643_v1  ;;  %v1781_v29 = vsel %vm874_vm0, %v1779_v21, %v1780_v58 }
 0x1b4   : > { %v1673_v7 = vadd.f32 %v1668_v46, %v1656_v47 }
 0x1b6   : > { %v1732_v51 = vpop.permute.xlu2 %1731  ;;  %v1688_v44 = vpop.permute.xlu1 %1687  ;;  %v1679_v34 = vadd.f32 %v1677_v60, %v1673_v7 }
 0x1b7   : > { %v1670_v10 = vpop.permute.xlu0 %1669 }
 0x1b8   : > { %v1674_v54 = vadd.f32 %v1670_v10, %v1657_v53  ;;  %v1693_v15 = vadd.f32 %v1688_v44, %v1679_v34 }
 0x1ba   : > { %v1680_v33 = vadd.f32 %v1678_v20, %v1674_v54  ;;  %v2037_v20 = vstv %s4190_s29  ;;  %v1869_v54 = vstv %s4192_s23 }
 0x1bc   : > { %v1694_v46 = vadd.f32 %v1690_v38, %v1680_v33  ;;  %v1911_v33 = vstv %s4197_s19 }
 0x1be   : > { %v1754_v39 = vpop.permute.xlu2 %1753  ;;  %v1704_v26 = vpop.permute.xlu1 %1703 }
 0x1bf   : > { %v1702_v43 = vpop.permute.xlu0 %1701  ;;  %v1708_v35 = vadd.f32 %v1704_v26, %v1694_v46  ;;  %v2079_v46 = vstv %s4204_s21 }
 0x1c0   : > { %v1707_v36 = vadd.f32 %v1702_v43, %v1693_v15 }
 0x1c1   : > { %v1721_v8 = vadd.f32 %v1716_v62, %v1708_v35  ;;  %v1953_v62 = vstv %s4195_s17 }
 0x1c2   : > { %v1720_v41 = vadd.f32 %v1717_v0, %v1707_v36 }
 0x1c4   : > { %v1737_v45 = vadd.f32 %v1732_v51, %v1720_v41  ;;  %v1804_v51 = vstv %s4184_s14  ;;  %s2608_s14 = sshll.u32 (%p2991_p5), %s2972_s12, 4 }
 0x1c5   : > { %s2155_s23 = scalar_lea.vmem (%p2991_p5), %s4357_s9, %s2608_s14 }
 0x1c6   : > { %v1796_v52 = vpop.permute.xlu2 %1795  ;;  %v1752_v4 = vpop.permute.xlu1 %1751  ;;  %v1743_v38 = vadd.f32 %v1741_v56, %v1737_v45 }
 0x1c7   : > { %v1734_v28 = vpop.permute.xlu0 %1733 }
 0x1c8   : > { %v1738_v31 = vadd.f32 %v1734_v28, %v1721_v8  ;;  %v1757_v40 = vadd.f32 %v1752_v4, %v1743_v38  ;;  %v2043_v4 = vstv %s4201_s2  ;;  %v1995_v28 = vstv %s4208_s1 }
 0x1ca   : > { %v1744_v5 = vadd.f32 %v1742_v9, %v1738_v31  ;;  %v1917_v31 = vstv %s4210_s25 }
 0x1cc   : > { %v1758_v48 = vadd.f32 %v1754_v39, %v1744_v5  ;;  %v1832_v39 = vstv %s4199_s20 }
 0x1ce   : > { %v4188_v3 = vpop.permute.xlu2 %1842  ;;  %v1768_v25 = vpop.permute.xlu1 %1767 }
 0x1cf   : > { %v1766_v1 = vpop.permute.xlu0 %1765  ;;  %v1772_v63 = vadd.f32 %v1768_v25, %v1758_v48 }
 0x1d0   : > { %v1771_v47 = vadd.f32 %v1766_v1, %v1757_v40 }
 0x1d1   : > { %v1785_v10 = vadd.f32 %v1780_v58, %v1772_v63  ;;  %v1959_v58 = vstv %s4215_s15 }
 0x1d2   : > { %v1784_v14 = vadd.f32 %v1781_v29, %v1771_v47 }
 0x1d4   : > { %v1801_v60 = vadd.f32 %v1796_v52, %v1784_v14 }
 0x1d6   : > { %v1926_v44 = vpop.permute.xlu2 %1925  ;;  %v1805_v7 = vadd.f32 %v1804_v51, %v1801_v60  ;;  %v1841_v53 = vpop.permute.xlu1 %1840 }
 0x1d7   : > { %v1798_v22 = vpop.permute.xlu0 %1797 }
 0x1d8   : > { %v4217_v34 = vmax.f32 %v1805_v7, 0.0  ;;  %v1802_v27 = vadd.f32 %v1798_v22, %v1785_v10 }
 0x1da   : > { %v1827_v15 = vmul.f32 %v1826_v16, %v4217_v34  ;;  %v1806_v26 = vadd.f32 %v1804_v51, %v1802_v27  ;;  %v2038_v0 = vmul.f32 %v2037_v20, %v4217_v34  ;;  %v1870_v43 = vmul.f32 %v1869_v54, %v4217_v34 }
 0x1db   : > { %v1954_v36 = vmul.f32 %v1953_v62, %v4217_v34  ;;  %v1912_v35 = vmul.f32 %v1911_v33, %v4217_v34  ;;  %v1996_v10 = vmul.f32 %v1995_v28, %v4217_v34 }
 0x1dc   : > { %v1829_v41 = vadd.f32 %v1827_v15, %v4119_v6  ;;  %v4231_v19 = vmax.f32 %v1806_v26, 0.0  ;;  %v1872_v52 = vadd.f32 %v1870_v43, %v4125_v50  ;;  %v2040_v45 = vadd.f32 %v2038_v0, %v4122_v57 }
 0x1dd   : > { %v1914_v8 = vadd.f32 %v1912_v35, %v4131_v32  ;;  %v1956_v57 = vadd.f32 %v1954_v36, %v4128_v18  ;;  %v1998_v26 = vadd.f32 %v1996_v10, %v4134_v24  ;;  %v2001_v0 = vstv %s4264_s26 }
 0x1de   : > { %v1970_v56 = vpop.permute.xlu2 %1969  ;;  %v1833_v30 = vadd.f32 %v1832_v39, %v1829_v41  ;;  %v1828_v61 = vmul.f32 %v1826_v16, %v4231_v19  ;;  %v1886_v9 = vpop.permute.xlu1 %1885  ;;  %v1871_v6 = vmul.f32 %v1869_v54, %v4231_v19  ;;  %v1876_v21 = vadd.f32 %v1875_v59, %v1872_v52 }
 0x1df   : > { %v1884_v38 = vpop.permute.xlu0 %1883  ;;  %v1955_v50 = vmul.f32 %v1953_v62, %v4231_v19  ;;  %v1913_v25 = vmul.f32 %v1911_v33, %v4231_v19  ;;  %v2044_v29 = vadd.f32 %v2043_v4, %v2040_v45  ;;  %v1918_v47 = vadd.f32 %v1917_v31, %v1914_v8 }
 0x1e0   : > { %v1846_v5 = vadd.f32 %v1841_v53, %v1833_v30  ;;  %v1830_v32 = vadd.f32 %v1828_v61, %v4142_v13  ;;  %v1873_v40 = vadd.f32 %v1871_v6, %v4145_v55  ;;  %v1889_v1 = vadd.f32 %v1884_v38, %v1876_v21 }
 0x1e1   : > { %v1957_v48 = vadd.f32 %v1955_v50, %v4151_v12  ;;  %v2081_v55 = vmul.f32 %v2079_v46, %v4231_v19  ;;  %v1915_v63 = vadd.f32 %v1913_v25, %v4154_v2  ;;  %v1931_v14 = vadd.f32 %v1926_v44, %v1918_v47 }
 0x1e2   : > { %1849 = vst.msk [vmem:[%s4254_s30] sm:$0xff] %vm1848_vm1, %v1846_v5  ;;  %v1834_v18 = vadd.f32 %v1832_v39, %v1830_v32  ;;  %v1877_v13 = vadd.f32 %v1875_v59, %v1873_v40  ;;  %v1960_v53 = vadd.f32 %v1959_v58, %v1956_v57  ;;  %v1997_v2 = vmul.f32 %v1995_v28, %v4231_v19 }
 0x1e3   : > { %2558 = vst.msk [vmem:[%s4254_s30 + $0x10] sm:$0xff] %vm1848_vm1, %v1889_v1  ;;  %v1961_v12 = vadd.f32 %v1959_v58, %v1957_v48  ;;  %v2083_v44 = vadd.f32 %v2081_v55, %v4148_v11  ;;  %v1919_v54 = vadd.f32 %v1917_v31, %v1915_v63  ;;  %v2085_v39 = vstv %s4250_s11 }
 0x1e4   : > { %v1847_v51 = vadd.f32 %v4188_v3, %v1834_v18  ;;  %v1890_v60 = vadd.f32 %v1886_v9, %v1877_v13  ;;  %2565 = vst.msk [vmem:[%s4254_s30 + $0x20] sm:$0xff] %vm1848_vm1, %v1931_v14  ;;  %v1999_v15 = vadd.f32 %v1997_v2, %v4157_v23  ;;  %v2080_v35 = vmul.f32 %v2079_v46, %v4217_v34 }
 0x1e5   : > { %v1974_v22 = vadd.f32 %v1970_v56, %v1961_v12  ;;  %v2087_v11 = vadd.f32 %v2085_v39, %v2083_v44  ;;  %v2002_v23 = vadd.f32 %v2001_v0, %v1998_v26  ;;  %v2039_v52 = vmul.f32 %v2037_v20, %v4231_v19 }
 0x1e6   : > { %v2052_v7 = vpop.permute.xlu2 %2051  ;;  %1851 = vst.msk [vmem:[%s4254_s30 + $0x8] sm:$0x3] %vm1850_vm2, %v1847_v51  ;;  %v1968_v3 = vpop.permute.xlu1 %1967  ;;  %v2003_v36 = vadd.f32 %v2001_v0, %v1999_v15  ;;  %v2082_v8 = vadd.f32 %v2080_v35, %v4139_v42  ;;  %v2121_v28 = vstv %s2598_s24  ;;  %v2127_v58 = vstv %s2599_s28 }
 0x1e7   : > { %v2057_v16 = vadd.f32 %v2052_v7, %v2044_v29  ;;  %2559 = vst.msk [vmem:[%s4254_s30 + $0x18] sm:$0x3] %vm1850_vm2, %v1890_v60  ;;  %v1973_v27 = vadd.f32 %v1968_v3, %v1960_v53  ;;  %v1928_v62 = vpop.permute.xlu0 %1927  ;;  %v2041_v46 = vadd.f32 %v2039_v52, %v4164_v37  ;;  %v2123_v20 = vmul.f32 %v2121_v28, %v4231_v19 }
 0x1e8   : > { %v1932_v33 = vadd.f32 %v1928_v62, %v1919_v54  ;;  %2573 = vst.msk [vmem:[%s4254_s30 + $0x38] sm:$0x3] %vm1850_vm2, %v1974_v22  ;;  %v2086_v30 = vadd.f32 %v2085_v39, %v2082_v8  ;;  %v2122_v6 = vmul.f32 %v2121_v28, %v4217_v34 }
 0x1e9   : > { %2586 = vst.msk [vmem:[%s4254_s30 + $0x50] sm:$0xff] %vm1848_vm1, %v2057_v16  ;;  %v2045_v9 = vadd.f32 %v2043_v4, %v2041_v46  ;;  %v2125_v42 = vadd.f32 %v2123_v20, %v4169_v49 }
 0x1ea   : > { %2572 = vst.msk [vmem:[%s4254_s30 + $0x30] sm:$0xff] %vm1848_vm1, %v1973_v27  ;;  %v2124_v37 = vadd.f32 %v2122_v6, %v4161_v17  ;;  %v2214_v17 = vld [vmem:[%s4254_s30] sm:$0xff] (%p2991_p5)  ;;  %v2218_v34 = vld [vmem:[%s4254_s30 + $0x10] sm:$0xff] (%p2991_p5) }
 0x1eb   : > { %2566 = vst.msk [vmem:[%s4254_s30 + $0x28] sm:$0x3] %vm1850_vm2, %v1932_v33  ;;  %v2129_v19 = vadd.f32 %v2127_v58, %v2125_v42  ;;  %v2222_v25 = vld [vmem:[%s4254_s30 + $0x20] sm:$0xff] (%p2991_p5) }
 0x1ec   : > { %v2128_v57 = vadd.f32 %v2127_v58, %v2124_v37  ;;  %2215 = vst [vmem:[%s2155_s23] sm:$0xff] (%p2991_p5), %v2214_v17 }
 0x1ed   : > { %v2216_v49 = vld [vmem:[%s4254_s30 + $0x8] sm:$0xff] (%p2991_p5)  ;;  %2219 = vst [vmem:[%s2155_s23 + $0x20] sm:$0xff] (%p2991_p5), %v2218_v34 }
 0x1ee   : > { %v2096_v43 = vpop.permute.xlu2 %2095  ;;  %v2012_v59 = vpop.permute.xlu1 %2011  ;;  %v2220_v40 = vld [vmem:[%s4254_s30 + $0x18] sm:$0xff] (%p2991_p5)  ;;  %2217 = vst [vmem:[%s2155_s23 + $0x8] sm:$0xff] (%p2991_p5), %v2216_v49 }
 0x1ef   : > { %v2100_v41 = vadd.f32 %v2096_v43, %v2087_v11  ;;  %v2016_v56 = vadd.f32 %v2012_v59, %v2003_v36  ;;  %v2010_v45 = vpop.permute.xlu0 %2009  ;;  %2221 = vst [vmem:[%s2155_s23 + $0x28] sm:$0xff] (%p2991_p5), %v2220_v40  ;;  %v2228_v48 = vld [vmem:[%s4254_s30 + $0x38] sm:$0xff] (%p2991_p5) }
 0x1f0   : > { %v2015_v24 = vadd.f32 %v2010_v45, %v2002_v23  ;;  %2223 = vst [vmem:[%s2155_s23 + $0x40] sm:$0xff] (%p2991_p5), %v2222_v25  ;;  %v2234_v13 = vld [vmem:[%s4254_s30 + $0x50] sm:$0xff] (%p2991_p5) }
 0x1f1   : > { %2594 = vst.msk [vmem:[%s4254_s30 + $0x68] sm:$0x3] %vm1850_vm2, %v2100_v41  ;;  %v2226_v1 = vld [vmem:[%s4254_s30 + $0x30] sm:$0xff] (%p2991_p5) }
 0x1f2   : > { %2580 = vst.msk [vmem:[%s4254_s30 + $0x48] sm:$0x3] %vm1850_vm2, %v2016_v56  ;;  %v2224_v29 = vld [vmem:[%s4254_s30 + $0x28] sm:$0xff] (%p2991_p5) }
 0x1f3   : > { %2579 = vst.msk [vmem:[%s4254_s30 + $0x40] sm:$0xff] %vm1848_vm1, %v2015_v24 }
 0x1f4   : > { %2225 = vst [vmem:[%s2155_s23 + $0x48] sm:$0xff] (%p2991_p5), %v2224_v29 }
 0x1f5   : > { %2227 = vst [vmem:[%s2155_s23 + $0x60] sm:$0xff] (%p2991_p5), %v2226_v1 }
 0x1f6   : > { %v2094_v61 = vpop.permute.xlu1 %2093  ;;  %2229 = vst [vmem:[%s2155_s23 + $0x68] sm:$0xff] (%p2991_p5), %v2228_v48 }
 0x1f7   : > { %v2099_v31 = vadd.f32 %v2094_v61, %v2086_v30  ;;  %v2054_v38 = vpop.permute.xlu0 %2053  ;;  %2235 = vst [vmem:[%s2155_s23 + $0xa0] sm:$0xff] (%p2991_p5), %v2234_v13 }
 0x1f8   : > { %v2058_v21 = vadd.f32 %v2054_v38, %v2045_v9  ;;  %v2240_v12 = vld [vmem:[%s4254_s30 + $0x68] sm:$0xff] (%p2991_p5) }
 0x1f9   : > { %2593 = vst.msk [vmem:[%s4254_s30 + $0x60] sm:$0xff] %vm1848_vm1, %v2099_v31  ;;  %v2232_v18 = vld [vmem:[%s4254_s30 + $0x48] sm:$0xff] (%p2991_p5) }
 0x1fa   : > { %2587 = vst.msk [vmem:[%s4254_s30 + $0x58] sm:$0x3] %vm1850_vm2, %v2058_v21  ;;  %v2230_v47 = vld [vmem:[%s4254_s30 + $0x40] sm:$0xff] (%p2991_p5) }
 0x1fb   : > { %2231 = vst [vmem:[%s2155_s23 + $0x80] sm:$0xff] (%p2991_p5), %v2230_v47 }
 0x1fc   : > { %2233 = vst [vmem:[%s2155_s23 + $0x88] sm:$0xff] (%p2991_p5), %v2232_v18 }
 0x1fd   : > { %2241 = vst [vmem:[%s2155_s23 + $0xc8] sm:$0xff] (%p2991_p5), %v2240_v12 }
 0x1fe   : > { %v2138_v50 = vpop.permute.xlu1 %2137  ;;  %2152 = sbr.rel (!%p2991_p5) target bundleno = 523 (0x20b), region = 130 }
 0x1ff   : > { %v2142_v4 = vadd.f32 %v2138_v50, %v2129_v19  ;;  %v2136_v5 = vpop.permute.xlu0 %2135 }
 0x200   : > { %v2141_v32 = vadd.f32 %v2136_v5, %v2128_v57  ;;  %v2238_v63 = vld [vmem:[%s4254_s30 + $0x60] sm:$0xff] (%p2991_p5) }
 0x201   : > { %2601 = vst.msk [vmem:[%s4254_s30 + $0x78] sm:$0x3] %vm1850_vm2, %v2142_v4  ;;  %v2236_v55 = vld [vmem:[%s4254_s30 + $0x58] sm:$0xff] (%p2991_p5) }
 0x202   : > { %2600 = vst.msk [vmem:[%s4254_s30 + $0x70] sm:$0xff] %vm1848_vm1, %v2141_v32 }
 0x203   : > { %2237 = vst [vmem:[%s2155_s23 + $0xa8] sm:$0xff] %v2236_v55 }
 0x204   : > { %2239 = vst [vmem:[%s2155_s23 + $0xc0] sm:$0xff] %v2238_v63 }
 0x208   : > { %v2244_v51 = vld [vmem:[%s4254_s30 + $0x78] sm:$0xff] }
 0x209   : > { %v2242_v14 = vld [vmem:[%s4254_s30 + $0x70] sm:$0xff]  ;;  %2245 = vst [vmem:[%s2155_s23 + $0xe8] sm:$0xff] %v2244_v51 }
 0x20a   : > { %2243 = vst [vmem:[%s2155_s23 + $0xe0] sm:$0xff] %v2242_v14 }
 0x20b PF: > { %p21_p13 = scmp.ge.s32.totalorder %s2975_s13, 4   ;;  %s4366_s30 = smov %s2890_s10 }
 0x20c   : > { %s4367_s10 = smov %s2985_s16  ;;  %s4368_s11 = smov %s2975_s13 }
 0x20d   :  { %23 = sbr.rel (!%p21_p13) target bundleno = 9 (0x9), region = 214 }
 0x212   :  { %2261 = vsyncpa [#allocation4], 1 }
 0x213   :  { %2263 = vsyncpa [#allocation4 + $0x1], 1 }
 0x214   :  { %2264 = vsyncpa [#allocation6], 1 }
 0x215   :  { %2265 = vsyncpa [#allocation9], 1 }
 0x216   :  { %2266 = vsyncpa [#allocation12], 1 }
 0x217   :  { %2267 = vsyncpa [#allocation15], 1 }

// kernel: _lambda_.5
= control target key start
LH: loop header
LB: loop body
LE: loop exit
PB: predicated region body
PF: predicated region fallthrough
CT: control target
= control target key end

     0   :  { %s4348_s0 = inlined_call_operand.vmem [shape: f32[8,2,14,14], index: 0, kind: input, shape index: {}]   ;;  %s4349_s1 = inlined_call_operand.vmem [shape: f32[32], index: 1, kind: input, shape index: {}]   ;;  %s4350_s2 = inlined_call_operand.vmem [shape: f32[4], index: 2, kind: input, shape index: {}]   ;;  %s4351_s3 = inlined_call_operand.vmem [shape: f32[144], index: 3, kind: input, shape index: {}]   ;;  %s4352_s4 = inlined_call_operand.vmem [shape: f32[4], index: 4, kind: input, shape index: {}]   ;;  %s4353_s5 = inlined_call_operand.vmem [shape: f32[32], index: 5, kind: input, shape index: {}]   ;;  %s4354_s6 = inlined_call_operand.vmem [shape: f32[8], index: 6, kind: input, shape index: {}]   ;;  %s4355_s7 = inlined_call_operand.vmem [shape: f32[8], index: 7, kind: input, shape index: {}]   ;;  %s4356_s8 = inlined_call_operand.vmem [shape: f32[8], index: 8, kind: input, shape index: {}]   ;;  %s4357_s9 = inlined_call_operand.vmem [shape: f32[8,2,12,12], index: 9, kind: output, shape index: {}]  }
   0x1   :  { %4358 = sst [smem:[#allocation22_spill]] %s4349_s1 }
   0x2   :  { %4359 = sst [smem:[#allocation23_spill]] %s4350_s2 }
   0x3   :  { %14 = vsyncpa [#allocation4], 0 }
   0x4   :  { %15 = vsyncpa [#allocation6], 0 }
   0x5   :  { %16 = vsyncpa [#allocation9], 0 }
   0x6   :  { %17 = vsyncpa [#allocation12], 0 }
   0x7   :  { %18 = vsyncpa [#allocation15], 0  ;;  %s2956_s30 = smov 0   ;;  %s2958_s10 = smov 0  }
   0x8   :  { %s2960_s11 = smov 0  }
   0x9 LB: > { %s2972_s12 = sadd.s32 4294967295, %s2894_s11   ;;  %s2975_s13 = sadd.s32 1, %s2894_s11   ;;  %s2894_s11 = sphi %s2960_s11, %s4368_s11   ;;  %s2890_s10 = sphi %s2958_s10, %s4367_s10   ;;  %s2886_s30 = sphi %s2956_s30, %s4366_s30  }
   0xa   : > { %s28_s14 = ssub.s32 %s2894_s11, %s2975_s13  ;;  %s31_s15 = sadd.s32 1, %s2890_s10 }
   0xb   : > { %p29_p0 = scmp.eq.s32.totalorder %s28_s14, 0  ;;  %p38_p1 = scmp.ne.s32.totalorder %s2890_s10, %s2886_s30 }
   0xc   : > { %p39_p2 = scmp.eq.s32.totalorder %s2894_s11, 0  ;;  %p236_p3 = scmp.eq.s32.totalorder %s2972_s12, 1 }
   0xd   : > { %s2985_s16 = scalar_select %p29_p0, %s2890_s10, %s31_s15  }
   0xe   : > { %p2987_p4 = por %p39_p2, %p38_p1  ;;  %p2991_p5 = por %p236_p3, %p38_p1 }
   0xf   : > { %p2386_p6 = scmp.ge.s32.totalorder %s2894_s11, 1  ;;  %p249_p7 = scmp.lt.s32.totalorder %s2894_s11, 3 }
  0x10   : > { %p2666_p8 = scmp.eq.s32.totalorder %s2972_s12, 0  ;;  %s4363_s2 = sld [smem:[#allocation23_spill]] }
  0x11   : > { %p2998_p9 = pnand %p2386_p6, %p249_p7  ;;  %s291_s25 = sshll.u32 %s4352_s4, 4  ;;  %s292_s25 = int_to_ptr.vmem [resolvable:$true] %s291_s25 }
  0x12   : > { %s311_s29 = sshll.u32 %s4354_s6, 4  ;;  %s4365_s1 = sld [smem:[#allocation22_spill]]  ;;  %s312_s29 = int_to_ptr.vmem [resolvable:$true] %s311_s29 }
  0x13   : > { %p2641_p10 = pneg %p2998_p9  ;;  %s2896_s21 = smov [#allocation5]  }
  0x14   : > { %s2897_s23 = smov [#allocation8]   ;;  %s2898_s24 = smov [#allocation11]  }
  0x15   : > { %p3012_p11 = pnand %p2666_p8, %p2641_p10  ;;  %s2899_s27 = smov [#allocation3]  }
  0x16   : > { %s271_s22 = sshll.u32 %s4363_s2, 4  ;;  %s281_s14 = sshll.u32 %s4351_s3, 4  ;;  %s272_s22 = int_to_ptr.vmem [resolvable:$true] %s271_s22  ;;  %s282_s14 = int_to_ptr.vmem [resolvable:$true] %s281_s14 }
  0x17   : > { %2647 = dma.vmem_to_smem (!%p3012_p11), %s272_s22, 16, %s2896_s21, [#allocation6]  }
  0x18   : > { %s261_s20 = sshll.u32 %s4365_s1, 4  ;;  %s301_s22 = sshll.u32 %s4353_s5, 4  ;;  %s262_s20 = int_to_ptr.vmem [resolvable:$true] %s261_s20  ;;  %s302_s22 = int_to_ptr.vmem [resolvable:$true] %s301_s22 }
  0x19   : > { %2653 = dma.vmem_to_smem (!%p3012_p11), %s292_s25, 16, %s2897_s23, [#allocation9]  }
  0x1a   : > { %2659 = dma.vmem_to_smem (!%p3012_p11), %s312_s29, 16, %s2898_s24, [#allocation12]  }
  0x1b   : > { %2644 = dma.vmem_to_smem (!%p3012_p11), %s262_s20, 16, %s2899_s27, [#allocation4]  }
  0x1c   : > { %s2900_s21 = smov [#allocation7]   ;;  %s2901_s25 = smov [#allocation10]  }
  0x1d   : > { %2650 = dma.vmem_to_smem (!%p3012_p11), %s282_s14, 32, %s2900_s21, [#allocation6]  }
  0x1e   : > { %2656 = dma.vmem_to_smem (!%p3012_p11), %s302_s22, 16, %s2901_s25, [#allocation9]  }
  0x1f   : > { %s321_s20 = sshll.u32 %s4355_s7, 4  ;;  %s331_s27 = sshll.u32 %s4356_s8, 4  ;;  %s322_s20 = int_to_ptr.vmem [resolvable:$true] %s321_s20  ;;  %s332_s27 = int_to_ptr.vmem [resolvable:$true] %s331_s27 }
  0x20   : > { %s2902_s28 = smov [#allocation13]   ;;  %s2903_s1 = smov [#allocation14]  }
  0x21   : > { %2662 = dma.vmem_to_smem (!%p3012_p11), %s322_s20, 16, %s2902_s28, [#allocation12]  }
  0x22   : > { %2665 = dma.vmem_to_smem (!%p3012_p11), %s332_s27, 16, %s2903_s1, [#allocation15]  }
  0x23   : > { %p2395_p12 = scmp.ge.s32.totalorder %s2894_s11, 2 }
  0x25   : > { %338 = sbr.rel (%p2395_p12) target bundleno = 62 (0x3e), region = 48 }
  0x2a   : > { %341 = sbr.rel (!%p2987_p4) target bundleno = 62 (0x3e), region = 52  ;;  %s343_s14 = sand.u32 (%p2987_p4), 1, %s2890_s10  }
  0x2b   : > { %s2607_s15 = sshll.u32 (%p2987_p4), %s2894_s11, 4  ;;  %s2396_s22 = sshll.u32 (%p2987_p4), %s343_s14, 7 }
  0x2c   : > { %s3058_s29 = scalar_lea.vmem (%p2987_p4), %s4348_s0, %s2607_s15  ;;  %s345_s11 = scalar_lea.vmem (%p2987_p4), [#allocation2], %s2396_s22 }
  0x2d   : > { %v407_v0 = vld [vmem:[%s3058_s29] sm:$0xff] (%p2987_p4)  ;;  %v409_v1 = vld [vmem:[%s3058_s29 + $0x8] sm:$0xff] (%p2987_p4) }
  0x2e   : > { %v411_v2 = vld [vmem:[%s3058_s29 + $0x20] sm:$0xff] (%p2987_p4)  ;;  %408 = vst [vmem:[%s345_s11] sm:$0xff] (%p2987_p4), %v407_v0  ;;  %v413_v3 = vld [vmem:[%s3058_s29 + $0x28] sm:$0xff] (%p2987_p4) }
  0x2f   : > { %410 = vst [vmem:[%s345_s11 + $0x8] sm:$0xff] %v409_v1  ;;  %v415_v4 = vld [vmem:[%s3058_s29 + $0x40] sm:$0xff]  ;;  %v417_v5 = vld [vmem:[%s3058_s29 + $0x48] sm:$0xff] }
  0x30   : > { %412 = vst [vmem:[%s345_s11 + $0x10] sm:$0xff] %v411_v2  ;;  %v419_v6 = vld [vmem:[%s3058_s29 + $0x60] sm:$0xff]  ;;  %v421_v7 = vld [vmem:[%s3058_s29 + $0x68] sm:$0xff] }
  0x31   : > { %414 = vst [vmem:[%s345_s11 + $0x18] sm:$0xff] %v413_v3  ;;  %v423_v8 = vld [vmem:[%s3058_s29 + $0x80] sm:$0xff]  ;;  %v425_v9 = vld [vmem:[%s3058_s29 + $0x88] sm:$0xff] }
  0x32   : > { %416 = vst [vmem:[%s345_s11 + $0x20] sm:$0xff] %v415_v4  ;;  %v427_v10 = vld [vmem:[%s3058_s29 + $0xa0] sm:$0xff]  ;;  %v429_v11 = vld [vmem:[%s3058_s29 + $0xa8] sm:$0xff] }
  0x33   : > { %418 = vst [vmem:[%s345_s11 + $0x28] sm:$0xff] %v417_v5  ;;  %v431_v12 = vld [vmem:[%s3058_s29 + $0xc0] sm:$0xff]  ;;  %v433_v13 = vld [vmem:[%s3058_s29 + $0xc8] sm:$0xff] }
  0x34   : > { %420 = vst [vmem:[%s345_s11 + $0x30] sm:$0xff] %v419_v6  ;;  %v435_v14 = vld [vmem:[%s3058_s29 + $0xe0] sm:$0xff]  ;;  %v437_v15 = vld [vmem:[%s3058_s29 + $0xe8] sm:$0xff] }
  0x35   : > { %422 = vst [vmem:[%s345_s11 + $0x38] sm:$0xff] %v421_v7 }
  0x36   : > { %424 = vst [vmem:[%s345_s11 + $0x40] sm:$0xff] %v423_v8 }
  0x37   : > { %426 = vst [vmem:[%s345_s11 + $0x48] sm:$0xff] %v425_v9 }
  0x38   : > { %428 = vst [vmem:[%s345_s11 + $0x50] sm:$0xff] %v427_v10 }
  0x39   : > { %430 = vst [vmem:[%s345_s11 + $0x58] sm:$0xff] %v429_v11 }
  0x3a   : > { %432 = vst [vmem:[%s345_s11 + $0x60] sm:$0xff] %v431_v12 }
  0x3b   : > { %434 = vst [vmem:[%s345_s11 + $0x68] sm:$0xff] %v433_v13 }
  0x3c   : > { %436 = vst [vmem:[%s345_s11 + $0x70] sm:$0xff] %v435_v14 }
  0x3d   : > { %438 = vst [vmem:[%s345_s11 + $0x78] sm:$0xff] %v437_v15 }
  0x3e PF: > { %447 = sbr.rel (%p2998_p9) target bundleno = 523 (0x20b), region = 90  ;;  %s450_s17 = sand.u32 (!%p2998_p9), 1, %s2886_s30  }
  0x3f   : > { %s3079_s26 = sshll.u32 (!%p2998_p9), %s450_s17, 7 }
  0x40   : > { %s3082_s23 = scalar_lea.vmem (!%p2998_p9), [#allocation2], %s3079_s26 }
  0x43   : > { %2865 = dma.done.wait (%p2666_p8), [#allocation4], 16  }
  0x44   : > { %2867 = vsyncadd (%p2666_p8), [#allocation4], 4294967280 }
  0x45   : > { %2869 = dma.done.wait (%p2666_p8), [#allocation6], 48  }
  0x46   : > { %2871 = vsyncadd (%p2666_p8), [#allocation6], 4294967248 }
  0x47   : > { %2873 = dma.done.wait (%p2666_p8), [#allocation9], 32  }
  0x48   : > { %2875 = vsyncadd (%p2666_p8), [#allocation9], 4294967264 }
  0x49   : > { %2877 = dma.done.wait (%p2666_p8), [#allocation12], 32  }
  0x4a   : > { %2879 = vsyncadd (%p2666_p8), [#allocation12], 4294967264 }
  0x4b   : > { %2881 = dma.done.wait (%p2666_p8), [#allocation15], 16  }
  0x4c   : > { %2883 = vsyncadd (%p2666_p8), [#allocation15], 4294967280 }
  0x4d   : > { %496 = sfence }
  0x4e   : > { %s548_s30 = sld [smem:[#allocation13]]  ;;  %v525_v16 = vld [vmem:[%s3082_s23] sm:$0xff]  ;;  %v526_v17 = vld [vmem:[%s3082_s23 + $0x8] sm:$0x3f]  ;;  %v2410_v21 = vld [vmem:[%s3082_s23 + $0x10] sm:$0xff]  ;;  %vm874_vm0 = vcmask 1046528  }
  0x4f   : > { %s552_s19 = sld [smem:[#allocation14]]  ;;  %v2411_v22 = vld [vmem:[%s3082_s23 + $0x18] sm:$0x3f]  ;;  %v2412_v24 = vld [vmem:[%s3082_s23 + $0x20] sm:$0xff]  ;;  %v2413_v25 = vld [vmem:[%s3082_s23 + $0x28] sm:$0x3f] }
  0x50   : > { %s2424_s20 = sld [smem:[#allocation13 + $0x1]]  ;;  %v2414_v33 = vld [vmem:[%s3082_s23 + $0x30] sm:$0xff]  ;;  %v2415_v34 = vld [vmem:[%s3082_s23 + $0x38] sm:$0x3f]  ;;  %v2416_v38 = vld [vmem:[%s3082_s23 + $0x40] sm:$0xff]  ;;  %vm1848_vm1 = vcmask 97280  }
  0x51   : > { %s3106_s2 = sld [smem:[#allocation14 + $0x1]]  ;;  %v2417_v39 = vld [vmem:[%s3082_s23 + $0x48] sm:$0x3f]  ;;  %v2418_v46 = vld [vmem:[%s3082_s23 + $0x50] sm:$0xff]  ;;  %v2419_v47 = vld [vmem:[%s3082_s23 + $0x58] sm:$0x3f] }
  0x52   : > { %s2426_s24 = sld [smem:[#allocation13 + $0x2]]  ;;  %v2420_v60 = vld [vmem:[%s3082_s23 + $0x60] sm:$0xff]  ;;  %v2421_v61 = vld [vmem:[%s3082_s23 + $0x68] sm:$0x3f]  ;;  %v2422_v2 = vld [vmem:[%s3082_s23 + $0x70] sm:$0xff]  ;;  %vm1850_vm2 = vcmask 93184  }
  0x53   : > { %s3108_s27 = sld [smem:[#allocation14 + $0x2]]  ;;  %v2423_v3 = vld [vmem:[%s3082_s23 + $0x78] sm:$0x3f] }
  0x54   : > { %v549_v18 = vstv %s548_s30  ;;  %s3112_s28 = sld [smem:[#allocation13 + $0x3]] }
  0x55   : > { %v550_v19 = vmul.f32 %v549_v18, %v525_v16  ;;  %v551_v20 = vmul.f32 %v549_v18, %v526_v17  ;;  %v553_v23 = vstv %s552_s19  ;;  %s3114_s1 = sld [smem:[#allocation14 + $0x3]] }
  0x56   : > { %v559_v26 = vstv %s2424_s20  ;;  %s3118_s14 = sld [smem:[#allocation13 + $0x4]] }
  0x57   : > { %v554_v27 = vadd.f32 %v553_v23, %v550_v19  ;;  %v555_v28 = vadd.f32 %v553_v23, %v551_v20  ;;  %v560_v29 = vmul.f32 %v2410_v21, %v559_v26  ;;  %v561_v30 = vmul.f32 %v2411_v22, %v559_v26  ;;  %s3120_s15 = sld [smem:[#allocation14 + $0x4]] }
  0x58   : > { %v563_v31 = vstv %s3106_s2  ;;  %v569_v32 = vstv %s2426_s24  ;;  %s3123_s22 = sld [smem:[#allocation13 + $0x5]] }
  0x59   : > { %v564_v35 = vadd.f32 %v563_v31, %v560_v29  ;;  %v570_v36 = vmul.f32 %v2412_v24, %v569_v32  ;;  %v571_v37 = vmul.f32 %v2413_v25, %v569_v32  ;;  %s3127_s21 = sld [smem:[#allocation14 + $0x5]]  ;;  %v565_v40 = vadd.f32 %v563_v31, %v561_v30 }
  0x5a   : > { %v573_v41 = vstv %s3108_s27  ;;  %v579_v42 = vstv %s3112_s28  ;;  %s3133_s25 = sld [smem:[#allocation13 + $0x6]]  ;;  %v3135_v43 = vmax.f32 %v554_v27, 0.0  ;;  %v3137_v44 = vmax.f32 %v555_v28, 0.0 }
  0x5b   : > { %v574_v45 = vadd.f32 %v573_v41, %v570_v36  ;;  %s3139_s29 = sld [smem:[#allocation14 + $0x6]]  ;;  %v580_v48 = vmul.f32 %v2414_v33, %v579_v42  ;;  %v581_v49 = vmul.f32 %v2415_v34, %v579_v42  ;;  %v583_v50 = vstv %s3114_s1 }
  0x5c   : > { %v589_v51 = vstv %s3118_s14  ;;  %s3145_s11 = sld [smem:[#allocation13 + $0x7]]  ;;  %v3147_v52 = vmax.f32 %v564_v35, 0.0  ;;  %v575_v53 = vadd.f32 %v573_v41, %v571_v37  ;;  %v3151_v56 = vmax.f32 %v565_v40, 0.0 }
  0x5d   : > { %v590_v54 = vmul.f32 %v2416_v38, %v589_v51  ;;  %v591_v55 = vmul.f32 %v2417_v39, %v589_v51  ;;  %s3149_s17 = sld [smem:[#allocation14 + $0x7]]  ;;  %v584_v57 = vadd.f32 %v583_v50, %v580_v48  ;;  %v593_v58 = vstv %s3120_s15 }
  0x5e   : > { %v599_v59 = vstv %s3123_s22  ;;  %s3155_s30 = sld [smem:[#allocation3]]  ;;  %v585_v62 = vadd.f32 %v583_v50, %v581_v49  ;;  %v3163_v4 = vmax.f32 %v574_v45, 0.0  ;;  %v3169_v8 = vmax.f32 %v575_v53, 0.0 }
  0x5f   : > { %v594_v63 = vadd.f32 %v593_v58, %v590_v54  ;;  %v600_v0 = vmul.f32 %v2418_v46, %v599_v59  ;;  %v601_v1 = vmul.f32 %v2419_v47, %v599_v59  ;;  %s3159_s19 = sld [smem:[#allocation3 + $0x1]]  ;;  %v595_v5 = vadd.f32 %v593_v58, %v591_v55 }
  0x60   : > { %v603_v6 = vstv %s3127_s21  ;;  %v609_v7 = vstv %s3133_s25  ;;  %s3167_s20 = sld [smem:[#allocation3 + $0x2]]  ;;  %v3171_v9 = vmax.f32 %v584_v57, 0.0  ;;  %v3179_v16 = vmax.f32 %v585_v62, 0.0 }
  0x61   : > { %v604_v10 = vadd.f32 %v603_v6, %v600_v0  ;;  %v605_v11 = vadd.f32 %v603_v6, %v601_v1  ;;  %s3173_s2 = sld [smem:[#allocation3 + $0x3]]  ;;  %v610_v12 = vmul.f32 %v2420_v60, %v609_v7  ;;  %v611_v13 = vmul.f32 %v2421_v61, %v609_v7 }
  0x62   : > { %v613_v14 = vstv %s3139_s29  ;;  %v619_v15 = vstv %s3145_s11  ;;  %s3177_s24 = sld [smem:[#allocation3 + $0x4]]  ;;  %v3181_v17 = vmax.f32 %v594_v63, 0.0  ;;  %v3185_v20 = vmax.f32 %v595_v5, 0.0 }
  0x63   : > { %v620_v18 = vmul.f32 %v2422_v2, %v619_v15  ;;  %v621_v19 = vmul.f32 %v2423_v3, %v619_v15  ;;  %s3183_s27 = sld [smem:[#allocation3 + $0x5]]  ;;  %v614_v21 = vadd.f32 %v613_v14, %v610_v12  ;;  %v623_v22 = vstv %s3149_s17 }
  0x64   : > { %v629_v23 = vstv %s3155_s30  ;;  %s3189_s28 = sld [smem:[#allocation3 + $0x6]]  ;;  %v3191_v24 = vmax.f32 %v604_v10, 0.0  ;;  %v3193_v25 = vmax.f32 %v605_v11, 0.0  ;;  %v615_v28 = vadd.f32 %v613_v14, %v611_v13 }
  0x65   : > { %v630_v26 = vmul.f32 %v629_v23, %v3135_v43  ;;  %v631_v27 = vmul.f32 %v629_v23, %v3137_v44  ;;  %s3197_s1 = sld [smem:[#allocation3 + $0x7]]  ;;  %v624_v29 = vadd.f32 %v623_v22, %v620_v18  ;;  %v633_v30 = vstv %s3159_s19 }
  0x66   : > { %v639_v31 = vstv %s3167_s20  ;;  %s3201_s14 = sld [smem:[#allocation5]]  ;;  %v3203_v32 = vmax.f32 %v614_v21, 0.0  ;;  %v625_v33 = vadd.f32 %v623_v22, %v621_v19  ;;  %v634_v34 = vmul.f32 %v633_v30, %v3147_v52 }
  0x67   : > { %v635_v35 = vmul.f32 %v633_v30, %v3151_v56  ;;  %s3207_s15 = sld [smem:[#allocation7 + $0x2]]  ;;  %v640_v36 = vmul.f32 %v639_v31, %v3163_v4  ;;  %v641_v37 = vmul.f32 %v639_v31, %v3169_v8  ;;  %v645_v38 = vstv %s3173_s2 }
  0x68   : > { %v651_v39 = vstv %s3177_s24  ;;  %s3213_s22 = sld [smem:[#allocation7 + $0x1]]  ;;  %v636_v40 = vadd.f32 %v634_v34, %v630_v26  ;;  %v646_v42 = vmul.f32 %v645_v38, %v3171_v9  ;;  %v647_v45 = vmul.f32 %v645_v38, %v3179_v16 }
  0x69   : > { %v637_v41 = vadd.f32 %v635_v35, %v631_v27  ;;  %s2445_s21 = sld [smem:[#allocation3 + $0x8]]  ;;  %v3217_v46 = vmax.f32 %v615_v28, 0.0  ;;  %v3219_v47 = vmax.f32 %v624_v29, 0.0  ;;  %v652_v48 = vmul.f32 %v651_v39, %v3181_v17 }
  0x6a   : > { %v657_v49 = vstv %s3183_s27  ;;  %s3223_s25 = sld [smem:[#allocation3 + $0x9]]  ;;  %v642_v50 = vadd.f32 %v640_v36, %v636_v40  ;;  %v653_v53 = vmul.f32 %v651_v39, %v3185_v20  ;;  %v663_v54 = vstv %s3189_s28 }
  0x6b   : > { %v643_v51 = vadd.f32 %v641_v37, %v637_v41  ;;  %s3227_s29 = sld [smem:[#allocation3 + $0xa]]  ;;  %v3229_v55 = vmax.f32 %v625_v33, 0.0  ;;  %v669_v57 = vstv %s3197_s1  ;;  %v658_v60 = vmul.f32 %v657_v49, %v3191_v24 }
  0x6c   : > { %s3232_s11 = sld [smem:[#allocation3 + $0xb]]  ;;  %v648_v58 = vadd.f32 %v646_v42, %v642_v50  ;;  %v659_v61 = vmul.f32 %v657_v49, %v3193_v25  ;;  %v664_v62 = vmul.f32 %v663_v54, %v3203_v32  ;;  %v665_v63 = vmul.f32 %v663_v54, %v3217_v46 }
  0x6d   : > { %v649_v59 = vadd.f32 %v647_v45, %v643_v51  ;;  %s3236_s17 = sld [smem:[#allocation3 + $0xc]]  ;;  %v675_v0 = vstv %s3201_s14  ;;  %v670_v3 = vmul.f32 %v669_v57, %v3219_v47  ;;  %v671_v6 = vmul.f32 %v669_v57, %v3229_v55 }
  0x6e   : > { %s3241_s30 = sld [smem:[#allocation3 + $0xd]]  ;;  %v654_v1 = vadd.f32 %v652_v48, %v648_v58  ;;  %v855_v18 = vstv %s3207_s15  ;;  %v841_v19 = vstv %s3213_s22 }
  0x6f   : > { %v655_v2 = vadd.f32 %v653_v53, %v649_v59  ;;  %v681_v5 = vstv %s2445_s21  ;;  %s3244_s19 = sld [smem:[#allocation3 + $0xe]]  ;;  %s2904_s21 = smov 126  }
  0x70   : > { %v682_v7 = vmul.f32 %v681_v5, %v3135_v43  ;;  %v683_v10 = vmul.f32 %v681_v5, %v3137_v44  ;;  %v685_v11 = vstv %s3223_s25  ;;  %s3250_s20 = sld [smem:[#allocation3 + $0xf]]  ;;  %v660_v12 = vadd.f32 %v658_v60, %v654_v1  ;;  %s2905_s25 = smov 127  }
  0x71   : > { %v661_v13 = vadd.f32 %v659_v61, %v655_v2  ;;  %v686_v14 = vmul.f32 %v685_v11, %v3147_v52  ;;  %v687_v15 = vmul.f32 %v685_v11, %v3151_v56  ;;  %v691_v21 = vstv %s3227_s29  ;;  %s3258_s2 = sld [smem:[#allocation5 + $0x1]] }
  0x72   : > { %v697_v22 = vstv %s3232_s11  ;;  %v666_v23 = vadd.f32 %v664_v62, %v660_v12  ;;  %s3260_s24 = sld [smem:[#allocation3 + $0x10]]  ;;  %v692_v29 = vmul.f32 %v691_v21, %v3163_v4  ;;  %v693_v30 = vmul.f32 %v691_v21, %v3169_v8 }
  0x73   : > { %v667_v26 = vadd.f32 %v665_v63, %v661_v13  ;;  %v688_v27 = vadd.f32 %v686_v14, %v682_v7  ;;  %v689_v28 = vadd.f32 %v687_v15, %v683_v10  ;;  %v698_v31 = vmul.f32 %v697_v22, %v3171_v9  ;;  %s3266_s27 = sld [smem:[#allocation3 + $0x11]] }
  0x74   : > { %v699_v33 = vmul.f32 %v697_v22, %v3179_v16  ;;  %v672_v34 = vadd.f32 %v670_v3, %v666_v23  ;;  %v703_v36 = vstv %s3236_s17  ;;  %v709_v37 = vstv %s3241_s30  ;;  %s3270_s28 = sld [smem:[#allocation3 + $0x12]] }
  0x75   : > { %v673_v35 = vadd.f32 %v671_v6, %v667_v26  ;;  %v694_v38 = vadd.f32 %v692_v29, %v688_v27  ;;  %v695_v39 = vadd.f32 %v693_v30, %v689_v28  ;;  %v704_v40 = vmul.f32 %v703_v36, %v3181_v17  ;;  %s3274_s1 = sld [smem:[#allocation3 + $0x13]] }
  0x76   : > { %v705_v41 = vmul.f32 %v703_v36, %v3185_v20  ;;  %v676_v42 = vadd.f32 %v675_v0, %v672_v34  ;;  %v710_v48 = vmul.f32 %v709_v37, %v3191_v24  ;;  %v711_v49 = vmul.f32 %v709_v37, %v3193_v25  ;;  %s3278_s14 = sld [smem:[#allocation3 + $0x14]] }
  0x77   : > { %v677_v45 = vadd.f32 %v675_v0, %v673_v35  ;;  %v700_v50 = vadd.f32 %v698_v31, %v694_v38  ;;  %v701_v51 = vadd.f32 %v699_v33, %v695_v39  ;;  %v715_v53 = vstv %s3244_s19  ;;  %s3290_s15 = sld [smem:[#allocation3 + $0x15]] }
  0x78   : > { %v721_v54 = vstv %s3250_s20  ;;  %v3282_v57 = vmax.f32 %v676_v42, 0.0  ;;  %v716_v59 = vmul.f32 %v715_v53, %v3203_v32  ;;  %v717_v60 = vmul.f32 %v715_v53, %v3217_v46  ;;  %s3296_s22 = sld [smem:[#allocation3 + $0x16]] }
  0x79   : > { %v3284_v58 = vmax.f32 %v677_v45, 0.0  ;;  %v706_v61 = vadd.f32 %v704_v40, %v700_v50  ;;  %v707_v62 = vadd.f32 %v705_v41, %v701_v51  ;;  %v722_v63 = vmul.f32 %v721_v54, %v3219_v47  ;;  %s3306_s29 = sld [smem:[#allocation3 + $0x17]] }
  0x7a   : > { %v723_v0 = vmul.f32 %v721_v54, %v3229_v55  ;;  %v856_v1 = vmul.f32 %v855_v18, %v3282_v57  ;;  %v842_v3 = vmul.f32 %v841_v19, %v3282_v57  ;;  %v727_v10 = vstv %s3258_s2  ;;  %s3310_s11 = sld [smem:[#allocation7 + $0xb]] }
  0x7b   : > { %v857_v2 = vmul.f32 %v855_v18, %v3284_v58  ;;  %v843_v5 = vmul.f32 %v841_v19, %v3284_v58  ;;  %v712_v6 = vadd.f32 %v710_v48, %v706_v61  ;;  %v713_v7 = vadd.f32 %v711_v49, %v707_v62  ;;  %s3316_s17 = sld [smem:[#allocation7 + $0xa]] }
  0x7c   : > { %v733_v11 = vstv %s3260_s24  ;;  %860 = vrot.lane.b32.xlu1 %v856_v1, %s2904_s21  ;;  %846 = vrot.lane.b32.xlu0 %v842_v3, %s2905_s25  ;;  %v737_v14 = vstv %s3266_s27  ;;  %s3318_s30 = sld [smem:[#allocation5 + $0x2]] }
  0x7d   : > { %v734_v12 = vmul.f32 %v733_v11, %v3135_v43  ;;  %v735_v13 = vmul.f32 %v733_v11, %v3137_v44  ;;  %v743_v15 = vstv %s3270_s28  ;;  %v718_v18 = vadd.f32 %v716_v59, %v712_v6  ;;  %s3324_s19 = sld [smem:[#allocation7 + $0x13]] }
  0x7e   : > { %v719_v19 = vadd.f32 %v717_v60, %v713_v7  ;;  %v738_v21 = vmul.f32 %v737_v14, %v3147_v52  ;;  %v739_v22 = vmul.f32 %v737_v14, %v3151_v56  ;;  %v744_v23 = vmul.f32 %v743_v15, %v3163_v4  ;;  %s3326_s20 = sld [smem:[#allocation3 + $0x18]] }
  0x7f   : > { %v745_v26 = vmul.f32 %v743_v15, %v3169_v8  ;;  %v749_v27 = vstv %s3274_s1  ;;  %v755_v28 = vstv %s3278_s14  ;;  %v724_v29 = vadd.f32 %v722_v63, %v718_v18  ;;  %s3330_s2 = sld [smem:[#allocation3 + $0x19]] }
  0x80   : > { %v725_v30 = vadd.f32 %v723_v0, %v719_v19  ;;  %v740_v31 = vadd.f32 %v738_v21, %v734_v12  ;;  %v741_v33 = vadd.f32 %v739_v22, %v735_v13  ;;  %v750_v34 = vmul.f32 %v749_v27, %v3171_v9  ;;  %s3334_s24 = sld [smem:[#allocation3 + $0x1a]] }
  0x81   : > { %v751_v35 = vmul.f32 %v749_v27, %v3179_v16  ;;  %v756_v36 = vmul.f32 %v755_v28, %v3181_v17  ;;  %v757_v37 = vmul.f32 %v755_v28, %v3185_v20  ;;  %v728_v38 = vadd.f32 %v727_v10, %v724_v29  ;;  %s3342_s27 = sld [smem:[#allocation3 + $0x1b]] }
  0x82   : > { %v729_v39 = vadd.f32 %v727_v10, %v725_v30  ;;  %v746_v40 = vadd.f32 %v744_v23, %v740_v31  ;;  %v747_v41 = vadd.f32 %v745_v26, %v741_v33  ;;  %v761_v42 = vstv %s3290_s15  ;;  %s3347_s28 = sld [smem:[#allocation7 + $0x4]] }
  0x83   : > { %v767_v45 = vstv %s3296_s22  ;;  %v3332_v48 = vmax.f32 %v728_v38, 0.0  ;;  %v762_v53 = vmul.f32 %v761_v42, %v3191_v24  ;;  %v763_v54 = vmul.f32 %v761_v42, %v3193_v25  ;;  %s3352_s1 = sld [smem:[#allocation3 + $0x1c]] }
  0x84   : > { %v752_v49 = vadd.f32 %v750_v34, %v746_v40  ;;  %v753_v50 = vadd.f32 %v751_v35, %v747_v41  ;;  %v3336_v51 = vmax.f32 %v729_v39, 0.0  ;;  %v773_v59 = vstv %s3306_s29  ;;  %862 = vrot.lane.b32.xlu1 %v857_v2, %s2904_s21  ;;  %848 = vrot.lane.b32.xlu0 %v843_v5, %s2905_s25  ;;  %s3356_s14 = sld [smem:[#allocation3 + $0x1d]] }
  0x85   : > { %v768_v62 = vmul.f32 %v767_v45, %v3203_v32  ;;  %v769_v63 = vmul.f32 %v767_v45, %v3217_v46  ;;  %v774_v0 = vmul.f32 %v773_v59, %v3219_v47  ;;  %v920_v1 = vstv %s3310_s11  ;;  %s3361_s15 = sld [smem:[#allocation3 + $0x1e]] }
  0x86   : > { %v758_v60 = vadd.f32 %v756_v36, %v752_v49  ;;  %v759_v61 = vadd.f32 %v757_v37, %v753_v50  ;;  %v906_v3 = vstv %s3316_s17  ;;  %v775_v7 = vmul.f32 %v773_v59, %v3229_v55  ;;  %s3367_s22 = sld [smem:[#allocation3 + $0x1f]] }
  0x87   : > { %v921_v10 = vmul.f32 %v920_v1, %v3332_v48  ;;  %v908_v5 = vmul.f32 %v906_v3, %v3336_v51  ;;  %v907_v13 = vmul.f32 %v906_v3, %v3332_v48  ;;  %v779_v14 = vstv %s3318_s30  ;;  %s3374_s29 = sld [smem:[#allocation7 + $0x14]] }
  0x88   : > { %v764_v2 = vadd.f32 %v762_v53, %v758_v60  ;;  %v765_v6 = vadd.f32 %v763_v54, %v759_v61  ;;  %v785_v15 = vstv %s3326_s20  ;;  %v789_v22 = vstv %s3330_s2  ;;  %s3391_s11 = sld [smem:[#allocation5 + $0x3]] }
  0x89   : > { %925 = vrot.lane.b32.xlu2 %v921_v10, %s2904_s21  ;;  %v786_v21 = vmul.f32 %v785_v15, %v3135_v43  ;;  %v790_v23 = vmul.f32 %v789_v22, %v3147_v52  ;;  %v795_v26 = vstv %s3334_s24  ;;  %v801_v27 = vstv %s3342_s27  ;;  %s3401_s17 = sld [smem:[#allocation7 + $0x16]] }
  0x8a   : > { %v770_v11 = vadd.f32 %v768_v62, %v764_v2  ;;  %v771_v12 = vadd.f32 %v769_v63, %v765_v6  ;;  %v796_v43 = vmul.f32 %v795_v26, %v3163_v4  ;;  %v953_v30 = vstv %s3324_s19  ;;  %s3406_s30 = sld [smem:[#allocation7 + $0x1c]] }
  0x8b   : > { %v792_v31 = vadd.f32 %v790_v23, %v786_v21  ;;  %v802_v33 = vmul.f32 %v801_v27, %v3171_v9  ;;  %v807_v34 = vstv %s3352_s1  ;;  %v883_v36 = vstv %s3347_s28  ;;  %s2487_s19 = sld [smem:[#allocation7 + $0x1d]] }
  0x8c   : > { %v776_v18 = vadd.f32 %v774_v0, %v770_v11  ;;  %v777_v19 = vadd.f32 %v775_v7, %v771_v12  ;;  %913 = vrot.lane.b32.xlu1 %v908_v5, %s2905_s25  ;;  %911 = vrot.lane.b32.xlu0 %v907_v13, %s2905_s25  ;;  %v813_v37 = vstv %s3356_s14  ;;  %v808_v39 = vmul.f32 %v807_v34, %v3181_v17  ;;  %s3432_s20 = sld [smem:[#allocation7 + $0x26]] }
  0x8d   : > { %v798_v38 = vadd.f32 %v796_v43, %v792_v31  ;;  %v922_v40 = vmul.f32 %v920_v1, %v3336_v51  ;;  %v819_v42 = vstv %s3361_s15  ;;  %v885_v9 = vmul.f32 %v883_v36, %v3284_v58  ;;  %s2493_s2 = sld [smem:[#allocation7 + $0x28]] }
  0x8e   : > { %v780_v28 = vadd.f32 %v779_v14, %v776_v18  ;;  %v781_v29 = vadd.f32 %v779_v14, %v777_v19  ;;  %v814_v49 = vmul.f32 %v813_v37, %v3191_v24  ;;  %v825_v50 = vstv %s3367_s22  ;;  %s2490_s24 = sld [smem:[#allocation7 + $0x25]] }
  0x8f   : > { %v804_v45 = vadd.f32 %v802_v33, %v798_v38  ;;  %v787_v17 = vmul.f32 %v785_v15, %v3137_v44  ;;  %v791_v53 = vmul.f32 %v789_v22, %v3151_v56  ;;  %v797_v54 = vmul.f32 %v795_v26, %v3169_v8  ;;  %s3451_s27 = sld [smem:[#allocation7 + $0x2f]] }
  0x90   : > { %v3380_v35 = vmax.f32 %v780_v28, 0.0  ;;  %v3382_v52 = vmax.f32 %v781_v29, 0.0  ;;  %v820_v60 = vmul.f32 %v819_v42, %v3203_v32  ;;  %v967_v24 = vstv %s3374_s29  ;;  %s2498_s28 = sld [smem:[#allocation7 + $0x31]] }
  0x91   : > { %v810_v59 = vadd.f32 %v808_v39, %v804_v45  ;;  %v793_v61 = vadd.f32 %v791_v53, %v787_v17  ;;  %v803_v44 = vmul.f32 %v801_v27, %v3179_v16  ;;  %v826_v56 = vmul.f32 %v825_v50, %v3219_v47  ;;  %s2495_s1 = sld [smem:[#allocation7 + $0x2e]] }
  0x92   : > { %v955_v41 = vmul.f32 %v953_v30, %v3382_v52  ;;  %v954_v4 = vmul.f32 %v953_v30, %v3380_v35  ;;  %v889_v8 = vrot.slane %v885_v9, 1  ;;  %v809_v0 = vmul.f32 %v807_v34, %v3185_v20  ;;  %s3467_s14 = sld [smem:[#allocation7 + $0x38]] }
  0x93   : > { %v816_v62 = vadd.f32 %v814_v49, %v810_v59  ;;  %v799_v63 = vadd.f32 %v797_v54, %v793_v61  ;;  %v884_v1 = vmul.f32 %v883_v36, %v3282_v57  ;;  %v969_v32 = vmul.f32 %v967_v24, %v3382_v52  ;;  %s2503_s15 = sld [smem:[#allocation7 + $0x3a]] }
  0x94   : > { %960 = vrot.lane.b32.xlu2 %v955_v41, %s2905_s25  ;;  %958 = vrot.lane.b32.xlu1 %v954_v4, %s2905_s25  ;;  %v968_v2 = vmul.f32 %v967_v24, %v3380_v35  ;;  %v831_v6 = vstv %s3391_s11  ;;  %v815_v16 = vmul.f32 %v813_v37, %v3193_v25  ;;  %v821_v5 = vmul.f32 %v819_v42, %v3217_v46  ;;  %s2500_s22 = sld [smem:[#allocation7 + $0x37]] }
  0x95   : > { %927 = vrot.lane.b32.xlu0 %v922_v40, %s2904_s21  ;;  %v822_v3 = vadd.f32 %v820_v60, %v816_v62  ;;  %v805_v7 = vadd.f32 %v803_v44, %v799_v63  ;;  %v888_v11 = vrot.slane %v884_v1, 1  ;;  %v994_v20 = vstv %s3401_s17  ;;  %s3483_s29 = sld [smem:[#allocation7 + $0x41]] }
  0x96   : > { %v1017_v13 = vstv %s3406_s30  ;;  %v827_v15 = vmul.f32 %v825_v50, %v3229_v55  ;;  %v996_v18 = vmul.f32 %v994_v20, %v3382_v52  ;;  %v995_v21 = vmul.f32 %v994_v20, %v3380_v35  ;;  %s2508_s11 = sld [smem:[#allocation7 + $0x43]] }
  0x97   : > { %v828_v10 = vadd.f32 %v826_v56, %v822_v3  ;;  %v811_v47 = vadd.f32 %v809_v0, %v805_v7  ;;  %v890_v46 = vsel %vm874_vm0, %v888_v11, %v889_v8  ;;  %v1031_v55 = vstv %s2487_s19  ;;  %s2505_s17 = sld [smem:[#allocation7 + $0x40]] }
  0x98   : > { %v1000_v26 = vrot.slane %v996_v18, 1  ;;  %v999_v28 = vrot.slane %v995_v21, 1  ;;  %v1082_v33 = vstv %s3432_s20  ;;  %v1109_v36 = vstv %s2493_s2  ;;  %s3493_s30 = sld [smem:[#allocation7]] }
  0x99   : > { %v832_v12 = vadd.f32 %v831_v6, %v828_v10  ;;  %v817_v14 = vadd.f32 %v815_v16, %v811_v47  ;;  %v1068_v37 = vstv %s2490_s24  ;;  %v1083_v38 = vmul.f32 %v1082_v33, %v3282_v57  ;;  %s2474_s19 = sld [smem:[#allocation7 + $0x3]] }
  0x9a   : > { %v1001_v43 = vsel %vm874_vm0, %v999_v28, %v1000_v26  ;;  %v1070_v39 = vmul.f32 %v1068_v37, %v3284_v58  ;;  %v1110_v40 = vmul.f32 %v1109_v36, %v3282_v57  ;;  %v1111_v41 = vmul.f32 %v1109_v36, %v3284_v58  ;;  %s3503_s20 = sld [smem:[#allocation7 + $0x4a]] }
  0x9b   : > { %v3423_v25 = vmax.f32 %v832_v12, 0.0  ;;  %v823_v19 = vadd.f32 %v821_v5, %v817_v14  ;;  %v1069_v9 = vmul.f32 %v1068_v37, %v3282_v57  ;;  %v1146_v49 = vstv %s3451_s27  ;;  %s2514_s2 = sld [smem:[#allocation7 + $0x4c]] }
  0x9c   : > { %893 = vrot.lane.b32.xlu2 %v889_v8, %s2905_s25  ;;  %974 = vrot.lane.b32.xlu1 %v969_v32, %s2904_s21  ;;  %v1115_v4 = vrot.slane %v1111_v41, 1  ;;  %v1114_v42 = vrot.slane %v1110_v40, 1  ;;  %v1084_v50 = vmul.f32 %v1082_v33, %v3284_v58  ;;  %v1173_v17 = vstv %s2498_s28  ;;  %s3507_s24 = sld [smem:[#allocation7 + $0x49]] }
  0x9d   : > { %972 = vrot.lane.b32.xlu0 %v968_v2, %s2904_s21  ;;  %v1018_v22 = vmul.f32 %v1017_v13, %v3423_v25  ;;  %v829_v23 = vadd.f32 %v827_v15, %v823_v19  ;;  %v1032_v31 = vmul.f32 %v1031_v55, %v3423_v25  ;;  %v1132_v53 = vstv %s2495_s1  ;;  %s2479_s27 = sld [smem:[#allocation7 + $0xc]] }
  0x9e   : > { %v1116_v45 = vsel %vm874_vm0, %v1114_v42, %v1115_v4  ;;  %v1147_v54 = vmul.f32 %v1146_v49, %v3332_v48  ;;  %v1134_v59 = vmul.f32 %v1132_v53, %v3336_v51  ;;  %v1174_v60 = vmul.f32 %v1173_v17, %v3332_v48  ;;  %s3523_s28 = sld [smem:[#allocation7 + $0x9]] }
  0x9f   : > { %v833_v27 = vadd.f32 %v831_v6, %v829_v23  ;;  %v1175_v24 = vmul.f32 %v1173_v17, %v3336_v51  ;;  %v1133_v62 = vmul.f32 %v1132_v53, %v3332_v48  ;;  %v1210_v8 = vstv %s3467_s14  ;;  %s3531_s1 = sld [smem:[#allocation7 + $0x53]] }
  0xa0   : > { %v1178_v44 = vrot.slane %v1174_v60, 1  ;;  %v1148_v63 = vmul.f32 %v1146_v49, %v3336_v51  ;;  %v1237_v0 = vstv %s2503_s15  ;;  %v1196_v1 = vstv %s2500_s22  ;;  %s3535_s14 = sld [smem:[#allocation7 + $0x52]] }
  0xa1   : > { %v3434_v29 = vmax.f32 %v833_v27, 0.0  ;;  %v1179_v61 = vrot.slane %v1175_v24, 1  ;;  %v1211_v32 = vmul.f32 %v1210_v8, %v3380_v35  ;;  %v1198_v3 = vmul.f32 %v1196_v1, %v3382_v52  ;;  %s3538_s15 = sld [smem:[#allocation7 + $0x12]] }
  0xa2   : > { %v1238_v2 = vmul.f32 %v1237_v0, %v3380_v35  ;;  %v1239_v6 = vmul.f32 %v1237_v0, %v3382_v52  ;;  %v1197_v10 = vmul.f32 %v1196_v1, %v3380_v35  ;;  %v1274_v5 = vstv %s3483_s29  ;;  %s3547_s22 = sld [smem:[#allocation7 + $0x15]] }
  0xa3   : > { %v1033_v30 = vmul.f32 %v1031_v55, %v3434_v29  ;;  %v1019_v34 = vmul.f32 %v1017_v13, %v3434_v29  ;;  %v1180_v56 = vsel %vm874_vm0, %v1178_v44, %v1179_v61  ;;  %v1212_v11 = vmul.f32 %v1210_v8, %v3382_v52  ;;  %s3551_s29 = sld [smem:[#allocation7 + $0x5b]] }
  0xa4   : > { %891 = vrot.lane.b32.xlu2 %v890_v46, %s2905_s25  ;;  %1022 = vrot.lane.b32.xlu1 %v1018_v22, %s2905_s25  ;;  %v1243_v7 = vrot.slane %v1239_v6, 1  ;;  %v1242_v16 = vrot.slane %v1238_v2, 1  ;;  %v1301_v20 = vstv %s2508_s11  ;;  %v1260_v12 = vstv %s2505_s17  ;;  %s3553_s11 = sld [smem:[#allocation7 + $0x5e]] }
  0xa5   : > { %1004 = vrot.lane.b32.xlu0 %v1000_v26, %s2905_s25  ;;  %v1275_v13 = vmul.f32 %v1274_v5, %v3423_v25  ;;  %v1262_v14 = vmul.f32 %v1260_v12, %v3434_v29  ;;  %v1302_v15 = vmul.f32 %v1301_v20, %v3423_v25  ;;  %v1303_v18 = vmul.f32 %v1301_v20, %v3434_v29  ;;  %s3572_s17 = sld [smem:[#allocation7 + $0x1b]] }
  0xa6   : > { %v1244_v47 = vsel %vm874_vm0, %v1242_v16, %v1243_v7  ;;  %v1261_v22 = vmul.f32 %v1260_v12, %v3423_v25  ;;  %v837_v23 = vstv %s3493_s30  ;;  %v869_v28 = vstv %s2474_s19  ;;  %s3576_s30 = sld [smem:[#allocation7 + $0x5c]] }
  0xa7   : > { %v1307_v46 = vrot.slane %v1303_v18, 1  ;;  %v1306_v21 = vrot.slane %v1302_v15, 1  ;;  %v838_v27 = vmul.f32 %v837_v23, %v3282_v57  ;;  %v871_v36 = vmul.f32 %v869_v28, %v3284_v58  ;;  %s3587_s19 = sld [smem:[#allocation7 + $0x64]] }
  0xa8   : > { %v870_v37 = vmul.f32 %v869_v28, %v3282_v57  ;;  %v1406_v16 = vstv %s3531_s1  ;;  %v1392_v18 = vstv %s3535_s14  ;;  %s3629_s1 = sld [smem:[#allocation7 + $0x2d]] }
  0xa9   : > { %v1308_v26 = vsel %vm874_vm0, %v1306_v21, %v1307_v46  ;;  %v1394_v21 = vmul.f32 %v1392_v18, %v3336_v51  ;;  %s3633_s14 = sld [smem:[#allocation7 + $0x70]] }
  0xaa   : > { %v875_v49 = vrot.slane %v870_v37, 1  ;;  %v1480_v37 = vstv %s3553_s11  ;;  %s3660_s11 = sld [smem:[#allocation7 + $0x36]] }
  0xac   : > { %1002 = vrot.lane.b32.xlu2 %v1001_v43, %s2905_s25  ;;  %1038 = vrot.lane.b32.xlu1 %v1033_v30, %s2904_s21  ;;  %v1342_v43 = vstv %s3503_s20  ;;  %v1276_v30 = vmul.f32 %v1274_v5, %v3434_v29  ;;  %s3598_s20 = sld [smem:[#allocation7 + $0x24]] }
  0xad   : > { %1036 = vrot.lane.b32.xlu0 %v1032_v31, %s2904_s21  ;;  %v1343_v40 = vmul.f32 %v1342_v43, %v3282_v57 }
  0xb4   : > { %1024 = vrot.lane.b32.xlu2 %v1019_v34, %s2905_s25  ;;  %1087 = vrot.lane.b32.xlu1 %v1083_v38, %s2904_s21  ;;  %v1369_v38 = vstv %s2514_s2  ;;  %s3603_s2 = sld [smem:[#allocation7 + $0x6d]] }
  0xb5   : > { %1075 = vrot.lane.b32.xlu0 %v1070_v39, %s2905_s25  ;;  %v1328_v39 = vstv %s3507_s24  ;;  %v1370_v42 = vmul.f32 %v1369_v38, %v3282_v57  ;;  %s3607_s24 = sld [smem:[#allocation7 + $0x65]] }
  0xb6   : > { %v1329_v60 = vmul.f32 %v1328_v39, %v3282_v57 }
  0xbc   : > { %1073 = vrot.lane.b32.xlu2 %v1069_v9, %s2905_s25  ;;  %1119 = vrot.lane.b32.xlu1 %v1115_v4, %s2905_s25  ;;  %v1330_v4 = vmul.f32 %v1328_v39, %v3284_v58  ;;  %v1371_v9 = vmul.f32 %v1369_v38, %v3284_v58  ;;  %v1393_v38 = vmul.f32 %v1392_v18, %v3332_v48 }
  0xbd   : > { %1117 = vrot.lane.b32.xlu0 %v1116_v45, %s2905_s25  ;;  %v876_v45 = vrot.slane %v871_v36, 1 }
  0xbf   : > { %v877_v24 = vsel %vm874_vm0, %v875_v49, %v876_v45  ;;  %v1481_v49 = vmul.f32 %v1480_v37, %v3380_v35 }
  0xc4   : > { %1089 = vrot.lane.b32.xlu2 %v1084_v50, %s2904_s21  ;;  %1151 = vrot.lane.b32.xlu1 %v1147_v54, %s2904_s21  ;;  %v839_v50 = vmul.f32 %v837_v23, %v3284_v58  ;;  %v1375_v54 = vrot.slane %v1371_v9, 1 }
  0xc5   : > { %1139 = vrot.lane.b32.xlu0 %v1134_v59, %s2905_s25  ;;  %v1374_v59 = vrot.slane %v1370_v42, 1 }
  0xc7   : > { %v1376_v0 = vsel %vm874_vm0, %v1374_v59, %v1375_v54 }
  0xcc   : > { %1137 = vrot.lane.b32.xlu2 %v1133_v62, %s2905_s25  ;;  %1183 = vrot.lane.b32.xlu1 %v1179_v61, %s2905_s25  ;;  %v934_v62 = vstv %s2479_s27  ;;  %s2492_s27 = sld [smem:[#allocation7 + $0x27]] }
  0xcd   : > { %1181 = vrot.lane.b32.xlu0 %v1180_v56, %s2905_s25  ;;  %v900_v56 = vstv %s3523_s28  ;;  %v935_v1 = vmul.f32 %v934_v62, %v3332_v48  ;;  %s3616_s28 = sld [smem:[#allocation7 + $0x6e]] }
  0xce   : > { %v902_v2 = vmul.f32 %v900_v56, %v3336_v51  ;;  %v901_v6 = vmul.f32 %v900_v56, %v3332_v48 }
  0xcf   : > { %v939_v12 = vrot.slane %v935_v1, 1  ;;  %v1011_v1 = vstv %s3572_s17  ;;  %s3663_s17 = sld [smem:[#allocation7 + $0x79]] }
  0xd4   : > { %1153 = vrot.lane.b32.xlu2 %v1148_v63, %s2904_s21  ;;  %1215 = vrot.lane.b32.xlu1 %v1211_v32, %s2904_s21  ;;  %v936_v32 = vmul.f32 %v934_v62, %v3336_v51 }
  0xd5   : > { %1203 = vrot.lane.b32.xlu0 %v1198_v3, %s2905_s25 }
  0xdc   : > { %1201 = vrot.lane.b32.xlu2 %v1197_v10, %s2905_s25  ;;  %1247 = vrot.lane.b32.xlu1 %v1243_v7, %s2905_s25 }
  0xdd   : > { %1245 = vrot.lane.b32.xlu0 %v1244_v47, %s2905_s25 }
  0xe3   : > { %v3499_v19 = vpop.permute.xlu2 %925 }
  0xe4   : > { %1217 = vrot.lane.b32.xlu2 %v1212_v11, %s2904_s21  ;;  %1279 = vrot.lane.b32.xlu1 %v1275_v13, %s2904_s21  ;;  %v1344_v11 = vmul.f32 %v1342_v43, %v3284_v58  ;;  %v940_v13 = vrot.slane %v936_v32, 1 }
  0xe5   : > { %1267 = vrot.lane.b32.xlu0 %v1262_v14, %s2905_s25 }
  0xec   : > { %1265 = vrot.lane.b32.xlu2 %v1261_v22, %s2905_s25  ;;  %1311 = vrot.lane.b32.xlu1 %v1307_v46, %s2905_s25  ;;  %v1407_v46 = vmul.f32 %v1406_v16, %v3332_v48  ;;  %v947_v22 = vstv %s3538_s15  ;;  %s3637_s15 = sld [smem:[#allocation7 + $0x76]] }
  0xed   : > { %1309 = vrot.lane.b32.xlu0 %v1308_v26, %s2905_s25  ;;  %v948_v43 = vmul.f32 %v947_v22, %v3380_v35  ;;  %v949_v9 = vmul.f32 %v947_v22, %v3382_v52 }
  0xee   : > { %v3513_v55 = vpop.permute.xlu2 %960  ;;  %v861_v31 = vpop.permute.xlu1 %860 }
  0xef   : > { %v847_v33 = vpop.permute.xlu0 %846 }
  0xf0   : > { %v852_v34 = vadd.f32 %v847_v33, %v838_v27  ;;  %v941_v27 = vsel %vm874_vm0, %v939_v12, %v940_v13  ;;  %v1439_v33 = vstv %s3551_s29  ;;  %s3649_s29 = sld [smem:[#allocation7 + $0x77]] }
  0xf1   : > { %v1441_v42 = vmul.f32 %v1439_v33, %v3382_v52 }
  0xf2   : > { %v866_v41 = vadd.f32 %v861_v31, %v852_v34 }
  0xf4   : > { %1281 = vrot.lane.b32.xlu2 %v1276_v30, %s2904_s21  ;;  %1347 = vrot.lane.b32.xlu1 %v1343_v40, %s2904_s21  ;;  %v880_v8 = vadd.f32 %v877_v24, %v866_v41  ;;  %v981_v30 = vstv %s3547_s22  ;;  %s2497_s22 = sld [smem:[#allocation7 + $0x30]] }
  0xf5   : > { %1335 = vrot.lane.b32.xlu0 %v1330_v4, %s2905_s25  ;;  %v982_v40 = vmul.f32 %v981_v30, %v3380_v35  ;;  %v983_v41 = vmul.f32 %v981_v30, %v3382_v52 }
  0xf6   : > { %v894_v17 = vpop.permute.xlu2 %893  ;;  %v863_v53 = vpop.permute.xlu1 %862 }
  0xf7   : > { %v849_v61 = vpop.permute.xlu0 %848  ;;  %v987_v59 = vrot.slane %v983_v41, 1 }
  0xf8   : > { %v853_v44 = vadd.f32 %v849_v61, %v839_v50  ;;  %v3581_v50 = vmul.f32 %v1480_v37, %v3382_v52  ;;  %v1485_v61 = vrot.slane %v1481_v49, 1  ;;  %v1517_v37 = vstv %s3607_s24  ;;  %s3696_s24 = sld [smem:[#allocation8]] }
  0xfa   : > { %v867_v63 = vadd.f32 %v863_v53, %v853_v44  ;;  %v1486_v44 = vrot.slane %v3581_v50, 1  ;;  %v1518_v50 = vmul.f32 %v1517_v37, %v3423_v25 }
  0xfc   : > { %1333 = vrot.lane.b32.xlu2 %v1329_v60, %s2905_s25  ;;  %v881_v3 = vadd.f32 %v876_v45, %v867_v63  ;;  %1379 = vrot.lane.b32.xlu1 %v1375_v54, %s2905_s25  ;;  %v1440_v45 = vmul.f32 %v1439_v33, %v3380_v35  ;;  %v986_v54 = vrot.slane %v982_v40, 1  ;;  %v1519_v40 = vmul.f32 %v1517_v37, %v3434_v29 }
  0xfd   : > { %1377 = vrot.lane.b32.xlu0 %v1376_v0, %s2905_s25 }
  0xfe   : > { %v892_v7 = vpop.permute.xlu2 %891  ;;  %v914_v47 = vpop.permute.xlu1 %913  ;;  %v898_v5 = vadd.f32 %v894_v17, %v881_v3  ;;  %v988_v63 = vsel %vm874_vm0, %v986_v54, %v987_v59 }
  0xff   : > { %v897_v10 = vadd.f32 %v892_v7, %v880_v8  ;;  %v912_v20 = vpop.permute.xlu0 %911  ;;  %v1408_v8 = vmul.f32 %v1406_v16, %v3336_v51 }
 0x100   : > { %v904_v14 = vadd.f32 %v902_v2, %v898_v5  ;;  %v1453_v2 = vstv %s3576_s30  ;;  %v1503_v5 = vstv %s3587_s19  ;;  %s3667_s30 = sld [smem:[#allocation7 + $0x7f]] }
 0x101   : > { %v903_v15 = vadd.f32 %v901_v6, %v897_v10  ;;  %v1487_v6 = vsel %vm874_vm0, %v1485_v61, %v1486_v44  ;;  %v1455_v7 = vmul.f32 %v1453_v2, %v3382_v52  ;;  %v1504_v22 = vmul.f32 %v1503_v5, %v3423_v25  ;;  %s3669_s19 = sld [smem:[#allocation7 + $0x1e]] }
 0x102   : > { %v918_v23 = vadd.f32 %v914_v47, %v904_v14  ;;  %v1012_v47 = vmul.f32 %v1011_v1, %v3423_v25  ;;  %v1454_v14 = vmul.f32 %v1453_v2, %v3380_v35 }
 0x103   : > { %v917_v26 = vadd.f32 %v912_v20, %v903_v15 }
 0x104   : > { %1349 = vrot.lane.b32.xlu2 %v1344_v11, %s2904_s21  ;;  %1411 = vrot.lane.b32.xlu1 %v1407_v46, %s2904_s21 }
 0x105   : > { %v931_v28 = vadd.f32 %v3499_v19, %v917_v26  ;;  %1399 = vrot.lane.b32.xlu0 %v1394_v21, %s2905_s25  ;;  %v1505_v21 = vmul.f32 %v1503_v5, %v3434_v29  ;;  %v1064_v26 = vstv %s3598_s20  ;;  %s3673_s20 = sld [smem:[#allocation7 + $0x39]] }
 0x106   : > { %v1003_v31 = vpop.permute.xlu2 %1002  ;;  %v959_v34 = vpop.permute.xlu1 %958 }
 0x107   : > { %v944_v36 = vadd.f32 %v941_v27, %v931_v28  ;;  %v928_v39 = vpop.permute.xlu0 %927 }
 0x108   : > { %v932_v4 = vadd.f32 %v928_v39, %v918_v23  ;;  %v1096_v39 = vstv %s2492_s27  ;;  %s3702_s27 = sld [smem:[#allocation7 + $0x3f]] }
 0x109   : > { %v950_v19 = vadd.f32 %v948_v43, %v944_v36  ;;  %v1554_v43 = vstv %s3603_s2  ;;  %s3683_s2 = sld [smem:[#allocation7 + $0x80]] }
 0x10a   : > { %v945_v53 = vadd.f32 %v940_v13, %v932_v4  ;;  %v1013_v13 = vmul.f32 %v1011_v1, %v3434_v29  ;;  %v1098_v4 = vmul.f32 %v1096_v39, %v3284_v58  ;;  %v1618_v1 = vstv %s3637_s15  ;;  %s3715_s15 = sld [smem:[#allocation10 + $0x14]] }
 0x10b   : > { %v964_v17 = vadd.f32 %v959_v34, %v950_v19  ;;  %v1097_v19 = vmul.f32 %v1096_v39, %v3282_v57  ;;  %v1619_v5 = vmul.f32 %v1618_v1, %v3332_v48 }
 0x10c   : > { %1397 = vrot.lane.b32.xlu2 %v1393_v38, %s2905_s25  ;;  %1446 = vrot.lane.b32.xlu1 %v1441_v42, %s2905_s25  ;;  %v951_v60 = vadd.f32 %v949_v9, %v945_v53  ;;  %v1555_v38 = vmul.f32 %v1554_v43, %v3282_v57  ;;  %v1066_v42 = vmul.f32 %v1064_v26, %v3284_v58 }
 0x10d   : > { %1444 = vrot.lane.b32.xlu0 %v1440_v45, %s2905_s25  ;;  %v1568_v45 = vstv %s3616_s28  ;;  %v1101_v54 = vrot.slane %v1097_v19, 1  ;;  %v1659_v19 = vstv %s3663_s17  ;;  %s3705_s28 = sld [smem:[#allocation7 + $0x82]] }
 0x10e   : > { %v1025_v24 = vpop.permute.xlu2 %1024  ;;  %v975_v62 = vpop.permute.xlu1 %974  ;;  %v965_v56 = vadd.f32 %v3513_v55, %v951_v60  ;;  %v1569_v61 = vmul.f32 %v1568_v45, %v3282_v57  ;;  %s3730_s17 = sld [smem:[#allocation10 + $0xc]] }
 0x10f   : > { %v973_v0 = vpop.permute.xlu0 %972 }
 0x110   : > { %v979_v32 = vadd.f32 %v975_v62, %v965_v56  ;;  %v978_v3 = vadd.f32 %v973_v0, %v964_v17  ;;  %v1126_v56 = vstv %s3629_s1  ;;  %s3711_s1 = sld [smem:[#allocation7 + $0x88]] }
 0x111   : > { %v1127_v2 = vmul.f32 %v1126_v56, %v3332_v48 }
 0x112   : > { %v991_v10 = vadd.f32 %v988_v63, %v978_v3  ;;  %v992_v12 = vadd.f32 %v987_v59, %v979_v32  ;;  %v1102_v59 = vrot.slane %v1098_v4, 1 }
 0x114   : > { %1413 = vrot.lane.b32.xlu2 %v1408_v8, %s2904_s21  ;;  %1488 = vrot.lane.b32.xlu1 %v1487_v6, %s2905_s25  ;;  %v1008_v55 = vadd.f32 %v1003_v31, %v991_v10  ;;  %v1065_v31 = vmul.f32 %v1064_v26, %v3282_v57  ;;  %v1103_v62 = vsel %vm874_vm0, %v1101_v54, %v1102_v59  ;;  %v1595_v8 = vstv %s3633_s14  ;;  %s3713_s14 = sld [smem:[#allocation10]] }
 0x115   : > { %1460 = vrot.lane.b32.xlu0 %v1455_v7, %s2904_s21  ;;  %v1556_v6 = vmul.f32 %v1554_v43, %v3284_v58 }
 0x116   : > { %v1074_v16 = vpop.permute.xlu2 %1073  ;;  %v1023_v11 = vpop.permute.xlu1 %1022  ;;  %v1014_v20 = vadd.f32 %v1012_v47, %v1008_v55  ;;  %v1597_v47 = vmul.f32 %v1595_v8, %v3284_v58 }
 0x117   : > { %v1005_v15 = vpop.permute.xlu0 %1004  ;;  %v1079_v41 = vadd.f32 %v1074_v16, %v1065_v31  ;;  %v1596_v16 = vmul.f32 %v1595_v8, %v3282_v57 }
 0x118   : > { %v1028_v18 = vadd.f32 %v1023_v11, %v1014_v20  ;;  %v1009_v46 = vadd.f32 %v1005_v15, %v992_v12  ;;  %v1160_v11 = vstv %s2497_s22  ;;  %v1128_v12 = vmul.f32 %v1126_v56, %v3336_v51  ;;  %s3719_s22 = sld [smem:[#allocation7 + $0x42]] }
 0x119   : > { %v1162_v15 = vmul.f32 %v1160_v11, %v3336_v51 }
 0x11a   : > { %v1015_v23 = vadd.f32 %v1013_v13, %v1009_v46  ;;  %v1601_v13 = vrot.slane %v1597_v47, 1 }
 0x11c   : > { %1458 = vrot.lane.b32.xlu2 %v1454_v14, %s2904_s21  ;;  %1510 = vrot.lane.b32.xlu1 %v1505_v21, %s2905_s25  ;;  %v1029_v27 = vadd.f32 %v1025_v24, %v1015_v23  ;;  %v1570_v24 = vmul.f32 %v1568_v45, %v3284_v58  ;;  %v1161_v14 = vmul.f32 %v1160_v11, %v3332_v48 }
 0x11d   : > { %1508 = vrot.lane.b32.xlu0 %v1504_v22, %s2905_s25  ;;  %v1632_v22 = vstv %s3649_s29  ;;  %s3722_s29 = sld [smem:[#allocation10 + $0x4]] }
 0x11e   : > { %v1090_v28 = vpop.permute.xlu2 %1089  ;;  %v1039_v30 = vpop.permute.xlu1 %1038  ;;  %v1165_v43 = vrot.slane %v1161_v14, 1  ;;  %v1634_v37 = vmul.f32 %v1632_v22, %v3336_v51 }
 0x11f   : > { %v3619_v33 = vadd.f32 %v1039_v30, %v1029_v27  ;;  %v1037_v34 = vpop.permute.xlu0 %1036  ;;  %v1166_v30 = vrot.slane %v1162_v15, 1 }
 0x120   : > { %v3621_v36 = vadd.f32 %v1037_v34, %v1028_v18  ;;  %v1600_v18 = vrot.slane %v1596_v16, 1 }
 0x122   : > { %v1602_v31 = vsel %vm874_vm0, %v1600_v18, %v1601_v13 }
 0x124   : > { %1490 = vrot.lane.b32.xlu2 %v1486_v44, %s2905_s25  ;;  %1559 = vrot.lane.b32.xlu1 %v1555_v38, %s2905_s25  ;;  %v1633_v38 = vmul.f32 %v1632_v22, %v3332_v48 }
 0x125   : > { %1524 = vrot.lane.b32.xlu0 %v1519_v40, %s2904_s21  ;;  %v1167_v40 = vsel %vm874_vm0, %v1165_v43, %v1166_v30 }
 0x126   : > { %v1138_v9 = vpop.permute.xlu2 %1137  ;;  %v1088_v49 = vpop.permute.xlu1 %1087 }
 0x127   : > { %v1093_v17 = vadd.f32 %v1088_v49, %v1079_v41  ;;  %v1076_v53 = vpop.permute.xlu0 %1075  ;;  %v1190_v41 = vstv %s3660_s11  ;;  %s3725_s11 = sld [smem:[#allocation10 + $0x18]] }
 0x128   : > { %v1080_v60 = vadd.f32 %v1076_v53, %v1066_v42  ;;  %v1620_v53 = vmul.f32 %v1618_v1, %v3336_v51 }
 0x129   : > { %v1106_v3 = vadd.f32 %v1103_v62, %v1093_v17  ;;  %v1045_v17 = vstv %s3669_s19  ;;  %v1224_v62 = vstv %s3673_s20  ;;  %s3734_s19 = sld [smem:[#allocation10 + $0x8]] }
 0x12a   : > { %v1094_v44 = vadd.f32 %v1090_v28, %v1080_v60  ;;  %v1661_v60 = vmul.f32 %v1659_v19, %v3336_v51  ;;  %v1046_v56 = vmul.f32 %v1045_v17, %v3423_v25  ;;  %v1047_v8 = vmul.f32 %v1045_v17, %v3434_v29  ;;  %s3740_s20 = sld [smem:[#allocation7 + $0x89]] }
 0x12c   : > { %1522 = vrot.lane.b32.xlu2 %v1518_v50, %s2904_s21  ;;  %1575 = vrot.lane.b32.xlu1 %v1570_v24, %s2904_s21  ;;  %v1107_v0 = vadd.f32 %v1102_v59, %v1094_v44  ;;  %v1191_v50 = vmul.f32 %v1190_v41, %v3380_v35  ;;  %v1665_v1 = vrot.slane %v1661_v60, 1  ;;  %v1050_v47 = vrot.slane %v1046_v56, 1 }
 0x12d   : > { %1573 = vrot.lane.b32.xlu0 %v1569_v61, %s2904_s21  ;;  %v1660_v61 = vmul.f32 %v1659_v19, %v3332_v48  ;;  %v1853_v56 = vstv %s3722_s29  ;;  %s3806_s29 = sld [smem:[#allocation10 + $0x15]] }
 0x12e   : > { %v1154_v63 = vpop.permute.xlu2 %1153  ;;  %v1120_v32 = vpop.permute.xlu1 %1119 }
 0x12f   : > { %v1124_v7 = vadd.f32 %v1120_v32, %v1107_v0  ;;  %v1118_v10 = vpop.permute.xlu0 %1117  ;;  %v1192_v0 = vmul.f32 %v1190_v41, %v3382_v52  ;;  %v1225_v32 = vmul.f32 %v1224_v62, %v3380_v35 }
 0x130   : > { %v1123_v55 = vadd.f32 %v1118_v10, %v1106_v3  ;;  %v1226_v3 = vmul.f32 %v1224_v62, %v3382_v52  ;;  %v1696_v10 = vstv %s3683_s2  ;;  %s3744_s2 = sld [smem:[#allocation10 + $0x10]]  ;;  %v2021_v62 = vstv %s3715_s15 }
 0x131   : > { %v1130_v26 = vadd.f32 %v1128_v12, %v1124_v7  ;;  %v1229_v12 = vrot.slane %v1225_v32, 1  ;;  %v1698_v18 = vmul.f32 %v1696_v10, %v3382_v52  ;;  %v2063_v32 = vstv %s3725_s11  ;;  %s3899_s15 = sld [smem:[#allocation10 + $0x1d]] }
 0x132   : > { %v1129_v20 = vadd.f32 %v1127_v2, %v1123_v55  ;;  %v1664_v2 = vrot.slane %v1660_v61, 1  ;;  %v1051_v55 = vrot.slane %v1047_v8, 1  ;;  %s3968_s11 = sld [smem:[#allocation7 + $0x5a]] }
 0x134   : > { %1561 = vrot.lane.b32.xlu2 %v1556_v6, %s2905_s25  ;;  %1623 = vrot.lane.b32.xlu1 %v1619_v5, %s2905_s25  ;;  %v1143_v46 = vadd.f32 %v1138_v9, %v1129_v20  ;;  %v1682_v9 = vstv %s3667_s30  ;;  %v1666_v14 = vsel %vm874_vm0, %v1664_v2, %v1665_v1  ;;  %s3764_s30 = sld [smem:[#allocation7 + $0x48]] }
 0x135   : > { %1605 = vrot.lane.b32.xlu0 %v1601_v13, %s2905_s25  ;;  %v1683_v44 = vmul.f32 %v1682_v9, %v3380_v35  ;;  %v1230_v13 = vrot.slane %v1226_v3, 1 }
 0x136   : > { %v1202_v21 = vpop.permute.xlu2 %1201  ;;  %v1152_v23 = vpop.permute.xlu1 %1151 }
 0x137   : > { %v1157_v27 = vadd.f32 %v1152_v23, %v1143_v46  ;;  %v1140_v28 = vpop.permute.xlu0 %1139  ;;  %v1697_v46 = vmul.f32 %v1696_v10, %v3380_v35  ;;  %v1231_v23 = vsel %vm874_vm0, %v1229_v12, %v1230_v13  ;;  %v1979_v10 = vstv %s3744_s2  ;;  %s3851_s2 = sld [smem:[#allocation10 + $0x9]] }
 0x138   : > { %v1144_v34 = vadd.f32 %v1140_v28, %v1130_v26  ;;  %v1254_v26 = vstv %s3702_s27  ;;  %v1056_v28 = vadd.f32 %v1051_v55, %v3619_v33  ;;  %v1684_v33 = vmul.f32 %v1682_v9, %v3382_v52  ;;  %s3750_s27 = sld [smem:[#allocation7 + $0x8b]] }
 0x139   : > { %v1170_v49 = vadd.f32 %v1167_v40, %v1157_v27  ;;  %v1723_v27 = vstv %s3705_s28  ;;  %v1255_v40 = vmul.f32 %v1254_v26, %v3423_v25  ;;  %s3778_s28 = sld [smem:[#allocation7 + $0x4b]] }
 0x13a   : > { %v1158_v39 = vadd.f32 %v1154_v63, %v1144_v34  ;;  %v1746_v34 = vstv %s3711_s1  ;;  %v1725_v19 = vmul.f32 %v1723_v27, %v3382_v52  ;;  %s3879_s1 = sld [smem:[#allocation7 + $0x54]] }
 0x13c   : > { %1603 = vrot.lane.b32.xlu2 %v1602_v31, %s2905_s25  ;;  %1639 = vrot.lane.b32.xlu1 %v1634_v37, %s2904_s21  ;;  %v1171_v42 = vadd.f32 %v1166_v30, %v1158_v39  ;;  %v1058_v37 = vstv %s3696_s24  ;;  %s3757_s24 = sld [smem:[#allocation10 + $0x1c]] }
 0x13d   : > { %1637 = vrot.lane.b32.xlu0 %v1633_v38, %s2904_s21 }
 0x13e   : > { %v1218_v4 = vpop.permute.xlu2 %1217  ;;  %v1184_v45 = vpop.permute.xlu1 %1183 }
 0x13f   : > { %v1188_v54 = vadd.f32 %v1184_v45, %v1171_v42  ;;  %v1182_v59 = vpop.permute.xlu0 %1181  ;;  %v1724_v42 = vmul.f32 %v1723_v27, %v3380_v35  ;;  %v1747_v45 = vmul.f32 %v1746_v34, %v3423_v25 }
 0x140   : > { %v1187_v24 = vadd.f32 %v1182_v59, %v1170_v49  ;;  %v1288_v49 = vstv %s3719_s22  ;;  %s3791_s22 = sld [smem:[#allocation10 + $0x1]] }
 0x141   : > { %v1194_v5 = vadd.f32 %v1192_v0, %v1188_v54  ;;  %v1729_v54 = vrot.slane %v1725_v19, 1  ;;  %v1289_v59 = vmul.f32 %v1288_v49, %v3423_v25  ;;  %v1290_v60 = vmul.f32 %v1288_v49, %v3434_v29 }
 0x142   : > { %v1193_v63 = vadd.f32 %v1191_v50, %v1187_v24  ;;  %v1060_v50 = vadd.f32 %v1058_v37, %v1056_v28  ;;  %v1810_v24 = vstv %s3713_s14  ;;  %v1728_v61 = vrot.slane %v1724_v42, 1  ;;  %s3781_s14 = sld [smem:[#allocation8 + $0x1]] }
 0x144   : > { %1625 = vrot.lane.b32.xlu2 %v1620_v53, %s2905_s25  ;;  %1687 = vrot.lane.b32.xlu1 %v1683_v44, %s2905_s25  ;;  %v1207_v6 = vadd.f32 %v1202_v21, %v1193_v63  ;;  %v1052_v21 = vsel %vm874_vm0, %v1050_v47, %v1051_v55  ;;  %v1256_v53 = vmul.f32 %v1254_v26, %v3434_v29  ;;  %v3770_v8 = vmax.f32 %v1060_v50, 0.0 }
 0x145   : > { %1669 = vrot.lane.b32.xlu0 %v1665_v1, %s2905_s25  ;;  %v1055_v43 = vadd.f32 %v1052_v21, %v3621_v36  ;;  %v1760_v1 = vstv %s3740_s20  ;;  %s3848_s20 = sld [smem:[#allocation10 + $0xd]] }
 0x146   : > { %v3707_v7 = vpop.permute.xlu2 %1265  ;;  %v1216_v16 = vpop.permute.xlu1 %1215  ;;  %v3809_v27 = vmul.f32 %v1853_v56, %v3770_v8 }
 0x147   : > { %v1221_v11 = vadd.f32 %v1216_v16, %v1207_v6  ;;  %v1204_v20 = vpop.permute.xlu0 %1203  ;;  %v1059_v9 = vadd.f32 %v1058_v37, %v1055_v43  ;;  %v1937_v6 = vstv %s3730_s17  ;;  %v1293_v16 = vrot.slane %v1289_v59, 1  ;;  %s3813_s17 = sld [smem:[#allocation10 + $0x5]] }
 0x148   : > { %v1208_v15 = vadd.f32 %v1204_v20, %v1194_v5  ;;  %v1294_v5 = vrot.slane %v1290_v60, 1  ;;  %v1730_v20 = vsel %vm874_vm0, %v1728_v61, %v1729_v54  ;;  %v1324_v37 = vstv %s3764_s30  ;;  %s3973_s30 = sld [smem:[#allocation7 + $0x5d]] }
 0x149   : > { %v1234_v39 = vadd.f32 %v1231_v23, %v1221_v11  ;;  %v3772_v63 = vmax.f32 %v1059_v9, 0.0  ;;  %v1787_v11 = vstv %s3750_s27  ;;  %v1318_v49 = vstv %s3781_s14  ;;  %s3863_s27 = sld [smem:[#allocation7 + $0x51]] }
 0x14a   : > { %v1222_v22 = vadd.f32 %v1218_v4, %v1208_v15  ;;  %v1761_v15 = vmul.f32 %v1760_v1, %v3423_v25  ;;  %v1788_v23 = vmul.f32 %v1787_v11, %v3423_v25  ;;  %v1789_v26 = vmul.f32 %v1787_v11, %v3434_v29  ;;  %s4058_s14 = sld [smem:[#allocation7 + $0x6c]] }
 0x14b   : > { %v3802_v21 = vmul.f32 %v2021_v62, %v3772_v63  ;;  %v1295_v28 = vsel %vm874_vm0, %v1293_v16, %v1294_v5  ;;  %v3816_v43 = vmul.f32 %v1853_v56, %v3772_v63  ;;  %v1748_v59 = vmul.f32 %v1746_v34, %v3434_v29 }
 0x14c   : > { %1667 = vrot.lane.b32.xlu2 %v1666_v14, %s2905_s25  ;;  %1703 = vrot.lane.b32.xlu1 %v1698_v18, %s2904_s21  ;;  %v1235_v31 = vadd.f32 %v1230_v13, %v1222_v22  ;;  %v1762_v13 = vmul.f32 %v1760_v1, %v3434_v29  ;;  %v2105_v14 = vstv %s3757_s24  ;;  %v3794_v18 = vmul.f32 %v1810_v24, %v3772_v63  ;;  %s4040_s24 = sld [smem:[#allocation7 + $0x66]] }
 0x14d   : > { %1701 = vrot.lane.b32.xlu0 %v1697_v46, %s2904_s21  ;;  %v3797_v46 = vmul.f32 %v1810_v24, %v3770_v8  ;;  %v3860_v61 = vmul.f32 %v1979_v10, %v3770_v8  ;;  %v3866_v1 = vmul.f32 %v1979_v10, %v3772_v63  ;;  %v3871_v34 = vmul.f32 %v2063_v32, %v3772_v63 }
 0x14e   : > { %v1282_v30 = vpop.permute.xlu2 %1281  ;;  %v1248_v38 = vpop.permute.xlu1 %1247  ;;  %v2025_v11 = vstv %s3806_s29  ;;  %s4066_s29 = sld [smem:[#allocation10 + $0x2]] }
 0x14f   : > { %v1252_v36 = vadd.f32 %v1248_v38, %v1235_v31  ;;  %v1246_v41 = vpop.permute.xlu0 %1245  ;;  %v3824_v31 = vmul.f32 %v1937_v6, %v3772_v63  ;;  %v3831_v38 = vmul.f32 %v1937_v6, %v3770_v8 }
 0x150   : > { %v1251_v4 = vadd.f32 %v1246_v41, %v1234_v39  ;;  %v2716_v41 = vld [vmem:[%s3082_s23] sm:$0xff] }
 0x151   : > { %v1258_v2 = vadd.f32 %v1256_v53, %v1252_v36  ;;  %v1837_v19 = vrot.slane %v2716_v41, 1  ;;  %v1793_v53 = vrot.slane %v1789_v26, 1 }
 0x152   : > { %v1257_v17 = vadd.f32 %v1255_v40, %v1251_v4  ;;  %v3844_v4 = vld [vmem:[%s3082_s23 + $0x8] sm:$0x3f] }
 0x153   : > { %v1838_v42 = vrot.slane %v3844_v4, 1 }
 0x154   : > { %1689 = vrot.lane.b32.xlu2 %v1684_v33, %s2905_s25  ;;  %1751 = vrot.lane.b32.xlu1 %v1747_v45, %s2905_s25  ;;  %v1271_v44 = vadd.f32 %v3707_v7, %v1257_v17  ;;  %v1895_v7 = vstv %s3734_s19  ;;  %s3828_s19 = sld [smem:[#allocation10 + $0x19]]  ;;  %v1356_v45 = vstv %s3778_s28  ;;  %v1792_v17 = vrot.slane %v1788_v23, 1 }
 0x155   : > { %1733 = vrot.lane.b32.xlu0 %v1729_v54, %s2905_s25  ;;  %v3834_v39 = vmul.f32 %v1895_v7, %v3770_v8  ;;  %v3837_v40 = vmul.f32 %v1895_v7, %v3772_v63  ;;  %v1325_v54 = vmul.f32 %v1324_v37, %v3282_v57  ;;  %v1357_v56 = vmul.f32 %v1356_v45, %v3282_v57  ;;  %v2719_v23 = vld [vmem:[%s3082_s23 + $0x10] sm:$0xff]  ;;  %s4042_s28 = sld [smem:[#allocation7 + $0x63]] }
 0x156   : > { %v3774_v0 = vpop.permute.xlu2 %1333  ;;  %v1280_v3 = vpop.permute.xlu1 %1279  ;;  %v3877_v6 = vmul.f32 %v1356_v45, %v3284_v58  ;;  %v3884_v7 = vmul.f32 %v2021_v62, %v3770_v8  ;;  %v1880_v26 = vrot.slane %v2719_v23, 1 }
 0x157   : > { %v1285_v47 = vadd.f32 %v1280_v3, %v1271_v44  ;;  %v1268_v55 = vpop.permute.xlu0 %1267  ;;  %v1339_v16 = vadd.f32 %v3774_v0, %v1325_v54  ;;  %v2718_v0 = vld [vmem:[%s3082_s23 + $0x18] sm:$0x3f]  ;;  %v1899_v54 = vstv %s3851_s2  ;;  %s4082_s2 = sld [smem:[#allocation10 + $0xe]] }
 0x158   : > { %v1272_v12 = vadd.f32 %v1268_v55, %v1258_v2  ;;  %v1839_v2 = vsel %vm874_vm0, %v1837_v19, %v1838_v42  ;;  %v3891_v55 = vmul.f32 %v2105_v14, %v3770_v8 }
 0x159   : > { %v1298_v9 = vadd.f32 %v1295_v28, %v1285_v47  ;;  %v1794_v47 = vsel %vm874_vm0, %v1792_v17, %v1793_v53  ;;  %v1362_v28 = vrot.slane %v3877_v6, 1 }
 0x15a   : > { %v1286_v22 = vadd.f32 %v1282_v30, %v1272_v12  ;;  %v3821_v30 = vmul.f32 %v2063_v32, %v3770_v8  ;;  %v1814_v32 = vstv %s3791_s22  ;;  %v1326_v8 = vmul.f32 %v1324_v37, %v3284_v58  ;;  %s4062_s22 = sld [smem:[#allocation8 + $0x2]] }
 0x15b   : > { %v1361_v12 = vrot.slane %v1357_v56, 1 }
 0x15c   : > { %1731 = vrot.lane.b32.xlu2 %v1730_v20, %s2905_s25  ;;  %1767 = vrot.lane.b32.xlu1 %v1762_v13, %s2904_s21  ;;  %v1299_v36 = vadd.f32 %v1294_v5, %v1286_v22  ;;  %v1857_v20 = vstv %s3813_s17  ;;  %v2067_v13 = vstv %s3828_s19  ;;  %v1881_v22 = vrot.slane %v2718_v0, 1  ;;  %s4074_s17 = sld [smem:[#allocation10 + $0x16]] }
 0x15d   : > { %1765 = vrot.lane.b32.xlu0 %v1761_v15, %s2904_s21  ;;  %s3857_s21 = sld [smem:[#allocation10 + $0x11]]  ;;  %v3951_v0 = vld [vmem:[%s3082_s23 + $0x38] sm:$0x3f] }
 0x15e   : > { %v3839_v33 = vpop.permute.xlu2 %1349  ;;  %v1312_v50 = vpop.permute.xlu1 %1311  ;;  %v1882_v56 = vsel %vm874_vm0, %v1880_v26, %v1881_v22  ;;  %s4077_s19 = sld [smem:[#allocation10 + $0x6]] }
 0x15f   : > { %v1316_v60 = vadd.f32 %v1312_v50, %v1299_v36  ;;  %v1310_v24 = vpop.permute.xlu0 %1309 }
 0x160   : > { %v1315_v44 = vadd.f32 %v1310_v24, %v1298_v9 }
 0x161   : > { %v1320_v3 = vadd.f32 %v1318_v49, %v1316_v60  ;;  %v1386_v60 = vstv %s3863_s27  ;;  %s4086_s27 = sld [smem:[#allocation10 + $0x12]] }
 0x162   : > { %v1319_v10 = vadd.f32 %v1318_v49, %v1315_v44  ;;  %v1941_v49 = vstv %s3848_s20  ;;  %s4080_s20 = sld [smem:[#allocation10 + $0x1a]] }
 0x163   : > { %v3895_v5 = vmax.f32 %v1320_v3, 0.0  ;;  %v1420_v3 = vstv %s3879_s1  ;;  %s4089_s1 = sld [smem:[#allocation10 + $0x1e]] }
 0x164   : > { %1753 = vrot.lane.b32.xlu2 %v1748_v59, %s2905_s25  ;;  %v3901_v62 = vmax.f32 %v1319_v10, 0.0  ;;  %1840 = vrot.lane.b32.xlu1 %v1839_v2, %s2905_s25  ;;  %v1983_v2 = vstv %s3857_s21  ;;  %v1421_v23 = vmul.f32 %v1420_v3, %v3332_v48  ;;  %v3956_v26 = vmul.f32 %v1420_v3, %v3336_v51  ;;  %s4084_s21 = sld [smem:[#allocation10 + $0xa]] }
 0x165   : > { %1797 = vrot.lane.b32.xlu0 %v1793_v53, %s2905_s25  ;;  %v1816_v36 = vmul.f32 %v1814_v32, %v3895_v5  ;;  %v1859_v45 = vmul.f32 %v1857_v20, %v3895_v5 }
 0x166   : > { %v3906_v15 = vpop.permute.xlu2 %1397  ;;  %v1348_v41 = vpop.permute.xlu1 %1347  ;;  %v1815_v37 = vmul.f32 %v1814_v32, %v3901_v62  ;;  %v2026_v19 = vmul.f32 %v2025_v11, %v3901_v62  ;;  %v1858_v53 = vmul.f32 %v1857_v20, %v3901_v62  ;;  %v1942_v32 = vmul.f32 %v1941_v49, %v3901_v62 }
 0x167   : > { %v1353_v50 = vadd.f32 %v1348_v41, %v1339_v16  ;;  %v1336_v9 = vpop.permute.xlu0 %1335  ;;  %v3920_v17 = vadd.f32 %v1816_v36, %v3797_v46  ;;  %v3934_v46 = vadd.f32 %v1859_v45, %v3809_v27  ;;  %v1387_v16 = vmul.f32 %v1386_v60, %v3332_v48 }
 0x168   : > { %v1340_v59 = vadd.f32 %v1336_v9, %v1326_v8  ;;  %v3926_v24 = vadd.f32 %v1815_v37, %v3794_v18  ;;  %v3929_v44 = vadd.f32 %v2026_v19, %v3802_v21  ;;  %v3939_v10 = vadd.f32 %v1858_v53, %v3816_v43  ;;  %v2720_v8 = vld [vmem:[%s3082_s23 + $0x30] sm:$0xff] }
 0x169   : > { %v2069_v18 = vmul.f32 %v2067_v13, %v3895_v5  ;;  %v1363_v21 = vsel %vm874_vm0, %v1361_v12, %v1362_v28  ;;  %v1943_v20 = vmul.f32 %v1941_v49, %v3895_v5  ;;  %v2109_v27 = vstv %s3899_s15  ;;  %s4116_s15 = sld [smem:[#allocation7 + $0x78]] }
 0x16a   : > { %v1354_v6 = vadd.f32 %v3839_v33, %v1340_v59  ;;  %v1964_v33 = vrot.slane %v2720_v8, 1  ;;  %v1965_v43 = vrot.slane %v3951_v0, 1  ;;  %v1366_v19 = vadd.f32 %v1363_v21, %v1353_v50 }
 0x16b   : > { %v3960_v36 = vadd.f32 %v2069_v18, %v3821_v30  ;;  %v3966_v41 = vadd.f32 %v1943_v20, %v3831_v38  ;;  %v1900_v45 = vmul.f32 %v1899_v54, %v3901_v62  ;;  %v1901_v49 = vmul.f32 %v1899_v54, %v3895_v5 }
 0x16c   : > { %1795 = vrot.lane.b32.xlu2 %v1794_v47, %s2905_s25  ;;  %1885 = vrot.lane.b32.xlu1 %v1881_v22, %s2905_s25  ;;  %v1367_v12 = vadd.f32 %v1362_v28, %v1354_v6  ;;  %v3963_v22 = vadd.f32 %v1942_v32, %v3824_v31  ;;  %v1985_v28 = vmul.f32 %v1983_v2, %v3895_v5  ;;  %v1425_v18 = vrot.slane %v1421_v23, 1 }
 0x16d   : > { %1883 = vrot.lane.b32.xlu0 %v1882_v56, %s2905_s25  ;;  %v1984_v31 = vmul.f32 %v1983_v2, %v3901_v62  ;;  %v2068_v38 = vmul.f32 %v2067_v13, %v3901_v62  ;;  %v2027_v50 = vmul.f32 %v2025_v11, %v3895_v5  ;;  %v3981_v59 = vadd.f32 %v1901_v49, %v3834_v39 }
 0x16e   : > { %v1414_v47 = vpop.permute.xlu2 %1413  ;;  %v1380_v37 = vpop.permute.xlu1 %1379  ;;  %v3984_v54 = vadd.f32 %v1900_v45, %v3837_v40  ;;  %v3987_v56 = vadd.f32 %v1985_v28, %v3860_v61  ;;  %v1966_v3 = vsel %vm874_vm0, %v1964_v33, %v1965_v43  ;;  %v2106_v39 = vmul.f32 %v2105_v14, %v3772_v63  ;;  %v2723_v14 = vld [vmem:[%s3082_s23 + $0x20] sm:$0xff] }
 0x16f   : > { %v1384_v9 = vadd.f32 %v1380_v37, %v1367_v12  ;;  %v1378_v30 = vpop.permute.xlu0 %1377  ;;  %v3993_v13 = vadd.f32 %v1984_v31, %v3866_v1  ;;  %v3996_v11 = vadd.f32 %v2068_v38, %v3871_v34  ;;  %v1388_v40 = vmul.f32 %v1386_v60, %v3336_v51  ;;  %v2722_v1 = vld [vmem:[%s3082_s23 + $0x28] sm:$0x3f] }
 0x170   : > { %v1383_v53 = vadd.f32 %v1378_v30, %v1366_v19  ;;  %v4003_v61 = vadd.f32 %v2027_v50, %v3884_v7  ;;  %v2111_v6 = vmul.f32 %v2109_v27, %v3895_v5  ;;  %v1923_v34 = vrot.slane %v2722_v1, 1 }
 0x171   : > { %v1426_v32 = vrot.slane %v3956_v26, 1  ;;  %v2110_v63 = vmul.f32 %v2109_v27, %v3901_v62  ;;  %v1922_v60 = vrot.slane %v2723_v14, 1  ;;  %v1390_v27 = vadd.f32 %v1388_v40, %v1384_v9 }
 0x172   : > { %v1389_v2 = vadd.f32 %v1387_v16, %v1383_v53  ;;  %v4016_v5 = vadd.f32 %v2111_v6, %v3891_v55  ;;  %v2725_v16 = vld [vmem:[%s3082_s23 + $0x40] sm:$0xff]  ;;  %v1433_v33 = vstv %s3968_s11  ;;  %s2539_s11 = sld [smem:[#allocation7 + $0x7e]] }
 0x173   : > { %v2006_v20 = vrot.slane %v2725_v16, 1  ;;  %v4021_v8 = vadd.f32 %v2110_v63, %v2106_v39  ;;  %v1427_v23 = vsel %vm874_vm0, %v1425_v18, %v1426_v32  ;;  %v1924_v55 = vsel %vm874_vm0, %v1922_v60, %v1923_v34  ;;  %v2726_v53 = vld [vmem:[%s3082_s23 + $0x60] sm:$0xff]  ;;  %v4037_v39 = vld [vmem:[%s3082_s23 + $0x68] sm:$0x3f]  ;;  %v2729_v16 = vld [vmem:[%s3082_s23 + $0x50] sm:$0xff] }
 0x174   : > { %1842 = vrot.lane.b32.xlu2 %v1838_v42, %s2905_s25  ;;  %1967 = vrot.lane.b32.xlu1 %v1966_v3, %s2905_s25  ;;  %v1403_v7 = vadd.f32 %v3906_v15, %v1389_v2  ;;  %v2724_v42 = vld [vmem:[%s3082_s23 + $0x48] sm:$0x3f]  ;;  %v1467_v15 = vstv %s3973_s30  ;;  %v1435_v45 = vmul.f32 %v1433_v33, %v3382_v52  ;;  %v1434_v49 = vmul.f32 %v1433_v33, %v3380_v35  ;;  %s2542_s30 = sld [smem:[#allocation7 + $0x81]] }
 0x175   : > { %1927 = vrot.lane.b32.xlu0 %v1923_v34, %s2905_s25  ;;  %v2007_v21 = vrot.slane %v2724_v42, 1  ;;  %v1468_v9 = vmul.f32 %v1467_v15, %v3380_v35  ;;  %v1469_v31 = vmul.f32 %v1467_v15, %v3382_v52  ;;  %v2090_v3 = vrot.slane %v2726_v53, 1  ;;  %v2728_v42 = vld [vmem:[%s3082_s23 + $0x58] sm:$0x3f] }
 0x176   : > { %v1459_v4 = vpop.permute.xlu2 %1458  ;;  %v1412_v62 = vpop.permute.xlu1 %1411  ;;  %v2091_v2 = vrot.slane %v4037_v39, 1  ;;  %v1531_v15 = vstv %s4040_s24  ;;  %s2544_s24 = sld [smem:[#allocation7 + $0x87]] }
 0x177   : > { %v1417_v26 = vadd.f32 %v1412_v62, %v1403_v7  ;;  %v1400_v12 = vpop.permute.xlu0 %1399  ;;  %v2008_v19 = vsel %vm874_vm0, %v2006_v20, %v2007_v21  ;;  %v1472_v1 = vrot.slane %v1468_v9, 1  ;;  %v1473_v34 = vrot.slane %v1469_v31, 1 }
 0x178   : > { %v1404_v37 = vadd.f32 %v1400_v12, %v1390_v27  ;;  %v2092_v14 = vsel %vm874_vm0, %v2090_v3, %v2091_v2  ;;  %v2048_v20 = vrot.slane %v2729_v16, 1 }
 0x179   : > { %v1430_v28 = vadd.f32 %v1427_v23, %v1417_v26  ;;  %v1474_v7 = vsel %vm874_vm0, %v1472_v1, %v1473_v34  ;;  %v2731_v26 = vld [vmem:[%s3082_s23 + $0x70] sm:$0xff] }
 0x17a   : > { %v1418_v30 = vadd.f32 %v1414_v47, %v1404_v37  ;;  %v2132_v12 = vrot.slane %v2731_v26, 1  ;;  %v1947_v26 = vstv %s4082_s2  ;;  %s4201_s2 = sld [smem:[#allocation11 + $0x5]] }
 0x17b   : > { %v1436_v6 = vadd.f32 %v1434_v49, %v1430_v28  ;;  %v1533_v49 = vmul.f32 %v1531_v15, %v3434_v29 }
 0x17c   : > { %1925 = vrot.lane.b32.xlu2 %v1924_v55, %s2905_s25  ;;  %2011 = vrot.lane.b32.xlu1 %v2007_v21, %s2905_s25  ;;  %v1431_v38 = vadd.f32 %v1426_v32, %v1418_v30  ;;  %v2049_v21 = vrot.slane %v2728_v42, 1  ;;  %v1497_v55 = vstv %s4042_s28  ;;  %v1550_v42 = vstv %s4058_s14  ;;  %s2547_s28 = sld [smem:[#allocation7 + $0x8a]] }
 0x17d   : > { %2009 = vrot.lane.b32.xlu0 %v2008_v19, %s2905_s25  ;;  %v1499_v9 = vmul.f32 %v1497_v55, %v3434_v29  ;;  %v1498_v31 = vmul.f32 %v1497_v55, %v3423_v25  ;;  %v1551_v55 = vmul.f32 %v1550_v42, %v3282_v57  ;;  %s4184_s14 = sld [smem:[#allocation8 + $0x3]] }
 0x17e   : > { %v1491_v50 = vpop.permute.xlu2 %1490  ;;  %v1447_v47 = vpop.permute.xlu1 %1446  ;;  %v1437_v40 = vadd.f32 %v1435_v45, %v1431_v38  ;;  %v2050_v37 = vsel %vm874_vm0, %v2048_v20, %v2049_v21  ;;  %v1532_v45 = vmul.f32 %v1531_v15, %v3423_v25  ;;  %v1552_v20 = vmul.f32 %v1550_v42, %v3284_v58 }
 0x17f   : > { %v1445_v18 = vpop.permute.xlu0 %1444 }
 0x180   : > { %v1451_v32 = vadd.f32 %v1447_v47, %v1437_v40  ;;  %v1450_v63 = vadd.f32 %v1445_v18, %v1436_v6  ;;  %v1536_v3 = vrot.slane %v1532_v45, 1  ;;  %v1537_v47 = vrot.slane %v1533_v49, 1 }
 0x181   : > { %v2115_v45 = vstv %s4089_s1  ;;  %s4208_s1 = sld [smem:[#allocation10 + $0x13]] }
 0x182   : > { %v1464_v60 = vadd.f32 %v1459_v4, %v1450_v63  ;;  %v2730_v4 = vld [vmem:[%s3082_s23 + $0x78] sm:$0x3f]  ;;  %s4071_s23 = sld [smem:[#allocation7 + $0x6f]] }
 0x183   : > { %v2133_v23 = vrot.slane %v2730_v4, 1  ;;  %v2031_v4 = vstv %s4074_s17  ;;  %s4195_s17 = sld [smem:[#allocation10 + $0xf]] }
 0x184   : > { %1969 = vrot.lane.b32.xlu2 %v1965_v43, %s2905_s25  ;;  %2093 = vrot.lane.b32.xlu1 %v2092_v14, %s2905_s25  ;;  %v1477_v27 = vadd.f32 %v1474_v7, %v1464_v60  ;;  %v1544_v60 = vstv %s4062_s22  ;;  %s4186_s22 = sld [smem:[#allocation10 + $0x3]] }
 0x185   : > { %2053 = vrot.lane.b32.xlu0 %v2049_v21, %s2905_s25  ;;  %v2134_v30 = vsel %vm874_vm0, %v2132_v12, %v2133_v23 }
 0x186   : > { %v1523_v62 = vpop.permute.xlu2 %1522  ;;  %v1489_v33 = vpop.permute.xlu1 %1488 }
 0x187   : > { %v1494_v0 = vadd.f32 %v1489_v33, %v1477_v27  ;;  %v1461_v43 = vpop.permute.xlu0 %1460 }
 0x188   : > { %v1465_v19 = vadd.f32 %v1461_v43, %v1451_v32  ;;  %v1538_v32 = vsel %vm874_vm0, %v1536_v3, %v1537_v47  ;;  %v1582_v14 = vstv %s4071_s23  ;;  %v1989_v43 = vstv %s4086_s27  ;;  %s4192_s23 = sld [smem:[#allocation10 + $0x7]] }
 0x189   : > { %v1500_v1 = vadd.f32 %v1498_v31, %v1494_v0  ;;  %v1583_v16 = vmul.f32 %v1582_v14, %v3282_v57  ;;  %v4102_v33 = vmul.f32 %v1582_v14, %v3284_v58  ;;  %v1905_v0 = vstv %s4084_s21  ;;  %s4204_s21 = sld [smem:[#allocation10 + $0x1b]] }
 0x18a   : > { %v1478_v28 = vadd.f32 %v1473_v34, %v1465_v19  ;;  %v2073_v19 = vstv %s4080_s20  ;;  %s4199_s20 = sld [smem:[#allocation11]] }
 0x18b   : > { %v1588_v58 = vrot.slane %v4102_v33, 1  ;;  %s4206_s27 = sld [smem:[#allocation11 + $0x1]] }
 0x18c   : > { %2051 = vrot.lane.b32.xlu2 %v2050_v37, %s2905_s25  ;;  %2137 = vrot.lane.b32.xlu1 %v2133_v23, %s2905_s25  ;;  %v1495_v38 = vadd.f32 %v1491_v50, %v1478_v28  ;;  %v1863_v23 = vstv %s4077_s19  ;;  %v1587_v37 = vrot.slane %v1583_v16, 1  ;;  %s4197_s19 = sld [smem:[#allocation10 + $0xb]] }
 0x18d   : > { %2135 = vrot.lane.b32.xlu0 %v2134_v30, %s2905_s25 }
 0x18e   : > { %v1562_v53 = vpop.permute.xlu2 %1561  ;;  %v1511_v40 = vpop.permute.xlu1 %1510  ;;  %v1501_v6 = vadd.f32 %v1499_v9, %v1495_v38 }
 0x18f   : > { %v1509_v34 = vpop.permute.xlu0 %1508 }
 0x190   : > { %v1515_v50 = vadd.f32 %v1511_v40, %v1501_v6  ;;  %v1514_v18 = vadd.f32 %v1509_v34, %v1500_v1 }
 0x192   : > { %v1528_v63 = vadd.f32 %v1523_v62, %v1514_v18 }
 0x194   : > { %2095 = vrot.lane.b32.xlu2 %v2091_v2, %s2905_s25  ;;  %v1541_v7 = vadd.f32 %v1538_v32, %v1528_v63  ;;  %s4104_s25 = sld [smem:[#allocation7 + $0x75]]  ;;  %v1820_v2 = vstv %s4066_s29 }
 0x195   : > { %s4190_s29 = sld [smem:[#allocation10 + $0x17]] }
 0x196   : > { %v4097_v21 = vpop.permute.xlu2 %1603  ;;  %v1560_v62 = vpop.permute.xlu1 %1559  ;;  %v1545_v27 = vadd.f32 %v1544_v60, %v1541_v7 }
 0x197   : > { %v1525_v39 = vpop.permute.xlu0 %1524  ;;  %v1565_v63 = vadd.f32 %v1560_v62, %v1551_v55 }
 0x198   : > { %v1547_v12 = vmax.f32 %v1545_v27, 0.0  ;;  %v1529_v15 = vadd.f32 %v1525_v39, %v1515_v50 }
 0x19a   : > { %v1542_v49 = vadd.f32 %v1537_v47, %v1529_v15  ;;  %v1821_v28 = vmul.f32 %v1820_v2, %v1547_v12  ;;  %v2032_v30 = vmul.f32 %v2031_v4, %v1547_v12  ;;  %v1864_v9 = vmul.f32 %v1863_v23, %v1547_v12 }
 0x19b   : > { %v1948_v31 = vmul.f32 %v1947_v26, %v1547_v12  ;;  %v1906_v38 = vmul.f32 %v1905_v0, %v1547_v12  ;;  %v1990_v3 = vmul.f32 %v1989_v43, %v1547_v12  ;;  %v2074_v1 = vmul.f32 %v2073_v19, %v1547_v12 }
 0x19c   : > { %v1546_v40 = vadd.f32 %v1544_v60, %v1542_v49  ;;  %v4119_v6 = vadd.f32 %v1821_v28, %v3926_v24  ;;  %v4122_v57 = vadd.f32 %v2032_v30, %v3929_v44  ;;  %v1566_v47 = vadd.f32 %v1562_v53, %v1552_v20 }
 0x19d   : > { %v4125_v50 = vadd.f32 %v1864_v9, %v3939_v10  ;;  %v4128_v18 = vadd.f32 %v1948_v31, %v3963_v22  ;;  %v4131_v32 = vadd.f32 %v1906_v38, %v3984_v54  ;;  %v4134_v24 = vadd.f32 %v1990_v3, %v3993_v13 }
 0x19e   : > { %v1626_v34 = vpop.permute.xlu2 %1625  ;;  %v1548_v14 = vmax.f32 %v1546_v40, 0.0  ;;  %v1576_v60 = vpop.permute.xlu1 %1575  ;;  %v1589_v44 = vsel %vm874_vm0, %v1587_v37, %v1588_v58  ;;  %v1612_v53 = vstv %s4104_s25  ;;  %v4139_v42 = vadd.f32 %v2074_v1, %v3996_v11  ;;  %s4210_s25 = sld [smem:[#allocation11 + $0x2]] }
 0x19f   : > { %v1574_v7 = vpop.permute.xlu0 %1573  ;;  %v2116_v10 = vmul.f32 %v2115_v45, %v1547_v12  ;;  %v1580_v27 = vadd.f32 %v1576_v60, %v1566_v47 }
 0x1a0   : > { %v1579_v16 = vadd.f32 %v1574_v7, %v1565_v63  ;;  %v1822_v22 = vmul.f32 %v1820_v2, %v1548_v14  ;;  %v1865_v20 = vmul.f32 %v1863_v23, %v1548_v14  ;;  %v2075_v54 = vmul.f32 %v2073_v19, %v1548_v14 }
 0x1a1   : > { %v1949_v62 = vmul.f32 %v1947_v26, %v1548_v14  ;;  %v1907_v33 = vmul.f32 %v1905_v0, %v1548_v14  ;;  %v1991_v39 = vmul.f32 %v1989_v43, %v1548_v14  ;;  %v2033_v26 = vmul.f32 %v2031_v4, %v1548_v14 }
 0x1a2   : > { %v1592_v15 = vadd.f32 %v1589_v44, %v1579_v16  ;;  %v4142_v13 = vadd.f32 %v1822_v22, %v3920_v17  ;;  %v4145_v55 = vadd.f32 %v1865_v20, %v3934_v46  ;;  %v4148_v11 = vadd.f32 %v2075_v54, %v3960_v36 }
 0x1a3   : > { %v4151_v12 = vadd.f32 %v1949_v62, %v3966_v41  ;;  %v4154_v2 = vadd.f32 %v1907_v33, %v3981_v59  ;;  %v4157_v23 = vadd.f32 %v1991_v39, %v3987_v56  ;;  %v1646_v0 = vstv %s4116_s15  ;;  %s4215_s15 = sld [smem:[#allocation11 + $0x3]] }
 0x1a4   : > { %v2117_v43 = vmul.f32 %v2115_v45, %v1548_v14  ;;  %v4161_v17 = vadd.f32 %v2116_v10, %v4021_v8  ;;  %v4164_v37 = vadd.f32 %v2033_v26, %v4003_v61  ;;  %v1613_v36 = vmul.f32 %v1612_v53, %v3332_v48 }
 0x1a5   : > { %v1609_v19 = vadd.f32 %v4097_v21, %v1592_v15  ;;  %v1593_v59 = vadd.f32 %v1588_v58, %v1580_v27  ;;  %v1647_v4 = vmul.f32 %v1646_v0, %v3332_v48  ;;  %v1648_v45 = vmul.f32 %v1646_v0, %v3336_v51 }
 0x1a6   : > { %v1668_v46 = vpop.permute.xlu2 %1667  ;;  %v1624_v41 = vpop.permute.xlu1 %1623  ;;  %v4169_v49 = vadd.f32 %v2117_v43, %v4016_v5  ;;  %v1614_v8 = vmul.f32 %v1612_v53, %v3336_v51  ;;  %v1676_v63 = vstv %s2539_s11  ;;  %v1710_v14 = vstv %s2542_s30  ;;  %s4250_s11 = sld [smem:[#allocation11 + $0x6]]  ;;  %s4254_s30 = scalar_lea.vmem [#allocation16], %s3079_s26 }
 0x1a7   : > { %v1606_v56 = vpop.permute.xlu0 %1605  ;;  %v1615_v30 = vadd.f32 %v1613_v36, %v1609_v19  ;;  %v1651_v61 = vrot.slane %v1647_v4, 1  ;;  %v1652_v9 = vrot.slane %v1648_v45, 1  ;;  %v1677_v60 = vmul.f32 %v1676_v63, %v3380_v35  ;;  %s4264_s26 = sld [smem:[#allocation11 + $0x4]] }
 0x1a8   : > { %v1610_v28 = vadd.f32 %v1606_v56, %v1593_v59  ;;  %v1711_v16 = vmul.f32 %v1710_v14, %v3380_v35  ;;  %v1712_v22 = vmul.f32 %v1710_v14, %v3382_v52  ;;  %v1678_v20 = vmul.f32 %v1676_v63, %v3382_v52 }
 0x1a9   : > { %v1629_v21 = vadd.f32 %v1624_v41, %v1615_v30  ;;  %v1653_v5 = vsel %vm874_vm0, %v1651_v61, %v1652_v9  ;;  %v1740_v19 = vstv %s2544_s24  ;;  %v1774_v59 = vstv %s2547_s28  ;;  %s2598_s24 = sld [smem:[#allocation10 + $0x1f]] }
 0x1aa   : > { %v1616_v31 = vadd.f32 %v1614_v8, %v1610_v28  ;;  %v1715_v27 = vrot.slane %v1711_v16, 1  ;;  %v1716_v62 = vrot.slane %v1712_v22, 1  ;;  %v1741_v56 = vmul.f32 %v1740_v19, %v3423_v25  ;;  %s2599_s28 = sld [smem:[#allocation11 + $0x7]] }
 0x1ab   : > { %v1775_v30 = vmul.f32 %v1774_v59, %v3423_v25  ;;  %v1776_v61 = vmul.f32 %v1774_v59, %v3434_v29  ;;  %v1826_v16 = vstv %s4186_s22  ;;  %v1875_v59 = vstv %s4206_s27 }
 0x1ac   : > { %v1630_v40 = vadd.f32 %v1626_v34, %v1616_v31  ;;  %v1717_v0 = vsel %vm874_vm0, %v1715_v27, %v1716_v62 }
 0x1ae   : > { %v1690_v38 = vpop.permute.xlu2 %1689  ;;  %v1640_v58 = vpop.permute.xlu1 %1639 }
 0x1af   : > { %v1638_v3 = vpop.permute.xlu0 %1637  ;;  %v1644_v48 = vadd.f32 %v1640_v58, %v1630_v40  ;;  %v1780_v58 = vrot.slane %v1776_v61, 1 }
 0x1b0   : > { %v1643_v1 = vadd.f32 %v1638_v3, %v1629_v21  ;;  %v1779_v21 = vrot.slane %v1775_v30, 1 }
 0x1b1   : > { %v1657_v53 = vadd.f32 %v1652_v9, %v1644_v48  ;;  %v1742_v9 = vmul.f32 %v1740_v19, %v3434_v29 }
 0x1b2   : > { %v1656_v47 = vadd.f32 %v1653_v5, %v1643_v1  ;;  %v1781_v29 = vsel %vm874_vm0, %v1779_v21, %v1780_v58 }
 0x1b4   : > { %v1673_v7 = vadd.f32 %v1668_v46, %v1656_v47 }
 0x1b6   : > { %v1732_v51 = vpop.permute.xlu2 %1731  ;;  %v1688_v44 = vpop.permute.xlu1 %1687  ;;  %v1679_v34 = vadd.f32 %v1677_v60, %v1673_v7 }
 0x1b7   : > { %v1670_v10 = vpop.permute.xlu0 %1669 }
 0x1b8   : > { %v1674_v54 = vadd.f32 %v1670_v10, %v1657_v53  ;;  %v1693_v15 = vadd.f32 %v1688_v44, %v1679_v34 }
 0x1ba   : > { %v1680_v33 = vadd.f32 %v1678_v20, %v1674_v54  ;;  %v2037_v20 = vstv %s4190_s29  ;;  %v1869_v54 = vstv %s4192_s23 }
 0x1bc   : > { %v1694_v46 = vadd.f32 %v1690_v38, %v1680_v33  ;;  %v1911_v33 = vstv %s4197_s19 }
 0x1be   : > { %v1754_v39 = vpop.permute.xlu2 %1753  ;;  %v1704_v26 = vpop.permute.xlu1 %1703 }
 0x1bf   : > { %v1702_v43 = vpop.permute.xlu0 %1701  ;;  %v1708_v35 = vadd.f32 %v1704_v26, %v1694_v46  ;;  %v2079_v46 = vstv %s4204_s21 }
 0x1c0   : > { %v1707_v36 = vadd.f32 %v1702_v43, %v1693_v15 }
 0x1c1   : > { %v1721_v8 = vadd.f32 %v1716_v62, %v1708_v35  ;;  %v1953_v62 = vstv %s4195_s17 }
 0x1c2   : > { %v1720_v41 = vadd.f32 %v1717_v0, %v1707_v36 }
 0x1c4   : > { %v1737_v45 = vadd.f32 %v1732_v51, %v1720_v41  ;;  %v1804_v51 = vstv %s4184_s14  ;;  %s2608_s14 = sshll.u32 (%p2991_p5), %s2972_s12, 4 }
 0x1c5   : > { %s2155_s23 = scalar_lea.vmem (%p2991_p5), %s4357_s9, %s2608_s14 }
 0x1c6   : > { %v1796_v52 = vpop.permute.xlu2 %1795  ;;  %v1752_v4 = vpop.permute.xlu1 %1751  ;;  %v1743_v38 = vadd.f32 %v1741_v56, %v1737_v45 }
 0x1c7   : > { %v1734_v28 = vpop.permute.xlu0 %1733 }
 0x1c8   : > { %v1738_v31 = vadd.f32 %v1734_v28, %v1721_v8  ;;  %v1757_v40 = vadd.f32 %v1752_v4, %v1743_v38  ;;  %v2043_v4 = vstv %s4201_s2  ;;  %v1995_v28 = vstv %s4208_s1 }
 0x1ca   : > { %v1744_v5 = vadd.f32 %v1742_v9, %v1738_v31  ;;  %v1917_v31 = vstv %s4210_s25 }
 0x1cc   : > { %v1758_v48 = vadd.f32 %v1754_v39, %v1744_v5  ;;  %v1832_v39 = vstv %s4199_s20 }
 0x1ce   : > { %v4188_v3 = vpop.permute.xlu2 %1842  ;;  %v1768_v25 = vpop.permute.xlu1 %1767 }
 0x1cf   : > { %v1766_v1 = vpop.permute.xlu0 %1765  ;;  %v1772_v63 = vadd.f32 %v1768_v25, %v1758_v48 }
 0x1d0   : > { %v1771_v47 = vadd.f32 %v1766_v1, %v1757_v40 }
 0x1d1   : > { %v1785_v10 = vadd.f32 %v1780_v58, %v1772_v63  ;;  %v1959_v58 = vstv %s4215_s15 }
 0x1d2   : > { %v1784_v14 = vadd.f32 %v1781_v29, %v1771_v47 }
 0x1d4   : > { %v1801_v60 = vadd.f32 %v1796_v52, %v1784_v14 }
 0x1d6   : > { %v1926_v44 = vpop.permute.xlu2 %1925  ;;  %v1805_v7 = vadd.f32 %v1804_v51, %v1801_v60  ;;  %v1841_v53 = vpop.permute.xlu1 %1840 }
 0x1d7   : > { %v1798_v22 = vpop.permute.xlu0 %1797 }
 0x1d8   : > { %v4217_v34 = vmax.f32 %v1805_v7, 0.0  ;;  %v1802_v27 = vadd.f32 %v1798_v22, %v1785_v10 }
 0x1da   : > { %v1827_v15 = vmul.f32 %v1826_v16, %v4217_v34  ;;  %v1806_v26 = vadd.f32 %v1804_v51, %v1802_v27  ;;  %v2038_v0 = vmul.f32 %v2037_v20, %v4217_v34  ;;  %v1870_v43 = vmul.f32 %v1869_v54, %v4217_v34 }
 0x1db   : > { %v1954_v36 = vmul.f32 %v1953_v62, %v4217_v34  ;;  %v1912_v35 = vmul.f32 %v1911_v33, %v4217_v34  ;;  %v1996_v10 = vmul.f32 %v1995_v28, %v4217_v34 }
 0x1dc   : > { %v1829_v41 = vadd.f32 %v1827_v15, %v4119_v6  ;;  %v4231_v19 = vmax.f32 %v1806_v26, 0.0  ;;  %v1872_v52 = vadd.f32 %v1870_v43, %v4125_v50  ;;  %v2040_v45 = vadd.f32 %v2038_v0, %v4122_v57 }
 0x1dd   : > { %v1914_v8 = vadd.f32 %v1912_v35, %v4131_v32  ;;  %v1956_v57 = vadd.f32 %v1954_v36, %v4128_v18  ;;  %v1998_v26 = vadd.f32 %v1996_v10, %v4134_v24  ;;  %v2001_v0 = vstv %s4264_s26 }
 0x1de   : > { %v1970_v56 = vpop.permute.xlu2 %1969  ;;  %v1833_v30 = vadd.f32 %v1832_v39, %v1829_v41  ;;  %v1828_v61 = vmul.f32 %v1826_v16, %v4231_v19  ;;  %v1886_v9 = vpop.permute.xlu1 %1885  ;;  %v1871_v6 = vmul.f32 %v1869_v54, %v4231_v19  ;;  %v1876_v21 = vadd.f32 %v1875_v59, %v1872_v52 }
 0x1df   : > { %v1884_v38 = vpop.permute.xlu0 %1883  ;;  %v1955_v50 = vmul.f32 %v1953_v62, %v4231_v19  ;;  %v1913_v25 = vmul.f32 %v1911_v33, %v4231_v19  ;;  %v2044_v29 = vadd.f32 %v2043_v4, %v2040_v45  ;;  %v1918_v47 = vadd.f32 %v1917_v31, %v1914_v8 }
 0x1e0   : > { %v1846_v5 = vadd.f32 %v1841_v53, %v1833_v30  ;;  %v1830_v32 = vadd.f32 %v1828_v61, %v4142_v13  ;;  %v1873_v40 = vadd.f32 %v1871_v6, %v4145_v55  ;;  %v1889_v1 = vadd.f32 %v1884_v38, %v1876_v21 }
 0x1e1   : > { %v1957_v48 = vadd.f32 %v1955_v50, %v4151_v12  ;;  %v2081_v55 = vmul.f32 %v2079_v46, %v4231_v19  ;;  %v1915_v63 = vadd.f32 %v1913_v25, %v4154_v2  ;;  %v1931_v14 = vadd.f32 %v1926_v44, %v1918_v47 }
 0x1e2   : > { %1849 = vst.msk [vmem:[%s4254_s30] sm:$0xff] %vm1848_vm1, %v1846_v5  ;;  %v1834_v18 = vadd.f32 %v1832_v39, %v1830_v32  ;;  %v1877_v13 = vadd.f32 %v1875_v59, %v1873_v40  ;;  %v1960_v53 = vadd.f32 %v1959_v58, %v1956_v57  ;;  %v1997_v2 = vmul.f32 %v1995_v28, %v4231_v19 }
 0x1e3   : > { %2558 = vst.msk [vmem:[%s4254_s30 + $0x10] sm:$0xff] %vm1848_vm1, %v1889_v1  ;;  %v1961_v12 = vadd.f32 %v1959_v58, %v1957_v48  ;;  %v2083_v44 = vadd.f32 %v2081_v55, %v4148_v11  ;;  %v1919_v54 = vadd.f32 %v1917_v31, %v1915_v63  ;;  %v2085_v39 = vstv %s4250_s11 }
 0x1e4   : > { %v1847_v51 = vadd.f32 %v4188_v3, %v1834_v18  ;;  %v1890_v60 = vadd.f32 %v1886_v9, %v1877_v13  ;;  %2565 = vst.msk [vmem:[%s4254_s30 + $0x20] sm:$0xff] %vm1848_vm1, %v1931_v14  ;;  %v1999_v15 = vadd.f32 %v1997_v2, %v4157_v23  ;;  %v2080_v35 = vmul.f32 %v2079_v46, %v4217_v34 }
 0x1e5   : > { %v1974_v22 = vadd.f32 %v1970_v56, %v1961_v12  ;;  %v2087_v11 = vadd.f32 %v2085_v39, %v2083_v44  ;;  %v2002_v23 = vadd.f32 %v2001_v0, %v1998_v26  ;;  %v2039_v52 = vmul.f32 %v2037_v20, %v4231_v19 }
 0x1e6   : > { %v2052_v7 = vpop.permute.xlu2 %2051  ;;  %1851 = vst.msk [vmem:[%s4254_s30 + $0x8] sm:$0xf] %vm1850_vm2, %v1847_v51  ;;  %v1968_v3 = vpop.permute.xlu1 %1967  ;;  %v2003_v36 = vadd.f32 %v2001_v0, %v1999_v15  ;;  %v2082_v8 = vadd.f32 %v2080_v35, %v4139_v42  ;;  %v2121_v28 = vstv %s2598_s24  ;;  %v2127_v58 = vstv %s2599_s28 }
 0x1e7   : > { %v2057_v16 = vadd.f32 %v2052_v7, %v2044_v29  ;;  %2559 = vst.msk [vmem:[%s4254_s30 + $0x18] sm:$0xf] %vm1850_vm2, %v1890_v60  ;;  %v1973_v27 = vadd.f32 %v1968_v3, %v1960_v53  ;;  %v1928_v62 = vpop.permute.xlu0 %1927  ;;  %v2041_v46 = vadd.f32 %v2039_v52, %v4164_v37  ;;  %v2123_v20 = vmul.f32 %v2121_v28, %v4231_v19 }
 0x1e8   : > { %v1932_v33 = vadd.f32 %v1928_v62, %v1919_v54  ;;  %2573 = vst.msk [vmem:[%s4254_s30 + $0x38] sm:$0xf] %vm1850_vm2, %v1974_v22  ;;  %v2086_v30 = vadd.f32 %v2085_v39, %v2082_v8  ;;  %v2122_v6 = vmul.f32 %v2121_v28, %v4217_v34 }
 0x1e9   : > { %2586 = vst.msk [vmem:[%s4254_s30 + $0x50] sm:$0xff] %vm1848_vm1, %v2057_v16  ;;  %v2045_v9 = vadd.f32 %v2043_v4, %v2041_v46  ;;  %v2125_v42 = vadd.f32 %v2123_v20, %v4169_v49 }
 0x1ea   : > { %2572 = vst.msk [vmem:[%s4254_s30 + $0x30] sm:$0xff] %vm1848_vm1, %v1973_v27  ;;  %v2124_v37 = vadd.f32 %v2122_v6, %v4161_v17  ;;  %v2214_v17 = vld [vmem:[%s4254_s30] sm:$0xff] (%p2991_p5)  ;;  %v2218_v34 = vld [vmem:[%s4254_s30 + $0x10] sm:$0xff] (%p2991_p5) }
 0x1eb   : > { %2566 = vst.msk [vmem:[%s4254_s30 + $0x28] sm:$0xf] %vm1850_vm2, %v1932_v33  ;;  %v2129_v19 = vadd.f32 %v2127_v58, %v2125_v42  ;;  %v2222_v25 = vld [vmem:[%s4254_s30 + $0x20] sm:$0xff] (%p2991_p5) }
 0x1ec   : > { %v2128_v57 = vadd.f32 %v2127_v58, %v2124_v37  ;;  %2215 = vst [vmem:[%s2155_s23] sm:$0xff] (%p2991_p5), %v2214_v17 }
 0x1ed   : > { %v2216_v49 = vld [vmem:[%s4254_s30 + $0x8] sm:$0xff] (%p2991_p5)  ;;  %2219 = vst [vmem:[%s2155_s23 + $0x20] sm:$0xff] (%p2991_p5), %v2218_v34 }
 0x1ee   : > { %v2096_v43 = vpop.permute.xlu2 %2095  ;;  %v2012_v59 = vpop.permute.xlu1 %2011  ;;  %v2220_v40 = vld [vmem:[%s4254_s30 + $0x18] sm:$0xff] (%p2991_p5)  ;;  %2217 = vst [vmem:[%s2155_s23 + $0x8] sm:$0xff] (%p2991_p5), %v2216_v49 }
 0x1ef   : > { %v2100_v41 = vadd.f32 %v2096_v43, %v2087_v11  ;;  %v2016_v56 = vadd.f32 %v2012_v59, %v2003_v36  ;;  %v2010_v45 = vpop.permute.xlu0 %2009  ;;  %2221 = vst [vmem:[%s2155_s23 + $0x28] sm:$0xff] (%p2991_p5), %v2220_v40  ;;  %v2228_v48 = vld [vmem:[%s4254_s30 + $0x38] sm:$0xff] (%p2991_p5) }
 0x1f0   : > { %v2015_v24 = vadd.f32 %v2010_v45, %v2002_v23  ;;  %2223 = vst [vmem:[%s2155_s23 + $0x40] sm:$0xff] (%p2991_p5), %v2222_v25  ;;  %v2234_v13 = vld [vmem:[%s4254_s30 + $0x50] sm:$0xff] (%p2991_p5) }
 0x1f1   : > { %2594 = vst.msk [vmem:[%s4254_s30 + $0x68] sm:$0xf] %vm1850_vm2, %v2100_v41  ;;  %v2226_v1 = vld [vmem:[%s4254_s30 + $0x30] sm:$0xff] (%p2991_p5) }
 0x1f2   : > { %2580 = vst.msk [vmem:[%s4254_s30 + $0x48] sm:$0xf] %vm1850_vm2, %v2016_v56  ;;  %v2224_v29 = vld [vmem:[%s4254_s30 + $0x28] sm:$0xff] (%p2991_p5) }
 0x1f3   : > { %2579 = vst.msk [vmem:[%s4254_s30 + $0x40] sm:$0xff] %vm1848_vm1, %v2015_v24 }
 0x1f4   : > { %2225 = vst [vmem:[%s2155_s23 + $0x48] sm:$0xff] (%p2991_p5), %v2224_v29 }
 0x1f5   : > { %2227 = vst [vmem:[%s2155_s23 + $0x60] sm:$0xff] (%p2991_p5), %v2226_v1 }
 0x1f6   : > { %v2094_v61 = vpop.permute.xlu1 %2093  ;;  %2229 = vst [vmem:[%s2155_s23 + $0x68] sm:$0xff] (%p2991_p5), %v2228_v48 }
 0x1f7   : > { %v2099_v31 = vadd.f32 %v2094_v61, %v2086_v30  ;;  %v2054_v38 = vpop.permute.xlu0 %2053  ;;  %2235 = vst [vmem:[%s2155_s23 + $0xa0] sm:$0xff] (%p2991_p5), %v2234_v13 }
 0x1f8   : > { %v2058_v21 = vadd.f32 %v2054_v38, %v2045_v9  ;;  %v2240_v12 = vld [vmem:[%s4254_s30 + $0x68] sm:$0xff] (%p2991_p5) }
 0x1f9   : > { %2593 = vst.msk [vmem:[%s4254_s30 + $0x60] sm:$0xff] %vm1848_vm1, %v2099_v31  ;;  %v2232_v18 = vld [vmem:[%s4254_s30 + $0x48] sm:$0xff] (%p2991_p5) }
 0x1fa   : > { %2587 = vst.msk [vmem:[%s4254_s30 + $0x58] sm:$0xf] %vm1850_vm2, %v2058_v21  ;;  %v2230_v47 = vld [vmem:[%s4254_s30 + $0x40] sm:$0xff] (%p2991_p5) }
 0x1fb   : > { %2231 = vst [vmem:[%s2155_s23 + $0x80] sm:$0xff] (%p2991_p5), %v2230_v47 }
 0x1fc   : > { %2233 = vst [vmem:[%s2155_s23 + $0x88] sm:$0xff] (%p2991_p5), %v2232_v18 }
 0x1fd   : > { %2241 = vst [vmem:[%s2155_s23 + $0xc8] sm:$0xff] (%p2991_p5), %v2240_v12 }
 0x1fe   : > { %v2138_v50 = vpop.permute.xlu1 %2137  ;;  %2152 = sbr.rel (!%p2991_p5) target bundleno = 523 (0x20b), region = 130 }
 0x1ff   : > { %v2142_v4 = vadd.f32 %v2138_v50, %v2129_v19  ;;  %v2136_v5 = vpop.permute.xlu0 %2135 }
 0x200   : > { %v2141_v32 = vadd.f32 %v2136_v5, %v2128_v57  ;;  %v2238_v63 = vld [vmem:[%s4254_s30 + $0x60] sm:$0xff] (%p2991_p5) }
 0x201   : > { %2601 = vst.msk [vmem:[%s4254_s30 + $0x78] sm:$0xf] %vm1850_vm2, %v2142_v4  ;;  %v2236_v55 = vld [vmem:[%s4254_s30 + $0x58] sm:$0xff] (%p2991_p5) }
 0x202   : > { %2600 = vst.msk [vmem:[%s4254_s30 + $0x70] sm:$0xff] %vm1848_vm1, %v2141_v32 }
 0x203   : > { %2237 = vst [vmem:[%s2155_s23 + $0xa8] sm:$0xff] %v2236_v55 }
 0x204   : > { %2239 = vst [vmem:[%s2155_s23 + $0xc0] sm:$0xff] %v2238_v63 }
 0x208   : > { %v2244_v51 = vld [vmem:[%s4254_s30 + $0x78] sm:$0xff] }
 0x209   : > { %v2242_v14 = vld [vmem:[%s4254_s30 + $0x70] sm:$0xff]  ;;  %2245 = vst [vmem:[%s2155_s23 + $0xe8] sm:$0xff] %v2244_v51 }
 0x20a   : > { %2243 = vst [vmem:[%s2155_s23 + $0xe0] sm:$0xff] %v2242_v14 }
 0x20b PF: > { %p21_p13 = scmp.ge.s32.totalorder %s2975_s13, 4   ;;  %s4366_s30 = smov %s2890_s10 }
 0x20c   : > { %s4367_s10 = smov %s2985_s16  ;;  %s4368_s11 = smov %s2975_s13 }
 0x20d   :  { %23 = sbr.rel (!%p21_p13) target bundleno = 9 (0x9), region = 214 }
 0x212   :  { %2261 = vsyncpa [#allocation4], 1 }
 0x213   :  { %2263 = vsyncpa [#allocation4 + $0x1], 1 }
 0x214   :  { %2264 = vsyncpa [#allocation6], 1 }
 0x215   :  { %2265 = vsyncpa [#allocation9], 1 }
 0x216   :  { %2266 = vsyncpa [#allocation12], 1 }
 0x217   :  { %2267 = vsyncpa [#allocation15], 1 }

</bundles_post_ra>
